<compile_context>
chip_gen: v6e
topology: v6e:2x2x1
jax: 0.10.0
libtpu: 0.0.40
codegen_flags: <defaults>
</compile_context>

<pallas_src>
import functools

import jax
import jax.numpy as jnp
from jax.experimental import pallas as pl
from jax.experimental.pallas import tpu as pltpu

LANE = 128
NODE_PAD = 512                        # pad N to a multiple of this (tiles never degrade)
VMEM_LIMIT = 48 * 1024 * 1024         # fits under v7x's 64 MiB/TC; ample on v5e/v6e
P_RESIDENT_BYTES = 8 * 1024 * 1024    # keep P VMEM-resident when it is this small


# ---------------------------------------------------------------------------
# small helpers
# ---------------------------------------------------------------------------
def _round_up(x, m):
    return ((x + m - 1) // m) * m


def _pad2d(a, rows, cols):
    r, c = a.shape
    return jnp.pad(a, ((0, rows - r), (0, cols - c)))


def _choose_tm(n_pad, target=512):
    """Row tile: multiple of 128 dividing n_pad; keep >=2 row tiles (v7x megacore)."""
    tm = min(target, n_pad)
    if n_pad >= 2 * LANE:
        tm = min(tm, n_pad // 2)
    tm = max(LANE, (tm // LANE) * LANE)
    while n_pad % tm:
        tm -= LANE
    return tm


def _choose_tk(n_pad, target=2048):
    """Reduction tile: multiple of 128 dividing n_pad (n_pad is a multiple of 512)."""
    tk = min(target, n_pad)
    tk = max(LANE, (tk // LANE) * LANE)
    while n_pad % tk:
        tk -= LANE
    return tk


# ---------------------------------------------------------------------------
# Pallas kernel 1: per-node projections  [P | S] = x @ [Wl | Wr],  S += b
# ---------------------------------------------------------------------------
def sage_project_kernel(x_ref, w_ref, b_ref, p_ref, s_ref, *, fout_pad):
    x = x_ref[...].astype(jnp.bfloat16)
    # single 2*fout-wide matmul fills the 256-wide MXU on v6e/v7x
    ps = jnp.dot(x, w_ref[...], preferred_element_type=jnp.float32)
    p_ref[...] = ps[:, :fout_pad].astype(p_ref.dtype)   # neighbor-side projection (bf16)
    s_ref[...] = ps[:, fout_pad:] + b_ref[...]          # self term + bias (f32)


# ---------------------------------------------------------------------------
# Pallas kernel 2: tiled aggregation  out = (A_mask @ P) * inv_deg + S  (+ReLU)
# ---------------------------------------------------------------------------
def sage_aggregate_kernel(a_ref, p_ref, s_ref, inv_ref, o_ref, acc_ref, *,
                          apply_relu, tk, p_resident):
    k = pl.program_id(1)

    @pl.when(k == 0)
    def _():
        acc_ref[...] = jnp.zeros_like(acc_ref)

    a = a_ref[...].astype(jnp.bfloat16)          # int8 0/1 mask -> bf16 (VPU, in slack)
    if p_resident:
        off = pl.multiple_of(k * tk, tk)
        p = p_ref[pl.ds(off, tk), :]             # P lives in VMEM for the whole kernel
    else:
        p = p_ref[...]
    acc_ref[...] += jnp.dot(a, p, preferred_element_type=jnp.float32)

    @pl.when(k == pl.num_programs(1) - 1)
    def _():
        h = acc_ref[...] * inv_ref[...] + s_ref[...]   # exact f32 per-row 1/in_deg scale
        if apply_relu:
            h = jnp.maximum(h, 0.0)
        o_ref[...] = h.astype(o_ref.dtype)


# ---------------------------------------------------------------------------
# One SAGEConv layer on padded operands
# ---------------------------------------------------------------------------
def sage_conv_pallas(A, inv_deg, h, W, b, *, apply_relu, out_dtype,
                     tm=512, tk=2048):
    """A:(Np,Np) int8 0/1 mask, inv_deg:(Np,1) f32, h:(Np,Fin_pad) f32/bf16,
    W:(Fin_pad, 2*Fout_pad) bf16 = [Wl|Wr], b:(1,Fout_pad) f32."""
    n_pad = A.shape[0]
    fin_pad = h.shape[1]
    fout_pad = W.shape[1] // 2
    tm = _choose_tm(n_pad, tm)
    tk = _choose_tk(n_pad, tk)

    # --- projection (cheap) -------------------------------------------------
    x_bytes = jnp.dtype(h.dtype).itemsize
    proj_cost = pl.CostEstimate(
        flops=2 * n_pad * fin_pad * 2 * fout_pad,
        transcendentals=0,
        bytes_accessed=x_bytes * n_pad * fin_pad + 2 * fin_pad * 2 * fout_pad
        + (2 + 4) * n_pad * fout_pad,
    )
    P, S = pl.pallas_call(
        functools.partial(sage_project_kernel, fout_pad=fout_pad),
        out_shape=(
            jax.ShapeDtypeStruct((n_pad, fout_pad), jnp.bfloat16),
            jax.ShapeDtypeStruct((n_pad, fout_pad), jnp.float32),
        ),
        grid=(n_pad // tm,),
        in_specs=[
            pl.BlockSpec((tm, fin_pad), lambda i: (i, 0)),
            pl.BlockSpec((fin_pad, 2 * fout_pad), lambda i: (0, 0)),
            pl.BlockSpec((1, fout_pad), lambda i: (0, 0)),
        ],
        out_specs=(
            pl.BlockSpec((tm, fout_pad), lambda i: (i, 0)),
            pl.BlockSpec((tm, fout_pad), lambda i: (i, 0)),
        ),
        compiler_params=pltpu.CompilerParams(
            dimension_semantics=("parallel",),
            vmem_limit_bytes=VMEM_LIMIT,
        ),
        cost_estimate=proj_cost,
    )(h, W, b)

    # --- aggregation (dominant, HBM-bound on A) ------------------------------
    p_resident = (n_pad * fout_pad * 2) <= P_RESIDENT_BYTES
    if p_resident:
        p_spec = pl.BlockSpec((n_pad, fout_pad), lambda i, k: (0, 0))   # DMA'd once
    else:
        p_spec = pl.BlockSpec((tk, fout_pad), lambda i, k: (k, 0))

    out_bytes = jnp.dtype(out_dtype).itemsize
    agg_cost = pl.CostEstimate(
        flops=2 * n_pad * n_pad * fout_pad + 3 * n_pad * fout_pad,
        transcendentals=0,
        bytes_accessed=n_pad * n_pad + (2 + 4 + out_bytes) * n_pad * fout_pad
        + 4 * n_pad,
    )
    kernel = functools.partial(sage_aggregate_kernel, apply_relu=apply_relu,
                               tk=tk, p_resident=p_resident)
    out = pl.pallas_call(
        kernel,
        out_shape=jax.ShapeDtypeStruct((n_pad, fout_pad), out_dtype),
        grid=(n_pad // tm, n_pad // tk),      # reduction axis innermost
        in_specs=[
            pl.BlockSpec((tm, tk), lambda i, k: (i, k)),        # A mask tile (int8)
            p_spec,                                             # P (bf16)
            pl.BlockSpec((tm, fout_pad), lambda i, k: (i, 0)),  # S (f32)
            pl.BlockSpec((tm, 1), lambda i, k: (i, 0)),         # 1/in_deg (f32)
        ],
        out_specs=pl.BlockSpec((tm, fout_pad), lambda i, k: (i, 0)),
        scratch_shapes=[pltpu.VMEM((tm, fout_pad), jnp.float32)],
        compiler_params=pltpu.CompilerParams(
            dimension_semantics=("parallel", "arbitrary"),
            vmem_limit_bytes=VMEM_LIMIT,
        ),
        cost_estimate=agg_cost,
    )(A, P, S, inv_deg)
    return out


# ---------------------------------------------------------------------------
# Glue: int8 binary adjacency mask + f32 reciprocal in-degrees (plain JAX)
# ---------------------------------------------------------------------------
def build_mean_adjacency(edge_index, num_nodes, n_pad):
    """edge_index:(2,E) int32, row 0 = source j, row 1 = target i.
    Returns int8 mask A (A[i,j]=1 for unique edge j->i) and f32 (n_pad,1) 1/in_deg
    (0 for isolated/padded rows)."""
    src = edge_index[0].astype(jnp.int32)
    dst = edge_index[1].astype(jnp.int32)
    A = jnp.zeros((n_pad, n_pad), jnp.int8)
    A = A.at[dst, src].set(jnp.int8(1))           # duplicate edges collapse (set semantics)
    deg = jnp.sum(A, axis=1, dtype=jnp.int32).astype(jnp.float32)[:, None]
    inv_deg = jnp.where(deg > 0, 1.0 / jnp.maximum(deg, 1.0), 0.0)
    return A, inv_deg


# ---------------------------------------------------------------------------
# GraphSAGE model (parameters + forward)
# ---------------------------------------------------------------------------
def init_graphsage_params(key, num_node_features, num_hidden, num_classes,
                          num_layers=3):
    dims = [num_node_features] + [num_hidden] * (num_layers - 1) + [num_classes]
    params = []
    for li in range(num_layers):
        fin, fout = dims[li], dims[li + 1]
        key, k1, k2, k3 = jax.random.split(key, 4)
        scale = 1.0 / jnp.sqrt(jnp.float32(fin))
        params.append({
            "Wl": jax.random.uniform(k1, (fin, fout), jnp.float32, -scale, scale),
            "Wr": jax.random.uniform(k2, (fin, fout), jnp.float32, -scale, scale),
            "b": jax.random.uniform(k3, (1, fout), jnp.float32, -scale, scale),
        })
    return params


def graphsage_forward(params, x, edge_index, *, tm=512, tk=2048):
    N, F = x.shape
    n_pad = _round_up(N, NODE_PAD)
    num_classes = params[-1]["Wl"].shape[1]

    A, inv_deg = build_mean_adjacency(edge_index, N, n_pad)

    h = _pad2d(x.astype(jnp.float32), n_pad, _round_up(F, LANE))
    n_layers = len(params)
    for li, p in enumerate(params):
        fin, fout = p["Wl"].shape
        fin_pad, fout_pad = _round_up(fin, LANE), _round_up(fout, LANE)
        Wl = _pad2d(p["Wl"], fin_pad, fout_pad)
        Wr = _pad2d(p["Wr"], fin_pad, fout_pad)
        W = jnp.concatenate([Wl, Wr], axis=1).astype(jnp.bfloat16)  # (fin_pad, 2*fout_pad)
        b = _pad2d(p["b"], 1, fout_pad).astype(jnp.float32)
        last = li == n_layers - 1
        h = sage_conv_pallas(A, inv_deg, h, W, b,
                             apply_relu=not last,
                             out_dtype=jnp.float32 if last else jnp.bfloat16,
                             tm=tm, tk=tk)
        # dropout in eval mode = identity; use_layer_norm=False (module default)
    return h[:N, :num_classes]


# ---------------------------------------------------------------------------
# Pure-JAX reference (same bf16 quantization of weights / activations /
# projection as the kernel; adjacency weights are exact f32 in both)
# ---------------------------------------------------------------------------
def graphsage_reference(params, x, edge_index):
    N = x.shape[0]
    src = edge_index[0].astype(jnp.int32)
    dst = edge_index[1].astype(jnp.int32)
    A = jnp.zeros((N, N), jnp.float32).at[dst, src].set(1.0)
    deg = jnp.sum(A, axis=1, keepdims=True)
    A = A / jnp.maximum(deg, 1.0)
    h = x.astype(jnp.float32)
    n_layers = len(params)
    for li, p in enumerate(params):
        wl = p["Wl"].astype(jnp.bfloat16).astype(jnp.float32)
        wr = p["Wr"].astype(jnp.bfloat16).astype(jnp.float32)
        xb = h.astype(jnp.bfloat16).astype(jnp.float32)
        proj = (xb @ wl).astype(jnp.bfloat16).astype(jnp.float32)
        out = A @ proj + xb @ wr + p["b"]
        h = out if li == n_layers - 1 else jnp.maximum(out, 0.0)
    return h


if __name__ == "__main__":
    key = jax.random.PRNGKey(0)

    # small synthetic graph (exercises a (2, 1) tiled grid with resident P)
    num_nodes = 1024
    num_edges = 4096
    num_node_features = 16
    num_hidden = 32
    num_classes = 8

    key, kx, ke_src, ke_dst, kp = jax.random.split(key, 5)
    x = jax.random.normal(kx, (num_nodes, num_node_features), jnp.float32)
    src = jax.random.randint(ke_src, (num_edges,), 0, num_nodes, jnp.int32)
    dst = jax.random.randint(ke_dst, (num_edges,), 0, num_nodes, jnp.int32)
    edge_index = jnp.stack([src, dst], axis=0)  # (2, E)

    params = init_graphsage_params(kp, num_node_features, num_hidden,
                                   num_classes, num_layers=3)

    fwd = jax.jit(graphsage_forward)
    out = jax.block_until_ready(fwd(params, x, edge_index))
    ref = jax.block_until_ready(graphsage_reference(params, x, edge_index))

    assert out.shape == (num_nodes, num_classes)
    max_err = float(jnp.max(jnp.abs(out - ref)))
    assert jnp.allclose(out, ref, atol=2e-2, rtol=2e-2), max_err

    print("KERNEL_OK")
</pallas_src>

<mosaic_0001>
module attributes {stable_mosaic.version = 11 : i64} {
  func.func @sage_project_kernel(%arg0: i32, %arg1: memref<512x128xf32, #tpu.memory_space<vmem>>, %arg2: memref<128x256xbf16, #tpu.memory_space<vmem>>, %arg3: memref<1x128xf32, #tpu.memory_space<vmem>>, %arg4: memref<512x128xbf16, #tpu.memory_space<vmem>>, %arg5: memref<512x128xf32, #tpu.memory_space<vmem>>) attributes {dimension_semantics = [#tpu.dimension_semantics<parallel>], iteration_bounds = array<i64: 2>, scalar_prefetch = 0 : i64, scratch_operands = 0 : i64, tpu.core_type = #tpu.core_type<tc>, window_params = [{transform_indices = @transform_0, window_bounds = array<i64: 512, 128>}, {pipeline_mode = #tpu.pipeline_mode<synchronous>, transform_indices = @transform_1, window_bounds = array<i64: 128, 256>}, {pipeline_mode = #tpu.pipeline_mode<synchronous>, transform_indices = @transform_2, window_bounds = array<i64: 1, 128>}, {transform_indices = @transform_3, window_bounds = array<i64: 512, 128>}, {transform_indices = @transform_4, window_bounds = array<i64: 512, 128>}]} {
    %c0 = arith.constant 0 : index
    %c0_0 = arith.constant 0 : index
    %0 = vector.load %arg1[%c0, %c0_0] : memref<512x128xf32, #tpu.memory_space<vmem>>, vector<512x128xf32>
    %1 = arith.truncf %0 : vector<512x128xf32> to vector<512x128xbf16>
    %c0_1 = arith.constant 0 : index
    %c0_2 = arith.constant 0 : index
    %2 = vector.load %arg2[%c0_1, %c0_2] : memref<128x256xbf16, #tpu.memory_space<vmem>>, vector<128x256xbf16>
    %cst = arith.constant dense<0.000000e+00> : vector<512x256xf32>
    %3 = tpu.matmul %1, %2, %cst {dimension_numbers = #tpu.dot_dimension_numbers<[1], [0], [0], [1], [0, 0, 1, 1], [], []>} : vector<512x128xbf16>, vector<128x256xbf16>, vector<512x256xf32> -> vector<512x256xf32>
    %4 = vector.extract_strided_slice %3 {offsets = [0, 0], sizes = [512, 128], strides = [1, 1]} : vector<512x256xf32> to vector<512x128xf32>
    %5 = arith.truncf %4 : vector<512x128xf32> to vector<512x128xbf16>
    %c0_3 = arith.constant 0 : index
    %c0_4 = arith.constant 0 : index
    %6 = vector.load %arg4[%c0_3, %c0_4] : memref<512x128xbf16, #tpu.memory_space<vmem>>, vector<512x128xbf16>
    tpu.vector_store %arg4[%c0_3, %c0_4], %5 {strides = array<i32>} : memref<512x128xbf16, #tpu.memory_space<vmem>>, vector<512x128xbf16>,
    %7 = vector.extract_strided_slice %3 {offsets = [0, 128], sizes = [512, 128], strides = [1, 1]} : vector<512x256xf32> to vector<512x128xf32>
    %c0_5 = arith.constant 0 : index
    %c0_6 = arith.constant 0 : index
    %8 = vector.load %arg3[%c0_5, %c0_6] : memref<1x128xf32, #tpu.memory_space<vmem>>, vector<1x128xf32>
    %9 = vector.broadcast %8 : vector<1x128xf32> to vector<512x128xf32>
    %10 = arith.addf %7, %9 : vector<512x128xf32>
    %c0_7 = arith.constant 0 : index
    %c0_8 = arith.constant 0 : index
    %11 = vector.load %arg5[%c0_7, %c0_8] : memref<512x128xf32, #tpu.memory_space<vmem>>, vector<512x128xf32>
    tpu.vector_store %arg5[%c0_7, %c0_8], %10 {strides = array<i32>} : memref<512x128xf32, #tpu.memory_space<vmem>>, vector<512x128xf32>,
    return
  }
  func.func @transform_0(%arg0: i32) -> (i32, i32) {
    %c0_i32 = arith.constant 0 : i32
    %c0_i32_0 = arith.constant 0 : i32
    return %arg0, %c0_i32 : i32, i32
  }
  func.func @transform_1(%arg0: i32) -> (i32, i32) {
    %c0_i32 = arith.constant 0 : i32
    %c0_i32_0 = arith.constant 0 : i32
    %c0_i32_1 = arith.constant 0 : i32
    return %c0_i32, %c0_i32_0 : i32, i32
  }
  func.func @transform_2(%arg0: i32) -> (i32, i32) {
    %c0_i32 = arith.constant 0 : i32
    %c0_i32_0 = arith.constant 0 : i32
    %c0_i32_1 = arith.constant 0 : i32
    return %c0_i32, %c0_i32_0 : i32, i32
  }
  func.func @transform_3(%arg0: i32) -> (i32, i32) {
    %c0_i32 = arith.constant 0 : i32
    %c0_i32_0 = arith.constant 0 : i32
    return %arg0, %c0_i32 : i32, i32
  }
  func.func @transform_4(%arg0: i32) -> (i32, i32) {
    %c0_i32 = arith.constant 0 : i32
    %c0_i32_0 = arith.constant 0 : i32
    return %arg0, %c0_i32 : i32, i32
  }
}

module attributes {stable_mosaic.version = 11 : i64} {
  func.func @sage_aggregate_kernel(%arg0: i32, %arg1: i32, %arg2: memref<512x1024xi8, #tpu.memory_space<vmem>>, %arg3: memref<1024x128xbf16, #tpu.memory_space<vmem>>, %arg4: memref<512x128xf32, #tpu.memory_space<vmem>>, %arg5: memref<512x1xf32, #tpu.memory_space<vmem>>, %arg6: memref<512x128xbf16, #tpu.memory_space<vmem>>, %arg7: memref<512x128xf32, #tpu.memory_space<vmem>>) attributes {dimension_semantics = [#tpu.dimension_semantics<parallel>, #tpu.dimension_semantics<arbitrary>], iteration_bounds = array<i64: 2, 1>, scalar_prefetch = 0 : i64, scratch_operands = 1 : i64, tpu.core_type = #tpu.core_type<tc>, window_params = [{transform_indices = @transform_0, window_bounds = array<i64: 512, 1024>}, {pipeline_mode = #tpu.pipeline_mode<synchronous>, transform_indices = @transform_1, window_bounds = array<i64: 1024, 128>}, {transform_indices = @transform_2, window_bounds = array<i64: 512, 128>}, {transform_indices = @transform_3, window_bounds = array<i64: 512, 1>}, {transform_indices = @transform_4, window_bounds = array<i64: 512, 128>}]} {
    %c0_i32 = arith.constant 0 : i32
    %0 = arith.cmpi eq, %arg1, %c0_i32 : i32
    %1 = arith.extui %0 : i1 to i32
    %c0_i32_0 = arith.constant 0 : i32
    %2 = arith.cmpi ne, %1, %c0_i32_0 : i32
    scf.if %2 {
      %cst_9 = arith.constant 0.000000e+00 : f32
      %16 = vector.broadcast %cst_9 : f32 to vector<512x128xf32>
      %c0_10 = arith.constant 0 : index
      %c0_11 = arith.constant 0 : index
      %17 = vector.load %arg7[%c0_10, %c0_11] : memref<512x128xf32, #tpu.memory_space<vmem>>, vector<512x128xf32>
      tpu.vector_store %arg7[%c0_10, %c0_11], %16 {strides = array<i32>} : memref<512x128xf32, #tpu.memory_space<vmem>>, vector<512x128xf32>,
    } else {
    }
    %c0 = arith.constant 0 : index
    %c0_1 = arith.constant 0 : index
    %3 = vector.load %arg2[%c0, %c0_1] : memref<512x1024xi8, #tpu.memory_space<vmem>>, vector<512x1024xi8>
    %4 = arith.sitofp %3 : vector<512x1024xi8> to vector<512x1024xbf16>
    %c1024_i32 = arith.constant 1024 : i32
    %5 = arith.muli %arg1, %c1024_i32 : i32
    %6 = tpu.assume_multiple %5, 1024 : i32
    %7 = arith.index_cast %6 : i32 to index
    %c0_2 = arith.constant 0 : index
    %8 = vector.load %arg3[%7, %c0_2] : memref<1024x128xbf16, #tpu.memory_space<vmem>>, vector<1024x128xbf16>
    %c0_3 = arith.constant 0 : index
    %c0_4 = arith.constant 0 : index
    %9 = vector.load %arg7[%c0_3, %c0_4] : memref<512x128xf32, #tpu.memory_space<vmem>>, vector<512x128xf32>
    %cst = arith.constant dense<0.000000e+00> : vector<512x128xf32>
    %10 = tpu.matmul %4, %8, %cst {dimension_numbers = #tpu.dot_dimension_numbers<[1], [0], [0], [1], [0, 0, 1, 1], [], []>} : vector<512x1024xbf16>, vector<1024x128xbf16>, vector<512x128xf32> -> vector<512x128xf32>
    %11 = arith.addf %9, %10 : vector<512x128xf32>
    %c0_5 = arith.constant 0 : index
    %c0_6 = arith.constant 0 : index
    %12 = vector.load %arg7[%c0_5, %c0_6] : memref<512x128xf32, #tpu.memory_space<vmem>>, vector<512x128xf32>
    tpu.vector_store %arg7[%c0_5, %c0_6], %11 {strides = array<i32>} : memref<512x128xf32, #tpu.memory_space<vmem>>, vector<512x128xf32>,
    %c0_i32_7 = arith.constant 0 : i32
    %13 = arith.cmpi eq, %arg1, %c0_i32_7 : i32
    %14 = arith.extui %13 : i1 to i32
    %c0_i32_8 = arith.constant 0 : i32
    %15 = arith.cmpi ne, %14, %c0_i32_8 : i32
    scf.if %15 {
      %c0_9 = arith.constant 0 : index
      %c0_10 = arith.constant 0 : index
      %16 = vector.load %arg7[%c0_9, %c0_10] : memref<512x128xf32, #tpu.memory_space<vmem>>, vector<512x128xf32>
      %c0_11 = arith.constant 0 : index
      %c0_12 = arith.constant 0 : index
      %17 = vector.load %arg5[%c0_11, %c0_12] : memref<512x1xf32, #tpu.memory_space<vmem>>, vector<512x1xf32>
      %18 = vector.broadcast %17 : vector<512x1xf32> to vector<512x128xf32>
      %19 = arith.mulf %16, %18 : vector<512x128xf32>
      %c0_13 = arith.constant 0 : index
      %c0_14 = arith.constant 0 : index
      %20 = vector.load %arg4[%c0_13, %c0_14] : memref<512x128xf32, #tpu.memory_space<vmem>>, vector<512x128xf32>
      %21 = arith.addf %19, %20 : vector<512x128xf32>
      %cst_15 = arith.constant 0.000000e+00 : f32
      %22 = vector.broadcast %cst_15 : f32 to vector<512x128xf32>
      %23 = arith.maximumf %21, %22 : vector<512x128xf32>
      %24 = arith.truncf %23 : vector<512x128xf32> to vector<512x128xbf16>
      %c0_16 = arith.constant 0 : index
      %c0_17 = arith.constant 0 : index
      %25 = vector.load %arg6[%c0_16, %c0_17] : memref<512x128xbf16, #tpu.memory_space<vmem>>, vector<512x128xbf16>
      tpu.vector_store %arg6[%c0_16, %c0_17], %24 {strides = array<i32>} : memref<512x128xbf16, #tpu.memory_space<vmem>>, vector<512x128xbf16>,
    } else {
    }
    return
  }
  func.func @transform_0(%arg0: i32, %arg1: i32) -> (i32, i32) {
    %c0_i32 = arith.constant 0 : i32
    return %arg0, %arg1 : i32, i32
  }
  func.func @transform_1(%arg0: i32, %arg1: i32) -> (i32, i32) {
    %c0_i32 = arith.constant 0 : i32
    %c0_i32_0 = arith.constant 0 : i32
    %c0_i32_1 = arith.constant 0 : i32
    return %c0_i32, %c0_i32_0 : i32, i32
  }
  func.func @transform_2(%arg0: i32, %arg1: i32) -> (i32, i32) {
    %c0_i32 = arith.constant 0 : i32
    %c0_i32_0 = arith.constant 0 : i32
    return %arg0, %c0_i32 : i32, i32
  }
  func.func @transform_3(%arg0: i32, %arg1: i32) -> (i32, i32) {
    %c0_i32 = arith.constant 0 : i32
    %c0_i32_0 = arith.constant 0 : i32
    return %arg0, %c0_i32 : i32, i32
  }
  func.func @transform_4(%arg0: i32, %arg1: i32) -> (i32, i32) {
    %c0_i32 = arith.constant 0 : i32
    %c0_i32_0 = arith.constant 0 : i32
    return %arg0, %c0_i32 : i32, i32
  }
}

module attributes {stable_mosaic.version = 11 : i64} {
  func.func @sage_project_kernel(%arg0: i32, %arg1: memref<512x128xbf16, #tpu.memory_space<vmem>>, %arg2: memref<128x256xbf16, #tpu.memory_space<vmem>>, %arg3: memref<1x128xf32, #tpu.memory_space<vmem>>, %arg4: memref<512x128xbf16, #tpu.memory_space<vmem>>, %arg5: memref<512x128xf32, #tpu.memory_space<vmem>>) attributes {dimension_semantics = [#tpu.dimension_semantics<parallel>], iteration_bounds = array<i64: 2>, scalar_prefetch = 0 : i64, scratch_operands = 0 : i64, tpu.core_type = #tpu.core_type<tc>, window_params = [{transform_indices = @transform_0, window_bounds = array<i64: 512, 128>}, {pipeline_mode = #tpu.pipeline_mode<synchronous>, transform_indices = @transform_1, window_bounds = array<i64: 128, 256>}, {pipeline_mode = #tpu.pipeline_mode<synchronous>, transform_indices = @transform_2, window_bounds = array<i64: 1, 128>}, {transform_indices = @transform_3, window_bounds = array<i64: 512, 128>}, {transform_indices = @transform_4, window_bounds = array<i64: 512, 128>}]} {
    %c0 = arith.constant 0 : index
    %c0_0 = arith.constant 0 : index
    %0 = vector.load %arg1[%c0, %c0_0] : memref<512x128xbf16, #tpu.memory_space<vmem>>, vector<512x128xbf16>
    %c0_1 = arith.constant 0 : index
    %c0_2 = arith.constant 0 : index
    %1 = vector.load %arg2[%c0_1, %c0_2] : memref<128x256xbf16, #tpu.memory_space<vmem>>, vector<128x256xbf16>
    %cst = arith.constant dense<0.000000e+00> : vector<512x256xf32>
    %2 = tpu.matmul %0, %1, %cst {dimension_numbers = #tpu.dot_dimension_numbers<[1], [0], [0], [1], [0, 0, 1, 1], [], []>} : vector<512x128xbf16>, vector<128x256xbf16>, vector<512x256xf32> -> vector<512x256xf32>
    %3 = vector.extract_strided_slice %2 {offsets = [0, 0], sizes = [512, 128], strides = [1, 1]} : vector<512x256xf32> to vector<512x128xf32>
    %4 = arith.truncf %3 : vector<512x128xf32> to vector<512x128xbf16>
    %c0_3 = arith.constant 0 : index
    %c0_4 = arith.constant 0 : index
    %5 = vector.load %arg4[%c0_3, %c0_4] : memref<512x128xbf16, #tpu.memory_space<vmem>>, vector<512x128xbf16>
    tpu.vector_store %arg4[%c0_3, %c0_4], %4 {strides = array<i32>} : memref<512x128xbf16, #tpu.memory_space<vmem>>, vector<512x128xbf16>,
    %6 = vector.extract_strided_slice %2 {offsets = [0, 128], sizes = [512, 128], strides = [1, 1]} : vector<512x256xf32> to vector<512x128xf32>
    %c0_5 = arith.constant 0 : index
    %c0_6 = arith.constant 0 : index
    %7 = vector.load %arg3[%c0_5, %c0_6] : memref<1x128xf32, #tpu.memory_space<vmem>>, vector<1x128xf32>
    %8 = vector.broadcast %7 : vector<1x128xf32> to vector<512x128xf32>
    %9 = arith.addf %6, %8 : vector<512x128xf32>
    %c0_7 = arith.constant 0 : index
    %c0_8 = arith.constant 0 : index
    %10 = vector.load %arg5[%c0_7, %c0_8] : memref<512x128xf32, #tpu.memory_space<vmem>>, vector<512x128xf32>
    tpu.vector_store %arg5[%c0_7, %c0_8], %9 {strides = array<i32>} : memref<512x128xf32, #tpu.memory_space<vmem>>, vector<512x128xf32>,
    return
  }
  func.func @transform_0(%arg0: i32) -> (i32, i32) {
    %c0_i32 = arith.constant 0 : i32
    %c0_i32_0 = arith.constant 0 : i32
    return %arg0, %c0_i32 : i32, i32
  }
  func.func @transform_1(%arg0: i32) -> (i32, i32) {
    %c0_i32 = arith.constant 0 : i32
    %c0_i32_0 = arith.constant 0 : i32
    %c0_i32_1 = arith.constant 0 : i32
    return %c0_i32, %c0_i32_0 : i32, i32
  }
  func.func @transform_2(%arg0: i32) -> (i32, i32) {
    %c0_i32 = arith.constant 0 : i32
    %c0_i32_0 = arith.constant 0 : i32
    %c0_i32_1 = arith.constant 0 : i32
    return %c0_i32, %c0_i32_0 : i32, i32
  }
  func.func @transform_3(%arg0: i32) -> (i32, i32) {
    %c0_i32 = arith.constant 0 : i32
    %c0_i32_0 = arith.constant 0 : i32
    return %arg0, %c0_i32 : i32, i32
  }
  func.func @transform_4(%arg0: i32) -> (i32, i32) {
    %c0_i32 = arith.constant 0 : i32
    %c0_i32_0 = arith.constant 0 : i32
    return %arg0, %c0_i32 : i32, i32
  }
}

module attributes {stable_mosaic.version = 11 : i64} {
  func.func @sage_aggregate_kernel(%arg0: i32, %arg1: i32, %arg2: memref<512x1024xi8, #tpu.memory_space<vmem>>, %arg3: memref<1024x128xbf16, #tpu.memory_space<vmem>>, %arg4: memref<512x128xf32, #tpu.memory_space<vmem>>, %arg5: memref<512x1xf32, #tpu.memory_space<vmem>>, %arg6: memref<512x128xf32, #tpu.memory_space<vmem>>, %arg7: memref<512x128xf32, #tpu.memory_space<vmem>>) attributes {dimension_semantics = [#tpu.dimension_semantics<parallel>, #tpu.dimension_semantics<arbitrary>], iteration_bounds = array<i64: 2, 1>, scalar_prefetch = 0 : i64, scratch_operands = 1 : i64, tpu.core_type = #tpu.core_type<tc>, window_params = [{transform_indices = @transform_0, window_bounds = array<i64: 512, 1024>}, {pipeline_mode = #tpu.pipeline_mode<synchronous>, transform_indices = @transform_1, window_bounds = array<i64: 1024, 128>}, {transform_indices = @transform_2, window_bounds = array<i64: 512, 128>}, {transform_indices = @transform_3, window_bounds = array<i64: 512, 1>}, {transform_indices = @transform_4, window_bounds = array<i64: 512, 128>}]} {
    %c0_i32 = arith.constant 0 : i32
    %0 = arith.cmpi eq, %arg1, %c0_i32 : i32
    %1 = arith.extui %0 : i1 to i32
    %c0_i32_0 = arith.constant 0 : i32
    %2 = arith.cmpi ne, %1, %c0_i32_0 : i32
    scf.if %2 {
      %cst_9 = arith.constant 0.000000e+00 : f32
      %16 = vector.broadcast %cst_9 : f32 to vector<512x128xf32>
      %c0_10 = arith.constant 0 : index
      %c0_11 = arith.constant 0 : index
      %17 = vector.load %arg7[%c0_10, %c0_11] : memref<512x128xf32, #tpu.memory_space<vmem>>, vector<512x128xf32>
      tpu.vector_store %arg7[%c0_10, %c0_11], %16 {strides = array<i32>} : memref<512x128xf32, #tpu.memory_space<vmem>>, vector<512x128xf32>,
    } else {
    }
    %c0 = arith.constant 0 : index
    %c0_1 = arith.constant 0 : index
    %3 = vector.load %arg2[%c0, %c0_1] : memref<512x1024xi8, #tpu.memory_space<vmem>>, vector<512x1024xi8>
    %4 = arith.sitofp %3 : vector<512x1024xi8> to vector<512x1024xbf16>
    %c1024_i32 = arith.constant 1024 : i32
    %5 = arith.muli %arg1, %c1024_i32 : i32
    %6 = tpu.assume_multiple %5, 1024 : i32
    %7 = arith.index_cast %6 : i32 to index
    %c0_2 = arith.constant 0 : index
    %8 = vector.load %arg3[%7, %c0_2] : memref<1024x128xbf16, #tpu.memory_space<vmem>>, vector<1024x128xbf16>
    %c0_3 = arith.constant 0 : index
    %c0_4 = arith.constant 0 : index
    %9 = vector.load %arg7[%c0_3, %c0_4] : memref<512x128xf32, #tpu.memory_space<vmem>>, vector<512x128xf32>
    %cst = arith.constant dense<0.000000e+00> : vector<512x128xf32>
    %10 = tpu.matmul %4, %8, %cst {dimension_numbers = #tpu.dot_dimension_numbers<[1], [0], [0], [1], [0, 0, 1, 1], [], []>} : vector<512x1024xbf16>, vector<1024x128xbf16>, vector<512x128xf32> -> vector<512x128xf32>
    %11 = arith.addf %9, %10 : vector<512x128xf32>
    %c0_5 = arith.constant 0 : index
    %c0_6 = arith.constant 0 : index
    %12 = vector.load %arg7[%c0_5, %c0_6] : memref<512x128xf32, #tpu.memory_space<vmem>>, vector<512x128xf32>
    tpu.vector_store %arg7[%c0_5, %c0_6], %11 {strides = array<i32>} : memref<512x128xf32, #tpu.memory_space<vmem>>, vector<512x128xf32>,
    %c0_i32_7 = arith.constant 0 : i32
    %13 = arith.cmpi eq, %arg1, %c0_i32_7 : i32
    %14 = arith.extui %13 : i1 to i32
    %c0_i32_8 = arith.constant 0 : i32
    %15 = arith.cmpi ne, %14, %c0_i32_8 : i32
    scf.if %15 {
      %c0_9 = arith.constant 0 : index
      %c0_10 = arith.constant 0 : index
      %16 = vector.load %arg7[%c0_9, %c0_10] : memref<512x128xf32, #tpu.memory_space<vmem>>, vector<512x128xf32>
      %c0_11 = arith.constant 0 : index
      %c0_12 = arith.constant 0 : index
      %17 = vector.load %arg5[%c0_11, %c0_12] : memref<512x1xf32, #tpu.memory_space<vmem>>, vector<512x1xf32>
      %18 = vector.broadcast %17 : vector<512x1xf32> to vector<512x128xf32>
      %19 = arith.mulf %16, %18 : vector<512x128xf32>
      %c0_13 = arith.constant 0 : index
      %c0_14 = arith.constant 0 : index
      %20 = vector.load %arg4[%c0_13, %c0_14] : memref<512x128xf32, #tpu.memory_space<vmem>>, vector<512x128xf32>
      %21 = arith.addf %19, %20 : vector<512x128xf32>
      %c0_15 = arith.constant 0 : index
      %c0_16 = arith.constant 0 : index
      %22 = vector.load %arg6[%c0_15, %c0_16] : memref<512x128xf32, #tpu.memory_space<vmem>>, vector<512x128xf32>
      tpu.vector_store %arg6[%c0_15, %c0_16], %21 {strides = array<i32>} : memref<512x128xf32, #tpu.memory_space<vmem>>, vector<512x128xf32>,
    } else {
    }
    return
  }
  func.func @transform_0(%arg0: i32, %arg1: i32) -> (i32, i32) {
    %c0_i32 = arith.constant 0 : i32
    return %arg0, %arg1 : i32, i32
  }
  func.func @transform_1(%arg0: i32, %arg1: i32) -> (i32, i32) {
    %c0_i32 = arith.constant 0 : i32
    %c0_i32_0 = arith.constant 0 : i32
    %c0_i32_1 = arith.constant 0 : i32
    return %c0_i32, %c0_i32_0 : i32, i32
  }
  func.func @transform_2(%arg0: i32, %arg1: i32) -> (i32, i32) {
    %c0_i32 = arith.constant 0 : i32
    %c0_i32_0 = arith.constant 0 : i32
    return %arg0, %c0_i32 : i32, i32
  }
  func.func @transform_3(%arg0: i32, %arg1: i32) -> (i32, i32) {
    %c0_i32 = arith.constant 0 : i32
    %c0_i32_0 = arith.constant 0 : i32
    return %arg0, %c0_i32 : i32, i32
  }
  func.func @transform_4(%arg0: i32, %arg1: i32) -> (i32, i32) {
    %c0_i32 = arith.constant 0 : i32
    %c0_i32_0 = arith.constant 0 : i32
    return %arg0, %c0_i32 : i32, i32
  }
}

</mosaic_0001>

<bundles_post_ra>
// kernel: graphsage_forward.6
= control target key start
LH: loop header
LB: loop body
LE: loop exit
PB: predicated region body
PF: predicated region fallthrough
CT: control target
= control target key end

     0   :  { %s1738_s15 = smov 0   ;;  %s2081_s0 = inlined_call_operand.vmem [shape: f32[1024,128], index: 0, kind: input, shape index: {}]   ;;  %s2082_s1 = inlined_call_operand.vmem [shape: bf16[128,256], index: 1, kind: input, shape index: {}]   ;;  %s2083_s2 = inlined_call_operand.vmem [shape: f32[1,128], index: 2, kind: input, shape index: {}]   ;;  %s2084_s3 = inlined_call_operand.vmem [shape: bf16[1024,128], index: 3, kind: output, shape index: {0}]   ;;  %s2085_s4 = inlined_call_operand.vmem [shape: f32[1024,128], index: 4, kind: output, shape index: {1}]  }
   0x1 LB: > { %s1306_s16 = sadd.s32 4294967295, %s1710_s15   ;;  %p1310_p0 = scmp.ge.s32.totalorder %s1710_s15, 1  ;;  %s1710_s15 = sphi %s1738_s15, %s15_s15  }
   0x2   : > { %p166_p1 = scmp.lt.s32.totalorder %s1710_s15, 3 }
   0x4   : > { %p167_p2 = pnand %p1310_p0, %p166_p1 }
   0x5   : > { %s1311_s5 = sshll.u32 (!%p167_p2), %s1306_s16, 6 }
   0x6   : > { %170 = sbr.rel (%p167_p2) target bundleno = 367 (0x16f), region = 32  ;;  %p198_p3 = scmp.lt.s32.totalorder (!%p167_p2), %s1311_s5, 127 }
   0xb   : > { %v1680_v0 = vld [vmem:[%s2082_s1 + $0x74] ss:$8 sps:$4 sm:$0xff]   ;;  %v1682_v1 = vld [vmem:[%s2082_s1 + $0x70] ss:$8 sps:$4 sm:$0xff]   ;;  %v1712_v2 = vmov 0   ;;  %s2087_s5 = smov (!%p198_p3, %s1311_s5), 127 }
   0xc   : > { %440 = vmatprep.mubr.bf16.mxu0 %v1712_v2  ;;  %600 = vmatprep.mubr.bf16.mxu1 %v1712_v2  ;;  %v1683_v3 = vld [vmem:[%s2082_s1 + $0x64] ss:$8 sps:$4 sm:$0xff]   ;;  %v1685_v4 = vld [vmem:[%s2082_s1 + $0x60] ss:$8 sps:$4 sm:$0xff]   ;;  %v1686_v5 = vld [vmem:[%s2082_s1 + $0x54] ss:$8 sps:$4 sm:$0xff]  }
   0xd   : > { %408 = vmatprep.subr.bf16.mxu0 %v1680_v0  ;;  %1655 = vmatprep.subr.bf16.mxu1 %v1680_v0  ;;  %v1688_v6 = vld [vmem:[%s2082_s1 + $0x50] ss:$8 sps:$4 sm:$0xff]   ;;  %v1689_v7 = vld [vmem:[%s2082_s1 + $0x44] ss:$8 sps:$4 sm:$0xff]   ;;  %v1691_v8 = vld [vmem:[%s2082_s1 + $0x40] ss:$8 sps:$4 sm:$0xff]  }
   0xe   : > { %409 = vmatpush1.bf16.msra.mxu0 %v1682_v1  ;;  %1663 = vmatpush1.bf16.msra.mxu1 %v1682_v1  ;;  %v1692_v9 = vld [vmem:[%s2082_s1 + $0x34] ss:$8 sps:$4 sm:$0xff]   ;;  %v1694_v10 = vld [vmem:[%s2082_s1 + $0x30] ss:$8 sps:$4 sm:$0xff]   ;;  %v1695_v11 = vld [vmem:[%s2082_s1 + $0x24] ss:$8 sps:$4 sm:$0xff]  }
   0xf   : > { %410 = vmatprep.subr.bf16.mxu0 %v1683_v3  ;;  %1656 = vmatprep.subr.bf16.mxu1 %v1683_v3  ;;  %v1697_v12 = vld [vmem:[%s2082_s1 + $0x20] ss:$8 sps:$4 sm:$0xff]   ;;  %v1698_v13 = vld [vmem:[%s2082_s1 + $0x14] ss:$8 sps:$4 sm:$0xff]   ;;  %s1312_s19 = sshll.u32 %s2087_s5, 3  ;;  %s1314_s6 = sshll.u32 %s2087_s5, 2 }
  0x10   : > { %v1700_v14 = vld [vmem:[%s2082_s1 + $0x10] ss:$8 sps:$4 sm:$0xff]   ;;  %s1798_s24 = scalar_lea.vmem %s2081_s0, %s1312_s19  ;;  %v1701_v15 = vld [vmem:[%s2082_s1 + $0x4] ss:$8 sps:$4 sm:$0xff]   ;;  %v1703_v16 = vld [vmem:[%s2082_s1] ss:$8 sps:$4 sm:$0xff]   ;;  %s1911_s9 = scalar_lea.vmem %s2085_s4, %s1312_s19 }
  0x11   : > { %v216_v17 = vld [vmem:[%s1798_s24] sm:$0xff]  ;;  %v217_v18 = vld [vmem:[%s1798_s24 + $0x8] sm:$0xff]  ;;  %v218_v23 = vld [vmem:[%s1798_s24 + $0x10] sm:$0xff]  ;;  %s1918_s12 = scalar_lea.vmem %s2084_s3, %s1314_s6 }
  0x12   : > { %411 = vmatpush1.bf16.msra.mxu0 %v1685_v4  ;;  %1664 = vmatpush1.bf16.msra.mxu1 %v1685_v4  ;;  %v248_v19 = vld [vmem:[%s1798_s24 + $0x100] sm:$0xff]  ;;  %v249_v20 = vld [vmem:[%s1798_s24 + $0x108] sm:$0xff]  ;;  %v280_v21 = vpack.c.bf16 %v217_v18, %v216_v17  ;;  %v219_v24 = vld [vmem:[%s1798_s24 + $0x18] sm:$0xff] }
  0x13   : > { %412 = vmatprep.subr.bf16.mxu0 %v1686_v5  ;;  %1657 = vmatprep.subr.bf16.mxu1 %v1686_v5  ;;  %v296_v22 = vpack.c.bf16 %v249_v20, %v248_v19  ;;  %v250_v25 = vld [vmem:[%s1798_s24 + $0x110] sm:$0xff]  ;;  %v251_v26 = vld [vmem:[%s1798_s24 + $0x118] sm:$0xff]  ;;  %v281_v27 = vpack.c.bf16 %v219_v24, %v218_v23  ;;  %v220_v29 = vld [vmem:[%s1798_s24 + $0x20] sm:$0xff] }
  0x14   : > { %v297_v28 = vpack.c.bf16 %v251_v26, %v250_v25  ;;  %v221_v30 = vld [vmem:[%s1798_s24 + $0x28] sm:$0xff]  ;;  %v252_v31 = vld [vmem:[%s1798_s24 + $0x120] sm:$0xff]  ;;  %v222_v35 = vld [vmem:[%s1798_s24 + $0x30] sm:$0xff] }
  0x15   : > { %v253_v32 = vld [vmem:[%s1798_s24 + $0x128] sm:$0xff]  ;;  %v282_v33 = vpack.c.bf16 %v221_v30, %v220_v29  ;;  %v223_v36 = vld [vmem:[%s1798_s24 + $0x38] sm:$0xff]  ;;  %v254_v37 = vld [vmem:[%s1798_s24 + $0x130] sm:$0xff] }
  0x16   : > { %413 = vmatpush1.bf16.msra.mxu0 %v1688_v6  ;;  %1665 = vmatpush1.bf16.msra.mxu1 %v1688_v6  ;;  %v298_v34 = vpack.c.bf16 %v253_v32, %v252_v31  ;;  %v255_v38 = vld [vmem:[%s1798_s24 + $0x138] sm:$0xff]  ;;  %v283_v39 = vpack.c.bf16 %v223_v36, %v222_v35  ;;  %v224_v41 = vld [vmem:[%s1798_s24 + $0x40] sm:$0xff]  ;;  %v225_v42 = vld [vmem:[%s1798_s24 + $0x48] sm:$0xff] }
  0x17   : > { %414 = vmatprep.subr.bf16.mxu0 %v1689_v7  ;;  %1658 = vmatprep.subr.bf16.mxu1 %v1689_v7  ;;  %v299_v40 = vpack.c.bf16 %v255_v38, %v254_v37  ;;  %v256_v43 = vld [vmem:[%s1798_s24 + $0x140] sm:$0xff]  ;;  %v257_v44 = vld [vmem:[%s1798_s24 + $0x148] sm:$0xff]  ;;  %v284_v45 = vpack.c.bf16 %v225_v42, %v224_v41  ;;  %v226_v47 = vld [vmem:[%s1798_s24 + $0x50] sm:$0xff] }
  0x18   : > { %v300_v46 = vpack.c.bf16 %v257_v44, %v256_v43  ;;  %v227_v48 = vld [vmem:[%s1798_s24 + $0x58] sm:$0xff]  ;;  %v258_v49 = vld [vmem:[%s1798_s24 + $0x150] sm:$0xff]  ;;  %v228_v53 = vld [vmem:[%s1798_s24 + $0x60] sm:$0xff] }
  0x19   : > { %v259_v50 = vld [vmem:[%s1798_s24 + $0x158] sm:$0xff]  ;;  %v285_v51 = vpack.c.bf16 %v227_v48, %v226_v47  ;;  %v229_v54 = vld [vmem:[%s1798_s24 + $0x68] sm:$0xff]  ;;  %v260_v55 = vld [vmem:[%s1798_s24 + $0x160] sm:$0xff] }
  0x1a   : > { %415 = vmatpush1.bf16.msra.mxu0 %v1691_v8  ;;  %1666 = vmatpush1.bf16.msra.mxu1 %v1691_v8  ;;  %v301_v52 = vpack.c.bf16 %v259_v50, %v258_v49  ;;  %v261_v56 = vld [vmem:[%s1798_s24 + $0x168] sm:$0xff]  ;;  %v286_v57 = vpack.c.bf16 %v229_v54, %v228_v53  ;;  %v230_v59 = vld [vmem:[%s1798_s24 + $0x70] sm:$0xff]  ;;  %v231_v60 = vld [vmem:[%s1798_s24 + $0x78] sm:$0xff] }
  0x1b   : > { %416 = vmatprep.subr.bf16.mxu0 %v1692_v9  ;;  %1659 = vmatprep.subr.bf16.mxu1 %v1692_v9  ;;  %v302_v58 = vpack.c.bf16 %v261_v56, %v260_v55  ;;  %v262_v61 = vld [vmem:[%s1798_s24 + $0x170] sm:$0xff]  ;;  %v263_v62 = vld [vmem:[%s1798_s24 + $0x178] sm:$0xff]  ;;  %v287_v63 = vpack.c.bf16 %v231_v60, %v230_v59  ;;  %v232_v1 = vld [vmem:[%s1798_s24 + $0x80] sm:$0xff] }
  0x1c   : > { %v303_v0 = vpack.c.bf16 %v263_v62, %v262_v61  ;;  %v233_v3 = vld [vmem:[%s1798_s24 + $0x88] sm:$0xff]  ;;  %v264_v4 = vld [vmem:[%s1798_s24 + $0x180] sm:$0xff]  ;;  %v234_v8 = vld [vmem:[%s1798_s24 + $0x90] sm:$0xff] }
  0x1d   : > { %v265_v5 = vld [vmem:[%s1798_s24 + $0x188] sm:$0xff]  ;;  %v288_v6 = vpack.c.bf16 %v233_v3, %v232_v1  ;;  %v235_v9 = vld [vmem:[%s1798_s24 + $0x98] sm:$0xff]  ;;  %v238_v20 = vld [vmem:[%s1798_s24 + $0xb0] sm:$0xff] }
  0x1e   : > { %417 = vmatpush1.bf16.msra.mxu0 %v1694_v10  ;;  %1667 = vmatpush1.bf16.msra.mxu1 %v1694_v10  ;;  %v304_v7 = vpack.c.bf16 %v265_v5, %v264_v4  ;;  %v266_v10 = vld [vmem:[%s1798_s24 + $0x190] sm:$0xff]  ;;  %v269_v17 = vld [vmem:[%s1798_s24 + $0x1a8] sm:$0xff]  ;;  %v271_v23 = vld [vmem:[%s1798_s24 + $0x1b8] sm:$0xff] }
  0x1f   : > { %418 = vmatprep.subr.bf16.mxu0 %v1695_v11  ;;  %1660 = vmatprep.subr.bf16.mxu1 %v1695_v11  ;;  %v267_v11 = vld [vmem:[%s1798_s24 + $0x198] sm:$0xff]  ;;  %v240_v26 = vld [vmem:[%s1798_s24 + $0xc0] sm:$0xff]  ;;  %v273_v29 = vld [vmem:[%s1798_s24 + $0x1c8] sm:$0xff] }
  0x20   : > { %v242_v32 = vld [vmem:[%s1798_s24 + $0xd0] sm:$0xff]  ;;  %v275_v35 = vld [vmem:[%s1798_s24 + $0x1d8] sm:$0xff]  ;;  %v244_v38 = vld [vmem:[%s1798_s24 + $0xe0] sm:$0xff] }
  0x21   : > { %v277_v41 = vld [vmem:[%s1798_s24 + $0x1e8] sm:$0xff]  ;;  %v246_v44 = vld [vmem:[%s1798_s24 + $0xf0] sm:$0xff]  ;;  %v279_v47 = vld [vmem:[%s1798_s24 + $0x1f8] sm:$0xff] }
  0x22   : > { %419 = vmatpush1.bf16.msra.mxu0 %v1697_v12  ;;  %1668 = vmatpush1.bf16.msra.mxu1 %v1697_v12  ;;  %v289_v12 = vpack.c.bf16 %v235_v9, %v234_v8 }
  0x23   : > { %420 = vmatprep.subr.bf16.mxu0 %v1698_v13  ;;  %1661 = vmatprep.subr.bf16.mxu1 %v1698_v13  ;;  %v305_v13 = vpack.c.bf16 %v267_v11, %v266_v10 }
  0x26   : > { %421 = vmatpush1.bf16.msra.mxu0 %v1700_v14  ;;  %1669 = vmatpush1.bf16.msra.mxu1 %v1700_v14  ;;  %v236_v14 = vld [vmem:[%s1798_s24 + $0xa0] sm:$0xff] }
  0x27   : > { %422 = vmatprep.subr.bf16.mxu0 %v1701_v15  ;;  %1662 = vmatprep.subr.bf16.mxu1 %v1701_v15  ;;  %v237_v15 = vld [vmem:[%s1798_s24 + $0xa8] sm:$0xff] }
  0x28   : > { %v290_v18 = vpack.c.bf16 %v237_v15, %v236_v14 }
  0x2a   : > { %423 = vmatpush1.bf16.msra.mxu0 %v1703_v16  ;;  %1670 = vmatpush1.bf16.msra.mxu1 %v1703_v16  ;;  %v268_v16 = vld [vmem:[%s1798_s24 + $0x1a0] sm:$0xff] }
  0x2b   : > { %v306_v19 = vpack.c.bf16 %v269_v17, %v268_v16 }
  0x2d   : > { %441 = vmatmul.mubr.bf16.vlgmr.msra.gmra.mxu0 %v280_v21  ;;  %601 = vmatmul.mubr.bf16.vlgmr.msra.gmra.mxu1 %v296_v22  ;;  %v239_v21 = vld [vmem:[%s1798_s24 + $0xb8] sm:$0xff]  ;;  %v270_v22 = vld [vmem:[%s1798_s24 + $0x1b0] sm:$0xff] }
  0x2e   : > { %450 = vmatprep.mubr.bf16.mxu0 %v1712_v2  ;;  %610 = vmatprep.mubr.bf16.mxu1 %v1712_v2  ;;  %v291_v24 = vpack.c.bf16 %v239_v21, %v238_v20  ;;  %v307_v25 = vpack.c.bf16 %v271_v23, %v270_v22 }
  0x35   : > { %451 = vmatmul.mubr.bf16.gmra.mxu0 %v281_v27  ;;  %611 = vmatmul.mubr.bf16.gmra.mxu1 %v297_v28  ;;  %v241_v27 = vld [vmem:[%s1798_s24 + $0xc8] sm:$0xff]  ;;  %v272_v28 = vld [vmem:[%s1798_s24 + $0x1c0] sm:$0xff] }
  0x36   : > { %460 = vmatprep.mubr.bf16.mxu0 %v1712_v2  ;;  %620 = vmatprep.mubr.bf16.mxu1 %v1712_v2  ;;  %v292_v30 = vpack.c.bf16 %v241_v27, %v240_v26  ;;  %v308_v31 = vpack.c.bf16 %v273_v29, %v272_v28 }
  0x3d   : > { %461 = vmatmul.mubr.bf16.gmra.mxu0 %v282_v33  ;;  %621 = vmatmul.mubr.bf16.gmra.mxu1 %v298_v34  ;;  %v243_v33 = vld [vmem:[%s1798_s24 + $0xd8] sm:$0xff]  ;;  %v274_v34 = vld [vmem:[%s1798_s24 + $0x1d0] sm:$0xff] }
  0x3e   : > { %470 = vmatprep.mubr.bf16.mxu0 %v1712_v2  ;;  %630 = vmatprep.mubr.bf16.mxu1 %v1712_v2  ;;  %v293_v36 = vpack.c.bf16 %v243_v33, %v242_v32  ;;  %v309_v37 = vpack.c.bf16 %v275_v35, %v274_v34 }
  0x45   : > { %471 = vmatmul.mubr.bf16.gmra.mxu0 %v283_v39  ;;  %631 = vmatmul.mubr.bf16.gmra.mxu1 %v299_v40  ;;  %v245_v39 = vld [vmem:[%s1798_s24 + $0xe8] sm:$0xff]  ;;  %v276_v40 = vld [vmem:[%s1798_s24 + $0x1e0] sm:$0xff] }
  0x46   : > { %480 = vmatprep.mubr.bf16.mxu0 %v1712_v2  ;;  %640 = vmatprep.mubr.bf16.mxu1 %v1712_v2  ;;  %v294_v42 = vpack.c.bf16 %v245_v39, %v244_v38  ;;  %v310_v43 = vpack.c.bf16 %v277_v41, %v276_v40 }
  0x4d   : > { %481 = vmatmul.mubr.bf16.gmra.mxu0 %v284_v45  ;;  %641 = vmatmul.mubr.bf16.gmra.mxu1 %v300_v46  ;;  %v247_v45 = vld [vmem:[%s1798_s24 + $0xf8] sm:$0xff]  ;;  %v278_v46 = vld [vmem:[%s1798_s24 + $0x1f0] sm:$0xff] }
  0x4e   : > { %490 = vmatprep.mubr.bf16.mxu0 %v1712_v2  ;;  %650 = vmatprep.mubr.bf16.mxu1 %v1712_v2  ;;  %v295_v48 = vpack.c.bf16 %v247_v45, %v246_v44  ;;  %v311_v49 = vpack.c.bf16 %v279_v47, %v278_v46 }
  0x55   : > { %491 = vmatmul.mubr.bf16.gmra.mxu0 %v285_v51  ;;  %651 = vmatmul.mubr.bf16.gmra.mxu1 %v301_v52  ;;  %v1903_v52 = vld [vmem:[%s2083_s2] ss:$0 sm:$0xff] }
  0x56   : > { %500 = vmatprep.mubr.bf16.mxu0 %v1712_v2  ;;  %660 = vmatprep.mubr.bf16.mxu1 %v1712_v2 }
  0x5d   : > { %501 = vmatmul.mubr.bf16.gmra.mxu0 %v286_v57  ;;  %661 = vmatmul.mubr.bf16.gmra.mxu1 %v302_v58 }
  0x5e   : > { %510 = vmatprep.mubr.bf16.mxu0 %v1712_v2  ;;  %670 = vmatprep.mubr.bf16.mxu1 %v1712_v2 }
  0x65   : > { %511 = vmatmul.mubr.bf16.gmra.mxu0 %v287_v63  ;;  %671 = vmatmul.mubr.bf16.gmra.mxu1 %v303_v0 }
  0x66   : > { %520 = vmatprep.mubr.bf16.mxu0 %v1712_v2  ;;  %680 = vmatprep.mubr.bf16.mxu1 %v1712_v2 }
  0x6d   : > { %521 = vmatmul.mubr.bf16.gmra.mxu0 %v288_v6  ;;  %681 = vmatmul.mubr.bf16.gmra.mxu1 %v304_v7 }
  0x6e   : > { %530 = vmatprep.mubr.bf16.mxu0 %v1712_v2  ;;  %690 = vmatprep.mubr.bf16.mxu1 %v1712_v2 }
  0x75   : > { %531 = vmatmul.mubr.bf16.gmra.mxu0 %v289_v12  ;;  %691 = vmatmul.mubr.bf16.gmra.mxu1 %v305_v13 }
  0x76   : > { %540 = vmatprep.mubr.bf16.mxu0 %v1712_v2  ;;  %700 = vmatprep.mubr.bf16.mxu1 %v1712_v2 }
  0x7d   : > { %541 = vmatmul.mubr.bf16.gmra.mxu0 %v290_v18  ;;  %701 = vmatmul.mubr.bf16.gmra.mxu1 %v306_v19 }
  0x7e   : > { %550 = vmatprep.mubr.bf16.mxu0 %v1712_v2  ;;  %710 = vmatprep.mubr.bf16.mxu1 %v1712_v2 }
  0x85   : > { %551 = vmatmul.mubr.bf16.gmra.mxu0 %v291_v24  ;;  %711 = vmatmul.mubr.bf16.gmra.mxu1 %v307_v25 }
  0x86   : > { %560 = vmatprep.mubr.bf16.mxu0 %v1712_v2  ;;  %720 = vmatprep.mubr.bf16.mxu1 %v1712_v2 }
  0x8d   : > { %561 = vmatmul.mubr.bf16.gmra.mxu0 %v292_v30  ;;  %721 = vmatmul.mubr.bf16.gmra.mxu1 %v308_v31 }
  0x8e   : > { %570 = vmatprep.mubr.bf16.mxu0 %v1712_v2  ;;  %730 = vmatprep.mubr.bf16.mxu1 %v1712_v2 }
  0x95   : > { %571 = vmatmul.mubr.bf16.gmra.mxu0 %v293_v36  ;;  %731 = vmatmul.mubr.bf16.gmra.mxu1 %v309_v37 }
  0x96   : > { %580 = vmatprep.mubr.bf16.mxu0 %v1712_v2  ;;  %740 = vmatprep.mubr.bf16.mxu1 %v1712_v2 }
  0x9d   : > { %581 = vmatmul.mubr.bf16.gmra.mxu0 %v294_v42  ;;  %741 = vmatmul.mubr.bf16.gmra.mxu1 %v310_v43 }
  0x9e   : > { %590 = vmatprep.mubr.bf16.mxu0 %v1712_v2  ;;  %750 = vmatprep.mubr.bf16.mxu1 %v1712_v2 }
  0xa5   : > { %591 = vmatmul.mubr.bf16.gmra.mxu0 %v295_v48  ;;  %751 = vmatmul.mubr.bf16.gmra.mxu1 %v311_v49 }
  0xed   : > { %v442_v50 = vpop.f32.mrf.mxu0  ;;  %v602_v51 = vpop.f32.mrf.mxu1 }
  0xef   : > { %v444_v2 = vpop.f32.mrf.mxu0  ;;  %v604_v53 = vpop.f32.mrf.mxu1 }
  0xf0   : > { %v1088_v54 = vadd.f32 %v1903_v52, %v444_v2  ;;  %v1120_v55 = vadd.f32 %v1903_v52, %v604_v53 }
  0xf1   : > { %v446_v56 = vpop.f32.mrf.mxu0  ;;  %v606_v57 = vpop.f32.mrf.mxu1 }
  0xf2   : > { %1152 = vst [vmem:[%s1911_s9] sm:$0xff] %v1088_v54  ;;  %1184 = vst [vmem:[%s1911_s9 + $0x100] sm:$0xff] %v1120_v55  ;;  %v1467_v58 = vpack.c.bf16 %v446_v56, %v442_v50  ;;  %v1547_v59 = vpack.c.bf16 %v606_v57, %v602_v51 }
  0xf3   : > { %v448_v60 = vpop.f32.mrf.mxu0  ;;  %v608_v61 = vpop.f32.mrf.mxu1 }
  0xf4   : > { %1468 = vst [vmem:[%s1918_s12] sm:$0xff] %v1467_v58   ;;  %1639 = vst [vmem:[%s1918_s12 + $0x80] sm:$0xff] %v1547_v59   ;;  %v1089_v62 = vadd.f32 %v1903_v52, %v448_v60  ;;  %v1121_v63 = vadd.f32 %v1903_v52, %v608_v61 }
  0xf5   : > { %v452_v0 = vpop.f32.mrf.mxu0  ;;  %v612_v1 = vpop.f32.mrf.mxu1 }
  0xf6   : > { %1153 = vst [vmem:[%s1911_s9 + $0x8] sm:$0xff] %v1089_v62  ;;  %1185 = vst [vmem:[%s1911_s9 + $0x108] sm:$0xff] %v1121_v63 }
  0xf7   : > { %v454_v3 = vpop.f32.mrf.mxu0  ;;  %v614_v4 = vpop.f32.mrf.mxu1 }
  0xf8   : > { %v1090_v5 = vadd.f32 %v1903_v52, %v454_v3  ;;  %v1122_v6 = vadd.f32 %v1903_v52, %v614_v4 }
  0xf9   : > { %v456_v7 = vpop.f32.mrf.mxu0  ;;  %v616_v8 = vpop.f32.mrf.mxu1 }
  0xfa   : > { %1154 = vst [vmem:[%s1911_s9 + $0x10] sm:$0xff] %v1090_v5  ;;  %1186 = vst [vmem:[%s1911_s9 + $0x110] sm:$0xff] %v1122_v6  ;;  %v1472_v9 = vpack.c.bf16 %v456_v7, %v452_v0  ;;  %v1552_v10 = vpack.c.bf16 %v616_v8, %v612_v1 }
  0xfb   : > { %v458_v11 = vpop.f32.mrf.mxu0  ;;  %v618_v12 = vpop.f32.mrf.mxu1 }
  0xfc   : > { %1624 = vst [vmem:[%s1918_s12 + $0x8] sm:$0xff] %v1472_v9   ;;  %1640 = vst [vmem:[%s1918_s12 + $0x88] sm:$0xff] %v1552_v10   ;;  %v1091_v13 = vadd.f32 %v1903_v52, %v458_v11  ;;  %v1123_v14 = vadd.f32 %v1903_v52, %v618_v12 }
  0xfd   : > { %v462_v15 = vpop.f32.mrf.mxu0  ;;  %v622_v16 = vpop.f32.mrf.mxu1 }
  0xfe   : > { %1155 = vst [vmem:[%s1911_s9 + $0x18] sm:$0xff] %v1091_v13  ;;  %1187 = vst [vmem:[%s1911_s9 + $0x118] sm:$0xff] %v1123_v14 }
  0xff   : > { %v464_v17 = vpop.f32.mrf.mxu0  ;;  %v624_v18 = vpop.f32.mrf.mxu1 }
 0x100   : > { %v1092_v19 = vadd.f32 %v1903_v52, %v464_v17  ;;  %v1124_v20 = vadd.f32 %v1903_v52, %v624_v18 }
 0x101   : > { %v466_v21 = vpop.f32.mrf.mxu0  ;;  %v626_v22 = vpop.f32.mrf.mxu1 }
 0x102   : > { %1156 = vst [vmem:[%s1911_s9 + $0x20] sm:$0xff] %v1092_v19  ;;  %1188 = vst [vmem:[%s1911_s9 + $0x120] sm:$0xff] %v1124_v20  ;;  %v1477_v23 = vpack.c.bf16 %v466_v21, %v462_v15  ;;  %v1557_v24 = vpack.c.bf16 %v626_v22, %v622_v16 }
 0x103   : > { %v468_v25 = vpop.f32.mrf.mxu0  ;;  %v628_v26 = vpop.f32.mrf.mxu1 }
 0x104   : > { %1625 = vst [vmem:[%s1918_s12 + $0x10] sm:$0xff] %v1477_v23   ;;  %1641 = vst [vmem:[%s1918_s12 + $0x90] sm:$0xff] %v1557_v24   ;;  %v1093_v27 = vadd.f32 %v1903_v52, %v468_v25  ;;  %v1125_v28 = vadd.f32 %v1903_v52, %v628_v26 }
 0x105   : > { %v472_v29 = vpop.f32.mrf.mxu0  ;;  %v632_v30 = vpop.f32.mrf.mxu1 }
 0x106   : > { %1157 = vst [vmem:[%s1911_s9 + $0x28] sm:$0xff] %v1093_v27  ;;  %1189 = vst [vmem:[%s1911_s9 + $0x128] sm:$0xff] %v1125_v28 }
 0x107   : > { %v474_v31 = vpop.f32.mrf.mxu0  ;;  %v634_v32 = vpop.f32.mrf.mxu1 }
 0x108   : > { %v1094_v33 = vadd.f32 %v1903_v52, %v474_v31  ;;  %v1126_v34 = vadd.f32 %v1903_v52, %v634_v32 }
 0x109   : > { %v476_v35 = vpop.f32.mrf.mxu0  ;;  %v636_v36 = vpop.f32.mrf.mxu1 }
 0x10a   : > { %1158 = vst [vmem:[%s1911_s9 + $0x30] sm:$0xff] %v1094_v33  ;;  %1190 = vst [vmem:[%s1911_s9 + $0x130] sm:$0xff] %v1126_v34  ;;  %v1482_v37 = vpack.c.bf16 %v476_v35, %v472_v29  ;;  %v1562_v38 = vpack.c.bf16 %v636_v36, %v632_v30 }
 0x10b   : > { %v478_v39 = vpop.f32.mrf.mxu0  ;;  %v638_v40 = vpop.f32.mrf.mxu1 }
 0x10c   : > { %1626 = vst [vmem:[%s1918_s12 + $0x18] sm:$0xff] %v1482_v37   ;;  %1642 = vst [vmem:[%s1918_s12 + $0x98] sm:$0xff] %v1562_v38   ;;  %v1095_v41 = vadd.f32 %v1903_v52, %v478_v39  ;;  %v1127_v42 = vadd.f32 %v1903_v52, %v638_v40 }
 0x10d   : > { %v482_v43 = vpop.f32.mrf.mxu0  ;;  %v642_v44 = vpop.f32.mrf.mxu1 }
 0x10e   : > { %1159 = vst [vmem:[%s1911_s9 + $0x38] sm:$0xff] %v1095_v41  ;;  %1191 = vst [vmem:[%s1911_s9 + $0x138] sm:$0xff] %v1127_v42 }
 0x10f   : > { %v484_v45 = vpop.f32.mrf.mxu0  ;;  %v644_v46 = vpop.f32.mrf.mxu1 }
 0x110   : > { %v1096_v47 = vadd.f32 %v1903_v52, %v484_v45  ;;  %v1128_v48 = vadd.f32 %v1903_v52, %v644_v46 }
 0x111   : > { %v486_v49 = vpop.f32.mrf.mxu0  ;;  %v646_v50 = vpop.f32.mrf.mxu1 }
 0x112   : > { %1160 = vst [vmem:[%s1911_s9 + $0x40] sm:$0xff] %v1096_v47  ;;  %1192 = vst [vmem:[%s1911_s9 + $0x140] sm:$0xff] %v1128_v48  ;;  %v1487_v51 = vpack.c.bf16 %v486_v49, %v482_v43  ;;  %v1567_v2 = vpack.c.bf16 %v646_v50, %v642_v44 }
 0x113   : > { %v488_v53 = vpop.f32.mrf.mxu0  ;;  %v648_v54 = vpop.f32.mrf.mxu1 }
 0x114   : > { %1627 = vst [vmem:[%s1918_s12 + $0x20] sm:$0xff] %v1487_v51   ;;  %1643 = vst [vmem:[%s1918_s12 + $0xa0] sm:$0xff] %v1567_v2   ;;  %v1097_v55 = vadd.f32 %v1903_v52, %v488_v53  ;;  %v1129_v56 = vadd.f32 %v1903_v52, %v648_v54 }
 0x115   : > { %v492_v57 = vpop.f32.mrf.mxu0  ;;  %v652_v58 = vpop.f32.mrf.mxu1 }
 0x116   : > { %1161 = vst [vmem:[%s1911_s9 + $0x48] sm:$0xff] %v1097_v55  ;;  %1193 = vst [vmem:[%s1911_s9 + $0x148] sm:$0xff] %v1129_v56 }
 0x117   : > { %v494_v59 = vpop.f32.mrf.mxu0  ;;  %v654_v60 = vpop.f32.mrf.mxu1 }
 0x118   : > { %v1098_v61 = vadd.f32 %v1903_v52, %v494_v59  ;;  %v1130_v62 = vadd.f32 %v1903_v52, %v654_v60 }
 0x119   : > { %v496_v63 = vpop.f32.mrf.mxu0  ;;  %v656_v0 = vpop.f32.mrf.mxu1 }
 0x11a   : > { %1162 = vst [vmem:[%s1911_s9 + $0x50] sm:$0xff] %v1098_v61  ;;  %1194 = vst [vmem:[%s1911_s9 + $0x150] sm:$0xff] %v1130_v62  ;;  %v1492_v1 = vpack.c.bf16 %v496_v63, %v492_v57  ;;  %v1572_v3 = vpack.c.bf16 %v656_v0, %v652_v58 }
 0x11b   : > { %v498_v4 = vpop.f32.mrf.mxu0  ;;  %v658_v5 = vpop.f32.mrf.mxu1 }
 0x11c   : > { %1628 = vst [vmem:[%s1918_s12 + $0x28] sm:$0xff] %v1492_v1   ;;  %1644 = vst [vmem:[%s1918_s12 + $0xa8] sm:$0xff] %v1572_v3   ;;  %v1099_v6 = vadd.f32 %v1903_v52, %v498_v4  ;;  %v1131_v7 = vadd.f32 %v1903_v52, %v658_v5 }
 0x11d   : > { %v502_v8 = vpop.f32.mrf.mxu0  ;;  %v662_v9 = vpop.f32.mrf.mxu1 }
 0x11e   : > { %1163 = vst [vmem:[%s1911_s9 + $0x58] sm:$0xff] %v1099_v6  ;;  %1195 = vst [vmem:[%s1911_s9 + $0x158] sm:$0xff] %v1131_v7 }
 0x11f   : > { %v504_v10 = vpop.f32.mrf.mxu0  ;;  %v664_v11 = vpop.f32.mrf.mxu1 }
 0x120   : > { %v1100_v12 = vadd.f32 %v1903_v52, %v504_v10  ;;  %v1132_v13 = vadd.f32 %v1903_v52, %v664_v11 }
 0x121   : > { %v506_v14 = vpop.f32.mrf.mxu0  ;;  %v666_v15 = vpop.f32.mrf.mxu1 }
 0x122   : > { %1164 = vst [vmem:[%s1911_s9 + $0x60] sm:$0xff] %v1100_v12  ;;  %1196 = vst [vmem:[%s1911_s9 + $0x160] sm:$0xff] %v1132_v13  ;;  %v1497_v16 = vpack.c.bf16 %v506_v14, %v502_v8  ;;  %v1577_v17 = vpack.c.bf16 %v666_v15, %v662_v9 }
 0x123   : > { %v508_v18 = vpop.f32.mrf.mxu0  ;;  %v668_v19 = vpop.f32.mrf.mxu1 }
 0x124   : > { %1629 = vst [vmem:[%s1918_s12 + $0x30] sm:$0xff] %v1497_v16   ;;  %1645 = vst [vmem:[%s1918_s12 + $0xb0] sm:$0xff] %v1577_v17   ;;  %v1101_v20 = vadd.f32 %v1903_v52, %v508_v18  ;;  %v1133_v21 = vadd.f32 %v1903_v52, %v668_v19 }
 0x125   : > { %v512_v22 = vpop.f32.mrf.mxu0  ;;  %v672_v23 = vpop.f32.mrf.mxu1 }
 0x126   : > { %1165 = vst [vmem:[%s1911_s9 + $0x68] sm:$0xff] %v1101_v20  ;;  %1197 = vst [vmem:[%s1911_s9 + $0x168] sm:$0xff] %v1133_v21 }
 0x127   : > { %v514_v24 = vpop.f32.mrf.mxu0  ;;  %v674_v25 = vpop.f32.mrf.mxu1 }
 0x128   : > { %v1102_v26 = vadd.f32 %v1903_v52, %v514_v24  ;;  %v1134_v27 = vadd.f32 %v1903_v52, %v674_v25 }
 0x129   : > { %v516_v28 = vpop.f32.mrf.mxu0  ;;  %v676_v29 = vpop.f32.mrf.mxu1 }
 0x12a   : > { %1166 = vst [vmem:[%s1911_s9 + $0x70] sm:$0xff] %v1102_v26  ;;  %1198 = vst [vmem:[%s1911_s9 + $0x170] sm:$0xff] %v1134_v27  ;;  %v1502_v30 = vpack.c.bf16 %v516_v28, %v512_v22  ;;  %v1582_v31 = vpack.c.bf16 %v676_v29, %v672_v23 }
 0x12b   : > { %v518_v32 = vpop.f32.mrf.mxu0  ;;  %v678_v33 = vpop.f32.mrf.mxu1 }
 0x12c   : > { %1630 = vst [vmem:[%s1918_s12 + $0x38] sm:$0xff] %v1502_v30   ;;  %1646 = vst [vmem:[%s1918_s12 + $0xb8] sm:$0xff] %v1582_v31   ;;  %v1103_v34 = vadd.f32 %v1903_v52, %v518_v32  ;;  %v1135_v35 = vadd.f32 %v1903_v52, %v678_v33 }
 0x12d   : > { %v522_v36 = vpop.f32.mrf.mxu0  ;;  %v682_v37 = vpop.f32.mrf.mxu1 }
 0x12e   : > { %1167 = vst [vmem:[%s1911_s9 + $0x78] sm:$0xff] %v1103_v34  ;;  %1199 = vst [vmem:[%s1911_s9 + $0x178] sm:$0xff] %v1135_v35 }
 0x12f   : > { %v524_v38 = vpop.f32.mrf.mxu0  ;;  %v684_v39 = vpop.f32.mrf.mxu1 }
 0x130   : > { %v1104_v40 = vadd.f32 %v1903_v52, %v524_v38  ;;  %v1136_v41 = vadd.f32 %v1903_v52, %v684_v39 }
 0x131   : > { %v526_v42 = vpop.f32.mrf.mxu0  ;;  %v686_v43 = vpop.f32.mrf.mxu1 }
 0x132   : > { %1168 = vst [vmem:[%s1911_s9 + $0x80] sm:$0xff] %v1104_v40  ;;  %1200 = vst [vmem:[%s1911_s9 + $0x180] sm:$0xff] %v1136_v41  ;;  %v1507_v44 = vpack.c.bf16 %v526_v42, %v522_v36  ;;  %v1587_v45 = vpack.c.bf16 %v686_v43, %v682_v37 }
 0x133   : > { %v528_v46 = vpop.f32.mrf.mxu0  ;;  %v688_v47 = vpop.f32.mrf.mxu1 }
 0x134   : > { %1631 = vst [vmem:[%s1918_s12 + $0x40] sm:$0xff] %v1507_v44   ;;  %1647 = vst [vmem:[%s1918_s12 + $0xc0] sm:$0xff] %v1587_v45   ;;  %v1105_v48 = vadd.f32 %v1903_v52, %v528_v46  ;;  %v1137_v49 = vadd.f32 %v1903_v52, %v688_v47 }
 0x135   : > { %v532_v50 = vpop.f32.mrf.mxu0  ;;  %v692_v51 = vpop.f32.mrf.mxu1 }
 0x136   : > { %1169 = vst [vmem:[%s1911_s9 + $0x88] sm:$0xff] %v1105_v48  ;;  %1201 = vst [vmem:[%s1911_s9 + $0x188] sm:$0xff] %v1137_v49 }
 0x137   : > { %v534_v2 = vpop.f32.mrf.mxu0  ;;  %v694_v53 = vpop.f32.mrf.mxu1 }
 0x138   : > { %v1106_v54 = vadd.f32 %v1903_v52, %v534_v2  ;;  %v1138_v55 = vadd.f32 %v1903_v52, %v694_v53 }
 0x139   : > { %v536_v56 = vpop.f32.mrf.mxu0  ;;  %v696_v57 = vpop.f32.mrf.mxu1 }
 0x13a   : > { %1170 = vst [vmem:[%s1911_s9 + $0x90] sm:$0xff] %v1106_v54  ;;  %1202 = vst [vmem:[%s1911_s9 + $0x190] sm:$0xff] %v1138_v55  ;;  %v1512_v58 = vpack.c.bf16 %v536_v56, %v532_v50  ;;  %v1592_v59 = vpack.c.bf16 %v696_v57, %v692_v51 }
 0x13b   : > { %v538_v60 = vpop.f32.mrf.mxu0  ;;  %v698_v61 = vpop.f32.mrf.mxu1 }
 0x13c   : > { %1632 = vst [vmem:[%s1918_s12 + $0x48] sm:$0xff] %v1512_v58   ;;  %1648 = vst [vmem:[%s1918_s12 + $0xc8] sm:$0xff] %v1592_v59   ;;  %v1107_v62 = vadd.f32 %v1903_v52, %v538_v60  ;;  %v1139_v63 = vadd.f32 %v1903_v52, %v698_v61 }
 0x13d   : > { %v542_v0 = vpop.f32.mrf.mxu0  ;;  %v702_v1 = vpop.f32.mrf.mxu1 }
 0x13e   : > { %1171 = vst [vmem:[%s1911_s9 + $0x98] sm:$0xff] %v1107_v62  ;;  %1203 = vst [vmem:[%s1911_s9 + $0x198] sm:$0xff] %v1139_v63 }
 0x13f   : > { %v544_v3 = vpop.f32.mrf.mxu0  ;;  %v704_v4 = vpop.f32.mrf.mxu1 }
 0x140   : > { %v1108_v5 = vadd.f32 %v1903_v52, %v544_v3  ;;  %v1140_v6 = vadd.f32 %v1903_v52, %v704_v4 }
 0x141   : > { %v546_v7 = vpop.f32.mrf.mxu0  ;;  %v706_v8 = vpop.f32.mrf.mxu1 }
 0x142   : > { %1172 = vst [vmem:[%s1911_s9 + $0xa0] sm:$0xff] %v1108_v5  ;;  %1204 = vst [vmem:[%s1911_s9 + $0x1a0] sm:$0xff] %v1140_v6  ;;  %v1517_v9 = vpack.c.bf16 %v546_v7, %v542_v0  ;;  %v1597_v10 = vpack.c.bf16 %v706_v8, %v702_v1 }
 0x143   : > { %v548_v11 = vpop.f32.mrf.mxu0  ;;  %v708_v12 = vpop.f32.mrf.mxu1 }
 0x144   : > { %1633 = vst [vmem:[%s1918_s12 + $0x50] sm:$0xff] %v1517_v9   ;;  %1649 = vst [vmem:[%s1918_s12 + $0xd0] sm:$0xff] %v1597_v10   ;;  %v1109_v13 = vadd.f32 %v1903_v52, %v548_v11  ;;  %v1141_v14 = vadd.f32 %v1903_v52, %v708_v12 }
 0x145   : > { %v552_v15 = vpop.f32.mrf.mxu0  ;;  %v712_v16 = vpop.f32.mrf.mxu1 }
 0x146   : > { %1173 = vst [vmem:[%s1911_s9 + $0xa8] sm:$0xff] %v1109_v13  ;;  %1205 = vst [vmem:[%s1911_s9 + $0x1a8] sm:$0xff] %v1141_v14 }
 0x147   : > { %v554_v17 = vpop.f32.mrf.mxu0  ;;  %v714_v18 = vpop.f32.mrf.mxu1 }
 0x148   : > { %v1110_v19 = vadd.f32 %v1903_v52, %v554_v17  ;;  %v1142_v20 = vadd.f32 %v1903_v52, %v714_v18 }
 0x149   : > { %v556_v21 = vpop.f32.mrf.mxu0  ;;  %v716_v22 = vpop.f32.mrf.mxu1 }
 0x14a   : > { %1174 = vst [vmem:[%s1911_s9 + $0xb0] sm:$0xff] %v1110_v19  ;;  %1206 = vst [vmem:[%s1911_s9 + $0x1b0] sm:$0xff] %v1142_v20  ;;  %v1522_v23 = vpack.c.bf16 %v556_v21, %v552_v15  ;;  %v1602_v24 = vpack.c.bf16 %v716_v22, %v712_v16 }
 0x14b   : > { %v558_v25 = vpop.f32.mrf.mxu0  ;;  %v718_v26 = vpop.f32.mrf.mxu1 }
 0x14c   : > { %1634 = vst [vmem:[%s1918_s12 + $0x58] sm:$0xff] %v1522_v23   ;;  %1650 = vst [vmem:[%s1918_s12 + $0xd8] sm:$0xff] %v1602_v24   ;;  %v1111_v27 = vadd.f32 %v1903_v52, %v558_v25  ;;  %v1143_v28 = vadd.f32 %v1903_v52, %v718_v26 }
 0x14d   : > { %v562_v29 = vpop.f32.mrf.mxu0  ;;  %v722_v30 = vpop.f32.mrf.mxu1 }
 0x14e   : > { %1175 = vst [vmem:[%s1911_s9 + $0xb8] sm:$0xff] %v1111_v27  ;;  %1207 = vst [vmem:[%s1911_s9 + $0x1b8] sm:$0xff] %v1143_v28 }
 0x14f   : > { %v564_v31 = vpop.f32.mrf.mxu0  ;;  %v724_v32 = vpop.f32.mrf.mxu1 }
 0x150   : > { %v1112_v33 = vadd.f32 %v1903_v52, %v564_v31  ;;  %v1144_v34 = vadd.f32 %v1903_v52, %v724_v32 }
 0x151   : > { %v566_v35 = vpop.f32.mrf.mxu0  ;;  %v726_v36 = vpop.f32.mrf.mxu1 }
 0x152   : > { %1176 = vst [vmem:[%s1911_s9 + $0xc0] sm:$0xff] %v1112_v33  ;;  %1208 = vst [vmem:[%s1911_s9 + $0x1c0] sm:$0xff] %v1144_v34  ;;  %v1527_v37 = vpack.c.bf16 %v566_v35, %v562_v29  ;;  %v1607_v38 = vpack.c.bf16 %v726_v36, %v722_v30 }
 0x153   : > { %v568_v39 = vpop.f32.mrf.mxu0  ;;  %v728_v40 = vpop.f32.mrf.mxu1 }
 0x154   : > { %1635 = vst [vmem:[%s1918_s12 + $0x60] sm:$0xff] %v1527_v37   ;;  %1651 = vst [vmem:[%s1918_s12 + $0xe0] sm:$0xff] %v1607_v38   ;;  %v1113_v41 = vadd.f32 %v1903_v52, %v568_v39  ;;  %v1145_v42 = vadd.f32 %v1903_v52, %v728_v40 }
 0x155   : > { %v572_v43 = vpop.f32.mrf.mxu0  ;;  %v732_v44 = vpop.f32.mrf.mxu1 }
 0x156   : > { %1177 = vst [vmem:[%s1911_s9 + $0xc8] sm:$0xff] %v1113_v41  ;;  %1209 = vst [vmem:[%s1911_s9 + $0x1c8] sm:$0xff] %v1145_v42 }
 0x157   : > { %v574_v45 = vpop.f32.mrf.mxu0  ;;  %v734_v46 = vpop.f32.mrf.mxu1 }
 0x158   : > { %v1114_v47 = vadd.f32 %v1903_v52, %v574_v45  ;;  %v1146_v48 = vadd.f32 %v1903_v52, %v734_v46 }
 0x159   : > { %v576_v49 = vpop.f32.mrf.mxu0  ;;  %v736_v50 = vpop.f32.mrf.mxu1 }
 0x15a   : > { %1178 = vst [vmem:[%s1911_s9 + $0xd0] sm:$0xff] %v1114_v47  ;;  %1210 = vst [vmem:[%s1911_s9 + $0x1d0] sm:$0xff] %v1146_v48  ;;  %v1532_v51 = vpack.c.bf16 %v576_v49, %v572_v43  ;;  %v1612_v2 = vpack.c.bf16 %v736_v50, %v732_v44 }
 0x15b   : > { %v578_v53 = vpop.f32.mrf.mxu0  ;;  %v738_v54 = vpop.f32.mrf.mxu1 }
 0x15c   : > { %1636 = vst [vmem:[%s1918_s12 + $0x68] sm:$0xff] %v1532_v51   ;;  %1652 = vst [vmem:[%s1918_s12 + $0xe8] sm:$0xff] %v1612_v2   ;;  %v1115_v55 = vadd.f32 %v1903_v52, %v578_v53  ;;  %v1147_v56 = vadd.f32 %v1903_v52, %v738_v54 }
 0x15d   : > { %v582_v57 = vpop.f32.mrf.mxu0  ;;  %v742_v58 = vpop.f32.mrf.mxu1 }
 0x15e   : > { %1179 = vst [vmem:[%s1911_s9 + $0xd8] sm:$0xff] %v1115_v55  ;;  %1211 = vst [vmem:[%s1911_s9 + $0x1d8] sm:$0xff] %v1147_v56 }
 0x15f   : > { %v584_v59 = vpop.f32.mrf.mxu0  ;;  %v744_v60 = vpop.f32.mrf.mxu1 }
 0x160   : > { %v1116_v61 = vadd.f32 %v1903_v52, %v584_v59  ;;  %v1148_v62 = vadd.f32 %v1903_v52, %v744_v60 }
 0x161   : > { %v586_v63 = vpop.f32.mrf.mxu0  ;;  %v746_v0 = vpop.f32.mrf.mxu1 }
 0x162   : > { %1180 = vst [vmem:[%s1911_s9 + $0xe0] sm:$0xff] %v1116_v61  ;;  %1212 = vst [vmem:[%s1911_s9 + $0x1e0] sm:$0xff] %v1148_v62  ;;  %v1537_v1 = vpack.c.bf16 %v586_v63, %v582_v57  ;;  %v1617_v3 = vpack.c.bf16 %v746_v0, %v742_v58 }
 0x163   : > { %v588_v4 = vpop.f32.mrf.mxu0  ;;  %v748_v5 = vpop.f32.mrf.mxu1 }
 0x164   : > { %1637 = vst [vmem:[%s1918_s12 + $0x70] sm:$0xff] %v1537_v1   ;;  %1653 = vst [vmem:[%s1918_s12 + $0xf0] sm:$0xff] %v1617_v3   ;;  %v1117_v6 = vadd.f32 %v1903_v52, %v588_v4  ;;  %v1149_v7 = vadd.f32 %v1903_v52, %v748_v5 }
 0x165   : > { %v592_v8 = vpop.f32.mrf.mxu0  ;;  %v752_v9 = vpop.f32.mrf.mxu1 }
 0x166   : > { %1181 = vst [vmem:[%s1911_s9 + $0xe8] sm:$0xff] %v1117_v6  ;;  %1213 = vst [vmem:[%s1911_s9 + $0x1e8] sm:$0xff] %v1149_v7 }
 0x167   : > { %v594_v10 = vpop.f32.mrf.mxu0  ;;  %v754_v11 = vpop.f32.mrf.mxu1 }
 0x168   : > { %v1118_v12 = vadd.f32 %v1903_v52, %v594_v10  ;;  %v1150_v13 = vadd.f32 %v1903_v52, %v754_v11 }
 0x169   : > { %v596_v14 = vpop.f32.mrf.mxu0  ;;  %v756_v15 = vpop.f32.mrf.mxu1 }
 0x16a   : > { %1182 = vst [vmem:[%s1911_s9 + $0xf0] sm:$0xff] %v1118_v12  ;;  %1214 = vst [vmem:[%s1911_s9 + $0x1f0] sm:$0xff] %v1150_v13  ;;  %v1542_v16 = vpack.c.bf16 %v596_v14, %v592_v8  ;;  %v1622_v17 = vpack.c.bf16 %v756_v15, %v752_v9 }
 0x16b   : > { %v598_v18 = vpop.f32.mrf.mxu0  ;;  %v758_v19 = vpop.f32.mrf.mxu1 }
 0x16c   : > { %1638 = vst [vmem:[%s1918_s12 + $0x78] sm:$0xff] %v1542_v16   ;;  %1654 = vst [vmem:[%s1918_s12 + $0xf8] sm:$0xff] %v1622_v17   ;;  %v1119_v20 = vadd.f32 %v1903_v52, %v598_v18  ;;  %v1151_v21 = vadd.f32 %v1903_v52, %v758_v19 }
 0x16e   : > { %1183 = vst [vmem:[%s1911_s9 + $0xf8] sm:$0xff] %v1119_v20  ;;  %1215 = vst [vmem:[%s1911_s9 + $0x1f8] sm:$0xff] %v1151_v21 }
 0x16f PF: > { %s15_s15 = sadd.s32 1, %s1710_s15  }
 0x170   : > { %p12_p4 = scmp.ge.s32.totalorder %s15_s15, 4  }
 0x172   :  { %14 = sbr.rel (!%p12_p4) target bundleno = 1 (0x1), region = 74 }

// kernel: graphsage_forward.8
= control target key start
LH: loop header
LB: loop body
LE: loop exit
PB: predicated region body
PF: predicated region fallthrough
CT: control target
= control target key end

     0   :  { %s1962_s15 = smov 0   ;;  %s2273_s0 = inlined_call_operand.vmem [shape: bf16[1024,128], index: 0, kind: input, shape index: {}]   ;;  %s2274_s1 = inlined_call_operand.vmem [shape: bf16[128,256], index: 1, kind: input, shape index: {}]   ;;  %s2275_s2 = inlined_call_operand.vmem [shape: f32[1,128], index: 2, kind: input, shape index: {}]   ;;  %s2276_s3 = inlined_call_operand.vmem [shape: bf16[1024,128], index: 3, kind: output, shape index: {0}]   ;;  %s2277_s4 = inlined_call_operand.vmem [shape: f32[1024,128], index: 4, kind: output, shape index: {1}]  }
   0x1 LB: > { %s1466_s16 = sadd.s32 4294967295, %s1934_s15   ;;  %p1470_p0 = scmp.ge.s32.totalorder %s1934_s15, 1  ;;  %s1934_s15 = sphi %s1962_s15, %s15_s15  }
   0x2   : > { %p166_p1 = scmp.lt.s32.totalorder %s1934_s15, 3 }
   0x4   : > { %p167_p2 = pnand %p1470_p0, %p166_p1 }
   0x5   : > { %s1471_s19 = sshll.u32 (!%p167_p2), %s1466_s16, 6 }
   0x6   : > { %170 = sbr.rel (%p167_p2) target bundleno = 367 (0x16f), region = 32  ;;  %p198_p3 = scmp.lt.s32.totalorder (!%p167_p2), %s1471_s19, 127 }
   0xb   : > { %v1872_v0 = vld [vmem:[%s2274_s1 + $0x74] ss:$8 sps:$4 sm:$0xff]   ;;  %v1874_v1 = vld [vmem:[%s2274_s1 + $0x70] ss:$8 sps:$4 sm:$0xff]   ;;  %v1936_v2 = vmov 0   ;;  %s2279_s19 = smov (!%p198_p3, %s1471_s19), 127 }
   0xc   : > { %600 = vmatprep.mubr.bf16.mxu0 %v1936_v2  ;;  %760 = vmatprep.mubr.bf16.mxu1 %v1936_v2  ;;  %v1875_v3 = vld [vmem:[%s2274_s1 + $0x64] ss:$8 sps:$4 sm:$0xff]   ;;  %v1877_v4 = vld [vmem:[%s2274_s1 + $0x60] ss:$8 sps:$4 sm:$0xff]   ;;  %v1878_v5 = vld [vmem:[%s2274_s1 + $0x54] ss:$8 sps:$4 sm:$0xff]  }
   0xd   : > { %568 = vmatprep.subr.bf16.mxu0 %v1872_v0  ;;  %1847 = vmatprep.subr.bf16.mxu1 %v1872_v0  ;;  %s1472_s28 = sshll.u32 %s2279_s19, 2  ;;  %v1880_v6 = vld [vmem:[%s2274_s1 + $0x50] ss:$8 sps:$4 sm:$0xff]   ;;  %v1881_v7 = vld [vmem:[%s2274_s1 + $0x44] ss:$8 sps:$4 sm:$0xff]   ;;  %s1476_s5 = sshll.u32 %s2279_s19, 3 }
   0xe   : > { %569 = vmatpush1.bf16.msra.mxu0 %v1874_v1  ;;  %1855 = vmatpush1.bf16.msra.mxu1 %v1874_v1  ;;  %s2001_s9 = scalar_lea.vmem %s2273_s0, %s1472_s28  ;;  %v1883_v8 = vld [vmem:[%s2274_s1 + $0x40] ss:$8 sps:$4 sm:$0xff]   ;;  %v1884_v9 = vld [vmem:[%s2274_s1 + $0x34] ss:$8 sps:$4 sm:$0xff]   ;;  %v1886_v10 = vld [vmem:[%s2274_s1 + $0x30] ss:$8 sps:$4 sm:$0xff]   ;;  %s2101_s11 = scalar_lea.vmem %s2277_s4, %s1476_s5 }
   0xf   : > { %570 = vmatprep.subr.bf16.mxu0 %v1875_v3  ;;  %1848 = vmatprep.subr.bf16.mxu1 %v1875_v3  ;;  %v1887_v11 = vld [vmem:[%s2274_s1 + $0x24] ss:$8 sps:$4 sm:$0xff]   ;;  %v1889_v12 = vld [vmem:[%s2274_s1 + $0x20] ss:$8 sps:$4 sm:$0xff]   ;;  %v1890_v13 = vld [vmem:[%s2274_s1 + $0x14] ss:$8 sps:$4 sm:$0xff]   ;;  %s2110_s13 = scalar_lea.vmem %s2276_s3, %s1472_s28 }
  0x10   : > { %v1892_v14 = vld [vmem:[%s2274_s1 + $0x10] ss:$8 sps:$4 sm:$0xff]   ;;  %v1893_v15 = vld [vmem:[%s2274_s1 + $0x4] ss:$8 sps:$4 sm:$0xff]   ;;  %v1895_v16 = vld [vmem:[%s2274_s1] ss:$8 sps:$4 sm:$0xff]  }
  0x11   : > { %v1896_v17 = vld [vmem:[%s2001_s9] sm:$0xff]   ;;  %v1898_v19 = vld [vmem:[%s2001_s9 + $0x8] sm:$0xff]   ;;  %v1900_v21 = vld [vmem:[%s2001_s9 + $0x10] sm:$0xff]  }
  0x12   : > { %571 = vmatpush1.bf16.msra.mxu0 %v1877_v4  ;;  %1856 = vmatpush1.bf16.msra.mxu1 %v1877_v4  ;;  %v1897_v18 = vld [vmem:[%s2001_s9 + $0x80] sm:$0xff]   ;;  %v1899_v20 = vld [vmem:[%s2001_s9 + $0x88] sm:$0xff]   ;;  %v1901_v22 = vld [vmem:[%s2001_s9 + $0x90] sm:$0xff]  }
  0x13   : > { %572 = vmatprep.subr.bf16.mxu0 %v1878_v5  ;;  %1849 = vmatprep.subr.bf16.mxu1 %v1878_v5  ;;  %v1902_v23 = vld [vmem:[%s2001_s9 + $0x18] sm:$0xff]   ;;  %v1904_v25 = vld [vmem:[%s2001_s9 + $0x20] sm:$0xff]   ;;  %v1906_v27 = vld [vmem:[%s2001_s9 + $0x28] sm:$0xff]  }
  0x14   : > { %v1903_v24 = vld [vmem:[%s2001_s9 + $0x98] sm:$0xff]   ;;  %v1905_v26 = vld [vmem:[%s2001_s9 + $0xa0] sm:$0xff]   ;;  %v1907_v28 = vld [vmem:[%s2001_s9 + $0xa8] sm:$0xff]  }
  0x15   : > { %v1908_v29 = vld [vmem:[%s2001_s9 + $0x30] sm:$0xff]   ;;  %v1910_v31 = vld [vmem:[%s2001_s9 + $0x38] sm:$0xff]   ;;  %v1912_v33 = vld [vmem:[%s2001_s9 + $0x40] sm:$0xff]  }
  0x16   : > { %573 = vmatpush1.bf16.msra.mxu0 %v1880_v6  ;;  %1857 = vmatpush1.bf16.msra.mxu1 %v1880_v6  ;;  %v1909_v30 = vld [vmem:[%s2001_s9 + $0xb0] sm:$0xff]   ;;  %v1911_v32 = vld [vmem:[%s2001_s9 + $0xb8] sm:$0xff]   ;;  %v1913_v34 = vld [vmem:[%s2001_s9 + $0xc0] sm:$0xff]  }
  0x17   : > { %574 = vmatprep.subr.bf16.mxu0 %v1881_v7  ;;  %1850 = vmatprep.subr.bf16.mxu1 %v1881_v7  ;;  %v1914_v35 = vld [vmem:[%s2001_s9 + $0x48] sm:$0xff]   ;;  %v1916_v37 = vld [vmem:[%s2001_s9 + $0x50] sm:$0xff]   ;;  %v1918_v39 = vld [vmem:[%s2001_s9 + $0x58] sm:$0xff]  }
  0x18   : > { %v1915_v36 = vld [vmem:[%s2001_s9 + $0xc8] sm:$0xff]   ;;  %v1917_v38 = vld [vmem:[%s2001_s9 + $0xd0] sm:$0xff]   ;;  %v1919_v40 = vld [vmem:[%s2001_s9 + $0xd8] sm:$0xff]  }
  0x19   : > { %v1920_v41 = vld [vmem:[%s2001_s9 + $0x60] sm:$0xff]   ;;  %v1922_v43 = vld [vmem:[%s2001_s9 + $0x68] sm:$0xff]   ;;  %v1924_v45 = vld [vmem:[%s2001_s9 + $0x70] sm:$0xff]  }
  0x1a   : > { %575 = vmatpush1.bf16.msra.mxu0 %v1883_v8  ;;  %1858 = vmatpush1.bf16.msra.mxu1 %v1883_v8  ;;  %v1921_v42 = vld [vmem:[%s2001_s9 + $0xe0] sm:$0xff]   ;;  %v1923_v44 = vld [vmem:[%s2001_s9 + $0xe8] sm:$0xff]   ;;  %v1925_v46 = vld [vmem:[%s2001_s9 + $0xf0] sm:$0xff]  }
  0x1b   : > { %576 = vmatprep.subr.bf16.mxu0 %v1884_v9  ;;  %1851 = vmatprep.subr.bf16.mxu1 %v1884_v9  ;;  %v1926_v47 = vld [vmem:[%s2001_s9 + $0x78] sm:$0xff]   ;;  %v2096_v51 = vld [vmem:[%s2275_s2] ss:$0 sm:$0xff] }
  0x1c   : > { %v1927_v48 = vld [vmem:[%s2001_s9 + $0xf8] sm:$0xff]  }
  0x1e   : > { %577 = vmatpush1.bf16.msra.mxu0 %v1886_v10  ;;  %1859 = vmatpush1.bf16.msra.mxu1 %v1886_v10 }
  0x1f   : > { %578 = vmatprep.subr.bf16.mxu0 %v1887_v11  ;;  %1852 = vmatprep.subr.bf16.mxu1 %v1887_v11 }
  0x22   : > { %579 = vmatpush1.bf16.msra.mxu0 %v1889_v12  ;;  %1860 = vmatpush1.bf16.msra.mxu1 %v1889_v12 }
  0x23   : > { %580 = vmatprep.subr.bf16.mxu0 %v1890_v13  ;;  %1853 = vmatprep.subr.bf16.mxu1 %v1890_v13 }
  0x26   : > { %581 = vmatpush1.bf16.msra.mxu0 %v1892_v14  ;;  %1861 = vmatpush1.bf16.msra.mxu1 %v1892_v14 }
  0x27   : > { %582 = vmatprep.subr.bf16.mxu0 %v1893_v15  ;;  %1854 = vmatprep.subr.bf16.mxu1 %v1893_v15 }
  0x2a   : > { %583 = vmatpush1.bf16.msra.mxu0 %v1895_v16  ;;  %1862 = vmatpush1.bf16.msra.mxu1 %v1895_v16 }
  0x2d   : > { %601 = vmatmul.mubr.bf16.vlgmr.msra.gmra.mxu0 %v1896_v17  ;;  %761 = vmatmul.mubr.bf16.vlgmr.msra.gmra.mxu1 %v1897_v18 }
  0x2e   : > { %610 = vmatprep.mubr.bf16.mxu0 %v1936_v2  ;;  %770 = vmatprep.mubr.bf16.mxu1 %v1936_v2 }
  0x35   : > { %611 = vmatmul.mubr.bf16.gmra.mxu0 %v1898_v19  ;;  %771 = vmatmul.mubr.bf16.gmra.mxu1 %v1899_v20 }
  0x36   : > { %620 = vmatprep.mubr.bf16.mxu0 %v1936_v2  ;;  %780 = vmatprep.mubr.bf16.mxu1 %v1936_v2 }
  0x3d   : > { %621 = vmatmul.mubr.bf16.gmra.mxu0 %v1900_v21  ;;  %781 = vmatmul.mubr.bf16.gmra.mxu1 %v1901_v22 }
  0x3e   : > { %630 = vmatprep.mubr.bf16.mxu0 %v1936_v2  ;;  %790 = vmatprep.mubr.bf16.mxu1 %v1936_v2 }
  0x45   : > { %631 = vmatmul.mubr.bf16.gmra.mxu0 %v1902_v23  ;;  %791 = vmatmul.mubr.bf16.gmra.mxu1 %v1903_v24 }
  0x46   : > { %640 = vmatprep.mubr.bf16.mxu0 %v1936_v2  ;;  %800 = vmatprep.mubr.bf16.mxu1 %v1936_v2 }
  0x4d   : > { %641 = vmatmul.mubr.bf16.gmra.mxu0 %v1904_v25  ;;  %801 = vmatmul.mubr.bf16.gmra.mxu1 %v1905_v26 }
  0x4e   : > { %650 = vmatprep.mubr.bf16.mxu0 %v1936_v2  ;;  %810 = vmatprep.mubr.bf16.mxu1 %v1936_v2 }
  0x55   : > { %651 = vmatmul.mubr.bf16.gmra.mxu0 %v1906_v27  ;;  %811 = vmatmul.mubr.bf16.gmra.mxu1 %v1907_v28 }
  0x56   : > { %660 = vmatprep.mubr.bf16.mxu0 %v1936_v2  ;;  %820 = vmatprep.mubr.bf16.mxu1 %v1936_v2 }
  0x5d   : > { %661 = vmatmul.mubr.bf16.gmra.mxu0 %v1908_v29  ;;  %821 = vmatmul.mubr.bf16.gmra.mxu1 %v1909_v30 }
  0x5e   : > { %670 = vmatprep.mubr.bf16.mxu0 %v1936_v2  ;;  %830 = vmatprep.mubr.bf16.mxu1 %v1936_v2 }
  0x65   : > { %671 = vmatmul.mubr.bf16.gmra.mxu0 %v1910_v31  ;;  %831 = vmatmul.mubr.bf16.gmra.mxu1 %v1911_v32 }
  0x66   : > { %680 = vmatprep.mubr.bf16.mxu0 %v1936_v2  ;;  %840 = vmatprep.mubr.bf16.mxu1 %v1936_v2 }
  0x6d   : > { %681 = vmatmul.mubr.bf16.gmra.mxu0 %v1912_v33  ;;  %841 = vmatmul.mubr.bf16.gmra.mxu1 %v1913_v34 }
  0x6e   : > { %690 = vmatprep.mubr.bf16.mxu0 %v1936_v2  ;;  %850 = vmatprep.mubr.bf16.mxu1 %v1936_v2 }
  0x75   : > { %691 = vmatmul.mubr.bf16.gmra.mxu0 %v1914_v35  ;;  %851 = vmatmul.mubr.bf16.gmra.mxu1 %v1915_v36 }
  0x76   : > { %700 = vmatprep.mubr.bf16.mxu0 %v1936_v2  ;;  %860 = vmatprep.mubr.bf16.mxu1 %v1936_v2 }
  0x7d   : > { %701 = vmatmul.mubr.bf16.gmra.mxu0 %v1916_v37  ;;  %861 = vmatmul.mubr.bf16.gmra.mxu1 %v1917_v38 }
  0x7e   : > { %710 = vmatprep.mubr.bf16.mxu0 %v1936_v2  ;;  %870 = vmatprep.mubr.bf16.mxu1 %v1936_v2 }
  0x85   : > { %711 = vmatmul.mubr.bf16.gmra.mxu0 %v1918_v39  ;;  %871 = vmatmul.mubr.bf16.gmra.mxu1 %v1919_v40 }
  0x86   : > { %720 = vmatprep.mubr.bf16.mxu0 %v1936_v2  ;;  %880 = vmatprep.mubr.bf16.mxu1 %v1936_v2 }
  0x8d   : > { %721 = vmatmul.mubr.bf16.gmra.mxu0 %v1920_v41  ;;  %881 = vmatmul.mubr.bf16.gmra.mxu1 %v1921_v42 }
  0x8e   : > { %730 = vmatprep.mubr.bf16.mxu0 %v1936_v2  ;;  %890 = vmatprep.mubr.bf16.mxu1 %v1936_v2 }
  0x95   : > { %731 = vmatmul.mubr.bf16.gmra.mxu0 %v1922_v43  ;;  %891 = vmatmul.mubr.bf16.gmra.mxu1 %v1923_v44 }
  0x96   : > { %740 = vmatprep.mubr.bf16.mxu0 %v1936_v2  ;;  %900 = vmatprep.mubr.bf16.mxu1 %v1936_v2 }
  0x9d   : > { %741 = vmatmul.mubr.bf16.gmra.mxu0 %v1924_v45  ;;  %901 = vmatmul.mubr.bf16.gmra.mxu1 %v1925_v46 }
  0x9e   : > { %750 = vmatprep.mubr.bf16.mxu0 %v1936_v2  ;;  %910 = vmatprep.mubr.bf16.mxu1 %v1936_v2 }
  0xa5   : > { %751 = vmatmul.mubr.bf16.gmra.mxu0 %v1926_v47  ;;  %911 = vmatmul.mubr.bf16.gmra.mxu1 %v1927_v48 }
  0xed   : > { %v602_v49 = vpop.f32.mrf.mxu0  ;;  %v762_v50 = vpop.f32.mrf.mxu1 }
  0xef   : > { %v604_v52 = vpop.f32.mrf.mxu0  ;;  %v764_v53 = vpop.f32.mrf.mxu1 }
  0xf0   : > { %v1248_v54 = vadd.f32 %v2096_v51, %v604_v52  ;;  %v1280_v55 = vadd.f32 %v2096_v51, %v764_v53 }
  0xf1   : > { %v606_v56 = vpop.f32.mrf.mxu0  ;;  %v766_v57 = vpop.f32.mrf.mxu1 }
  0xf2   : > { %1312 = vst [vmem:[%s2101_s11] sm:$0xff] %v1248_v54  ;;  %1344 = vst [vmem:[%s2101_s11 + $0x100] sm:$0xff] %v1280_v55  ;;  %v1659_v58 = vpack.c.bf16 %v606_v56, %v602_v49  ;;  %v1739_v59 = vpack.c.bf16 %v766_v57, %v762_v50 }
  0xf3   : > { %v608_v60 = vpop.f32.mrf.mxu0  ;;  %v768_v61 = vpop.f32.mrf.mxu1 }
  0xf4   : > { %1660 = vst [vmem:[%s2110_s13] sm:$0xff] %v1659_v58   ;;  %1831 = vst [vmem:[%s2110_s13 + $0x80] sm:$0xff] %v1739_v59   ;;  %v1249_v62 = vadd.f32 %v2096_v51, %v608_v60  ;;  %v1281_v63 = vadd.f32 %v2096_v51, %v768_v61 }
  0xf5   : > { %v612_v0 = vpop.f32.mrf.mxu0  ;;  %v772_v1 = vpop.f32.mrf.mxu1 }
  0xf6   : > { %1313 = vst [vmem:[%s2101_s11 + $0x8] sm:$0xff] %v1249_v62  ;;  %1345 = vst [vmem:[%s2101_s11 + $0x108] sm:$0xff] %v1281_v63 }
  0xf7   : > { %v614_v2 = vpop.f32.mrf.mxu0  ;;  %v774_v3 = vpop.f32.mrf.mxu1 }
  0xf8   : > { %v1250_v4 = vadd.f32 %v2096_v51, %v614_v2  ;;  %v1282_v5 = vadd.f32 %v2096_v51, %v774_v3 }
  0xf9   : > { %v616_v6 = vpop.f32.mrf.mxu0  ;;  %v776_v7 = vpop.f32.mrf.mxu1 }
  0xfa   : > { %1314 = vst [vmem:[%s2101_s11 + $0x10] sm:$0xff] %v1250_v4  ;;  %1346 = vst [vmem:[%s2101_s11 + $0x110] sm:$0xff] %v1282_v5  ;;  %v1664_v8 = vpack.c.bf16 %v616_v6, %v612_v0  ;;  %v1744_v9 = vpack.c.bf16 %v776_v7, %v772_v1 }
  0xfb   : > { %v618_v10 = vpop.f32.mrf.mxu0  ;;  %v778_v11 = vpop.f32.mrf.mxu1 }
  0xfc   : > { %1816 = vst [vmem:[%s2110_s13 + $0x8] sm:$0xff] %v1664_v8   ;;  %1832 = vst [vmem:[%s2110_s13 + $0x88] sm:$0xff] %v1744_v9   ;;  %v1251_v12 = vadd.f32 %v2096_v51, %v618_v10  ;;  %v1283_v13 = vadd.f32 %v2096_v51, %v778_v11 }
  0xfd   : > { %v622_v14 = vpop.f32.mrf.mxu0  ;;  %v782_v15 = vpop.f32.mrf.mxu1 }
  0xfe   : > { %1315 = vst [vmem:[%s2101_s11 + $0x18] sm:$0xff] %v1251_v12  ;;  %1347 = vst [vmem:[%s2101_s11 + $0x118] sm:$0xff] %v1283_v13 }
  0xff   : > { %v624_v16 = vpop.f32.mrf.mxu0  ;;  %v784_v17 = vpop.f32.mrf.mxu1 }
 0x100   : > { %v1252_v18 = vadd.f32 %v2096_v51, %v624_v16  ;;  %v1284_v19 = vadd.f32 %v2096_v51, %v784_v17 }
 0x101   : > { %v626_v20 = vpop.f32.mrf.mxu0  ;;  %v786_v21 = vpop.f32.mrf.mxu1 }
 0x102   : > { %1316 = vst [vmem:[%s2101_s11 + $0x20] sm:$0xff] %v1252_v18  ;;  %1348 = vst [vmem:[%s2101_s11 + $0x120] sm:$0xff] %v1284_v19  ;;  %v1669_v22 = vpack.c.bf16 %v626_v20, %v622_v14  ;;  %v1749_v23 = vpack.c.bf16 %v786_v21, %v782_v15 }
 0x103   : > { %v628_v24 = vpop.f32.mrf.mxu0  ;;  %v788_v25 = vpop.f32.mrf.mxu1 }
 0x104   : > { %1817 = vst [vmem:[%s2110_s13 + $0x10] sm:$0xff] %v1669_v22   ;;  %1833 = vst [vmem:[%s2110_s13 + $0x90] sm:$0xff] %v1749_v23   ;;  %v1253_v26 = vadd.f32 %v2096_v51, %v628_v24  ;;  %v1285_v27 = vadd.f32 %v2096_v51, %v788_v25 }
 0x105   : > { %v632_v28 = vpop.f32.mrf.mxu0  ;;  %v792_v29 = vpop.f32.mrf.mxu1 }
 0x106   : > { %1317 = vst [vmem:[%s2101_s11 + $0x28] sm:$0xff] %v1253_v26  ;;  %1349 = vst [vmem:[%s2101_s11 + $0x128] sm:$0xff] %v1285_v27 }
 0x107   : > { %v634_v30 = vpop.f32.mrf.mxu0  ;;  %v794_v31 = vpop.f32.mrf.mxu1 }
 0x108   : > { %v1254_v32 = vadd.f32 %v2096_v51, %v634_v30  ;;  %v1286_v33 = vadd.f32 %v2096_v51, %v794_v31 }
 0x109   : > { %v636_v34 = vpop.f32.mrf.mxu0  ;;  %v796_v35 = vpop.f32.mrf.mxu1 }
 0x10a   : > { %1318 = vst [vmem:[%s2101_s11 + $0x30] sm:$0xff] %v1254_v32  ;;  %1350 = vst [vmem:[%s2101_s11 + $0x130] sm:$0xff] %v1286_v33  ;;  %v1674_v36 = vpack.c.bf16 %v636_v34, %v632_v28  ;;  %v1754_v37 = vpack.c.bf16 %v796_v35, %v792_v29 }
 0x10b   : > { %v638_v38 = vpop.f32.mrf.mxu0  ;;  %v798_v39 = vpop.f32.mrf.mxu1 }
 0x10c   : > { %1818 = vst [vmem:[%s2110_s13 + $0x18] sm:$0xff] %v1674_v36   ;;  %1834 = vst [vmem:[%s2110_s13 + $0x98] sm:$0xff] %v1754_v37   ;;  %v1255_v40 = vadd.f32 %v2096_v51, %v638_v38  ;;  %v1287_v41 = vadd.f32 %v2096_v51, %v798_v39 }
 0x10d   : > { %v642_v42 = vpop.f32.mrf.mxu0  ;;  %v802_v43 = vpop.f32.mrf.mxu1 }
 0x10e   : > { %1319 = vst [vmem:[%s2101_s11 + $0x38] sm:$0xff] %v1255_v40  ;;  %1351 = vst [vmem:[%s2101_s11 + $0x138] sm:$0xff] %v1287_v41 }
 0x10f   : > { %v644_v44 = vpop.f32.mrf.mxu0  ;;  %v804_v45 = vpop.f32.mrf.mxu1 }
 0x110   : > { %v1256_v46 = vadd.f32 %v2096_v51, %v644_v44  ;;  %v1288_v47 = vadd.f32 %v2096_v51, %v804_v45 }
 0x111   : > { %v646_v48 = vpop.f32.mrf.mxu0  ;;  %v806_v49 = vpop.f32.mrf.mxu1 }
 0x112   : > { %1320 = vst [vmem:[%s2101_s11 + $0x40] sm:$0xff] %v1256_v46  ;;  %1352 = vst [vmem:[%s2101_s11 + $0x140] sm:$0xff] %v1288_v47  ;;  %v1679_v50 = vpack.c.bf16 %v646_v48, %v642_v42  ;;  %v1759_v52 = vpack.c.bf16 %v806_v49, %v802_v43 }
 0x113   : > { %v648_v53 = vpop.f32.mrf.mxu0  ;;  %v808_v54 = vpop.f32.mrf.mxu1 }
 0x114   : > { %1819 = vst [vmem:[%s2110_s13 + $0x20] sm:$0xff] %v1679_v50   ;;  %1835 = vst [vmem:[%s2110_s13 + $0xa0] sm:$0xff] %v1759_v52   ;;  %v1257_v55 = vadd.f32 %v2096_v51, %v648_v53  ;;  %v1289_v56 = vadd.f32 %v2096_v51, %v808_v54 }
 0x115   : > { %v652_v57 = vpop.f32.mrf.mxu0  ;;  %v812_v58 = vpop.f32.mrf.mxu1 }
 0x116   : > { %1321 = vst [vmem:[%s2101_s11 + $0x48] sm:$0xff] %v1257_v55  ;;  %1353 = vst [vmem:[%s2101_s11 + $0x148] sm:$0xff] %v1289_v56 }
 0x117   : > { %v654_v59 = vpop.f32.mrf.mxu0  ;;  %v814_v60 = vpop.f32.mrf.mxu1 }
 0x118   : > { %v1258_v61 = vadd.f32 %v2096_v51, %v654_v59  ;;  %v1290_v62 = vadd.f32 %v2096_v51, %v814_v60 }
 0x119   : > { %v656_v63 = vpop.f32.mrf.mxu0  ;;  %v816_v0 = vpop.f32.mrf.mxu1 }
 0x11a   : > { %1322 = vst [vmem:[%s2101_s11 + $0x50] sm:$0xff] %v1258_v61  ;;  %1354 = vst [vmem:[%s2101_s11 + $0x150] sm:$0xff] %v1290_v62  ;;  %v1684_v1 = vpack.c.bf16 %v656_v63, %v652_v57  ;;  %v1764_v2 = vpack.c.bf16 %v816_v0, %v812_v58 }
 0x11b   : > { %v658_v3 = vpop.f32.mrf.mxu0  ;;  %v818_v4 = vpop.f32.mrf.mxu1 }
 0x11c   : > { %1820 = vst [vmem:[%s2110_s13 + $0x28] sm:$0xff] %v1684_v1   ;;  %1836 = vst [vmem:[%s2110_s13 + $0xa8] sm:$0xff] %v1764_v2   ;;  %v1259_v5 = vadd.f32 %v2096_v51, %v658_v3  ;;  %v1291_v6 = vadd.f32 %v2096_v51, %v818_v4 }
 0x11d   : > { %v662_v7 = vpop.f32.mrf.mxu0  ;;  %v822_v8 = vpop.f32.mrf.mxu1 }
 0x11e   : > { %1323 = vst [vmem:[%s2101_s11 + $0x58] sm:$0xff] %v1259_v5  ;;  %1355 = vst [vmem:[%s2101_s11 + $0x158] sm:$0xff] %v1291_v6 }
 0x11f   : > { %v664_v9 = vpop.f32.mrf.mxu0  ;;  %v824_v10 = vpop.f32.mrf.mxu1 }
 0x120   : > { %v1260_v11 = vadd.f32 %v2096_v51, %v664_v9  ;;  %v1292_v12 = vadd.f32 %v2096_v51, %v824_v10 }
 0x121   : > { %v666_v13 = vpop.f32.mrf.mxu0  ;;  %v826_v14 = vpop.f32.mrf.mxu1 }
 0x122   : > { %1324 = vst [vmem:[%s2101_s11 + $0x60] sm:$0xff] %v1260_v11  ;;  %1356 = vst [vmem:[%s2101_s11 + $0x160] sm:$0xff] %v1292_v12  ;;  %v1689_v15 = vpack.c.bf16 %v666_v13, %v662_v7  ;;  %v1769_v16 = vpack.c.bf16 %v826_v14, %v822_v8 }
 0x123   : > { %v668_v17 = vpop.f32.mrf.mxu0  ;;  %v828_v18 = vpop.f32.mrf.mxu1 }
 0x124   : > { %1821 = vst [vmem:[%s2110_s13 + $0x30] sm:$0xff] %v1689_v15   ;;  %1837 = vst [vmem:[%s2110_s13 + $0xb0] sm:$0xff] %v1769_v16   ;;  %v1261_v19 = vadd.f32 %v2096_v51, %v668_v17  ;;  %v1293_v20 = vadd.f32 %v2096_v51, %v828_v18 }
 0x125   : > { %v672_v21 = vpop.f32.mrf.mxu0  ;;  %v832_v22 = vpop.f32.mrf.mxu1 }
 0x126   : > { %1325 = vst [vmem:[%s2101_s11 + $0x68] sm:$0xff] %v1261_v19  ;;  %1357 = vst [vmem:[%s2101_s11 + $0x168] sm:$0xff] %v1293_v20 }
 0x127   : > { %v674_v23 = vpop.f32.mrf.mxu0  ;;  %v834_v24 = vpop.f32.mrf.mxu1 }
 0x128   : > { %v1262_v25 = vadd.f32 %v2096_v51, %v674_v23  ;;  %v1294_v26 = vadd.f32 %v2096_v51, %v834_v24 }
 0x129   : > { %v676_v27 = vpop.f32.mrf.mxu0  ;;  %v836_v28 = vpop.f32.mrf.mxu1 }
 0x12a   : > { %1326 = vst [vmem:[%s2101_s11 + $0x70] sm:$0xff] %v1262_v25  ;;  %1358 = vst [vmem:[%s2101_s11 + $0x170] sm:$0xff] %v1294_v26  ;;  %v1694_v29 = vpack.c.bf16 %v676_v27, %v672_v21  ;;  %v1774_v30 = vpack.c.bf16 %v836_v28, %v832_v22 }
 0x12b   : > { %v678_v31 = vpop.f32.mrf.mxu0  ;;  %v838_v32 = vpop.f32.mrf.mxu1 }
 0x12c   : > { %1822 = vst [vmem:[%s2110_s13 + $0x38] sm:$0xff] %v1694_v29   ;;  %1838 = vst [vmem:[%s2110_s13 + $0xb8] sm:$0xff] %v1774_v30   ;;  %v1263_v33 = vadd.f32 %v2096_v51, %v678_v31  ;;  %v1295_v34 = vadd.f32 %v2096_v51, %v838_v32 }
 0x12d   : > { %v682_v35 = vpop.f32.mrf.mxu0  ;;  %v842_v36 = vpop.f32.mrf.mxu1 }
 0x12e   : > { %1327 = vst [vmem:[%s2101_s11 + $0x78] sm:$0xff] %v1263_v33  ;;  %1359 = vst [vmem:[%s2101_s11 + $0x178] sm:$0xff] %v1295_v34 }
 0x12f   : > { %v684_v37 = vpop.f32.mrf.mxu0  ;;  %v844_v38 = vpop.f32.mrf.mxu1 }
 0x130   : > { %v1264_v39 = vadd.f32 %v2096_v51, %v684_v37  ;;  %v1296_v40 = vadd.f32 %v2096_v51, %v844_v38 }
 0x131   : > { %v686_v41 = vpop.f32.mrf.mxu0  ;;  %v846_v42 = vpop.f32.mrf.mxu1 }
 0x132   : > { %1328 = vst [vmem:[%s2101_s11 + $0x80] sm:$0xff] %v1264_v39  ;;  %1360 = vst [vmem:[%s2101_s11 + $0x180] sm:$0xff] %v1296_v40  ;;  %v1699_v43 = vpack.c.bf16 %v686_v41, %v682_v35  ;;  %v1779_v44 = vpack.c.bf16 %v846_v42, %v842_v36 }
 0x133   : > { %v688_v45 = vpop.f32.mrf.mxu0  ;;  %v848_v46 = vpop.f32.mrf.mxu1 }
 0x134   : > { %1823 = vst [vmem:[%s2110_s13 + $0x40] sm:$0xff] %v1699_v43   ;;  %1839 = vst [vmem:[%s2110_s13 + $0xc0] sm:$0xff] %v1779_v44   ;;  %v1265_v47 = vadd.f32 %v2096_v51, %v688_v45  ;;  %v1297_v48 = vadd.f32 %v2096_v51, %v848_v46 }
 0x135   : > { %v692_v49 = vpop.f32.mrf.mxu0  ;;  %v852_v50 = vpop.f32.mrf.mxu1 }
 0x136   : > { %1329 = vst [vmem:[%s2101_s11 + $0x88] sm:$0xff] %v1265_v47  ;;  %1361 = vst [vmem:[%s2101_s11 + $0x188] sm:$0xff] %v1297_v48 }
 0x137   : > { %v694_v52 = vpop.f32.mrf.mxu0  ;;  %v854_v53 = vpop.f32.mrf.mxu1 }
 0x138   : > { %v1266_v54 = vadd.f32 %v2096_v51, %v694_v52  ;;  %v1298_v55 = vadd.f32 %v2096_v51, %v854_v53 }
 0x139   : > { %v696_v56 = vpop.f32.mrf.mxu0  ;;  %v856_v57 = vpop.f32.mrf.mxu1 }
 0x13a   : > { %1330 = vst [vmem:[%s2101_s11 + $0x90] sm:$0xff] %v1266_v54  ;;  %1362 = vst [vmem:[%s2101_s11 + $0x190] sm:$0xff] %v1298_v55  ;;  %v1704_v58 = vpack.c.bf16 %v696_v56, %v692_v49  ;;  %v1784_v59 = vpack.c.bf16 %v856_v57, %v852_v50 }
 0x13b   : > { %v698_v60 = vpop.f32.mrf.mxu0  ;;  %v858_v61 = vpop.f32.mrf.mxu1 }
 0x13c   : > { %1824 = vst [vmem:[%s2110_s13 + $0x48] sm:$0xff] %v1704_v58   ;;  %1840 = vst [vmem:[%s2110_s13 + $0xc8] sm:$0xff] %v1784_v59   ;;  %v1267_v62 = vadd.f32 %v2096_v51, %v698_v60  ;;  %v1299_v63 = vadd.f32 %v2096_v51, %v858_v61 }
 0x13d   : > { %v702_v0 = vpop.f32.mrf.mxu0  ;;  %v862_v1 = vpop.f32.mrf.mxu1 }
 0x13e   : > { %1331 = vst [vmem:[%s2101_s11 + $0x98] sm:$0xff] %v1267_v62  ;;  %1363 = vst [vmem:[%s2101_s11 + $0x198] sm:$0xff] %v1299_v63 }
 0x13f   : > { %v704_v2 = vpop.f32.mrf.mxu0  ;;  %v864_v3 = vpop.f32.mrf.mxu1 }
 0x140   : > { %v1268_v4 = vadd.f32 %v2096_v51, %v704_v2  ;;  %v1300_v5 = vadd.f32 %v2096_v51, %v864_v3 }
 0x141   : > { %v706_v6 = vpop.f32.mrf.mxu0  ;;  %v866_v7 = vpop.f32.mrf.mxu1 }
 0x142   : > { %1332 = vst [vmem:[%s2101_s11 + $0xa0] sm:$0xff] %v1268_v4  ;;  %1364 = vst [vmem:[%s2101_s11 + $0x1a0] sm:$0xff] %v1300_v5  ;;  %v1709_v8 = vpack.c.bf16 %v706_v6, %v702_v0  ;;  %v1789_v9 = vpack.c.bf16 %v866_v7, %v862_v1 }
 0x143   : > { %v708_v10 = vpop.f32.mrf.mxu0  ;;  %v868_v11 = vpop.f32.mrf.mxu1 }
 0x144   : > { %1825 = vst [vmem:[%s2110_s13 + $0x50] sm:$0xff] %v1709_v8   ;;  %1841 = vst [vmem:[%s2110_s13 + $0xd0] sm:$0xff] %v1789_v9   ;;  %v1269_v12 = vadd.f32 %v2096_v51, %v708_v10  ;;  %v1301_v13 = vadd.f32 %v2096_v51, %v868_v11 }
 0x145   : > { %v712_v14 = vpop.f32.mrf.mxu0  ;;  %v872_v15 = vpop.f32.mrf.mxu1 }
 0x146   : > { %1333 = vst [vmem:[%s2101_s11 + $0xa8] sm:$0xff] %v1269_v12  ;;  %1365 = vst [vmem:[%s2101_s11 + $0x1a8] sm:$0xff] %v1301_v13 }
 0x147   : > { %v714_v16 = vpop.f32.mrf.mxu0  ;;  %v874_v17 = vpop.f32.mrf.mxu1 }
 0x148   : > { %v1270_v18 = vadd.f32 %v2096_v51, %v714_v16  ;;  %v1302_v19 = vadd.f32 %v2096_v51, %v874_v17 }
 0x149   : > { %v716_v20 = vpop.f32.mrf.mxu0  ;;  %v876_v21 = vpop.f32.mrf.mxu1 }
 0x14a   : > { %1334 = vst [vmem:[%s2101_s11 + $0xb0] sm:$0xff] %v1270_v18  ;;  %1366 = vst [vmem:[%s2101_s11 + $0x1b0] sm:$0xff] %v1302_v19  ;;  %v1714_v22 = vpack.c.bf16 %v716_v20, %v712_v14  ;;  %v1794_v23 = vpack.c.bf16 %v876_v21, %v872_v15 }
 0x14b   : > { %v718_v24 = vpop.f32.mrf.mxu0  ;;  %v878_v25 = vpop.f32.mrf.mxu1 }
 0x14c   : > { %1826 = vst [vmem:[%s2110_s13 + $0x58] sm:$0xff] %v1714_v22   ;;  %1842 = vst [vmem:[%s2110_s13 + $0xd8] sm:$0xff] %v1794_v23   ;;  %v1271_v26 = vadd.f32 %v2096_v51, %v718_v24  ;;  %v1303_v27 = vadd.f32 %v2096_v51, %v878_v25 }
 0x14d   : > { %v722_v28 = vpop.f32.mrf.mxu0  ;;  %v882_v29 = vpop.f32.mrf.mxu1 }
 0x14e   : > { %1335 = vst [vmem:[%s2101_s11 + $0xb8] sm:$0xff] %v1271_v26  ;;  %1367 = vst [vmem:[%s2101_s11 + $0x1b8] sm:$0xff] %v1303_v27 }
 0x14f   : > { %v724_v30 = vpop.f32.mrf.mxu0  ;;  %v884_v31 = vpop.f32.mrf.mxu1 }
 0x150   : > { %v1272_v32 = vadd.f32 %v2096_v51, %v724_v30  ;;  %v1304_v33 = vadd.f32 %v2096_v51, %v884_v31 }
 0x151   : > { %v726_v34 = vpop.f32.mrf.mxu0  ;;  %v886_v35 = vpop.f32.mrf.mxu1 }
 0x152   : > { %1336 = vst [vmem:[%s2101_s11 + $0xc0] sm:$0xff] %v1272_v32  ;;  %1368 = vst [vmem:[%s2101_s11 + $0x1c0] sm:$0xff] %v1304_v33  ;;  %v1719_v36 = vpack.c.bf16 %v726_v34, %v722_v28  ;;  %v1799_v37 = vpack.c.bf16 %v886_v35, %v882_v29 }
 0x153   : > { %v728_v38 = vpop.f32.mrf.mxu0  ;;  %v888_v39 = vpop.f32.mrf.mxu1 }
 0x154   : > { %1827 = vst [vmem:[%s2110_s13 + $0x60] sm:$0xff] %v1719_v36   ;;  %1843 = vst [vmem:[%s2110_s13 + $0xe0] sm:$0xff] %v1799_v37   ;;  %v1273_v40 = vadd.f32 %v2096_v51, %v728_v38  ;;  %v1305_v41 = vadd.f32 %v2096_v51, %v888_v39 }
 0x155   : > { %v732_v42 = vpop.f32.mrf.mxu0  ;;  %v892_v43 = vpop.f32.mrf.mxu1 }
 0x156   : > { %1337 = vst [vmem:[%s2101_s11 + $0xc8] sm:$0xff] %v1273_v40  ;;  %1369 = vst [vmem:[%s2101_s11 + $0x1c8] sm:$0xff] %v1305_v41 }
 0x157   : > { %v734_v44 = vpop.f32.mrf.mxu0  ;;  %v894_v45 = vpop.f32.mrf.mxu1 }
 0x158   : > { %v1274_v46 = vadd.f32 %v2096_v51, %v734_v44  ;;  %v1306_v47 = vadd.f32 %v2096_v51, %v894_v45 }
 0x159   : > { %v736_v48 = vpop.f32.mrf.mxu0  ;;  %v896_v49 = vpop.f32.mrf.mxu1 }
 0x15a   : > { %1338 = vst [vmem:[%s2101_s11 + $0xd0] sm:$0xff] %v1274_v46  ;;  %1370 = vst [vmem:[%s2101_s11 + $0x1d0] sm:$0xff] %v1306_v47  ;;  %v1724_v50 = vpack.c.bf16 %v736_v48, %v732_v42  ;;  %v1804_v52 = vpack.c.bf16 %v896_v49, %v892_v43 }
 0x15b   : > { %v738_v53 = vpop.f32.mrf.mxu0  ;;  %v898_v54 = vpop.f32.mrf.mxu1 }
 0x15c   : > { %1828 = vst [vmem:[%s2110_s13 + $0x68] sm:$0xff] %v1724_v50   ;;  %1844 = vst [vmem:[%s2110_s13 + $0xe8] sm:$0xff] %v1804_v52   ;;  %v1275_v55 = vadd.f32 %v2096_v51, %v738_v53  ;;  %v1307_v56 = vadd.f32 %v2096_v51, %v898_v54 }
 0x15d   : > { %v742_v57 = vpop.f32.mrf.mxu0  ;;  %v902_v58 = vpop.f32.mrf.mxu1 }
 0x15e   : > { %1339 = vst [vmem:[%s2101_s11 + $0xd8] sm:$0xff] %v1275_v55  ;;  %1371 = vst [vmem:[%s2101_s11 + $0x1d8] sm:$0xff] %v1307_v56 }
 0x15f   : > { %v744_v59 = vpop.f32.mrf.mxu0  ;;  %v904_v60 = vpop.f32.mrf.mxu1 }
 0x160   : > { %v1276_v61 = vadd.f32 %v2096_v51, %v744_v59  ;;  %v1308_v62 = vadd.f32 %v2096_v51, %v904_v60 }
 0x161   : > { %v746_v63 = vpop.f32.mrf.mxu0  ;;  %v906_v0 = vpop.f32.mrf.mxu1 }
 0x162   : > { %1340 = vst [vmem:[%s2101_s11 + $0xe0] sm:$0xff] %v1276_v61  ;;  %1372 = vst [vmem:[%s2101_s11 + $0x1e0] sm:$0xff] %v1308_v62  ;;  %v1729_v1 = vpack.c.bf16 %v746_v63, %v742_v57  ;;  %v1809_v2 = vpack.c.bf16 %v906_v0, %v902_v58 }
 0x163   : > { %v748_v3 = vpop.f32.mrf.mxu0  ;;  %v908_v4 = vpop.f32.mrf.mxu1 }
 0x164   : > { %1829 = vst [vmem:[%s2110_s13 + $0x70] sm:$0xff] %v1729_v1   ;;  %1845 = vst [vmem:[%s2110_s13 + $0xf0] sm:$0xff] %v1809_v2   ;;  %v1277_v5 = vadd.f32 %v2096_v51, %v748_v3  ;;  %v1309_v6 = vadd.f32 %v2096_v51, %v908_v4 }
 0x165   : > { %v752_v7 = vpop.f32.mrf.mxu0  ;;  %v912_v8 = vpop.f32.mrf.mxu1 }
 0x166   : > { %1341 = vst [vmem:[%s2101_s11 + $0xe8] sm:$0xff] %v1277_v5  ;;  %1373 = vst [vmem:[%s2101_s11 + $0x1e8] sm:$0xff] %v1309_v6 }
 0x167   : > { %v754_v9 = vpop.f32.mrf.mxu0  ;;  %v914_v10 = vpop.f32.mrf.mxu1 }
 0x168   : > { %v1278_v11 = vadd.f32 %v2096_v51, %v754_v9  ;;  %v1310_v12 = vadd.f32 %v2096_v51, %v914_v10 }
 0x169   : > { %v756_v13 = vpop.f32.mrf.mxu0  ;;  %v916_v14 = vpop.f32.mrf.mxu1 }
 0x16a   : > { %1342 = vst [vmem:[%s2101_s11 + $0xf0] sm:$0xff] %v1278_v11  ;;  %1374 = vst [vmem:[%s2101_s11 + $0x1f0] sm:$0xff] %v1310_v12  ;;  %v1734_v15 = vpack.c.bf16 %v756_v13, %v752_v7  ;;  %v1814_v16 = vpack.c.bf16 %v916_v14, %v912_v8 }
 0x16b   : > { %v758_v17 = vpop.f32.mrf.mxu0  ;;  %v918_v18 = vpop.f32.mrf.mxu1 }
 0x16c   : > { %1830 = vst [vmem:[%s2110_s13 + $0x78] sm:$0xff] %v1734_v15   ;;  %1846 = vst [vmem:[%s2110_s13 + $0xf8] sm:$0xff] %v1814_v16   ;;  %v1279_v19 = vadd.f32 %v2096_v51, %v758_v17  ;;  %v1311_v20 = vadd.f32 %v2096_v51, %v918_v18 }
 0x16e   : > { %1343 = vst [vmem:[%s2101_s11 + $0xf8] sm:$0xff] %v1279_v19  ;;  %1375 = vst [vmem:[%s2101_s11 + $0x1f8] sm:$0xff] %v1311_v20 }
 0x16f PF: > { %s15_s15 = sadd.s32 1, %s1934_s15  }
 0x170   : > { %p12_p4 = scmp.ge.s32.totalorder %s15_s15, 4  }
 0x172   :  { %14 = sbr.rel (!%p12_p4) target bundleno = 1 (0x1), region = 74 }

// kernel: graphsage_forward.7
= control target key start
LH: loop header
LB: loop body
LE: loop exit
PB: predicated region body
PF: predicated region fallthrough
CT: control target
= control target key end

     0   :  { %s4259_s15 = smov 0   ;;  %s4261_s16 = smov 0   ;;  %s5088_s0 = inlined_call_operand.vmem [shape: s8[1024,1024], index: 0, kind: input, shape index: {}]   ;;  %s5089_s1 = inlined_call_operand.vmem [shape: bf16[1024,128], index: 1, kind: input, shape index: {}]   ;;  %s5090_s2 = inlined_call_operand.vmem [shape: f32[1024,128], index: 2, kind: input, shape index: {}]   ;;  %s5091_s3 = inlined_call_operand.vmem [shape: f32[1024,1], index: 3, kind: input, shape index: {}]   ;;  %s5092_s4 = inlined_call_operand.vmem [shape: bf16[1024,128], index: 4, kind: output, shape index: {}]  }
   0x1   :  { %s4263_s17 = smov 0  }
   0x2 LB: > { %s26_s18 = sadd.s32 1, %s4227_s16  ;;  %p3722_p0 = scmp.ge.s32.totalorder %s4231_s17, 1  ;;  %s4231_s17 = sphi %s4263_s17, %s14_s17   ;;  %s4227_s16 = sphi %s4261_s16, %s5138_s16   ;;  %s4223_s15 = sphi %s4259_s15, %s5137_s15  }
   0x3   : > { %p28_p1 = scmp.ge.s32.totalorder %s26_s18, 2  ;;  %p205_p2 = scmp.lt.s32.totalorder %s4231_s17, 3 }
   0x5   : > { %s5140_s18 = smov (%p28_p1, %s26_s18), 0  ;;  %p206_p3 = pnand %p3722_p0, %p205_p2 }
   0x7   : > { %209 = sbr.rel (%p206_p3) target bundleno = 791 (0x317), region = 36 }
   0xc   : > { %v4145_v0 = vld [vmem:[%s5089_s1 + $0x38] sm:$0xff]   ;;  %v4233_v1 = vmov 0   ;;  %v4147_v3 = vld [vmem:[%s5089_s1 + $0x30] sm:$0xff]   ;;  %v4149_v5 = vld [vmem:[%s5089_s1 + $0x28] sm:$0xff]   ;;  %s3723_s13 = sshll.u32 %s4223_s15, 4  ;;  %s3726_s24 = sshll.u32 %s4223_s15, 6 }
   0xd   : > { %1310 = vmatprep.subr.bf16.mxu0 %v4233_v1  ;;  %1599 = vmatprep.subr.bf16.mxu1 %v4233_v1  ;;  %v4146_v2 = vld [vmem:[%s5089_s1 + $0xb8] sm:$0xff]   ;;  %v4148_v4 = vld [vmem:[%s5089_s1 + $0xb0] sm:$0xff]   ;;  %v4150_v6 = vld [vmem:[%s5089_s1 + $0xa8] sm:$0xff]   ;;  %p248_p4 = scmp.lt.s32.totalorder %s3723_s13, 31  ;;  %p259_p5 = scmp.lt.s32.totalorder %s3726_s24, 127 }
   0xe   : > { %1311 = vmatpush1.bf16.msra.mxu0 %v4145_v0  ;;  %4143 = vset.pattern.permute.xlu0 %v4233_v1  ;;  %v4151_v7 = vld [vmem:[%s5089_s1 + $0x20] sm:$0xff]   ;;  %v4153_v9 = vld [vmem:[%s5089_s1 + $0x18] sm:$0xff]   ;;  %v4155_v11 = vld [vmem:[%s5089_s1 + $0x10] sm:$0xff]  }
   0xf   : > { %1600 = vmatpush1.bf16.msra.mxu1 %v4146_v2  ;;  %1312 = vmatprep.subr.bf16.mxu0 %v4233_v1  ;;  %v4152_v8 = vld [vmem:[%s5089_s1 + $0xa0] sm:$0xff]   ;;  %v4154_v10 = vld [vmem:[%s5089_s1 + $0x98] sm:$0xff]   ;;  %v4156_v12 = vld [vmem:[%s5089_s1 + $0x90] sm:$0xff]   ;;  %s5142_s13 = smov (!%p248_p4, %s3723_s13), 31  ;;  %s5144_s24 = smov (!%p259_p5, %s3726_s24), 127 }
  0x10   : > { %1601 = vmatprep.subr.bf16.mxu1 %v4233_v1  ;;  %4144 = vset.pattern.permute.xlu1 %v4233_v1  ;;  %v4157_v13 = vld [vmem:[%s5089_s1 + $0x8] sm:$0xff]   ;;  %v4159_v15 = vld [vmem:[%s5089_s1] sm:$0xff]   ;;  %s3862_s28 = sshll.u32 %s5142_s13, 6  ;;  %v4161_v17 = vld [vmem:[%s5089_s1 + $0x78] sm:$0xff]   ;;  %s3727_s15 = sshll.u32 %s5144_s24, 3 }
  0x11   : > { %v4158_v14 = vld [vmem:[%s5089_s1 + $0x88] sm:$0xff]   ;;  %v4160_v16 = vld [vmem:[%s5089_s1 + $0x80] sm:$0xff]   ;;  %s4349_s7 = scalar_lea.vmem %s5088_s0, %s3862_s28  ;;  %v4162_v18 = vld [vmem:[%s5089_s1 + $0xf8] sm:$0xff]   ;;  %s4618_s27 = scalar_lea.vmem %s5091_s3, %s3727_s15 }
  0x12   : > { %1313 = vmatpush1.bf16.msra.mxu0 %v4147_v3  ;;  %v4360_v19 = vld [vmem:[%s4349_s7 + $0x8] sm:$0xff]  ;;  %v4363_v20 = vld [vmem:[%s4349_s7 + $0x18] sm:$0xff]  ;;  %v4163_v23 = vld [vmem:[%s5089_s1 + $0x70] sm:$0xff]   ;;  %s4877_s30 = scalar_lea.vmem %s5090_s2, %s3727_s15  ;;  %s3731_s5 = sshll.u32 %s5144_s24, 2 }
  0x13   : > { %1602 = vmatpush1.bf16.msra.mxu1 %v4148_v4  ;;  %1314 = vmatprep.subr.bf16.mxu0 %v4233_v1  ;;  %v474_v21 = vunpack.c.l.s8.bf16 %v4360_v19  ;;  %v476_v22 = vunpack.c.l.s8.bf16 %v4363_v20  ;;  %v4164_v24 = vld [vmem:[%s5089_s1 + $0xf0] sm:$0xff]   ;;  %v4165_v25 = vld [vmem:[%s5089_s1 + $0x68] sm:$0xff]   ;;  %v4167_v27 = vld [vmem:[%s5089_s1 + $0x60] sm:$0xff]   ;;  %v482_v42 = vunpack.c.h.s8.bf16 %v4360_v19  ;;  %v484_v44 = vunpack.c.h.s8.bf16 %v4363_v20  ;;  %s4894_s9 = scalar_lea.vmem %s5092_s4, %s3731_s5 }
  0x14   : > { %1603 = vmatprep.subr.bf16.mxu1 %v4233_v1  ;;  %v4166_v26 = vld [vmem:[%s5089_s1 + $0xe8] sm:$0xff]   ;;  %v4168_v28 = vld [vmem:[%s5089_s1 + $0xe0] sm:$0xff]   ;;  %v4169_v29 = vld [vmem:[%s5089_s1 + $0x58] sm:$0xff]  }
  0x15   : > { %1342 = vmatprep.mubr.bf16.mxu0 %v474_v21  ;;  %1631 = vmatprep.mubr.bf16.mxu1 %v476_v22  ;;  %v4170_v30 = vld [vmem:[%s5089_s1 + $0xd8] sm:$0xff]   ;;  %v4171_v31 = vld [vmem:[%s5089_s1 + $0x50] sm:$0xff]   ;;  %v4173_v33 = vld [vmem:[%s5089_s1 + $0x48] sm:$0xff]  }
  0x16   : > { %1315 = vmatpush1.bf16.msra.mxu0 %v4149_v5  ;;  %v4172_v32 = vld [vmem:[%s5089_s1 + $0xd0] sm:$0xff]   ;;  %v4174_v34 = vld [vmem:[%s5089_s1 + $0xc8] sm:$0xff]   ;;  %v4175_v35 = vld [vmem:[%s5089_s1 + $0x40] sm:$0xff]  }
  0x17   : > { %1604 = vmatpush1.bf16.msra.mxu1 %v4150_v6  ;;  %1316 = vmatprep.subr.bf16.mxu0 %v4233_v1  ;;  %v345_v36 = vld [vmem:[%s4349_s7] sm:$0xff]  ;;  %v347_v38 = vld [vmem:[%s4349_s7 + $0x10] sm:$0xff]  ;;  %v4177_v39 = vld [vmem:[%s5089_s1 + $0x138] sm:$0xff]  }
  0x18   : > { %1605 = vmatprep.subr.bf16.mxu1 %v4233_v1  ;;  %v4176_v37 = vld [vmem:[%s5089_s1 + $0xc0] sm:$0xff]   ;;  %v473_v40 = vunpack.c.l.s8.bf16 %v345_v36  ;;  %v475_v41 = vunpack.c.l.s8.bf16 %v347_v38  ;;  %v4178_v43 = vld [vmem:[%s5089_s1 + $0x1b8] sm:$0xff]   ;;  %v354_v45 = vld [vmem:[%s4349_s7 + $0x48] sm:$0xff]  ;;  %v481_v49 = vunpack.c.h.s8.bf16 %v345_v36  ;;  %v483_v50 = vunpack.c.h.s8.bf16 %v347_v38 }
  0x19   : > { %v356_v46 = vld [vmem:[%s4349_s7 + $0x58] sm:$0xff]  ;;  %v4179_v47 = vld [vmem:[%s5089_s1 + $0x130] sm:$0xff]   ;;  %v490_v51 = vunpack.c.l.s8.bf16 %v354_v45  ;;  %v4181_v53 = vld [vmem:[%s5089_s1 + $0x128] sm:$0xff]   ;;  %v498_v61 = vunpack.c.h.s8.bf16 %v354_v45 }
  0x1a   : > { %1317 = vmatpush1.bf16.msra.mxu0 %v4151_v7  ;;  %v4180_v48 = vld [vmem:[%s5089_s1 + $0x1b0] sm:$0xff]   ;;  %v492_v52 = vunpack.c.l.s8.bf16 %v356_v46  ;;  %v4182_v54 = vld [vmem:[%s5089_s1 + $0x1a8] sm:$0xff]   ;;  %v353_v55 = vld [vmem:[%s4349_s7 + $0x40] sm:$0xff]  ;;  %v500_v62 = vunpack.c.h.s8.bf16 %v356_v46 }
  0x1b   : > { %1606 = vmatpush1.bf16.msra.mxu1 %v4152_v8  ;;  %1318 = vmatprep.subr.bf16.mxu0 %v4233_v1  ;;  %v355_v56 = vld [vmem:[%s4349_s7 + $0x50] sm:$0xff]  ;;  %v4183_v57 = vld [vmem:[%s5089_s1 + $0x120] sm:$0xff]   ;;  %v489_v59 = vunpack.c.l.s8.bf16 %v353_v55  ;;  %v4185_v63 = vld [vmem:[%s5089_s1 + $0x118] sm:$0xff]   ;;  %v497_v6 = vunpack.c.h.s8.bf16 %v353_v55 }
  0x1c   : > { %1607 = vmatprep.subr.bf16.mxu1 %v4233_v1  ;;  %v4184_v58 = vld [vmem:[%s5089_s1 + $0x1a0] sm:$0xff]   ;;  %v491_v60 = vunpack.c.l.s8.bf16 %v355_v56  ;;  %v4186_v0 = vld [vmem:[%s5089_s1 + $0x198] sm:$0xff]   ;;  %v362_v2 = vld [vmem:[%s4349_s7 + $0x88] sm:$0xff]  ;;  %v499_v7 = vunpack.c.h.s8.bf16 %v355_v56 }
  0x1d   : > { %v4187_v3 = vld [vmem:[%s5089_s1 + $0x110] sm:$0xff]   ;;  %v364_v4 = vld [vmem:[%s4349_s7 + $0x98] sm:$0xff]  ;;  %v506_v8 = vunpack.c.l.s8.bf16 %v362_v2  ;;  %v370_v22 = vld [vmem:[%s4349_s7 + $0xc8] sm:$0xff] }
  0x1e   : > { %1319 = vmatpush1.bf16.msra.mxu0 %v4153_v9  ;;  %v4188_v5 = vld [vmem:[%s5089_s1 + $0x190] sm:$0xff]   ;;  %v508_v9 = vunpack.c.l.s8.bf16 %v364_v4  ;;  %v516_v19 = vunpack.c.h.s8.bf16 %v364_v4  ;;  %v4193_v20 = vld [vmem:[%s5089_s1 + $0x178] sm:$0xff]   ;;  %v530_v36 = vunpack.c.h.s8.bf16 %v370_v22  ;;  %v4199_v38 = vld [vmem:[%s5089_s1 + $0x160] sm:$0xff]  }
  0x1f   : > { %1608 = vmatpush1.bf16.msra.mxu1 %v4154_v10  ;;  %1320 = vmatprep.subr.bf16.mxu0 %v4233_v1  ;;  %v4189_v10 = vld [vmem:[%s5089_s1 + $0x108] sm:$0xff]   ;;  %v4194_v21 = vld [vmem:[%s5089_s1 + $0x1f8] sm:$0xff]   ;;  %v377_v46 = vld [vmem:[%s4349_s7 + $0x100] sm:$0xff] }
  0x20   : > { %1609 = vmatprep.subr.bf16.mxu1 %v4233_v1  ;;  %v4202_v55 = vld [vmem:[%s5089_s1 + $0x1d8] sm:$0xff]   ;;  %v545_v56 = vunpack.c.h.s8.bf16 %v377_v46  ;;  %v4203_v4 = vld [vmem:[%s5089_s1 + $0x150] sm:$0xff]  }
  0x22   : > { %1321 = vmatpush1.bf16.msra.mxu0 %v4155_v11  ;;  %v4190_v11 = vld [vmem:[%s5089_s1 + $0x188] sm:$0xff]  }
  0x23   : > { %1610 = vmatpush1.bf16.msra.mxu1 %v4156_v12  ;;  %1322 = vmatprep.subr.bf16.mxu0 %v4233_v1  ;;  %v361_v12 = vld [vmem:[%s4349_s7 + $0x80] sm:$0xff] }
  0x24   : > { %1611 = vmatprep.subr.bf16.mxu1 %v4233_v1 }
  0x26   : > { %1323 = vmatpush1.bf16.msra.mxu0 %v4157_v13  ;;  %v363_v13 = vld [vmem:[%s4349_s7 + $0x90] sm:$0xff] }
  0x27   : > { %1612 = vmatpush1.bf16.msra.mxu1 %v4158_v14  ;;  %1324 = vmatprep.subr.bf16.mxu0 %v4233_v1  ;;  %v4191_v14 = vld [vmem:[%s5089_s1 + $0x100] sm:$0xff]  }
  0x28   : > { %1613 = vmatprep.subr.bf16.mxu1 %v4233_v1 }
  0x2a   : > { %1325 = vmatpush1.bf16.msra.mxu0 %v4159_v15  ;;  %v4192_v15 = vld [vmem:[%s5089_s1 + $0x180] sm:$0xff]  }
  0x2b   : > { %1614 = vmatpush1.bf16.msra.mxu1 %v4160_v16  ;;  %1326 = vmatprep.subr.bf16.mxu0 %v4233_v1  ;;  %v505_v16 = vunpack.c.l.s8.bf16 %v361_v12 }
  0x2c   : > { %1615 = vmatprep.subr.bf16.mxu1 %v4233_v1 }
  0x2e   : > { %1327 = vmatpush2.bf16.msra.mxu0 %v4161_v17  ;;  %v507_v17 = vunpack.c.l.s8.bf16 %v363_v13 }
  0x2f   : > { %1616 = vmatpush2.bf16.msra.mxu1 %v4162_v18  ;;  %1328 = vmatprep.subr.bf16.mxu0 %v4233_v1  ;;  %v514_v18 = vunpack.c.h.s8.bf16 %v362_v2 }
  0x30   : > { %1617 = vmatprep.subr.bf16.mxu1 %v4233_v1 }
  0x32   : > { %1329 = vmatpush2.bf16.msra.mxu0 %v4163_v23  ;;  %v4195_v23 = vld [vmem:[%s5089_s1 + $0x170] sm:$0xff]  }
  0x33   : > { %1618 = vmatpush2.bf16.msra.mxu1 %v4164_v24  ;;  %1330 = vmatprep.subr.bf16.mxu0 %v4233_v1  ;;  %v372_v24 = vld [vmem:[%s4349_s7 + $0xd8] sm:$0xff] }
  0x34   : > { %1619 = vmatprep.subr.bf16.mxu1 %v4233_v1 }
  0x36   : > { %1331 = vmatpush2.bf16.msra.mxu0 %v4165_v25  ;;  %v4196_v25 = vld [vmem:[%s5089_s1 + $0x1f0] sm:$0xff]  }
  0x37   : > { %1620 = vmatpush2.bf16.msra.mxu1 %v4166_v26  ;;  %1332 = vmatprep.subr.bf16.mxu0 %v4233_v1  ;;  %v513_v26 = vunpack.c.h.s8.bf16 %v361_v12  ;;  %v395_v12 = vld [vmem:[%s4349_s7 + $0x190] sm:$0xff] }
  0x38   : > { %1621 = vmatprep.subr.bf16.mxu1 %v4233_v1 }
  0x3a   : > { %1333 = vmatpush2.bf16.msra.mxu0 %v4167_v27  ;;  %v515_v27 = vunpack.c.h.s8.bf16 %v363_v13 }
  0x3b   : > { %1622 = vmatpush2.bf16.msra.mxu1 %v4168_v28  ;;  %1334 = vmatprep.subr.bf16.mxu0 %v4233_v1  ;;  %v522_v28 = vunpack.c.l.s8.bf16 %v370_v22  ;;  %v579_v22 = vunpack.c.h.s8.bf16 %v395_v12 }
  0x3c   : > { %1623 = vmatprep.subr.bf16.mxu1 %v4233_v1 }
  0x3e   : > { %1335 = vmatpush2.bf16.msra.mxu0 %v4169_v29  ;;  %v524_v29 = vunpack.c.l.s8.bf16 %v372_v24 }
  0x3f   : > { %1624 = vmatpush2.bf16.msra.mxu1 %v4170_v30  ;;  %1336 = vmatprep.subr.bf16.mxu0 %v4233_v1  ;;  %v4197_v30 = vld [vmem:[%s5089_s1 + $0x168] sm:$0xff]  }
  0x40   : > { %1625 = vmatprep.subr.bf16.mxu1 %v4233_v1 }
  0x42   : > { %1337 = vmatpush2.bf16.msra.mxu0 %v4171_v31  ;;  %v4198_v31 = vld [vmem:[%s5089_s1 + $0x1e8] sm:$0xff]  }
  0x43   : > { %1626 = vmatpush2.bf16.msra.mxu1 %v4172_v32  ;;  %1338 = vmatprep.subr.bf16.mxu0 %v4233_v1  ;;  %v369_v32 = vld [vmem:[%s4349_s7 + $0xc0] sm:$0xff] }
  0x44   : > { %1627 = vmatprep.subr.bf16.mxu1 %v4233_v1 }
  0x46   : > { %1339 = vmatpush2.bf16.msra.mxu0 %v4173_v33  ;;  %v371_v33 = vld [vmem:[%s4349_s7 + $0xd0] sm:$0xff] }
  0x47   : > { %1628 = vmatpush2.bf16.msra.mxu1 %v4174_v34  ;;  %1340 = vmatprep.subr.bf16.mxu0 %v4233_v1  ;;  %v521_v34 = vunpack.c.l.s8.bf16 %v369_v32 }
  0x48   : > { %1629 = vmatprep.subr.bf16.mxu1 %v4233_v1 }
  0x4a   : > { %1341 = vmatpush2.bf16.msra.mxu0 %v4175_v35  ;;  %v523_v35 = vunpack.c.l.s8.bf16 %v371_v33 }
  0x4b   : > { %1630 = vmatpush2.bf16.msra.mxu1 %v4176_v37  ;;  %1888 = vmatprep.subr.bf16.mxu0 %v4233_v1  ;;  %v532_v37 = vunpack.c.h.s8.bf16 %v372_v24 }
  0x4c   : > { %2177 = vmatprep.subr.bf16.mxu1 %v4233_v1 }
  0x4d   : > { %1343 = vmatmul.mubr.bf16.vlgmr.msra.gmra.mxu0 %v473_v40  ;;  %v378_v40 = vld [vmem:[%s4349_s7 + $0x108] sm:$0xff] }
  0x4e   : > { %1632 = vmatmul.mubr.bf16.vlgmr.msra.gmra.mxu1 %v475_v41  ;;  %1889 = vmatpush1.bf16.msra.mxu0 %v4177_v39  ;;  %v4200_v39 = vld [vmem:[%s5089_s1 + $0x1e0] sm:$0xff]   ;;  %v380_v41 = vld [vmem:[%s4349_s7 + $0x118] sm:$0xff] }
  0x4f   : > { %2178 = vmatpush1.bf16.msra.mxu1 %v4178_v43  ;;  %1350 = vmatprep.mubr.bf16.mxu0 %v482_v42  ;;  %v529_v42 = vunpack.c.h.s8.bf16 %v369_v32  ;;  %v531_v43 = vunpack.c.h.s8.bf16 %v371_v33  ;;  %v540_v45 = vunpack.c.l.s8.bf16 %v380_v41  ;;  %v412_v32 = vld [vmem:[%s4349_s7 + $0x218] sm:$0xff]  ;;  %v4208_v33 = vld [vmem:[%s5089_s1 + $0x1c0] sm:$0xff]  }
  0x50   : > { %1639 = vmatprep.mubr.bf16.mxu1 %v484_v44  ;;  %1890 = vmatprep.subr.bf16.mxu0 %v4233_v1  ;;  %v538_v44 = vunpack.c.l.s8.bf16 %v378_v40 }
  0x51   : > { %2179 = vmatprep.subr.bf16.mxu1 %v4233_v1 }
  0x52   : > { %1891 = vmatpush1.bf16.msra.mxu0 %v4179_v47  ;;  %v379_v47 = vld [vmem:[%s4349_s7 + $0x110] sm:$0xff] }
  0x53   : > { %2180 = vmatpush1.bf16.msra.mxu1 %v4180_v48  ;;  %1892 = vmatprep.subr.bf16.mxu0 %v4233_v1  ;;  %v537_v48 = vunpack.c.l.s8.bf16 %v377_v46 }
  0x54   : > { %2181 = vmatprep.subr.bf16.mxu1 %v4233_v1 }
  0x55   : > { %1351 = vmatmul.mubr.bf16.gmra.mxu0 %v481_v49  ;;  %v539_v49 = vunpack.c.l.s8.bf16 %v379_v47 }
  0x56   : > { %1640 = vmatmul.mubr.bf16.gmra.mxu1 %v483_v50  ;;  %1358 = vmatprep.mubr.bf16.mxu0 %v490_v51  ;;  %v546_v50 = vunpack.c.h.s8.bf16 %v378_v40  ;;  %v548_v51 = vunpack.c.h.s8.bf16 %v380_v41 }
  0x57   : > { %1647 = vmatprep.mubr.bf16.mxu1 %v492_v52  ;;  %1893 = vmatpush1.bf16.msra.mxu0 %v4181_v53  ;;  %v386_v52 = vld [vmem:[%s4349_s7 + $0x148] sm:$0xff]  ;;  %v4201_v53 = vld [vmem:[%s5089_s1 + $0x158] sm:$0xff]  }
  0x58   : > { %2182 = vmatpush1.bf16.msra.mxu1 %v4182_v54  ;;  %1894 = vmatprep.subr.bf16.mxu0 %v4233_v1  ;;  %v388_v54 = vld [vmem:[%s4349_s7 + $0x158] sm:$0xff] }
  0x59   : > { %2183 = vmatprep.subr.bf16.mxu1 %v4233_v1  ;;  %v564_v2 = vunpack.c.h.s8.bf16 %v388_v54 }
  0x5b   : > { %1895 = vmatpush1.bf16.msra.mxu0 %v4183_v57  ;;  %v547_v57 = vunpack.c.h.s8.bf16 %v379_v47 }
  0x5c   : > { %2184 = vmatpush1.bf16.msra.mxu1 %v4184_v58  ;;  %1896 = vmatprep.subr.bf16.mxu0 %v4233_v1  ;;  %v554_v58 = vunpack.c.l.s8.bf16 %v386_v52 }
  0x5d   : > { %1359 = vmatmul.mubr.bf16.gmra.mxu0 %v489_v59  ;;  %2185 = vmatprep.subr.bf16.mxu1 %v4233_v1  ;;  %v556_v59 = vunpack.c.l.s8.bf16 %v388_v54 }
  0x5e   : > { %1648 = vmatmul.mubr.bf16.gmra.mxu1 %v491_v60  ;;  %1366 = vmatprep.mubr.bf16.mxu0 %v498_v61  ;;  %v385_v60 = vld [vmem:[%s4349_s7 + $0x140] sm:$0xff]  ;;  %v387_v61 = vld [vmem:[%s4349_s7 + $0x150] sm:$0xff] }
  0x5f   : > { %1655 = vmatprep.mubr.bf16.mxu1 %v500_v62  ;;  %1897 = vmatpush1.bf16.msra.mxu0 %v4185_v63  ;;  %v553_v62 = vunpack.c.l.s8.bf16 %v385_v60  ;;  %v555_v63 = vunpack.c.l.s8.bf16 %v387_v61 }
  0x60   : > { %2186 = vmatpush1.bf16.msra.mxu1 %v4186_v0  ;;  %1898 = vmatprep.subr.bf16.mxu0 %v4233_v1  ;;  %v562_v0 = vunpack.c.h.s8.bf16 %v386_v52 }
  0x61   : > { %2187 = vmatprep.subr.bf16.mxu1 %v4233_v1 }
  0x63   : > { %1899 = vmatpush1.bf16.msra.mxu0 %v4187_v3  ;;  %v394_v3 = vld [vmem:[%s4349_s7 + $0x188] sm:$0xff] }
  0x64   : > { %2188 = vmatpush1.bf16.msra.mxu1 %v4188_v5  ;;  %1900 = vmatprep.subr.bf16.mxu0 %v4233_v1  ;;  %v396_v5 = vld [vmem:[%s4349_s7 + $0x198] sm:$0xff] }
  0x65   : > { %1367 = vmatmul.mubr.bf16.gmra.mxu0 %v497_v6  ;;  %2189 = vmatprep.subr.bf16.mxu1 %v4233_v1  ;;  %v4204_v6 = vld [vmem:[%s5089_s1 + $0x1d0] sm:$0xff]  }
  0x66   : > { %1656 = vmatmul.mubr.bf16.gmra.mxu1 %v499_v7  ;;  %1374 = vmatprep.mubr.bf16.mxu0 %v506_v8  ;;  %v561_v7 = vunpack.c.h.s8.bf16 %v385_v60  ;;  %v563_v8 = vunpack.c.h.s8.bf16 %v387_v61 }
  0x67   : > { %1663 = vmatprep.mubr.bf16.mxu1 %v508_v9  ;;  %1901 = vmatpush1.bf16.msra.mxu0 %v4189_v10  ;;  %v570_v9 = vunpack.c.l.s8.bf16 %v394_v3  ;;  %v572_v10 = vunpack.c.l.s8.bf16 %v396_v5 }
  0x68   : > { %2190 = vmatpush1.bf16.msra.mxu1 %v4190_v11  ;;  %1902 = vmatprep.subr.bf16.mxu0 %v4233_v1  ;;  %v393_v11 = vld [vmem:[%s4349_s7 + $0x180] sm:$0xff] }
  0x69   : > { %2191 = vmatprep.subr.bf16.mxu1 %v4233_v1  ;;  %v569_v13 = vunpack.c.l.s8.bf16 %v393_v11 }
  0x6b   : > { %1903 = vmatpush1.bf16.msra.mxu0 %v4191_v14  ;;  %v571_v14 = vunpack.c.l.s8.bf16 %v395_v12  ;;  %v435_v12 = vld [vmem:[%s4349_s7 + $0x2d0] sm:$0xff] }
  0x6c   : > { %2192 = vmatpush1.bf16.msra.mxu1 %v4192_v15  ;;  %1904 = vmatprep.subr.bf16.mxu0 %v4233_v1  ;;  %v578_v15 = vunpack.c.h.s8.bf16 %v394_v3 }
  0x6d   : > { %1375 = vmatmul.mubr.bf16.gmra.mxu0 %v505_v16  ;;  %2193 = vmatprep.subr.bf16.mxu1 %v4233_v1  ;;  %v580_v16 = vunpack.c.h.s8.bf16 %v396_v5  ;;  %v434_v5 = vld [vmem:[%s4349_s7 + $0x2c8] sm:$0xff] }
  0x6e   : > { %1664 = vmatmul.mubr.bf16.gmra.mxu1 %v507_v17  ;;  %1382 = vmatprep.mubr.bf16.mxu0 %v514_v18  ;;  %v402_v17 = vld [vmem:[%s4349_s7 + $0x1c8] sm:$0xff] }
  0x6f   : > { %1671 = vmatprep.mubr.bf16.mxu1 %v516_v19  ;;  %1905 = vmatpush2.bf16.msra.mxu0 %v4193_v20  ;;  %v4205_v18 = vld [vmem:[%s5089_s1 + $0x148] sm:$0xff]   ;;  %v404_v19 = vld [vmem:[%s4349_s7 + $0x1d8] sm:$0xff] }
  0x70   : > { %2194 = vmatpush2.bf16.msra.mxu1 %v4194_v21  ;;  %1906 = vmatprep.subr.bf16.mxu0 %v4233_v1  ;;  %v4206_v20 = vld [vmem:[%s5089_s1 + $0x1c8] sm:$0xff]   ;;  %v577_v21 = vunpack.c.h.s8.bf16 %v393_v11  ;;  %v588_v24 = vunpack.c.l.s8.bf16 %v404_v19  ;;  %v433_v11 = vld [vmem:[%s4349_s7 + $0x2c0] sm:$0xff] }
  0x71   : > { %2195 = vmatprep.subr.bf16.mxu1 %v4233_v1 }
  0x73   : > { %1907 = vmatpush2.bf16.msra.mxu0 %v4195_v23  ;;  %v586_v23 = vunpack.c.l.s8.bf16 %v402_v17 }
  0x74   : > { %2196 = vmatpush2.bf16.msra.mxu1 %v4196_v25  ;;  %1908 = vmatprep.subr.bf16.mxu0 %v4233_v1  ;;  %v401_v25 = vld [vmem:[%s4349_s7 + $0x1c0] sm:$0xff] }
  0x75   : > { %1383 = vmatmul.mubr.bf16.gmra.mxu0 %v513_v26  ;;  %2197 = vmatprep.subr.bf16.mxu1 %v4233_v1  ;;  %v403_v26 = vld [vmem:[%s4349_s7 + $0x1d0] sm:$0xff] }
  0x76   : > { %1672 = vmatmul.mubr.bf16.gmra.mxu1 %v515_v27  ;;  %1390 = vmatprep.mubr.bf16.mxu0 %v522_v28  ;;  %v585_v27 = vunpack.c.l.s8.bf16 %v401_v25  ;;  %v587_v28 = vunpack.c.l.s8.bf16 %v403_v26 }
  0x77   : > { %1679 = vmatprep.mubr.bf16.mxu1 %v524_v29  ;;  %1909 = vmatpush2.bf16.msra.mxu0 %v4197_v30  ;;  %v594_v29 = vunpack.c.h.s8.bf16 %v402_v17  ;;  %v596_v30 = vunpack.c.h.s8.bf16 %v404_v19  ;;  %v442_v17 = vld [vmem:[%s4349_s7 + $0x308] sm:$0xff]  ;;  %v657_v19 = vunpack.c.h.s8.bf16 %v433_v11 }
  0x78   : > { %2198 = vmatpush2.bf16.msra.mxu1 %v4198_v31  ;;  %1910 = vmatprep.subr.bf16.mxu0 %v4233_v1  ;;  %v410_v31 = vld [vmem:[%s4349_s7 + $0x208] sm:$0xff] }
  0x79   : > { %2199 = vmatprep.subr.bf16.mxu1 %v4233_v1 }
  0x7b   : > { %1911 = vmatpush2.bf16.msra.mxu0 %v4199_v38  ;;  %v409_v38 = vld [vmem:[%s4349_s7 + $0x200] sm:$0xff] }
  0x7c   : > { %2200 = vmatpush2.bf16.msra.mxu1 %v4200_v39  ;;  %1912 = vmatprep.subr.bf16.mxu0 %v4233_v1  ;;  %v411_v39 = vld [vmem:[%s4349_s7 + $0x210] sm:$0xff]  ;;  %v601_v40 = vunpack.c.l.s8.bf16 %v409_v38  ;;  %v609_v46 = vunpack.c.h.s8.bf16 %v409_v38 }
  0x7d   : > { %1391 = vmatmul.mubr.bf16.gmra.mxu0 %v521_v34  ;;  %2201 = vmatprep.subr.bf16.mxu1 %v4233_v1  ;;  %v593_v34 = vunpack.c.h.s8.bf16 %v401_v25  ;;  %v603_v41 = vunpack.c.l.s8.bf16 %v411_v39  ;;  %v611_v47 = vunpack.c.h.s8.bf16 %v411_v39 }
  0x7e   : > { %1680 = vmatmul.mubr.bf16.gmra.mxu1 %v523_v35  ;;  %1398 = vmatprep.mubr.bf16.mxu0 %v530_v36  ;;  %v595_v35 = vunpack.c.h.s8.bf16 %v403_v26  ;;  %v602_v36 = vunpack.c.l.s8.bf16 %v410_v31 }
  0x7f   : > { %1687 = vmatprep.mubr.bf16.mxu1 %v532_v37  ;;  %1913 = vmatpush2.bf16.msra.mxu0 %v4201_v53  ;;  %v604_v37 = vunpack.c.l.s8.bf16 %v412_v32 }
  0x80   : > { %2202 = vmatpush2.bf16.msra.mxu1 %v4202_v55  ;;  %1914 = vmatprep.subr.bf16.mxu0 %v4233_v1 }
  0x81   : > { %2203 = vmatprep.subr.bf16.mxu1 %v4233_v1 }
  0x83   : > { %1915 = vmatpush2.bf16.msra.mxu0 %v4203_v4 }
  0x84   : > { %2204 = vmatpush2.bf16.msra.mxu1 %v4204_v6  ;;  %1916 = vmatprep.subr.bf16.mxu0 %v4233_v1  ;;  %v436_v6 = vld [vmem:[%s4349_s7 + $0x2d8] sm:$0xff] }
  0x85   : > { %1399 = vmatmul.mubr.bf16.gmra.mxu0 %v529_v42  ;;  %2205 = vmatprep.subr.bf16.mxu1 %v4233_v1  ;;  %v610_v42 = vunpack.c.h.s8.bf16 %v410_v31 }
  0x86   : > { %1688 = vmatmul.mubr.bf16.gmra.mxu1 %v531_v43  ;;  %1406 = vmatprep.mubr.bf16.mxu0 %v538_v44  ;;  %v612_v43 = vunpack.c.h.s8.bf16 %v412_v32  ;;  %v418_v44 = vld [vmem:[%s4349_s7 + $0x248] sm:$0xff] }
  0x87   : > { %1695 = vmatprep.mubr.bf16.mxu1 %v540_v45  ;;  %1917 = vmatpush2.bf16.msra.mxu0 %v4205_v18  ;;  %v420_v45 = vld [vmem:[%s4349_s7 + $0x258] sm:$0xff]  ;;  %v626_v54 = vunpack.c.h.s8.bf16 %v418_v44  ;;  %v450_v32 = vld [vmem:[%s4349_s7 + $0x348] sm:$0xff] }
  0x88   : > { %2206 = vmatpush2.bf16.msra.mxu1 %v4206_v20  ;;  %1918 = vmatprep.subr.bf16.mxu0 %v4233_v1  ;;  %v628_v55 = vunpack.c.h.s8.bf16 %v420_v45  ;;  %v444_v18 = vld [vmem:[%s4349_s7 + $0x318] sm:$0xff]  ;;  %v659_v20 = vunpack.c.h.s8.bf16 %v435_v12  ;;  %v682_v39 = vunpack.c.l.s8.bf16 %v450_v32 }
  0x89   : > { %2207 = vmatprep.subr.bf16.mxu1 %v4233_v1  ;;  %v4207_v1 = vld [vmem:[%s5089_s1 + $0x140] sm:$0xff]  }
  0x8b   : > { %1919 = vmatpush2.bf16.msra.mxu0 %v4207_v1 }
  0x8c   : > { %2208 = vmatpush2.bf16.msra.mxu1 %v4208_v33 }
  0x8d   : > { %1407 = vmatmul.mubr.bf16.gmra.mxu0 %v537_v48  ;;  %v618_v48 = vunpack.c.l.s8.bf16 %v418_v44 }
  0x8e   : > { %1696 = vmatmul.mubr.bf16.gmra.mxu1 %v539_v49  ;;  %1414 = vmatprep.mubr.bf16.mxu0 %v546_v50  ;;  %v620_v49 = vunpack.c.l.s8.bf16 %v420_v45  ;;  %v417_v50 = vld [vmem:[%s4349_s7 + $0x240] sm:$0xff] }
  0x8f   : > { %1703 = vmatprep.mubr.bf16.mxu1 %v548_v51  ;;  %v419_v51 = vld [vmem:[%s4349_s7 + $0x250] sm:$0xff]  ;;  %v617_v52 = vunpack.c.l.s8.bf16 %v417_v50 }
  0x90   : > { %v619_v53 = vunpack.c.l.s8.bf16 %v419_v51 }
  0x95   : > { %1415 = vmatmul.mubr.bf16.gmra.mxu0 %v545_v56  ;;  %v426_v56 = vld [vmem:[%s4349_s7 + $0x288] sm:$0xff] }
  0x96   : > { %1704 = vmatmul.mubr.bf16.gmra.mxu1 %v547_v57  ;;  %1422 = vmatprep.mubr.bf16.mxu0 %v554_v58  ;;  %v428_v57 = vld [vmem:[%s4349_s7 + $0x298] sm:$0xff]  ;;  %v625_v58 = vunpack.c.h.s8.bf16 %v417_v50  ;;  %v634_v60 = vunpack.c.l.s8.bf16 %v426_v56  ;;  %v642_v3 = vunpack.c.h.s8.bf16 %v426_v56  ;;  %v451_v50 = vld [vmem:[%s4349_s7 + $0x350] sm:$0xff]  ;;  %v690_v56 = vunpack.c.h.s8.bf16 %v450_v32 }
  0x97   : > { %1711 = vmatprep.mubr.bf16.mxu1 %v556_v59  ;;  %v627_v59 = vunpack.c.h.s8.bf16 %v419_v51  ;;  %v636_v61 = vunpack.c.l.s8.bf16 %v428_v57  ;;  %v644_v4 = vunpack.c.h.s8.bf16 %v428_v57  ;;  %v2662_v57 = vld [vmem:[%s4618_s27 + $0x8] sm:$0xff] }
  0x9d   : > { %1423 = vmatmul.mubr.bf16.gmra.mxu0 %v553_v62  ;;  %v425_v62 = vld [vmem:[%s4349_s7 + $0x280] sm:$0xff] }
  0x9e   : > { %1712 = vmatmul.mubr.bf16.gmra.mxu1 %v555_v63  ;;  %1430 = vmatprep.mubr.bf16.mxu0 %v562_v0  ;;  %v427_v63 = vld [vmem:[%s4349_s7 + $0x290] sm:$0xff]  ;;  %v633_v0 = vunpack.c.l.s8.bf16 %v425_v62 }
  0x9f   : > { %1719 = vmatprep.mubr.bf16.mxu1 %v564_v2  ;;  %v635_v2 = vunpack.c.l.s8.bf16 %v427_v63 }
  0xa5   : > { %1431 = vmatmul.mubr.bf16.gmra.mxu0 %v561_v7  ;;  %v641_v7 = vunpack.c.h.s8.bf16 %v425_v62 }
  0xa6   : > { %1720 = vmatmul.mubr.bf16.gmra.mxu1 %v563_v8  ;;  %1438 = vmatprep.mubr.bf16.mxu0 %v570_v9  ;;  %v643_v8 = vunpack.c.h.s8.bf16 %v427_v63  ;;  %v650_v9 = vunpack.c.l.s8.bf16 %v434_v5 }
  0xa7   : > { %1727 = vmatprep.mubr.bf16.mxu1 %v572_v10  ;;  %v652_v10 = vunpack.c.l.s8.bf16 %v436_v6 }
  0xad   : > { %1439 = vmatmul.mubr.bf16.gmra.mxu0 %v569_v13  ;;  %v649_v13 = vunpack.c.l.s8.bf16 %v433_v11  ;;  %v691_v11 = vunpack.c.h.s8.bf16 %v451_v50 }
  0xae   : > { %1728 = vmatmul.mubr.bf16.gmra.mxu1 %v571_v14  ;;  %1446 = vmatprep.mubr.bf16.mxu0 %v578_v15  ;;  %v651_v14 = vunpack.c.l.s8.bf16 %v435_v12  ;;  %v658_v15 = vunpack.c.h.s8.bf16 %v434_v5  ;;  %v458_v5 = vld [vmem:[%s4349_s7 + $0x388] sm:$0xff] }
  0xaf   : > { %1735 = vmatprep.mubr.bf16.mxu1 %v580_v16  ;;  %v660_v16 = vunpack.c.h.s8.bf16 %v436_v6  ;;  %v698_v12 = vunpack.c.l.s8.bf16 %v458_v5  ;;  %v706_v32 = vunpack.c.h.s8.bf16 %v458_v5 }
  0xb5   : > { %1447 = vmatmul.mubr.bf16.gmra.mxu0 %v577_v21  ;;  %v666_v21 = vunpack.c.l.s8.bf16 %v442_v17 }
  0xb6   : > { %1736 = vmatmul.mubr.bf16.gmra.mxu1 %v579_v22  ;;  %1454 = vmatprep.mubr.bf16.mxu0 %v586_v23  ;;  %v668_v22 = vunpack.c.l.s8.bf16 %v444_v18  ;;  %v441_v23 = vld [vmem:[%s4349_s7 + $0x300] sm:$0xff] }
  0xb7   : > { %1743 = vmatprep.mubr.bf16.mxu1 %v588_v24  ;;  %v443_v24 = vld [vmem:[%s4349_s7 + $0x310] sm:$0xff]  ;;  %v665_v25 = vunpack.c.l.s8.bf16 %v441_v23 }
  0xb8   : > { %v667_v26 = vunpack.c.l.s8.bf16 %v443_v24  ;;  %v675_v38 = vunpack.c.h.s8.bf16 %v443_v24 }
  0xbd   : > { %1455 = vmatmul.mubr.bf16.gmra.mxu0 %v585_v27  ;;  %v674_v27 = vunpack.c.h.s8.bf16 %v442_v17 }
  0xbe   : > { %1744 = vmatmul.mubr.bf16.gmra.mxu1 %v587_v28  ;;  %1462 = vmatprep.mubr.bf16.mxu0 %v594_v29  ;;  %v676_v28 = vunpack.c.h.s8.bf16 %v444_v18 }
  0xbf   : > { %1751 = vmatprep.mubr.bf16.mxu1 %v596_v30 }
  0xc5   : > { %1463 = vmatmul.mubr.bf16.gmra.mxu0 %v593_v34  ;;  %v452_v34 = vld [vmem:[%s4349_s7 + $0x358] sm:$0xff] }
  0xc6   : > { %1752 = vmatmul.mubr.bf16.gmra.mxu1 %v595_v35  ;;  %1470 = vmatprep.mubr.bf16.mxu0 %v602_v36  ;;  %v673_v36 = vunpack.c.h.s8.bf16 %v441_v23  ;;  %v2667_v23 = vld [vmem:[%s4618_s27 + $0x30] sm:$0xff] }
  0xc7   : > { %1759 = vmatprep.mubr.bf16.mxu1 %v604_v37 }
  0xcd   : > { %1471 = vmatmul.mubr.bf16.gmra.mxu0 %v601_v40 }
  0xce   : > { %1760 = vmatmul.mubr.bf16.gmra.mxu1 %v603_v41  ;;  %1478 = vmatprep.mubr.bf16.mxu0 %v610_v42  ;;  %v684_v42 = vunpack.c.l.s8.bf16 %v452_v34 }
  0xcf   : > { %1767 = vmatprep.mubr.bf16.mxu1 %v612_v43 }
  0xd5   : > { %1479 = vmatmul.mubr.bf16.gmra.mxu0 %v609_v46  ;;  %v449_v46 = vld [vmem:[%s4349_s7 + $0x340] sm:$0xff] }
  0xd6   : > { %1768 = vmatmul.mubr.bf16.gmra.mxu1 %v611_v47  ;;  %1486 = vmatprep.mubr.bf16.mxu0 %v618_v48  ;;  %v2661_v47 = vld [vmem:[%s4618_s27] sm:$0xff] }
  0xd7   : > { %1775 = vmatprep.mubr.bf16.mxu1 %v620_v49  ;;  %2727 = vperm.xlu0 %4143, %v2661_v47  }
  0xdb   : > { %2732 = vperm.xlu0 %4143, %v2662_v57  }
  0xdd   : > { %1487 = vmatmul.mubr.bf16.gmra.mxu0 %v617_v52 }
  0xde   : > { %1776 = vmatmul.mubr.bf16.gmra.mxu1 %v619_v53  ;;  %1494 = vmatprep.mubr.bf16.mxu0 %v626_v54  ;;  %v681_v53 = vunpack.c.l.s8.bf16 %v449_v46 }
  0xdf   : > { %1783 = vmatprep.mubr.bf16.mxu1 %v628_v55  ;;  %v683_v55 = vunpack.c.l.s8.bf16 %v451_v50 }
  0xe5   : > { %1495 = vmatmul.mubr.bf16.gmra.mxu0 %v625_v58  ;;  %v2663_v58 = vld [vmem:[%s4618_s27 + $0x10] sm:$0xff] }
  0xe6   : > { %1784 = vmatmul.mubr.bf16.gmra.mxu1 %v627_v59  ;;  %1502 = vmatprep.mubr.bf16.mxu0 %v634_v60 }
  0xe7   : > { %1791 = vmatprep.mubr.bf16.mxu1 %v636_v61  ;;  %v692_v61 = vunpack.c.h.s8.bf16 %v452_v34  ;;  %2737 = vperm.xlu1 %4144, %v2663_v58   ;;  %v2669_v34 = vld [vmem:[%s4618_s27 + $0x40] sm:$0xff] }
  0xed   : > { %1503 = vmatmul.mubr.bf16.gmra.mxu0 %v633_v0 }
  0xee   : > { %1792 = vmatmul.mubr.bf16.gmra.mxu1 %v635_v2  ;;  %1510 = vmatprep.mubr.bf16.mxu0 %v642_v3  ;;  %v2664_v2 = vld [vmem:[%s4618_s27 + $0x18] sm:$0xff] }
  0xef   : > { %1799 = vmatprep.mubr.bf16.mxu1 %v644_v4  ;;  %2742 = vperm.xlu1 %4144, %v2664_v2   ;;  %v2676_v2 = vld [vmem:[%s4618_s27 + $0x78] sm:$0xff] }
  0xf5   : > { %1511 = vmatmul.mubr.bf16.gmra.mxu0 %v641_v7  ;;  %v460_v7 = vld [vmem:[%s4349_s7 + $0x398] sm:$0xff] }
  0xf6   : > { %1800 = vmatmul.mubr.bf16.gmra.mxu1 %v643_v8  ;;  %1518 = vmatprep.mubr.bf16.mxu0 %v650_v9  ;;  %v689_v9 = vunpack.c.h.s8.bf16 %v449_v46  ;;  %v700_v17 = vunpack.c.l.s8.bf16 %v460_v7  ;;  %v466_v46 = vld [vmem:[%s4349_s7 + $0x3c8] sm:$0xff] }
  0xf7   : > { %1807 = vmatprep.mubr.bf16.mxu1 %v652_v10 }
  0xfd   : > { %1519 = vmatmul.mubr.bf16.gmra.mxu0 %v649_v13  ;;  %v2666_v13 = vld [vmem:[%s4618_s27 + $0x28] sm:$0xff] }
  0xfe   : > { %1808 = vmatmul.mubr.bf16.gmra.mxu1 %v651_v14  ;;  %1526 = vmatprep.mubr.bf16.mxu0 %v658_v15  ;;  %v2665_v14 = vld [vmem:[%s4618_s27 + $0x20] sm:$0xff] }
  0xff   : > { %1815 = vmatprep.mubr.bf16.mxu1 %v660_v16  ;;  %2752 = vperm.xlu1 %4144, %v2666_v13   ;;  %v722_v13 = vunpack.c.h.s8.bf16 %v466_v46 }
 0x100   : > { %2747 = vperm.xlu0 %4143, %v2665_v14   ;;  %v2678_v14 = vld [vmem:[%s4618_s27 + $0x88] sm:$0xff] }
 0x104   : > { %2757 = vperm.xlu0 %4143, %v2667_v23   ;;  %v2680_v23 = vld [vmem:[%s4618_s27 + $0x98] sm:$0xff] }
 0x105   : > { %1527 = vmatmul.mubr.bf16.gmra.mxu0 %v657_v19 }
 0x106   : > { %1816 = vmatmul.mubr.bf16.gmra.mxu1 %v659_v20  ;;  %1534 = vmatprep.mubr.bf16.mxu0 %v666_v21  ;;  %v457_v21 = vld [vmem:[%s4349_s7 + $0x380] sm:$0xff] }
 0x107   : > { %1823 = vmatprep.mubr.bf16.mxu1 %v668_v22  ;;  %v2668_v22 = vld [vmem:[%s4618_s27 + $0x38] sm:$0xff] }
 0x108   : > { %2762 = vperm.xlu1 %4144, %v2668_v22   ;;  %2767 = vperm.xlu0 %4143, %v2669_v34  }
 0x10d   : > { %v1344_v29 = vpop.f32.mrf.mxu0  ;;  %1535 = vmatmul.mubr.bf16.gmra.mxu0 %v665_v25 }
 0x10e   : > { %v1633_v30 = vpop.f32.mrf.mxu1  ;;  %1824 = vmatmul.mubr.bf16.gmra.mxu1 %v667_v26  ;;  %1542 = vmatprep.mubr.bf16.mxu0 %v674_v27  ;;  %v459_v26 = vld [vmem:[%s4349_s7 + $0x390] sm:$0xff] }
 0x10f   : > { %v4603_v31 = vadd.f32 %v1633_v30, %v1344_v29  ;;  %v1346_v1 = vpop.f32.mrf.mxu0  ;;  %1831 = vmatprep.mubr.bf16.mxu1 %v676_v28  ;;  %v697_v29 = vunpack.c.l.s8.bf16 %v457_v21 }
 0x110   : > { %v1635_v33 = vpop.f32.mrf.mxu1  ;;  %v699_v1 = vunpack.c.l.s8.bf16 %v459_v26 }
 0x111   : > { %v1347_v35 = vpop.f32.mrf.mxu0  ;;  %v2670_v33 = vld [vmem:[%s4618_s27 + $0x48] sm:$0xff] }
 0x112   : > { %v1636_v37 = vpop.f32.mrf.mxu1  ;;  %2772 = vperm.xlu1 %4144, %v2670_v33  }
 0x113   : > { %v4610_v40 = vadd.f32 %v1636_v37, %v1347_v35  ;;  %v1349_v41 = vpop.f32.mrf.mxu0  ;;  %v708_v37 = vunpack.c.h.s8.bf16 %v460_v7  ;;  %v467_v7 = vld [vmem:[%s4349_s7 + $0x3d0] sm:$0xff] }
 0x114   : > { %v1638_v43 = vpop.f32.mrf.mxu1  ;;  %v723_v34 = vunpack.c.h.s8.bf16 %v467_v7 }
 0x115   : > { %v1352_v44 = vpop.f32.mrf.mxu0  ;;  %1543 = vmatmul.mubr.bf16.gmra.mxu0 %v673_v36  ;;  %v2671_v43 = vld [vmem:[%s4618_s27 + $0x50] sm:$0xff] }
 0x116   : > { %v1641_v45 = vpop.f32.mrf.mxu1  ;;  %1832 = vmatmul.mubr.bf16.gmra.mxu1 %v675_v38  ;;  %1550 = vmatprep.mubr.bf16.mxu0 %v682_v39 }
 0x117   : > { %v4622_v48 = vadd.f32 %v1641_v45, %v1352_v44  ;;  %v1354_v49 = vpop.f32.mrf.mxu0  ;;  %1839 = vmatprep.mubr.bf16.mxu1 %v684_v42  ;;  %v2672_v42 = vld [vmem:[%s4618_s27 + $0x58] sm:$0xff]  ;;  %2777 = vperm.xlu0 %4143, %v2671_v43  }
 0x118   : > { %v1643_v51 = vpop.f32.mrf.mxu1  ;;  %2782 = vperm.xlu1 %4144, %v2672_v42   ;;  %v468_v49 = vld [vmem:[%s4349_s7 + $0x3d8] sm:$0xff] }
 0x119   : > { %v1355_v52 = vpop.f32.mrf.mxu0  ;;  %v705_v51 = vunpack.c.h.s8.bf16 %v457_v21 }
 0x11a   : > { %v1644_v54 = vpop.f32.mrf.mxu1 }
 0x11b   : > { %v4627_v59 = vadd.f32 %v1644_v54, %v1355_v52  ;;  %v1357_v60 = vpop.f32.mrf.mxu0  ;;  %v714_v54 = vunpack.c.l.s8.bf16 %v466_v46 }
 0x11c   : > { %v1646_v62 = vpop.f32.mrf.mxu1  ;;  %v716_v60 = vunpack.c.l.s8.bf16 %v468_v49 }
 0x11d   : > { %v1360_v63 = vpop.f32.mrf.mxu0  ;;  %1551 = vmatmul.mubr.bf16.gmra.mxu0 %v681_v53  ;;  %v707_v53 = vunpack.c.h.s8.bf16 %v459_v26 }
 0x11e   : > { %v1649_v0 = vpop.f32.mrf.mxu1  ;;  %1840 = vmatmul.mubr.bf16.gmra.mxu1 %v683_v55  ;;  %1558 = vmatprep.mubr.bf16.mxu0 %v690_v56  ;;  %v2674_v55 = vld [vmem:[%s4618_s27 + $0x68] sm:$0xff]  ;;  %v2673_v56 = vld [vmem:[%s4618_s27 + $0x60] sm:$0xff] }
 0x11f   : > { %v4630_v3 = vadd.f32 %v1649_v0, %v1360_v63  ;;  %v1362_v4 = vpop.f32.mrf.mxu0  ;;  %1847 = vmatprep.mubr.bf16.mxu1 %v692_v61  ;;  %2792 = vperm.xlu1 %4144, %v2674_v55   ;;  %v465_v0 = vld [vmem:[%s4349_s7 + $0x3c0] sm:$0xff] }
 0x120   : > { %v1651_v6 = vpop.f32.mrf.mxu1  ;;  %2787 = vperm.xlu0 %4143, %v2673_v56   ;;  %v2675_v4 = vld [vmem:[%s4618_s27 + $0x70] sm:$0xff] }
 0x121   : > { %v1363_v8 = vpop.f32.mrf.mxu0 }
 0x122   : > { %v1652_v10 = vpop.f32.mrf.mxu1 }
 0x123   : > { %v4636_v15 = vadd.f32 %v1652_v10, %v1363_v8  ;;  %v1365_v16 = vpop.f32.mrf.mxu0  ;;  %2802 = vperm.xlu1 %4144, %v2676_v2   ;;  %v713_v10 = vunpack.c.l.s8.bf16 %v465_v0 }
 0x124   : > { %v1654_v18 = vpop.f32.mrf.mxu1  ;;  %2797 = vperm.xlu0 %4143, %v2675_v4   ;;  %v2677_v16 = vld [vmem:[%s4618_s27 + $0x80] sm:$0xff] }
 0x125   : > { %v1368_v19 = vpop.f32.mrf.mxu0  ;;  %1559 = vmatmul.mubr.bf16.gmra.mxu0 %v689_v9 }
 0x126   : > { %v1657_v20 = vpop.f32.mrf.mxu1  ;;  %1848 = vmatmul.mubr.bf16.gmra.mxu1 %v691_v11  ;;  %1566 = vmatprep.mubr.bf16.mxu0 %v698_v12  ;;  %v715_v12 = vunpack.c.l.s8.bf16 %v467_v7 }
 0x127   : > { %v4641_v24 = vadd.f32 %v1657_v20, %v1368_v19  ;;  %v1370_v25 = vpop.f32.mrf.mxu0  ;;  %1855 = vmatprep.mubr.bf16.mxu1 %v700_v17  ;;  %v724_v19 = vunpack.c.h.s8.bf16 %v468_v49  ;;  %2812 = vperm.xlu1 %4144, %v2678_v14   ;;  %v2684_v49 = vld [vmem:[%s4618_s27 + $0xb8] sm:$0xff] }
 0x128   : > { %v1659_v27 = vpop.f32.mrf.mxu1  ;;  %2807 = vperm.xlu0 %4143, %v2677_v16   ;;  %v2679_v25 = vld [vmem:[%s4618_s27 + $0x90] sm:$0xff]  ;;  %v360_v16 = vld [vmem:[%s4349_s7 + $0x78] sm:$0xff] }
 0x129   : > { %v1371_v28 = vpop.f32.mrf.mxu0 }
 0x12a   : > { %v1660_v30 = vpop.f32.mrf.mxu1 }
 0x12b   : > { %v4646_v35 = vadd.f32 %v1660_v30, %v1371_v28  ;;  %v1373_v36 = vpop.f32.mrf.mxu0  ;;  %v350_v28 = vld [vmem:[%s4349_s7 + $0x28] sm:$0xff]  ;;  %2822 = vperm.xlu1 %4144, %v2680_v23   ;;  %v352_v30 = vld [vmem:[%s4349_s7 + $0x38] sm:$0xff] }
 0x12c   : > { %v1662_v38 = vpop.f32.mrf.mxu1  ;;  %2817 = vperm.xlu0 %4143, %v2679_v25   ;;  %v478_v36 = vunpack.c.l.s8.bf16 %v350_v28  ;;  %v480_v42 = vunpack.c.l.s8.bf16 %v352_v30  ;;  %v488_v4 = vunpack.c.h.s8.bf16 %v352_v30  ;;  %v2690_v23 = vld [vmem:[%s4618_s27 + $0xe8] sm:$0xff]  ;;  %v2689_v25 = vld [vmem:[%s4618_s27 + $0xe0] sm:$0xff] }
 0x12d   : > { %v1376_v39 = vpop.f32.mrf.mxu0  ;;  %1567 = vmatmul.mubr.bf16.gmra.mxu0 %v697_v29  ;;  %v2681_v38 = vld [vmem:[%s4618_s27 + $0xa0] sm:$0xff] }
 0x12e   : > { %v1665_v41 = vpop.f32.mrf.mxu1  ;;  %1856 = vmatmul.mubr.bf16.gmra.mxu1 %v699_v1  ;;  %1574 = vmatprep.mubr.bf16.mxu0 %v706_v32  ;;  %v721_v32 = vunpack.c.h.s8.bf16 %v465_v0 }
 0x12f   : > { %v4650_v44 = vadd.f32 %v1665_v41, %v1376_v39  ;;  %v1378_v45 = vpop.f32.mrf.mxu0  ;;  %1863 = vmatprep.mubr.bf16.mxu1 %v708_v37  ;;  %v2682_v37 = vld [vmem:[%s4618_s27 + $0xa8] sm:$0xff] }
 0x130   : > { %v1667_v47 = vpop.f32.mrf.mxu1  ;;  %2832 = vperm.xlu1 %4144, %v2682_v37   ;;  %2827 = vperm.xlu0 %4143, %v2681_v38  }
 0x131   : > { %v1379_v50 = vpop.f32.mrf.mxu0  ;;  %v349_v47 = vld [vmem:[%s4349_s7 + $0x20] sm:$0xff] }
 0x132   : > { %v1668_v52 = vpop.f32.mrf.mxu1  ;;  %v477_v56 = vunpack.c.l.s8.bf16 %v349_v47 }
 0x133   : > { %v4656_v57 = vadd.f32 %v1668_v52, %v1379_v50  ;;  %v1381_v58 = vpop.f32.mrf.mxu0  ;;  %v2683_v50 = vld [vmem:[%s4618_s27 + $0xb0] sm:$0xff] }
 0x134   : > { %v1670_v61 = vpop.f32.mrf.mxu1  ;;  %2842 = vperm.xlu1 %4144, %v2684_v49   ;;  %2837 = vperm.xlu0 %4143, %v2683_v50   ;;  %v2694_v50 = vld [vmem:[%s4618_s27 + $0x108] sm:$0xff] }
 0x135   : > { %v1384_v62 = vpop.f32.mrf.mxu0  ;;  %1575 = vmatmul.mubr.bf16.gmra.mxu0 %v705_v51  ;;  %v486_v61 = vunpack.c.h.s8.bf16 %v350_v28 }
 0x136   : > { %v1673_v63 = vpop.f32.mrf.mxu1  ;;  %1864 = vmatmul.mubr.bf16.gmra.mxu1 %v707_v53  ;;  %1582 = vmatprep.mubr.bf16.mxu0 %v714_v54  ;;  %v351_v53 = vld [vmem:[%s4349_s7 + $0x30] sm:$0xff] }
 0x137   : > { %v4661_v5 = vadd.f32 %v1673_v63, %v1384_v62  ;;  %v1386_v6 = vpop.f32.mrf.mxu0  ;;  %1871 = vmatprep.mubr.bf16.mxu1 %v716_v60  ;;  %v479_v60 = vunpack.c.l.s8.bf16 %v351_v53  ;;  %v2686_v62 = vld [vmem:[%s4618_s27 + $0xc8] sm:$0xff]  ;;  %v2685_v63 = vld [vmem:[%s4618_s27 + $0xc0] sm:$0xff] }
 0x138   : > { %v1675_v8 = vpop.f32.mrf.mxu1  ;;  %2852 = vperm.xlu1 %4144, %v2686_v62   ;;  %2847 = vperm.xlu0 %4143, %v2685_v63   ;;  %v2695_v62 = vld [vmem:[%s4618_s27 + $0x110] sm:$0xff] }
 0x139   : > { %v1387_v9 = vpop.f32.mrf.mxu0 }
 0x13a   : > { %v1676_v11 = vpop.f32.mrf.mxu1 }
 0x13b   : > { %v4666_v17 = vadd.f32 %v1676_v11, %v1387_v9  ;;  %v1389_v18 = vpop.f32.mrf.mxu0  ;;  %v2688_v9 = vld [vmem:[%s4618_s27 + $0xd8] sm:$0xff] }
 0x13c   : > { %v1678_v20 = vpop.f32.mrf.mxu1  ;;  %2862 = vperm.xlu1 %4144, %v2688_v9  }
 0x13d   : > { %v1392_v21 = vpop.f32.mrf.mxu0  ;;  %1583 = vmatmul.mubr.bf16.gmra.mxu0 %v713_v10  ;;  %v2687_v10 = vld [vmem:[%s4618_s27 + $0xd0] sm:$0xff] }
 0x13e   : > { %v1681_v22 = vpop.f32.mrf.mxu1  ;;  %1872 = vmatmul.mubr.bf16.gmra.mxu1 %v715_v12  ;;  %1590 = vmatprep.mubr.bf16.mxu0 %v722_v13  ;;  %v358_v13 = vld [vmem:[%s4349_s7 + $0x68] sm:$0xff] }
 0x13f   : > { %v4670_v26 = vadd.f32 %v1681_v22, %v1392_v21  ;;  %v1394_v27 = vpop.f32.mrf.mxu0  ;;  %1879 = vmatprep.mubr.bf16.mxu1 %v724_v19  ;;  %2857 = vperm.xlu0 %4143, %v2687_v10   ;;  %v485_v19 = vunpack.c.h.s8.bf16 %v349_v47  ;;  %v487_v21 = vunpack.c.h.s8.bf16 %v351_v53  ;;  %v494_v22 = vunpack.c.l.s8.bf16 %v358_v13 }
 0x140   : > { %v1683_v29 = vpop.f32.mrf.mxu1  ;;  %2872 = vperm.xlu1 %4144, %v2690_v23   ;;  %v502_v49 = vunpack.c.h.s8.bf16 %v358_v13 }
 0x141   : > { %v1395_v1 = vpop.f32.mrf.mxu0  ;;  %v496_v29 = vunpack.c.l.s8.bf16 %v360_v16 }
 0x142   : > { %v1684_v33 = vpop.f32.mrf.mxu1 }
 0x143   : > { %v4676_v39 = vadd.f32 %v1684_v33, %v1395_v1  ;;  %v1397_v41 = vpop.f32.mrf.mxu0  ;;  %2867 = vperm.xlu0 %4143, %v2689_v25   ;;  %v357_v33 = vld [vmem:[%s4349_s7 + $0x60] sm:$0xff] }
 0x144   : > { %v1686_v43 = vpop.f32.mrf.mxu1  ;;  %v359_v41 = vld [vmem:[%s4349_s7 + $0x70] sm:$0xff]  ;;  %v501_v9 = vunpack.c.h.s8.bf16 %v357_v33  ;;  %v365_v25 = vld [vmem:[%s4349_s7 + $0xa0] sm:$0xff] }
 0x145   : > { %v1400_v45 = vpop.f32.mrf.mxu0  ;;  %1591 = vmatmul.mubr.bf16.gmra.mxu0 %v721_v32  ;;  %v495_v47 = vunpack.c.l.s8.bf16 %v359_v41 }
 0x146   : > { %v1689_v46 = vpop.f32.mrf.mxu1  ;;  %1880 = vmatmul.mubr.bf16.gmra.mxu1 %v723_v34  ;;  %1920 = vmatprep.mubr.bf16.mxu0 %v478_v36  ;;  %v2692_v34 = vld [vmem:[%s4618_s27 + $0xf8] sm:$0xff]  ;;  %v2691_v36 = vld [vmem:[%s4618_s27 + $0xf0] sm:$0xff] }
 0x147   : > { %v4681_v51 = vadd.f32 %v1689_v46, %v1400_v45  ;;  %v1402_v52 = vpop.f32.mrf.mxu0  ;;  %2209 = vmatprep.mubr.bf16.mxu1 %v480_v42  ;;  %2882 = vperm.xlu1 %4144, %v2692_v34   ;;  %v493_v45 = vunpack.c.l.s8.bf16 %v357_v33 }
 0x148   : > { %v1691_v54 = vpop.f32.mrf.mxu1  ;;  %2877 = vperm.xlu0 %4143, %v2691_v36   ;;  %v2693_v52 = vld [vmem:[%s4618_s27 + $0x100] sm:$0xff]  ;;  %v509_v36 = vunpack.c.l.s8.bf16 %v365_v25 }
 0x149   : > { %v1403_v55 = vpop.f32.mrf.mxu0 }
 0x14a   : > { %v1692_v58 = vpop.f32.mrf.mxu1 }
 0x14b   : > { %v4686_v0 = vadd.f32 %v1692_v58, %v1403_v55  ;;  %v1405_v2 = vpop.f32.mrf.mxu0  ;;  %v504_v55 = vunpack.c.h.s8.bf16 %v360_v16  ;;  %2892 = vperm.xlu1 %4144, %v2694_v50   ;;  %v2697_v16 = vld [vmem:[%s4618_s27 + $0x120] sm:$0xff] }
 0x14c   : > { %v1694_v6 = vpop.f32.mrf.mxu1  ;;  %2887 = vperm.xlu0 %4143, %v2693_v52  }
 0x14d   : > { %v1408_v7 = vpop.f32.mrf.mxu0  ;;  %1921 = vmatmul.mubr.bf16.vlgmr.msra.gmra.mxu0 %v477_v56 }
 0x14e   : > { %v1697_v8 = vpop.f32.mrf.mxu1  ;;  %2210 = vmatmul.mubr.bf16.vlgmr.msra.gmra.mxu1 %v479_v60  ;;  %1928 = vmatprep.mubr.bf16.mxu0 %v486_v61  ;;  %v2696_v61 = vld [vmem:[%s4618_s27 + $0x118] sm:$0xff] }
 0x14f   : > { %v4690_v11 = vadd.f32 %v1697_v8, %v1408_v7  ;;  %v1410_v12 = vpop.f32.mrf.mxu0  ;;  %2217 = vmatprep.mubr.bf16.mxu1 %v488_v4  ;;  %v366_v4 = vld [vmem:[%s4349_s7 + $0xa8] sm:$0xff]  ;;  %2902 = vperm.xlu1 %4144, %v2696_v61   ;;  %v368_v7 = vld [vmem:[%s4349_s7 + $0xb8] sm:$0xff] }
 0x150   : > { %v1699_v14 = vpop.f32.mrf.mxu1  ;;  %2897 = vperm.xlu0 %4143, %v2695_v62   ;;  %v503_v12 = vunpack.c.h.s8.bf16 %v359_v41  ;;  %v510_v13 = vunpack.c.l.s8.bf16 %v366_v4  ;;  %v374_v61 = vld [vmem:[%s4349_s7 + $0xe8] sm:$0xff] }
 0x151   : > { %v1411_v18 = vpop.f32.mrf.mxu0  ;;  %v2698_v14 = vld [vmem:[%s4618_s27 + $0x128] sm:$0xff] }
 0x152   : > { %v1700_v20 = vpop.f32.mrf.mxu1 }
 0x153   : > { %v4696_v27 = vadd.f32 %v1700_v20, %v1411_v18  ;;  %v1413_v28 = vpop.f32.mrf.mxu0  ;;  %v512_v20 = vunpack.c.l.s8.bf16 %v368_v7  ;;  %2912 = vperm.xlu1 %4144, %v2698_v14  }
 0x154   : > { %v1702_v30 = vpop.f32.mrf.mxu1  ;;  %2907 = vperm.xlu0 %4143, %v2697_v16   ;;  %v2700_v28 = vld [vmem:[%s4618_s27 + $0x138] sm:$0xff] }
 0x155   : > { %v1416_v1 = vpop.f32.mrf.mxu0  ;;  %1929 = vmatmul.mubr.bf16.gmra.mxu0 %v485_v19 }
 0x156   : > { %v1705_v32 = vpop.f32.mrf.mxu1  ;;  %2218 = vmatmul.mubr.bf16.gmra.mxu1 %v487_v21  ;;  %1936 = vmatprep.mubr.bf16.mxu0 %v494_v22 }
 0x157   : > { %v4701_v37 = vadd.f32 %v1705_v32, %v1416_v1  ;;  %v1418_v38 = vpop.f32.mrf.mxu0  ;;  %2225 = vmatprep.mubr.bf16.mxu1 %v496_v29  ;;  %v2699_v29 = vld [vmem:[%s4618_s27 + $0x130] sm:$0xff]  ;;  %2922 = vperm.xlu1 %4144, %v2700_v28  }
 0x158   : > { %v1707_v42 = vpop.f32.mrf.mxu1  ;;  %v367_v32 = vld [vmem:[%s4349_s7 + $0xb0] sm:$0xff]  ;;  %2917 = vperm.xlu0 %4143, %v2699_v29  }
 0x159   : > { %v1419_v43 = vpop.f32.mrf.mxu0  ;;  %v511_v41 = vunpack.c.l.s8.bf16 %v367_v32  ;;  %v518_v42 = vunpack.c.h.s8.bf16 %v366_v4 }
 0x15a   : > { %v1708_v46 = vpop.f32.mrf.mxu1 }
 0x15b   : > { %v4706_v53 = vadd.f32 %v1708_v46, %v1419_v43  ;;  %v1421_v54 = vpop.f32.mrf.mxu0  ;;  %v2702_v43 = vld [vmem:[%s4618_s27 + $0x148] sm:$0xff] }
 0x15c   : > { %v1710_v56 = vpop.f32.mrf.mxu1  ;;  %2932 = vperm.xlu1 %4144, %v2702_v43   ;;  %v2709_v43 = vld [vmem:[%s4618_s27 + $0x180] sm:$0xff] }
 0x15d   : > { %v1424_v58 = vpop.f32.mrf.mxu0  ;;  %1937 = vmatmul.mubr.bf16.gmra.mxu0 %v493_v45  ;;  %v2701_v45 = vld [vmem:[%s4618_s27 + $0x140] sm:$0xff]  ;;  %v2703_v56 = vld [vmem:[%s4618_s27 + $0x150] sm:$0xff] }
 0x15e   : > { %v1713_v60 = vpop.f32.mrf.mxu1  ;;  %2226 = vmatmul.mubr.bf16.gmra.mxu1 %v495_v47  ;;  %1944 = vmatprep.mubr.bf16.mxu0 %v502_v49  ;;  %v520_v49 = vunpack.c.h.s8.bf16 %v368_v7 }
 0x15f   : > { %v4710_v63 = vadd.f32 %v1713_v60, %v1424_v58  ;;  %v1426_v2 = vpop.f32.mrf.mxu0  ;;  %2233 = vmatprep.mubr.bf16.mxu1 %v504_v55  ;;  %2927 = vperm.xlu0 %4143, %v2701_v45   ;;  %v2704_v55 = vld [vmem:[%s4618_s27 + $0x158] sm:$0xff] }
 0x160   : > { %v1715_v6 = vpop.f32.mrf.mxu1  ;;  %2942 = vperm.xlu1 %4144, %v2704_v55   ;;  %v376_v2 = vld [vmem:[%s4349_s7 + $0xf8] sm:$0xff] }
 0x161   : > { %v1427_v8 = vpop.f32.mrf.mxu0  ;;  %v517_v6 = vunpack.c.h.s8.bf16 %v365_v25  ;;  %v528_v16 = vunpack.c.l.s8.bf16 %v376_v2  ;;  %v2707_v25 = vld [vmem:[%s4618_s27 + $0x170] sm:$0xff]  ;;  %v2712_v55 = vld [vmem:[%s4618_s27 + $0x198] sm:$0xff] }
 0x162   : > { %v1716_v10 = vpop.f32.mrf.mxu1 }
 0x163   : > { %v4716_v18 = vadd.f32 %v1716_v10, %v1427_v8  ;;  %v1429_v19 = vpop.f32.mrf.mxu0  ;;  %2937 = vperm.xlu0 %4143, %v2703_v56   ;;  %v519_v8 = vunpack.c.h.s8.bf16 %v367_v32  ;;  %v2706_v10 = vld [vmem:[%s4618_s27 + $0x168] sm:$0xff]  ;;  %v2711_v56 = vld [vmem:[%s4618_s27 + $0x190] sm:$0xff] }
 0x164   : > { %v1718_v21 = vpop.f32.mrf.mxu1  ;;  %2952 = vperm.xlu1 %4144, %v2706_v10  }
 0x165   : > { %v1432_v22 = vpop.f32.mrf.mxu0  ;;  %1945 = vmatmul.mubr.bf16.gmra.mxu0 %v501_v9  ;;  %v526_v9 = vunpack.c.l.s8.bf16 %v374_v61 }
 0x166   : > { %v1721_v23 = vpop.f32.mrf.mxu1  ;;  %2234 = vmatmul.mubr.bf16.gmra.mxu1 %v503_v12  ;;  %1952 = vmatprep.mubr.bf16.mxu0 %v510_v13  ;;  %v2705_v12 = vld [vmem:[%s4618_s27 + $0x160] sm:$0xff] }
 0x167   : > { %v4721_v30 = vadd.f32 %v1721_v23, %v1432_v22  ;;  %v1434_v1 = vpop.f32.mrf.mxu0  ;;  %2241 = vmatprep.mubr.bf16.mxu1 %v512_v20  ;;  %2947 = vperm.xlu0 %4143, %v2705_v12   ;;  %v373_v22 = vld [vmem:[%s4349_s7 + $0xe0] sm:$0xff]  ;;  %v2708_v23 = vld [vmem:[%s4618_s27 + $0x178] sm:$0xff]  ;;  %v2714_v12 = vld [vmem:[%s4618_s27 + $0x1a8] sm:$0xff] }
 0x168   : > { %v1723_v33 = vpop.f32.mrf.mxu1  ;;  %v375_v1 = vld [vmem:[%s4349_s7 + $0xf0] sm:$0xff]  ;;  %2962 = vperm.xlu1 %4144, %v2708_v23  }
 0x169   : > { %v1435_v34 = vpop.f32.mrf.mxu0 }
 0x16a   : > { %v1724_v38 = vpop.f32.mrf.mxu1 }
 0x16b   : > { %v4726_v46 = vadd.f32 %v1724_v38, %v1435_v34  ;;  %v1437_v47 = vpop.f32.mrf.mxu0  ;;  %2957 = vperm.xlu0 %4143, %v2707_v25   ;;  %v525_v34 = vunpack.c.l.s8.bf16 %v373_v22  ;;  %v527_v38 = vunpack.c.l.s8.bf16 %v375_v1 }
 0x16c   : > { %v1726_v50 = vpop.f32.mrf.mxu1 }
 0x16d   : > { %v1440_v52 = vpop.f32.mrf.mxu0  ;;  %1953 = vmatmul.mubr.bf16.gmra.mxu0 %v509_v36 }
 0x16e   : > { %v1729_v54 = vpop.f32.mrf.mxu1  ;;  %2242 = vmatmul.mubr.bf16.gmra.mxu1 %v511_v41  ;;  %1960 = vmatprep.mubr.bf16.mxu0 %v518_v42  ;;  %v534_v41 = vunpack.c.h.s8.bf16 %v374_v61  ;;  %v2710_v42 = vld [vmem:[%s4618_s27 + $0x188] sm:$0xff] }
 0x16f   : > { %v4730_v58 = vadd.f32 %v1729_v54, %v1440_v52  ;;  %v1442_v60 = vpop.f32.mrf.mxu0  ;;  %2249 = vmatprep.mubr.bf16.mxu1 %v520_v49  ;;  %v536_v49 = vunpack.c.h.s8.bf16 %v376_v2  ;;  %2972 = vperm.xlu1 %4144, %v2710_v42  }
 0x170   : > { %v1731_v62 = vpop.f32.mrf.mxu1  ;;  %2967 = vperm.xlu0 %4143, %v2709_v43  }
 0x171   : > { %v1443_v4 = vpop.f32.mrf.mxu0  ;;  %v382_v62 = vld [vmem:[%s4349_s7 + $0x128] sm:$0xff] }
 0x172   : > { %v1732_v7 = vpop.f32.mrf.mxu1  ;;  %v542_v10 = vunpack.c.l.s8.bf16 %v382_v62 }
 0x173   : > { %v4736_v13 = vadd.f32 %v1732_v7, %v1443_v4  ;;  %v1445_v14 = vpop.f32.mrf.mxu0  ;;  %2982 = vperm.xlu1 %4144, %v2712_v55   ;;  %v384_v4 = vld [vmem:[%s4349_s7 + $0x138] sm:$0xff]  ;;  %v533_v7 = vunpack.c.h.s8.bf16 %v373_v22  ;;  %v381_v22 = vld [vmem:[%s4349_s7 + $0x120] sm:$0xff] }
 0x174   : > { %v1734_v19 = vpop.f32.mrf.mxu1  ;;  %2977 = vperm.xlu0 %4143, %v2711_v56   ;;  %v2713_v14 = vld [vmem:[%s4618_s27 + $0x1a0] sm:$0xff]  ;;  %v552_v55 = vunpack.c.h.s8.bf16 %v384_v4 }
 0x175   : > { %v1448_v20 = vpop.f32.mrf.mxu0  ;;  %1961 = vmatmul.mubr.bf16.gmra.mxu0 %v517_v6 }
 0x176   : > { %v1737_v21 = vpop.f32.mrf.mxu1  ;;  %2250 = vmatmul.mubr.bf16.gmra.mxu1 %v519_v8  ;;  %1968 = vmatprep.mubr.bf16.mxu0 %v526_v9  ;;  %v535_v9 = vunpack.c.h.s8.bf16 %v375_v1  ;;  %v2715_v1 = vld [vmem:[%s4618_s27 + $0x1b0] sm:$0xff] }
 0x177   : > { %v4741_v28 = vadd.f32 %v1737_v21, %v1448_v20  ;;  %v1450_v29 = vpop.f32.mrf.mxu0  ;;  %2257 = vmatprep.mubr.bf16.mxu1 %v528_v16  ;;  %v544_v20 = vunpack.c.l.s8.bf16 %v384_v4  ;;  %2992 = vperm.xlu1 %4144, %v2714_v12  }
 0x178   : > { %v1739_v32 = vpop.f32.mrf.mxu1  ;;  %2987 = vperm.xlu0 %4143, %v2713_v14   ;;  %v2716_v29 = vld [vmem:[%s4618_s27 + $0x1b8] sm:$0xff]  ;;  %v549_v14 = vunpack.c.h.s8.bf16 %v381_v22 }
 0x179   : > { %v1451_v33 = vpop.f32.mrf.mxu0 }
 0x17a   : > { %v1740_v36 = vpop.f32.mrf.mxu1 }
 0x17b   : > { %v4746_v45 = vadd.f32 %v1740_v36, %v1451_v33  ;;  %v1453_v47 = vpop.f32.mrf.mxu0  ;;  %3002 = vperm.xlu1 %4144, %v2716_v29  }
 0x17c   : > { %v1742_v50 = vpop.f32.mrf.mxu1  ;;  %2997 = vperm.xlu0 %4143, %v2715_v1   ;;  %v550_v47 = vunpack.c.h.s8.bf16 %v382_v62  ;;  %v2719_v62 = vld [vmem:[%s4618_s27 + $0x1d0] sm:$0xff] }
 0x17d   : > { %v1456_v52 = vpop.f32.mrf.mxu0  ;;  %1969 = vmatmul.mubr.bf16.gmra.mxu0 %v525_v34  ;;  %v383_v34 = vld [vmem:[%s4349_s7 + $0x130] sm:$0xff]  ;;  %v2717_v50 = vld [vmem:[%s4618_s27 + $0x1c0] sm:$0xff] }
 0x17e   : > { %v1745_v54 = vpop.f32.mrf.mxu1  ;;  %2258 = vmatmul.mubr.bf16.gmra.mxu1 %v527_v38  ;;  %1976 = vmatprep.mubr.bf16.mxu0 %v534_v41  ;;  %v541_v41 = vunpack.c.l.s8.bf16 %v381_v22  ;;  %v543_v43 = vunpack.c.l.s8.bf16 %v383_v34  ;;  %v389_v22 = vld [vmem:[%s4349_s7 + $0x160] sm:$0xff] }
 0x17f   : > { %v4750_v60 = vadd.f32 %v1745_v54, %v1456_v52  ;;  %v1458_v61 = vpop.f32.mrf.mxu0  ;;  %2265 = vmatprep.mubr.bf16.mxu1 %v536_v49  ;;  %v2718_v49 = vld [vmem:[%s4618_s27 + $0x1c8] sm:$0xff] }
 0x180   : > { %v1747_v2 = vpop.f32.mrf.mxu1  ;;  %3012 = vperm.xlu1 %4144, %v2718_v49   ;;  %3007 = vperm.xlu0 %4143, %v2717_v50   ;;  %v391_v49 = vld [vmem:[%s4349_s7 + $0x170] sm:$0xff] }
 0x181   : > { %v1459_v6 = vpop.f32.mrf.mxu0 }
 0x182   : > { %v1748_v8 = vpop.f32.mrf.mxu1 }
 0x183   : > { %v4756_v16 = vadd.f32 %v1748_v8, %v1459_v6  ;;  %v1461_v19 = vpop.f32.mrf.mxu0  ;;  %v2720_v6 = vld [vmem:[%s4618_s27 + $0x1d8] sm:$0xff] }
 0x184   : > { %v1750_v21 = vpop.f32.mrf.mxu1  ;;  %3022 = vperm.xlu1 %4144, %v2720_v6   ;;  %3017 = vperm.xlu0 %4143, %v2719_v62  }
 0x185   : > { %v1464_v23 = vpop.f32.mrf.mxu0  ;;  %1977 = vmatmul.mubr.bf16.gmra.mxu0 %v533_v7 }
 0x186   : > { %v1753_v25 = vpop.f32.mrf.mxu1  ;;  %2266 = vmatmul.mubr.bf16.gmra.mxu1 %v535_v9  ;;  %1984 = vmatprep.mubr.bf16.mxu0 %v542_v10  ;;  %v390_v9 = vld [vmem:[%s4349_s7 + $0x168] sm:$0xff]  ;;  %v392_v10 = vld [vmem:[%s4349_s7 + $0x178] sm:$0xff] }
 0x187   : > { %v4761_v32 = vadd.f32 %v1753_v25, %v1464_v23  ;;  %v1466_v33 = vpop.f32.mrf.mxu0  ;;  %2273 = vmatprep.mubr.bf16.mxu1 %v544_v20  ;;  %v551_v20 = vunpack.c.h.s8.bf16 %v383_v34  ;;  %v558_v21 = vunpack.c.l.s8.bf16 %v390_v9  ;;  %v2722_v23 = vld [vmem:[%s4618_s27 + $0x1e8] sm:$0xff]  ;;  %v2721_v25 = vld [vmem:[%s4618_s27 + $0x1e0] sm:$0xff]  ;;  %v2724_v34 = vld [vmem:[%s4618_s27 + $0x1f8] sm:$0xff] }
 0x188   : > { %v1755_v36 = vpop.f32.mrf.mxu1  ;;  %v560_v33 = vunpack.c.l.s8.bf16 %v392_v10  ;;  %3032 = vperm.xlu1 %4144, %v2722_v23   ;;  %3027 = vperm.xlu0 %4143, %v2721_v25   ;;  %v400_v25 = vld [vmem:[%s4349_s7 + $0x1b8] sm:$0xff] }
 0x189   : > { %v1467_v38 = vpop.f32.mrf.mxu0 }
 0x18a   : > { %v1756_v42 = vpop.f32.mrf.mxu1 }
 0x18b   : > { %v4766_v52 = vadd.f32 %v1756_v42, %v1467_v38  ;;  %v1469_v54 = vpop.f32.mrf.mxu0  ;;  %v2723_v42 = vld [vmem:[%s4618_s27 + $0x1f0] sm:$0xff] }
 0x18c   : > { %v1758_v56 = vpop.f32.mrf.mxu1  ;;  %3042 = vperm.xlu1 %4144, %v2724_v34   ;;  %3037 = vperm.xlu0 %4143, %v2723_v42   ;;  %v576_v34 = vunpack.c.l.s8.bf16 %v400_v25 }
 0x18d   : > { %v1472_v61 = vpop.f32.mrf.mxu0  ;;  %1985 = vmatmul.mubr.bf16.gmra.mxu0 %v541_v41 }
 0x18e   : > { %v1761_v2 = vpop.f32.mrf.mxu1  ;;  %2274 = vmatmul.mubr.bf16.gmra.mxu1 %v543_v43  ;;  %1992 = vmatprep.mubr.bf16.mxu0 %v550_v47 }
 0x18f   : > { %v4770_v7 = vadd.f32 %v1761_v2, %v1472_v61  ;;  %v1474_v8 = vpop.f32.mrf.mxu0  ;;  %2281 = vmatprep.mubr.bf16.mxu1 %v552_v55  ;;  %v557_v55 = vunpack.c.l.s8.bf16 %v389_v22  ;;  %v559_v61 = vunpack.c.l.s8.bf16 %v391_v49  ;;  %v566_v2 = vunpack.c.h.s8.bf16 %v390_v9 }
 0x190   : > { %v1763_v4 = vpop.f32.mrf.mxu1  ;;  %v568_v8 = vunpack.c.h.s8.bf16 %v392_v10  ;;  %v565_v9 = vunpack.c.h.s8.bf16 %v389_v22  ;;  %v399_v22 = vld [vmem:[%s4349_s7 + $0x1b0] sm:$0xff] }
 0x191   : > { %v1475_v12 = vpop.f32.mrf.mxu0 }
 0x192   : > { %v1764_v19 = vpop.f32.mrf.mxu1 }
 0x193   : > { %v4776_v29 = vadd.f32 %v1764_v19, %v1475_v12  ;;  %v1477_v1 = vpop.f32.mrf.mxu0 }
 0x194   : > { %v1766_v36 = vpop.f32.mrf.mxu1 }
 0x195   : > { %v1480_v38 = vpop.f32.mrf.mxu0  ;;  %1993 = vmatmul.mubr.bf16.gmra.mxu0 %v549_v14  ;;  %v567_v36 = vunpack.c.h.s8.bf16 %v391_v49 }
 0x196   : > { %v1769_v41 = vpop.f32.mrf.mxu1  ;;  %2282 = vmatmul.mubr.bf16.gmra.mxu1 %v551_v20  ;;  %2000 = vmatprep.mubr.bf16.mxu0 %v558_v21  ;;  %v398_v21 = vld [vmem:[%s4349_s7 + $0x1a8] sm:$0xff] }
 0x197   : > { %v4781_v43 = vadd.f32 %v1769_v41, %v1480_v38  ;;  %v1482_v47 = vpop.f32.mrf.mxu0  ;;  %2289 = vmatprep.mubr.bf16.mxu1 %v560_v33  ;;  %v574_v10 = vunpack.c.l.s8.bf16 %v398_v21 }
 0x198   : > { %v1771_v50 = vpop.f32.mrf.mxu1 }
 0x199   : > { %v1483_v54 = vpop.f32.mrf.mxu0 }
 0x19a   : > { %v1772_v56 = vpop.f32.mrf.mxu1 }
 0x19b   : > { %v4784_v6 = vadd.f32 %v1772_v56, %v1483_v54  ;;  %v1485_v62 = vpop.f32.mrf.mxu0  ;;  %v397_v54 = vld [vmem:[%s4349_s7 + $0x1a0] sm:$0xff] }
 0x19c   : > { %v1774_v4 = vpop.f32.mrf.mxu1  ;;  %v573_v49 = vunpack.c.l.s8.bf16 %v397_v54 }
 0x19d   : > { %v1488_v12 = vpop.f32.mrf.mxu0  ;;  %2001 = vmatmul.mubr.bf16.gmra.mxu0 %v557_v55  ;;  %v582_v4 = vunpack.c.h.s8.bf16 %v398_v21  ;;  %v581_v21 = vunpack.c.h.s8.bf16 %v397_v54  ;;  %v407_v54 = vld [vmem:[%s4349_s7 + $0x1f0] sm:$0xff] }
 0x19e   : > { %v1777_v14 = vpop.f32.mrf.mxu1  ;;  %2290 = vmatmul.mubr.bf16.gmra.mxu1 %v559_v61  ;;  %2008 = vmatprep.mubr.bf16.mxu0 %v566_v2 }
 0x19f   : > { %v4786_v19 = vadd.f32 %v1777_v14, %v1488_v12  ;;  %v1490_v20 = vpop.f32.mrf.mxu0  ;;  %2297 = vmatprep.mubr.bf16.mxu1 %v568_v8  ;;  %v575_v8 = vunpack.c.l.s8.bf16 %v399_v22 }
 0x1a0   : > { %v1779_v23 = vpop.f32.mrf.mxu1  ;;  %v584_v20 = vunpack.c.h.s8.bf16 %v400_v25 }
 0x1a1   : > { %v1491_v1 = vpop.f32.mrf.mxu0 }
 0x1a2   : > { %v1780_v33 = vpop.f32.mrf.mxu1 }
 0x1a3   : > { %v4790_v38 = vadd.f32 %v1780_v33, %v1491_v1  ;;  %v1493_v41 = vpop.f32.mrf.mxu0 }
 0x1a4   : > { %v1782_v42 = vpop.f32.mrf.mxu1 }
 0x1a5   : > { %v1496_v47 = vpop.f32.mrf.mxu0  ;;  %2009 = vmatmul.mubr.bf16.gmra.mxu0 %v565_v9 }
 0x1a6   : > { %v1785_v50 = vpop.f32.mrf.mxu1  ;;  %2298 = vmatmul.mubr.bf16.gmra.mxu1 %v567_v36  ;;  %2016 = vmatprep.mubr.bf16.mxu0 %v574_v10  ;;  %v406_v10 = vld [vmem:[%s4349_s7 + $0x1e8] sm:$0xff] }
 0x1a7   : > { %v4793_v55 = vadd.f32 %v1785_v50, %v1496_v47  ;;  %v1498_v56 = vpop.f32.mrf.mxu0  ;;  %2305 = vmatprep.mubr.bf16.mxu1 %v576_v34  ;;  %v408_v34 = vld [vmem:[%s4349_s7 + $0x1f8] sm:$0xff]  ;;  %v583_v50 = vunpack.c.h.s8.bf16 %v399_v22  ;;  %v590_v25 = vunpack.c.l.s8.bf16 %v406_v10 }
 0x1a8   : > { %v1787_v61 = vpop.f32.mrf.mxu1 }
 0x1a9   : > { %v1499_v2 = vpop.f32.mrf.mxu0 }
 0x1aa   : > { %v1788_v62 = vpop.f32.mrf.mxu1 }
 0x1ab   : > { %v4796_v12 = vadd.f32 %v1788_v62, %v1499_v2  ;;  %v1501_v14 = vpop.f32.mrf.mxu0  ;;  %v592_v2 = vunpack.c.l.s8.bf16 %v408_v34 }
 0x1ac   : > { %v1790_v23 = vpop.f32.mrf.mxu1 }
 0x1ad   : > { %v1504_v1 = vpop.f32.mrf.mxu0  ;;  %2017 = vmatmul.mubr.bf16.gmra.mxu0 %v573_v49 }
 0x1ae   : > { %v1793_v9 = vpop.f32.mrf.mxu1  ;;  %2306 = vmatmul.mubr.bf16.gmra.mxu1 %v575_v8  ;;  %2024 = vmatprep.mubr.bf16.mxu0 %v582_v4  ;;  %v405_v4 = vld [vmem:[%s4349_s7 + $0x1e0] sm:$0xff] }
 0x1af   : > { %v4798_v33 = vadd.f32 %v1793_v9, %v1504_v1  ;;  %v1506_v36 = vpop.f32.mrf.mxu0  ;;  %2313 = vmatprep.mubr.bf16.mxu1 %v584_v20  ;;  %v589_v22 = vunpack.c.l.s8.bf16 %v405_v4 }
 0x1b0   : > { %v1795_v41 = vpop.f32.mrf.mxu1  ;;  %v591_v36 = vunpack.c.l.s8.bf16 %v407_v54 }
 0x1b1   : > { %v1507_v42 = vpop.f32.mrf.mxu0  ;;  %v598_v41 = vunpack.c.h.s8.bf16 %v406_v10  ;;  %v597_v10 = vunpack.c.h.s8.bf16 %v405_v4  ;;  %v415_v4 = vld [vmem:[%s4349_s7 + $0x230] sm:$0xff] }
 0x1b2   : > { %v1796_v47 = vpop.f32.mrf.mxu1 }
 0x1b3   : > { %v4802_v56 = vadd.f32 %v1796_v47, %v1507_v42  ;;  %v1509_v61 = vpop.f32.mrf.mxu0  ;;  %v600_v47 = vunpack.c.h.s8.bf16 %v408_v34 }
 0x1b4   : > { %v1798_v49 = vpop.f32.mrf.mxu1 }
 0x1b5   : > { %v1512_v62 = vpop.f32.mrf.mxu0  ;;  %2025 = vmatmul.mubr.bf16.gmra.mxu0 %v581_v21 }
 0x1b6   : > { %v1801_v8 = vpop.f32.mrf.mxu1  ;;  %2314 = vmatmul.mubr.bf16.gmra.mxu1 %v583_v50  ;;  %2032 = vmatprep.mubr.bf16.mxu0 %v590_v25 }
 0x1b7   : > { %v4805_v14 = vadd.f32 %v1801_v8, %v1512_v62  ;;  %v1514_v20 = vpop.f32.mrf.mxu0  ;;  %2321 = vmatprep.mubr.bf16.mxu1 %v592_v2  ;;  %v414_v62 = vld [vmem:[%s4349_s7 + $0x228] sm:$0xff] }
 0x1b8   : > { %v1803_v23 = vpop.f32.mrf.mxu1  ;;  %v416_v20 = vld [vmem:[%s4349_s7 + $0x238] sm:$0xff]  ;;  %v606_v34 = vunpack.c.l.s8.bf16 %v414_v62 }
 0x1b9   : > { %5093 = vst [vmem:[#allocation3_spill] sm:$0xff] %v4805_v14  ;;  %v1515_v1 = vpop.f32.mrf.mxu0 }
 0x1ba   : > { %v1804_v9 = vpop.f32.mrf.mxu1 }
 0x1bb   : > { %v4808_v42 = vadd.f32 %v1804_v9, %v1515_v1  ;;  %v1517_v21 = vpop.f32.mrf.mxu0  ;;  %v599_v9 = vunpack.c.h.s8.bf16 %v407_v54 }
 0x1bc   : > { %v1806_v50 = vpop.f32.mrf.mxu1 }
 0x1bd   : > { %5094 = vst [vmem:[#allocation4_spill] sm:$0xff] %v4808_v42  ;;  %v1520_v25 = vpop.f32.mrf.mxu0  ;;  %2033 = vmatmul.mubr.bf16.gmra.mxu0 %v589_v22  ;;  %v608_v50 = vunpack.c.l.s8.bf16 %v416_v20 }
 0x1be   : > { %v1809_v61 = vpop.f32.mrf.mxu1  ;;  %2322 = vmatmul.mubr.bf16.gmra.mxu1 %v591_v36  ;;  %2040 = vmatprep.mubr.bf16.mxu0 %v598_v41 }
 0x1bf   : > { %v4810_v2 = vadd.f32 %v1809_v61, %v1520_v25  ;;  %v1522_v49 = vpop.f32.mrf.mxu0  ;;  %2329 = vmatprep.mubr.bf16.mxu1 %v600_v47  ;;  %v413_v47 = vld [vmem:[%s4349_s7 + $0x220] sm:$0xff] }
 0x1c0   : > { %v1811_v8 = vpop.f32.mrf.mxu1  ;;  %v605_v54 = vunpack.c.l.s8.bf16 %v413_v47 }
 0x1c1   : > { %5095 = vst [vmem:[#allocation5_spill] sm:$0xff] %v4810_v2  ;;  %v1523_v23 = vpop.f32.mrf.mxu0 }
 0x1c2   : > { %v1812_v1 = vpop.f32.mrf.mxu1 }
 0x1c3   : > { %v4814_v21 = vadd.f32 %v1812_v1, %v1523_v23  ;;  %v1525_v22 = vpop.f32.mrf.mxu0  ;;  %v607_v1 = vunpack.c.l.s8.bf16 %v415_v4 }
 0x1c4   : > { %v1814_v36 = vpop.f32.mrf.mxu1  ;;  %v614_v22 = vunpack.c.h.s8.bf16 %v414_v62  ;;  %v613_v62 = vunpack.c.h.s8.bf16 %v413_v47  ;;  %v423_v47 = vld [vmem:[%s4349_s7 + $0x270] sm:$0xff] }
 0x1c5   : > { %5096 = vst [vmem:[#allocation6_spill] sm:$0xff] %v4814_v21  ;;  %v1528_v41 = vpop.f32.mrf.mxu0  ;;  %2041 = vmatmul.mubr.bf16.gmra.mxu0 %v597_v10  ;;  %v616_v21 = vunpack.c.h.s8.bf16 %v416_v20 }
 0x1c6   : > { %v1817_v25 = vpop.f32.mrf.mxu1  ;;  %2330 = vmatmul.mubr.bf16.gmra.mxu1 %v599_v9  ;;  %2048 = vmatprep.mubr.bf16.mxu0 %v606_v34 }
 0x1c7   : > { %v4817_v61 = vadd.f32 %v1817_v25, %v1528_v41  ;;  %v1530_v49 = vpop.f32.mrf.mxu0  ;;  %2337 = vmatprep.mubr.bf16.mxu1 %v608_v50 }
 0x1c8   : > { %v1819_v8 = vpop.f32.mrf.mxu1  ;;  %v422_v49 = vld [vmem:[%s4349_s7 + $0x268] sm:$0xff] }
 0x1c9   : > { %5097 = vst [vmem:[#allocation7_spill] sm:$0xff] %v4817_v61  ;;  %v1531_v2 = vpop.f32.mrf.mxu0  ;;  %v424_v61 = vld [vmem:[%s4349_s7 + $0x278] sm:$0xff]  ;;  %v622_v20 = vunpack.c.l.s8.bf16 %v422_v49 }
 0x1ca   : > { %v1820_v23 = vpop.f32.mrf.mxu1 }
 0x1cb   : > { %v4820_v36 = vadd.f32 %v1820_v23, %v1531_v2  ;;  %v1533_v10 = vpop.f32.mrf.mxu0  ;;  %v615_v23 = vunpack.c.h.s8.bf16 %v415_v4 }
 0x1cc   : > { %v1822_v9 = vpop.f32.mrf.mxu1 }
 0x1cd   : > { %5098 = vst [vmem:[#allocation8_spill] sm:$0xff] %v4820_v36  ;;  %v1536_v34 = vpop.f32.mrf.mxu0  ;;  %2049 = vmatmul.mubr.bf16.gmra.mxu0 %v605_v54  ;;  %v624_v9 = vunpack.c.l.s8.bf16 %v424_v61 }
 0x1ce   : > { %v1825_v41 = vpop.f32.mrf.mxu1  ;;  %2338 = vmatmul.mubr.bf16.gmra.mxu1 %v607_v1  ;;  %2056 = vmatprep.mubr.bf16.mxu0 %v614_v22 }
 0x1cf   : > { %v4822_v50 = vadd.f32 %v1825_v41, %v1536_v34  ;;  %v1538_v25 = vpop.f32.mrf.mxu0  ;;  %2345 = vmatprep.mubr.bf16.mxu1 %v616_v21  ;;  %v421_v21 = vld [vmem:[%s4349_s7 + $0x260] sm:$0xff] }
 0x1d0   : > { %v1827_v8 = vpop.f32.mrf.mxu1  ;;  %v621_v4 = vunpack.c.l.s8.bf16 %v421_v21 }
 0x1d1   : > { %5099 = vst [vmem:[#allocation9_spill] sm:$0xff] %v4822_v50  ;;  %v1539_v42 = vpop.f32.mrf.mxu0 }
 0x1d2   : > { %v1828_v2 = vpop.f32.mrf.mxu1 }
 0x1d3   : > { %v4826_v10 = vadd.f32 %v1828_v2, %v1539_v42  ;;  %v1541_v54 = vpop.f32.mrf.mxu0  ;;  %v623_v2 = vunpack.c.l.s8.bf16 %v423_v47 }
 0x1d4   : > { %v1830_v1 = vpop.f32.mrf.mxu1  ;;  %v630_v54 = vunpack.c.h.s8.bf16 %v422_v49  ;;  %v629_v49 = vunpack.c.h.s8.bf16 %v421_v21  ;;  %v431_v21 = vld [vmem:[%s4349_s7 + $0x2b0] sm:$0xff] }
 0x1d5   : > { %5100 = vst [vmem:[#allocation10_spill] sm:$0xff] %v4826_v10  ;;  %v1544_v22 = vpop.f32.mrf.mxu0  ;;  %2057 = vmatmul.mubr.bf16.gmra.mxu0 %v613_v62  ;;  %v632_v10 = vunpack.c.h.s8.bf16 %v424_v61 }
 0x1d6   : > { %v1833_v34 = vpop.f32.mrf.mxu1  ;;  %2346 = vmatmul.mubr.bf16.gmra.mxu1 %v615_v23  ;;  %2064 = vmatprep.mubr.bf16.mxu0 %v622_v20 }
 0x1d7   : > { %v4829_v41 = vadd.f32 %v1833_v34, %v1544_v22  ;;  %v1546_v25 = vpop.f32.mrf.mxu0  ;;  %2353 = vmatprep.mubr.bf16.mxu1 %v624_v9 }
 0x1d8   : > { %v1835_v8 = vpop.f32.mrf.mxu1  ;;  %v430_v25 = vld [vmem:[%s4349_s7 + $0x2a8] sm:$0xff] }
 0x1d9   : > { %5101 = vst [vmem:[#allocation11_spill] sm:$0xff] %v4829_v41  ;;  %v1547_v50 = vpop.f32.mrf.mxu0  ;;  %v432_v41 = vld [vmem:[%s4349_s7 + $0x2b8] sm:$0xff]  ;;  %v638_v61 = vunpack.c.l.s8.bf16 %v430_v25 }
 0x1da   : > { %v1836_v42 = vpop.f32.mrf.mxu1 }
 0x1db   : > { %v4832_v1 = vadd.f32 %v1836_v42, %v1547_v50  ;;  %v1549_v62 = vpop.f32.mrf.mxu0  ;;  %v631_v42 = vunpack.c.h.s8.bf16 %v423_v47 }
 0x1dc   : > { %v1838_v23 = vpop.f32.mrf.mxu1 }
 0x1dd   : > { %5102 = vst [vmem:[#allocation12_spill] sm:$0xff] %v4832_v1  ;;  %v1552_v20 = vpop.f32.mrf.mxu0  ;;  %2065 = vmatmul.mubr.bf16.gmra.mxu0 %v621_v4  ;;  %v640_v23 = vunpack.c.l.s8.bf16 %v432_v41 }
 0x1de   : > { %v1841_v22 = vpop.f32.mrf.mxu1  ;;  %2354 = vmatmul.mubr.bf16.gmra.mxu1 %v623_v2  ;;  %2072 = vmatprep.mubr.bf16.mxu0 %v630_v54 }
 0x1df   : > { %v4834_v9 = vadd.f32 %v1841_v22, %v1552_v20  ;;  %v1554_v34 = vpop.f32.mrf.mxu0  ;;  %2361 = vmatprep.mubr.bf16.mxu1 %v632_v10  ;;  %v429_v10 = vld [vmem:[%s4349_s7 + $0x2a0] sm:$0xff] }
 0x1e0   : > { %v1843_v8 = vpop.f32.mrf.mxu1  ;;  %v637_v47 = vunpack.c.l.s8.bf16 %v429_v10 }
 0x1e1   : > { %5103 = vst [vmem:[#allocation13_spill] sm:$0xff] %v4834_v9  ;;  %v1555_v36 = vpop.f32.mrf.mxu0 }
 0x1e2   : > { %v1844_v50 = vpop.f32.mrf.mxu1 }
 0x1e3   : > { %v4838_v62 = vadd.f32 %v1844_v50, %v1555_v36  ;;  %v1557_v4 = vpop.f32.mrf.mxu0  ;;  %v639_v50 = vunpack.c.l.s8.bf16 %v431_v21 }
 0x1e4   : > { %v1846_v2 = vpop.f32.mrf.mxu1  ;;  %v646_v4 = vunpack.c.h.s8.bf16 %v430_v25  ;;  %v645_v25 = vunpack.c.h.s8.bf16 %v429_v10  ;;  %v439_v10 = vld [vmem:[%s4349_s7 + $0x2f0] sm:$0xff] }
 0x1e5   : > { %5104 = vst [vmem:[#allocation14_spill] sm:$0xff] %v4838_v62  ;;  %v1560_v54 = vpop.f32.mrf.mxu0  ;;  %2073 = vmatmul.mubr.bf16.gmra.mxu0 %v629_v49  ;;  %v648_v62 = vunpack.c.h.s8.bf16 %v432_v41 }
 0x1e6   : > { %v1849_v20 = vpop.f32.mrf.mxu1  ;;  %2362 = vmatmul.mubr.bf16.gmra.mxu1 %v631_v42  ;;  %2080 = vmatprep.mubr.bf16.mxu0 %v638_v61 }
 0x1e7   : > { %v4841_v22 = vadd.f32 %v1849_v20, %v1560_v54  ;;  %v1562_v34 = vpop.f32.mrf.mxu0  ;;  %2369 = vmatprep.mubr.bf16.mxu1 %v640_v23 }
 0x1e8   : > { %v1851_v8 = vpop.f32.mrf.mxu1  ;;  %v438_v34 = vld [vmem:[%s4349_s7 + $0x2e8] sm:$0xff] }
 0x1e9   : > { %5105 = vst [vmem:[#allocation15_spill] sm:$0xff] %v4841_v22  ;;  %v1563_v9 = vpop.f32.mrf.mxu0  ;;  %v440_v22 = vld [vmem:[%s4349_s7 + $0x2f8] sm:$0xff]  ;;  %v654_v41 = vunpack.c.l.s8.bf16 %v438_v34 }
 0x1ea   : > { %v1852_v36 = vpop.f32.mrf.mxu1 }
 0x1eb   : > { %v4844_v2 = vadd.f32 %v1852_v36, %v1563_v9  ;;  %v1565_v49 = vpop.f32.mrf.mxu0  ;;  %v647_v36 = vunpack.c.h.s8.bf16 %v431_v21 }
 0x1ec   : > { %v1854_v42 = vpop.f32.mrf.mxu1 }
 0x1ed   : > { %5106 = vst [vmem:[#allocation16_spill] sm:$0xff] %v4844_v2  ;;  %v1568_v61 = vpop.f32.mrf.mxu0  ;;  %2081 = vmatmul.mubr.bf16.gmra.mxu0 %v637_v47  ;;  %v656_v42 = vunpack.c.l.s8.bf16 %v440_v22 }
 0x1ee   : > { %v1857_v54 = vpop.f32.mrf.mxu1  ;;  %2370 = vmatmul.mubr.bf16.gmra.mxu1 %v639_v50  ;;  %2088 = vmatprep.mubr.bf16.mxu0 %v646_v4 }
 0x1ef   : > { %v4846_v23 = vadd.f32 %v1857_v54, %v1568_v61  ;;  %v1570_v20 = vpop.f32.mrf.mxu0  ;;  %2377 = vmatprep.mubr.bf16.mxu1 %v648_v62  ;;  %v437_v62 = vld [vmem:[%s4349_s7 + $0x2e0] sm:$0xff] }
 0x1f0   : > { %v1859_v8 = vpop.f32.mrf.mxu1  ;;  %v653_v21 = vunpack.c.l.s8.bf16 %v437_v62 }
 0x1f1   : > { %5107 = vst [vmem:[#allocation17_spill] sm:$0xff] %v4846_v23  ;;  %v1571_v1 = vpop.f32.mrf.mxu0 }
 0x1f2   : > { %v1860_v9 = vpop.f32.mrf.mxu1 }
 0x1f3   : > { %v4850_v49 = vadd.f32 %v1860_v9, %v1571_v1  ;;  %v1573_v47 = vpop.f32.mrf.mxu0  ;;  %v655_v9 = vunpack.c.l.s8.bf16 %v439_v10 }
 0x1f4   : > { %v1862_v50 = vpop.f32.mrf.mxu1  ;;  %v662_v47 = vunpack.c.h.s8.bf16 %v438_v34  ;;  %v661_v34 = vunpack.c.h.s8.bf16 %v437_v62  ;;  %v447_v62 = vld [vmem:[%s4349_s7 + $0x330] sm:$0xff] }
 0x1f5   : > { %5108 = vst [vmem:[#allocation18_spill] sm:$0xff] %v4850_v49  ;;  %v1576_v4 = vpop.f32.mrf.mxu0  ;;  %2089 = vmatmul.mubr.bf16.gmra.mxu0 %v645_v25  ;;  %v664_v49 = vunpack.c.h.s8.bf16 %v440_v22 }
 0x1f6   : > { %v1865_v61 = vpop.f32.mrf.mxu1  ;;  %2378 = vmatmul.mubr.bf16.gmra.mxu1 %v647_v36  ;;  %2096 = vmatprep.mubr.bf16.mxu0 %v654_v41 }
 0x1f7   : > { %v4853_v54 = vadd.f32 %v1865_v61, %v1576_v4  ;;  %v1578_v20 = vpop.f32.mrf.mxu0  ;;  %2385 = vmatprep.mubr.bf16.mxu1 %v656_v42 }
 0x1f8   : > { %v1867_v8 = vpop.f32.mrf.mxu1  ;;  %v446_v20 = vld [vmem:[%s4349_s7 + $0x328] sm:$0xff] }
 0x1f9   : > { %5109 = vst [vmem:[#allocation19_spill] sm:$0xff] %v4853_v54  ;;  %v1579_v23 = vpop.f32.mrf.mxu0  ;;  %v448_v54 = vld [vmem:[%s4349_s7 + $0x338] sm:$0xff]  ;;  %v670_v22 = vunpack.c.l.s8.bf16 %v446_v20 }
 0x1fa   : > { %v1868_v1 = vpop.f32.mrf.mxu1 }
 0x1fb   : > { %v4856_v50 = vadd.f32 %v1868_v1, %v1579_v23  ;;  %v1581_v25 = vpop.f32.mrf.mxu0  ;;  %v663_v1 = vunpack.c.h.s8.bf16 %v439_v10 }
 0x1fc   : > { %v1870_v36 = vpop.f32.mrf.mxu1 }
 0x1fd   : > { %5110 = vst [vmem:[#allocation20_spill] sm:$0xff] %v4856_v50  ;;  %v1584_v41 = vpop.f32.mrf.mxu0  ;;  %2097 = vmatmul.mubr.bf16.gmra.mxu0 %v653_v21  ;;  %v672_v36 = vunpack.c.l.s8.bf16 %v448_v54 }
 0x1fe   : > { %v1873_v4 = vpop.f32.mrf.mxu1  ;;  %2386 = vmatmul.mubr.bf16.gmra.mxu1 %v655_v9  ;;  %2104 = vmatprep.mubr.bf16.mxu0 %v662_v47 }
 0x1ff   : > { %v4858_v42 = vadd.f32 %v1873_v4, %v1584_v41  ;;  %v1586_v61 = vpop.f32.mrf.mxu0  ;;  %2393 = vmatprep.mubr.bf16.mxu1 %v664_v49  ;;  %v445_v49 = vld [vmem:[%s4349_s7 + $0x320] sm:$0xff] }
 0x200   : > { %v1875_v8 = vpop.f32.mrf.mxu1  ;;  %v669_v10 = vunpack.c.l.s8.bf16 %v445_v49 }
 0x201   : > { %5111 = vst [vmem:[#allocation21_spill] sm:$0xff] %v4858_v42  ;;  %v1587_v2 = vpop.f32.mrf.mxu0 }
 0x202   : > { %v1876_v23 = vpop.f32.mrf.mxu1 }
 0x203   : > { %v4862_v25 = vadd.f32 %v1876_v23, %v1587_v2  ;;  %v1589_v21 = vpop.f32.mrf.mxu0  ;;  %v671_v2 = vunpack.c.l.s8.bf16 %v447_v62  ;;  %v678_v23 = vunpack.c.h.s8.bf16 %v446_v20 }
 0x204   : > { %v1878_v9 = vpop.f32.mrf.mxu1 }
 0x205   : > { %5112 = vst [vmem:[#allocation22_spill] sm:$0xff] %v4862_v25  ;;  %v1592_v47 = vpop.f32.mrf.mxu0  ;;  %2105 = vmatmul.mubr.bf16.gmra.mxu0 %v661_v34 }
 0x206   : > { %v1881_v41 = vpop.f32.mrf.mxu1  ;;  %2394 = vmatmul.mubr.bf16.gmra.mxu1 %v663_v1  ;;  %2112 = vmatprep.mubr.bf16.mxu0 %v670_v22  ;;  %v680_v1 = vunpack.c.h.s8.bf16 %v448_v54 }
 0x207   : > { %v4865_v4 = vadd.f32 %v1881_v41, %v1592_v47  ;;  %v1594_v61 = vpop.f32.mrf.mxu0  ;;  %2401 = vmatprep.mubr.bf16.mxu1 %v672_v36  ;;  %v2728_v47 = vpop.permute.xlu0 %2727 }
 0x208   : > { %v1883_v8 = vpop.f32.mrf.mxu1 }
 0x209   : > { %5113 = vst [vmem:[#allocation23_spill] sm:$0xff] %v4865_v4  ;;  %v1595_v42 = vpop.f32.mrf.mxu0  ;;  %v454_v8 = vld [vmem:[%s4349_s7 + $0x368] sm:$0xff] }
 0x20a   : > { %v1884_v50 = vpop.f32.mrf.mxu1 }
 0x20b   : > { %v4868_v21 = vadd.f32 %v1884_v50, %v1595_v42  ;;  %v1597_v34 = vpop.f32.mrf.mxu0  ;;  %v456_v42 = vld [vmem:[%s4349_s7 + $0x378] sm:$0xff] }
 0x20c   : > { %v1886_v22 = vpop.f32.mrf.mxu1  ;;  %v679_v34 = vunpack.c.h.s8.bf16 %v447_v62  ;;  %v453_v62 = vld [vmem:[%s4349_s7 + $0x360] sm:$0xff] }
 0x20d   : > { %5114 = vst [vmem:[#allocation24_spill] sm:$0xff] %v4868_v21  ;;  %v1922_v9 = vpop.f32.mrf.mxu0  ;;  %2113 = vmatmul.mubr.bf16.gmra.mxu0 %v669_v10  ;;  %v677_v10 = vunpack.c.h.s8.bf16 %v445_v49  ;;  %v3109_v22 = vld [vmem:[%s4877_s30] sm:$0xff]  ;;  %v688_v21 = vunpack.c.l.s8.bf16 %v456_v42 }
 0x20e   : > { %v1923_v36 = vadd.f32 %v1922_v9, %v4603_v31  ;;  %v2211_v41 = vpop.f32.mrf.mxu1  ;;  %2402 = vmatmul.mubr.bf16.gmra.mxu1 %v671_v2  ;;  %2120 = vmatprep.mubr.bf16.mxu0 %v678_v23 }
 0x20f   : > { %v1924_v61 = vpop.f32.mrf.mxu0  ;;  %2409 = vmatprep.mubr.bf16.mxu1 %v680_v1  ;;  %v686_v1 = vunpack.c.l.s8.bf16 %v454_v8 }
 0x210   : > { %v2212_v54 = vadd.f32 %v2211_v41, %v1923_v36  ;;  %v2213_v50 = vpop.f32.mrf.mxu1  ;;  %v2733_v61 = vpop.permute.xlu0 %2732  ;;  %v3110_v41 = vld [vmem:[%s4877_s30 + $0x8] sm:$0xff] }
 0x211   : > { %v1925_v20 = vpop.f32.mrf.mxu0 }
 0x212   : > { %v3045_v31 = vmul.f32 %v2728_v47, %v2212_v54  ;;  %v1926_v2 = vadd.f32 %v1925_v20, %v4610_v40  ;;  %v2214_v23 = vpop.f32.mrf.mxu1  ;;  %v4886_v54 = vld [vmem:[%s4349_s7 + $0x370] sm:$0xff]  ;;  %v2738_v20 = vpop.permute.xlu1 %2737 }
 0x213   : > { %v1927_v9 = vpop.f32.mrf.mxu0 }
 0x214   : > { %v2215_v4 = vadd.f32 %v2214_v23, %v1926_v2  ;;  %v2216_v36 = vpop.f32.mrf.mxu1  ;;  %v3173_v25 = vadd.f32 %v3109_v22, %v3045_v31 }
 0x215   : > { %v1930_v50 = vpop.f32.mrf.mxu0  ;;  %2121 = vmatmul.mubr.bf16.gmra.mxu0 %v677_v10  ;;  %v685_v10 = vunpack.c.l.s8.bf16 %v453_v62 }
 0x216   : > { %v3046_v49 = vmul.f32 %v2733_v61, %v2215_v4  ;;  %v1931_v47 = vadd.f32 %v1930_v50, %v4622_v48  ;;  %v2219_v40 = vpop.f32.mrf.mxu1  ;;  %2410 = vmatmul.mubr.bf16.gmra.mxu1 %v679_v34  ;;  %2128 = vmatprep.mubr.bf16.mxu0 %v686_v1  ;;  %v687_v4 = vunpack.c.l.s8.bf16 %v4886_v54  ;;  %v694_v48 = vunpack.c.h.s8.bf16 %v454_v8  ;;  %v2743_v8 = vpop.permute.xlu1 %2742 }
 0x217   : > { %v1932_v9 = vpop.f32.mrf.mxu0  ;;  %2417 = vmatprep.mubr.bf16.mxu1 %v688_v21  ;;  %v3237_v31 = vmax.f32 %v3173_v25, 0.0  ;;  %v3111_v21 = vld [vmem:[%s4877_s30 + $0x10] sm:$0xff]  ;;  %v696_v50 = vunpack.c.h.s8.bf16 %v456_v42  ;;  %v3112_v25 = vld [vmem:[%s4877_s30 + $0x18] sm:$0xff] }
 0x218   : > { %v3174_v2 = vadd.f32 %v3110_v41, %v3046_v49  ;;  %v2220_v23 = vadd.f32 %v2219_v40, %v1931_v47  ;;  %v2221_v36 = vpop.f32.mrf.mxu1 }
 0x219   : > { %v1933_v14 = vpop.f32.mrf.mxu0 }
 0x21a   : > { %v3238_v34 = vmax.f32 %v3174_v2, 0.0  ;;  %v3047_v1 = vmul.f32 %v2738_v20, %v2220_v23  ;;  %v1934_v22 = vadd.f32 %v1933_v14, %v4627_v59  ;;  %v2222_v61 = vpop.f32.mrf.mxu1  ;;  %v4901_v23 = vld [vmem:[%s4349_s7 + $0x3a8] sm:$0xff] }
 0x21b   : > { %v1935_v41 = vpop.f32.mrf.mxu0 }
 0x21c   : > { %v3930_v49 = vpack.c.bf16 %v3238_v34, %v3237_v31  ;;  %v2223_v47 = vadd.f32 %v2222_v61, %v1934_v22  ;;  %v2224_v40 = vpop.f32.mrf.mxu1  ;;  %v3175_v59 = vadd.f32 %v3111_v21, %v3047_v1  ;;  %v4904_v22 = vld [vmem:[%s4349_s7 + $0x3b8] sm:$0xff]  ;;  %v2748_v61 = vpop.permute.xlu0 %2747  ;;  %v693_v1 = vunpack.c.h.s8.bf16 %v453_v62 }
 0x21d   : > { %v1938_v20 = vpop.f32.mrf.mxu0  ;;  %2129 = vmatmul.mubr.bf16.gmra.mxu0 %v685_v10  ;;  %v695_v21 = vunpack.c.h.s8.bf16 %v4886_v54  ;;  %v3114_v54 = vld [vmem:[%s4877_s30 + $0x28] sm:$0xff] }
 0x21e   : > { %3931 = vst [vmem:[%s4894_s9] sm:$0xff] %v3930_v49   ;;  %v3048_v14 = vmul.f32 %v2743_v8, %v2223_v47  ;;  %v1939_v9 = vadd.f32 %v1938_v20, %v4630_v3  ;;  %v2227_v2 = vpop.f32.mrf.mxu1  ;;  %2418 = vmatmul.mubr.bf16.gmra.mxu1 %v687_v4  ;;  %2136 = vmatprep.mubr.bf16.mxu0 %v694_v48  ;;  %v702_v3 = vunpack.c.l.s8.bf16 %v4901_v23  ;;  %v3239_v4 = vmax.f32 %v3175_v59, 0.0  ;;  %v3113_v47 = vld [vmem:[%s4877_s30 + $0x20] sm:$0xff] }
 0x21f   : > { %v1940_v36 = vpop.f32.mrf.mxu0  ;;  %2425 = vmatprep.mubr.bf16.mxu1 %v696_v50  ;;  %v704_v8 = vunpack.c.l.s8.bf16 %v4904_v22 }
 0x220   : > { %v3176_v42 = vadd.f32 %v3112_v25, %v3048_v14  ;;  %v2228_v31 = vadd.f32 %v2227_v2, %v1939_v9  ;;  %v2229_v34 = vpop.f32.mrf.mxu1  ;;  %v2753_v14 = vpop.permute.xlu1 %2752 }
 0x221   : > { %v1941_v10 = vpop.f32.mrf.mxu0 }
 0x222   : > { %v3240_v48 = vmax.f32 %v3176_v42, 0.0  ;;  %v3049_v41 = vmul.f32 %v2748_v61, %v2228_v31  ;;  %v1942_v49 = vadd.f32 %v1941_v10, %v4636_v15  ;;  %v2230_v50 = vpop.f32.mrf.mxu1  ;;  %v461_v42 = vld [vmem:[%s4349_s7 + $0x3a0] sm:$0xff]  ;;  %v4916_v31 = vld [vmem:[%s4349_s7 + $0x3b0] sm:$0xff] }
 0x223   : > { %v1943_v40 = vpop.f32.mrf.mxu0 }
 0x224   : > { %v3935_v25 = vpack.c.bf16 %v3240_v48, %v3239_v4  ;;  %v2231_v20 = vadd.f32 %v2230_v50, %v1942_v49  ;;  %v2232_v62 = vpop.f32.mrf.mxu1  ;;  %v3177_v59 = vadd.f32 %v3113_v47, %v3049_v41  ;;  %v2758_v48 = vpop.permute.xlu0 %2757  ;;  %v703_v41 = vunpack.c.l.s8.bf16 %v4916_v31 }
 0x225   : > { %v1946_v9 = vpop.f32.mrf.mxu0  ;;  %2137 = vmatmul.mubr.bf16.gmra.mxu0 %v693_v1  ;;  %v701_v1 = vunpack.c.l.s8.bf16 %v461_v42 }
 0x226   : > { %4087 = vst [vmem:[%s4894_s9 + $0x8] sm:$0xff] %v3935_v25   ;;  %v3050_v2 = vmul.f32 %v2753_v14, %v2231_v20  ;;  %v1947_v36 = vadd.f32 %v1946_v9, %v4641_v24  ;;  %v2235_v15 = vpop.f32.mrf.mxu1  ;;  %2426 = vmatmul.mubr.bf16.gmra.mxu1 %v695_v21  ;;  %2144 = vmatprep.mubr.bf16.mxu0 %v702_v3  ;;  %v710_v24 = vunpack.c.h.s8.bf16 %v4901_v23  ;;  %v3241_v21 = vmax.f32 %v3177_v59, 0.0  ;;  %v3115_v25 = vld [vmem:[%s4877_s30 + $0x30] sm:$0xff]  ;;  %v2763_v9 = vpop.permute.xlu1 %2762 }
 0x227   : > { %v1948_v34 = vpop.f32.mrf.mxu0  ;;  %2433 = vmatprep.mubr.bf16.mxu1 %v704_v8  ;;  %v712_v20 = vunpack.c.h.s8.bf16 %v4904_v22 }
 0x228   : > { %v3178_v61 = vadd.f32 %v3114_v54, %v3050_v2  ;;  %v2236_v10 = vadd.f32 %v2235_v15, %v1947_v36  ;;  %v2237_v4 = vpop.f32.mrf.mxu1  ;;  %v3116_v2 = vld [vmem:[%s4877_s30 + $0x38] sm:$0xff]  ;;  %v4927_v34 = vld [vmem:[%s4349_s7 + $0x3e8] sm:$0xff] }
 0x229   : > { %v1949_v49 = vpop.f32.mrf.mxu0 }
 0x22a   : > { %v3242_v3 = vmax.f32 %v3178_v61, 0.0  ;;  %v3051_v50 = vmul.f32 %v2758_v48, %v2236_v10  ;;  %v1950_v47 = vadd.f32 %v1949_v49, %v4646_v35  ;;  %v2238_v40 = vpop.f32.mrf.mxu1  ;;  %v4930_v48 = vld [vmem:[%s4349_s7 + $0x3f8] sm:$0xff]  ;;  %v2768_v49 = vpop.permute.xlu0 %2767 }
 0x22b   : > { %v1951_v8 = vpop.f32.mrf.mxu0 }
 0x22c   : > { %v3940_v62 = vpack.c.bf16 %v3242_v3, %v3241_v21  ;;  %v2239_v14 = vadd.f32 %v2238_v40, %v1950_v47  ;;  %v2240_v54 = vpop.f32.mrf.mxu1  ;;  %v3179_v23 = vadd.f32 %v3115_v25, %v3051_v50  ;;  %v709_v21 = vunpack.c.h.s8.bf16 %v461_v42  ;;  %v3117_v25 = vld [vmem:[%s4877_s30 + $0x40] sm:$0xff] }
 0x22d   : > { %v1954_v36 = vpop.f32.mrf.mxu0  ;;  %2145 = vmatmul.mubr.bf16.gmra.mxu0 %v701_v1  ;;  %v711_v3 = vunpack.c.h.s8.bf16 %v4916_v31  ;;  %v2773_v54 = vpop.permute.xlu1 %2772  ;;  %v3118_v31 = vld [vmem:[%s4877_s30 + $0x48] sm:$0xff] }
 0x22e   : > { %4088 = vst [vmem:[%s4894_s9 + $0x10] sm:$0xff] %v3940_v62   ;;  %v3052_v59 = vmul.f32 %v2763_v9, %v2239_v14  ;;  %v1955_v15 = vadd.f32 %v1954_v36, %v4650_v44  ;;  %v2243_v35 = vpop.f32.mrf.mxu1  ;;  %2434 = vmatmul.mubr.bf16.gmra.mxu1 %v703_v41  ;;  %2152 = vmatprep.mubr.bf16.mxu0 %v710_v24  ;;  %v718_v44 = vunpack.c.l.s8.bf16 %v4927_v34  ;;  %v3243_v41 = vmax.f32 %v3179_v23, 0.0 }
 0x22f   : > { %v1956_v61 = vpop.f32.mrf.mxu0  ;;  %2441 = vmatprep.mubr.bf16.mxu1 %v712_v20  ;;  %v720_v20 = vunpack.c.l.s8.bf16 %v4930_v48 }
 0x230   : > { %v3180_v22 = vadd.f32 %v3116_v2, %v3052_v59  ;;  %v2244_v10 = vadd.f32 %v2243_v35, %v1955_v15  ;;  %v2245_v4 = vpop.f32.mrf.mxu1  ;;  %v469_v59 = vld [vmem:[%s4349_s7 + $0x3e0] sm:$0xff]  ;;  %v471_v15 = vld [vmem:[%s4349_s7 + $0x3f0] sm:$0xff] }
 0x231   : > { %v1957_v1 = vpop.f32.mrf.mxu0  ;;  %v2778_v4 = vpop.permute.xlu0 %2777 }
 0x232   : > { %v3244_v24 = vmax.f32 %v3180_v22, 0.0  ;;  %v3053_v50 = vmul.f32 %v2768_v49, %v2244_v10  ;;  %v1958_v47 = vadd.f32 %v1957_v1, %v4656_v57  ;;  %v2246_v40 = vpop.f32.mrf.mxu1  ;;  %v717_v1 = vunpack.c.l.s8.bf16 %v469_v59 }
 0x233   : > { %v1959_v8 = vpop.f32.mrf.mxu0 }
 0x234   : > { %v3945_v62 = vpack.c.bf16 %v3244_v24, %v3243_v41  ;;  %v2247_v14 = vadd.f32 %v2246_v40, %v1958_v47  ;;  %v2248_v42 = vpop.f32.mrf.mxu1  ;;  %v3181_v2 = vadd.f32 %v3117_v25, %v3053_v50  ;;  %v726_v41 = vunpack.c.h.s8.bf16 %v4927_v34  ;;  %v3119_v47 = vld [vmem:[%s4877_s30 + $0x50] sm:$0xff] }
 0x235   : > { %v1962_v9 = vpop.f32.mrf.mxu0  ;;  %2153 = vmatmul.mubr.bf16.gmra.mxu0 %v709_v21  ;;  %v719_v21 = vunpack.c.l.s8.bf16 %v471_v15  ;;  %v728_v25 = vunpack.c.h.s8.bf16 %v4930_v48  ;;  %v3120_v42 = vld [vmem:[%s4877_s30 + $0x58] sm:$0xff] }
 0x236   : > { %4089 = vst [vmem:[%s4894_s9 + $0x18] sm:$0xff] %v3945_v62   ;;  %v3054_v36 = vmul.f32 %v2773_v54, %v2247_v14  ;;  %v1963_v23 = vadd.f32 %v1962_v9, %v4661_v5  ;;  %v2251_v57 = vpop.f32.mrf.mxu1  ;;  %2442 = vmatmul.mubr.bf16.gmra.mxu1 %v711_v3  ;;  %2160 = vmatprep.mubr.bf16.mxu0 %v718_v44  ;;  %v3245_v5 = vmax.f32 %v3181_v2, 0.0  ;;  %v2783_v14 = vpop.permute.xlu1 %2782 }
 0x237   : > { %v1964_v35 = vpop.f32.mrf.mxu0  ;;  %2449 = vmatprep.mubr.bf16.mxu1 %v720_v20 }
 0x238   : > { %v3182_v61 = vadd.f32 %v3118_v31, %v3054_v36  ;;  %v2252_v22 = vadd.f32 %v2251_v57, %v1963_v23  ;;  %v2253_v10 = vpop.f32.mrf.mxu1  ;;  %v2788_v57 = vpop.permute.xlu0 %2787 }
 0x239   : > { %v1965_v49 = vpop.f32.mrf.mxu0 }
 0x23a   : > { %v3246_v24 = vmax.f32 %v3182_v61, 0.0  ;;  %v3055_v3 = vmul.f32 %v2778_v4, %v2252_v22  ;;  %v1966_v44 = vadd.f32 %v1965_v49, %v4666_v17  ;;  %v2254_v50 = vpop.f32.mrf.mxu1  ;;  %v725_v61 = vunpack.c.h.s8.bf16 %v469_v59 }
 0x23b   : > { %v1967_v40 = vpop.f32.mrf.mxu0  ;;  %v727_v22 = vunpack.c.h.s8.bf16 %v471_v15 }
 0x23c   : > { %v3950_v8 = vpack.c.bf16 %v3246_v24, %v3245_v5  ;;  %v2255_v20 = vadd.f32 %v2254_v50, %v1966_v44  ;;  %v2256_v62 = vpop.f32.mrf.mxu1  ;;  %v3183_v34 = vadd.f32 %v3119_v47, %v3055_v3  ;;  %v2793_v44 = vpop.permute.xlu1 %2792  ;;  %v3122_v50 = vld [vmem:[%s4877_s30 + $0x68] sm:$0xff] }
 0x23d   : > { %v1970_v54 = vpop.f32.mrf.mxu0  ;;  %2161 = vmatmul.mubr.bf16.gmra.mxu0 %v717_v1 }
 0x23e   : > { %4090 = vst [vmem:[%s4894_s9 + $0x20] sm:$0xff] %v3950_v8   ;;  %v3056_v31 = vmul.f32 %v2783_v14, %v2255_v20  ;;  %v1971_v9 = vadd.f32 %v1970_v54, %v4670_v26  ;;  %v2259_v2 = vpop.f32.mrf.mxu1  ;;  %2450 = vmatmul.mubr.bf16.gmra.mxu1 %v719_v21  ;;  %2168 = vmatprep.mubr.bf16.mxu0 %v726_v41  ;;  %v3247_v10 = vmax.f32 %v3183_v34, 0.0  ;;  %v3121_v21 = vld [vmem:[%s4877_s30 + $0x60] sm:$0xff]  ;;  %v2798_v14 = vpop.permute.xlu0 %2797 }
 0x23f   : > { %v1972_v17 = vpop.f32.mrf.mxu0  ;;  %2457 = vmatprep.mubr.bf16.mxu1 %v728_v25 }
 0x240   : > { %v3184_v36 = vadd.f32 %v3120_v42, %v3056_v31  ;;  %v2260_v48 = vadd.f32 %v2259_v2, %v1971_v9  ;;  %v2261_v23 = vpop.f32.mrf.mxu1  ;;  %v3123_v17 = vld [vmem:[%s4877_s30 + $0x70] sm:$0xff] }
 0x241   : > { %v1973_v35 = vpop.f32.mrf.mxu0 }
 0x242   : > { %v3248_v4 = vmax.f32 %v3184_v36, 0.0  ;;  %v3057_v49 = vmul.f32 %v2788_v57, %v2260_v48  ;;  %v1974_v26 = vadd.f32 %v1973_v35, %v4676_v39  ;;  %v2262_v1 = vpop.f32.mrf.mxu1  ;;  %v2803_v57 = vpop.permute.xlu1 %2802  ;;  %v3124_v35 = vld [vmem:[%s4877_s30 + $0x78] sm:$0xff] }
 0x243   : > { %v1975_v5 = vpop.f32.mrf.mxu0 }
 0x244   : > { %v3955_v41 = vpack.c.bf16 %v3248_v4, %v3247_v10  ;;  %v2263_v24 = vadd.f32 %v2262_v1, %v1974_v26  ;;  %v2264_v3 = vpop.f32.mrf.mxu1  ;;  %v3185_v40 = vadd.f32 %v3121_v21, %v3057_v49  ;;  %v2808_v5 = vpop.permute.xlu0 %2807 }
 0x245   : > { %v1978_v47 = vpop.f32.mrf.mxu0  ;;  %2169 = vmatmul.mubr.bf16.gmra.mxu0 %v725_v61 }
 0x246   : > { %4091 = vst [vmem:[%s4894_s9 + $0x28] sm:$0xff] %v3955_v41   ;;  %v3058_v59 = vmul.f32 %v2793_v44, %v2263_v24  ;;  %v1979_v15 = vadd.f32 %v1978_v47, %v4681_v51  ;;  %v2267_v25 = vpop.f32.mrf.mxu1  ;;  %2458 = vmatmul.mubr.bf16.gmra.mxu1 %v727_v22  ;;  %v3249_v54 = vmax.f32 %v3185_v40, 0.0  ;;  %v3125_v40 = vld [vmem:[%s4877_s30 + $0x80] sm:$0xff] }
 0x247   : > { %v1980_v8 = vpop.f32.mrf.mxu0 }
 0x248   : > { %v3186_v39 = vadd.f32 %v3122_v50, %v3058_v59  ;;  %v2268_v20 = vadd.f32 %v2267_v25, %v1979_v15  ;;  %v2269_v62 = vpop.f32.mrf.mxu1  ;;  %v2813_v8 = vpop.permute.xlu1 %2812 }
 0x249   : > { %v1981_v42 = vpop.f32.mrf.mxu0 }
 0x24a   : > { %v3250_v34 = vmax.f32 %v3186_v39, 0.0  ;;  %v3059_v31 = vmul.f32 %v2798_v14, %v2268_v20  ;;  %v1982_v9 = vadd.f32 %v1981_v42, %v4686_v0  ;;  %v2270_v2 = vpop.f32.mrf.mxu1  ;;  %v3126_v39 = vld [vmem:[%s4877_s30 + $0x88] sm:$0xff] }
 0x24b   : > { %v1983_v36 = vpop.f32.mrf.mxu0 }
 0x24c   : > { %v3960_v48 = vpack.c.bf16 %v3250_v34, %v3249_v54  ;;  %v2271_v51 = vadd.f32 %v2270_v2, %v1982_v9  ;;  %v2272_v23 = vpop.f32.mrf.mxu1  ;;  %v3187_v22 = vadd.f32 %v3123_v17, %v3059_v31  ;;  %v2818_v2 = vpop.permute.xlu0 %2817 }
 0x24d   : > { %v1986_v61 = vpop.f32.mrf.mxu0 }
 0x24e   : > { %4092 = vst [vmem:[%s4894_s9 + $0x30] sm:$0xff] %v3960_v48   ;;  %v3060_v10 = vmul.f32 %v2803_v57, %v2271_v51  ;;  %v1987_v4 = vadd.f32 %v1986_v61, %v4690_v11  ;;  %v2275_v49 = vpop.f32.mrf.mxu1  ;;  %v3251_v24 = vmax.f32 %v3187_v22, 0.0 }
 0x24f   : > { %v1988_v26 = vpop.f32.mrf.mxu0 }
 0x250   : > { %v3188_v1 = vadd.f32 %v3124_v35, %v3060_v10  ;;  %v2276_v0 = vadd.f32 %v2275_v49, %v1987_v4  ;;  %v2277_v21 = vpop.f32.mrf.mxu1  ;;  %v3127_v35 = vld [vmem:[%s4877_s30 + $0x90] sm:$0xff]  ;;  %v2823_v4 = vpop.permute.xlu1 %2822  ;;  %v3128_v49 = vld [vmem:[%s4877_s30 + $0x98] sm:$0xff] }
 0x251   : > { %v1989_v41 = vpop.f32.mrf.mxu0 }
 0x252   : > { %v3252_v3 = vmax.f32 %v3188_v1, 0.0  ;;  %v3061_v44 = vmul.f32 %v2808_v5, %v2276_v0  ;;  %v1990_v50 = vadd.f32 %v1989_v41, %v4696_v27  ;;  %v2278_v47 = vpop.f32.mrf.mxu1 }
 0x253   : > { %v1991_v59 = vpop.f32.mrf.mxu0 }
 0x254   : > { %v3965_v15 = vpack.c.bf16 %v3252_v3, %v3251_v24  ;;  %v2279_v25 = vadd.f32 %v2278_v47, %v1990_v50  ;;  %v2280_v11 = vpop.f32.mrf.mxu1  ;;  %v3189_v62 = vadd.f32 %v3125_v40, %v3061_v44  ;;  %v2828_v44 = vpop.permute.xlu0 %2827 }
 0x255   : > { %v1994_v20 = vpop.f32.mrf.mxu0  ;;  %v3129_v11 = vld [vmem:[%s4877_s30 + $0xa0] sm:$0xff] }
 0x256   : > { %4093 = vst [vmem:[%s4894_s9 + $0x38] sm:$0xff] %v3965_v15   ;;  %v3062_v14 = vmul.f32 %v2813_v8, %v2279_v25  ;;  %v1995_v42 = vadd.f32 %v1994_v20, %v4701_v37  ;;  %v2283_v54 = vpop.f32.mrf.mxu1  ;;  %v3253_v36 = vmax.f32 %v3189_v62, 0.0  ;;  %v2833_v62 = vpop.permute.xlu1 %2832 }
 0x257   : > { %v1996_v34 = vpop.f32.mrf.mxu0 }
 0x258   : > { %v3190_v31 = vadd.f32 %v3126_v39, %v3062_v14  ;;  %v2284_v27 = vadd.f32 %v2283_v54, %v1995_v42  ;;  %v2285_v9 = vpop.f32.mrf.mxu1  ;;  %v3130_v14 = vld [vmem:[%s4877_s30 + $0xa8] sm:$0xff] }
 0x259   : > { %v1997_v17 = vpop.f32.mrf.mxu0 }
 0x25a   : > { %v3254_v48 = vmax.f32 %v3190_v31, 0.0  ;;  %v3063_v51 = vmul.f32 %v2818_v2, %v2284_v27  ;;  %v1998_v23 = vadd.f32 %v1997_v17, %v4706_v53  ;;  %v2286_v57 = vpop.f32.mrf.mxu1 }
 0x25b   : > { %v1999_v61 = vpop.f32.mrf.mxu0 }
 0x25c   : > { %v3970_v22 = vpack.c.bf16 %v3254_v48, %v3253_v36  ;;  %v2287_v10 = vadd.f32 %v2286_v57, %v1998_v23  ;;  %v2288_v37 = vpop.f32.mrf.mxu1  ;;  %v3191_v1 = vadd.f32 %v3127_v35, %v3063_v51  ;;  %v2838_v36 = vpop.permute.xlu0 %2837 }
 0x25d   : > { %v2002_v26 = vpop.f32.mrf.mxu0 }
 0x25e   : > { %4094 = vst [vmem:[%s4894_s9 + $0x40] sm:$0xff] %v3970_v22   ;;  %v3064_v0 = vmul.f32 %v2823_v4, %v2287_v10  ;;  %v2003_v21 = vadd.f32 %v2002_v26, %v4710_v63  ;;  %v2291_v5 = vpop.f32.mrf.mxu1  ;;  %v3255_v47 = vmax.f32 %v3191_v1, 0.0  ;;  %v3131_v22 = vld [vmem:[%s4877_s30 + $0xb0] sm:$0xff]  ;;  %v3132_v26 = vld [vmem:[%s4877_s30 + $0xb8] sm:$0xff] }
 0x25f   : > { %v2004_v41 = vpop.f32.mrf.mxu0 }
 0x260   : > { %v3192_v24 = vadd.f32 %v3128_v49, %v3064_v0  ;;  %v2292_v53 = vadd.f32 %v2291_v5, %v2003_v21  ;;  %v2293_v3 = vpop.f32.mrf.mxu1  ;;  %v2843_v49 = vpop.permute.xlu1 %2842 }
 0x261   : > { %v2005_v50 = vpop.f32.mrf.mxu0 }
 0x262   : > { %v3256_v40 = vmax.f32 %v3192_v24, 0.0  ;;  %v3065_v59 = vmul.f32 %v2828_v44, %v2292_v53  ;;  %v2006_v15 = vadd.f32 %v2005_v50, %v4716_v18  ;;  %v2294_v25 = vpop.f32.mrf.mxu1  ;;  %v2848_v44 = vpop.permute.xlu0 %2847 }
 0x263   : > { %v2007_v8 = vpop.f32.mrf.mxu0 }
 0x264   : > { %v3975_v39 = vpack.c.bf16 %v3256_v40, %v3255_v47  ;;  %v2295_v20 = vadd.f32 %v2294_v25, %v2006_v15  ;;  %v2296_v63 = vpop.f32.mrf.mxu1  ;;  %v3193_v54 = vadd.f32 %v3129_v11, %v3065_v59  ;;  %v3133_v11 = vld [vmem:[%s4877_s30 + $0xc0] sm:$0xff] }
 0x265   : > { %v2010_v42 = vpop.f32.mrf.mxu0  ;;  %v2853_v63 = vpop.permute.xlu1 %2852 }
 0x266   : > { %4095 = vst [vmem:[%s4894_s9 + $0x48] sm:$0xff] %v3975_v39   ;;  %v3066_v34 = vmul.f32 %v2833_v62, %v2295_v20  ;;  %v2011_v31 = vadd.f32 %v2010_v42, %v4721_v30  ;;  %v2299_v27 = vpop.f32.mrf.mxu1  ;;  %v3257_v51 = vmax.f32 %v3193_v54, 0.0  ;;  %v3134_v62 = vld [vmem:[%s4877_s30 + $0xc8] sm:$0xff] }
 0x267   : > { %v2012_v9 = vpop.f32.mrf.mxu0 }
 0x268   : > { %v3194_v2 = vadd.f32 %v3130_v14, %v3066_v34  ;;  %v2300_v18 = vadd.f32 %v2299_v27, %v2011_v31  ;;  %v2301_v17 = vpop.f32.mrf.mxu1 }
 0x269   : > { %v2013_v48 = vpop.f32.mrf.mxu0 }
 0x26a   : > { %v3258_v23 = vmax.f32 %v3194_v2, 0.0  ;;  %v3067_v57 = vmul.f32 %v2838_v36, %v2300_v18  ;;  %v2014_v35 = vadd.f32 %v2013_v48, %v4726_v46  ;;  %v2302_v61 = vpop.f32.mrf.mxu1  ;;  %v2858_v18 = vpop.permute.xlu0 %2857 }
 0x26b   : > { %v2015_v10 = vpop.f32.mrf.mxu0 }
 0x26c   : > { %v3980_v37 = vpack.c.bf16 %v3258_v23, %v3257_v51  ;;  %v2303_v4 = vadd.f32 %v2302_v61, %v2014_v35  ;;  %v2304_v30 = vpop.f32.mrf.mxu1  ;;  %v3195_v0 = vadd.f32 %v3131_v22, %v3067_v57  ;;  %v3135_v35 = vld [vmem:[%s4877_s30 + $0xd0] sm:$0xff] }
 0x26d   : > { %v2018_v1 = vpop.f32.mrf.mxu0 }
 0x26e   : > { %4096 = vst [vmem:[%s4894_s9 + $0x50] sm:$0xff] %v3980_v37   ;;  %v3068_v21 = vmul.f32 %v2843_v49, %v2303_v4  ;;  %v2019_v5 = vadd.f32 %v2018_v1, %v4730_v58  ;;  %v2307_v41 = vpop.f32.mrf.mxu1  ;;  %v3259_v47 = vmax.f32 %v3195_v0, 0.0  ;;  %v2863_v37 = vpop.permute.xlu1 %2862  ;;  %v3136_v4 = vld [vmem:[%s4877_s30 + $0xd8] sm:$0xff] }
 0x26f   : > { %v2020_v24 = vpop.f32.mrf.mxu0 }
 0x270   : > { %v3196_v53 = vadd.f32 %v3132_v26, %v3068_v21  ;;  %v2308_v46 = vadd.f32 %v2307_v41, %v2019_v5  ;;  %v2309_v3 = vpop.f32.mrf.mxu1  ;;  %v2868_v24 = vpop.permute.xlu0 %2867 }
 0x271   : > { %v2021_v50 = vpop.f32.mrf.mxu0 }
 0x272   : > { %v3260_v40 = vmax.f32 %v3196_v53, 0.0  ;;  %v3069_v59 = vmul.f32 %v2848_v44, %v2308_v46  ;;  %v2022_v15 = vadd.f32 %v2021_v50, %v4736_v13  ;;  %v2310_v25 = vpop.f32.mrf.mxu1 }
 0x273   : > { %v2023_v8 = vpop.f32.mrf.mxu0 }
 0x274   : > { %v3985_v39 = vpack.c.bf16 %v3260_v40, %v3259_v47  ;;  %v2311_v20 = vadd.f32 %v2310_v25, %v2022_v15  ;;  %v2312_v58 = vpop.f32.mrf.mxu1  ;;  %v3197_v42 = vadd.f32 %v3133_v11, %v3069_v59  ;;  %v3137_v40 = vld [vmem:[%s4877_s30 + $0xe0] sm:$0xff]  ;;  %v2873_v11 = vpop.permute.xlu1 %2872  ;;  %v3138_v8 = vld [vmem:[%s4877_s30 + $0xe8] sm:$0xff] }
 0x275   : > { %v2026_v14 = vpop.f32.mrf.mxu0 }
 0x276   : > { %4097 = vst [vmem:[%s4894_s9 + $0x58] sm:$0xff] %v3985_v39   ;;  %v3070_v54 = vmul.f32 %v2853_v63, %v2311_v20  ;;  %v2027_v34 = vadd.f32 %v2026_v14, %v4741_v28  ;;  %v2315_v31 = vpop.f32.mrf.mxu1  ;;  %v3261_v36 = vmax.f32 %v3197_v42, 0.0 }
 0x277   : > { %v2028_v27 = vpop.f32.mrf.mxu0 }
 0x278   : > { %v3198_v9 = vadd.f32 %v3134_v62, %v3070_v54  ;;  %v2316_v13 = vadd.f32 %v2315_v31, %v2027_v34  ;;  %v2317_v2 = vpop.f32.mrf.mxu1  ;;  %v2878_v34 = vpop.permute.xlu0 %2877 }
 0x279   : > { %v2029_v17 = vpop.f32.mrf.mxu0 }
 0x27a   : > { %v3262_v48 = vmax.f32 %v3198_v9, 0.0  ;;  %v3071_v51 = vmul.f32 %v2858_v18, %v2316_v13  ;;  %v2030_v23 = vadd.f32 %v2029_v17, %v4746_v45  ;;  %v2318_v57 = vpop.f32.mrf.mxu1  ;;  %v3139_v17 = vld [vmem:[%s4877_s30 + $0xf0] sm:$0xff] }
 0x27b   : > { %v2031_v61 = vpop.f32.mrf.mxu0 }
 0x27c   : > { %v3990_v22 = vpack.c.bf16 %v3262_v48, %v3261_v36  ;;  %v2319_v10 = vadd.f32 %v2318_v57, %v2030_v23  ;;  %v2320_v28 = vpop.f32.mrf.mxu1  ;;  %v3199_v49 = vadd.f32 %v3135_v35, %v3071_v51  ;;  %v2883_v23 = vpop.permute.xlu1 %2882  ;;  %v3140_v57 = vld [vmem:[%s4877_s30 + $0xf8] sm:$0xff] }
 0x27d   : > { %v2034_v30 = vpop.f32.mrf.mxu0 }
 0x27e   : > { %4098 = vst [vmem:[%s4894_s9 + $0x60] sm:$0xff] %v3990_v22   ;;  %v3072_v26 = vmul.f32 %v2863_v37, %v2319_v10  ;;  %v2035_v1 = vadd.f32 %v2034_v30, %v4750_v60  ;;  %v2323_v0 = vpop.f32.mrf.mxu1  ;;  %v3263_v46 = vmax.f32 %v3199_v49, 0.0  ;;  %v2888_v49 = vpop.permute.xlu0 %2887 }
 0x27f   : > { %v2036_v21 = vpop.f32.mrf.mxu0 }
 0x280   : > { %v3200_v5 = vadd.f32 %v3136_v4, %v3072_v26  ;;  %v2324_v45 = vadd.f32 %v2323_v0, %v2035_v1  ;;  %v2325_v41 = vpop.f32.mrf.mxu1 }
 0x281   : > { %v2037_v53 = vpop.f32.mrf.mxu0  ;;  %v3141_v41 = vld [vmem:[%s4877_s30 + $0x100] sm:$0xff] }
 0x282   : > { %v3264_v3 = vmax.f32 %v3200_v5, 0.0  ;;  %v3073_v44 = vmul.f32 %v2868_v24, %v2324_v45  ;;  %v2038_v50 = vadd.f32 %v2037_v53, %v4756_v16  ;;  %v2326_v47 = vpop.f32.mrf.mxu1 }
 0x283   : > { %v2039_v59 = vpop.f32.mrf.mxu0 }
 0x284   : > { %v3995_v15 = vpack.c.bf16 %v3264_v3, %v3263_v46  ;;  %v2327_v25 = vadd.f32 %v2326_v47, %v2038_v50  ;;  %v2328_v60 = vpop.f32.mrf.mxu1  ;;  %v3201_v20 = vadd.f32 %v3137_v40, %v3073_v44  ;;  %v2893_v3 = vpop.permute.xlu1 %2892  ;;  %v3142_v44 = vld [vmem:[%s4877_s30 + $0x108] sm:$0xff] }
 0x285   : > { %v2042_v39 = vpop.f32.mrf.mxu0 }
 0x286   : > { %4099 = vst [vmem:[%s4894_s9 + $0x68] sm:$0xff] %v3995_v15   ;;  %v3074_v58 = vmul.f32 %v2873_v11, %v2327_v25  ;;  %v2043_v63 = vadd.f32 %v2042_v39, %v4761_v32  ;;  %v2331_v62 = vpop.f32.mrf.mxu1  ;;  %v3265_v27 = vmax.f32 %v3201_v20, 0.0 }
 0x287   : > { %v2044_v14 = vpop.f32.mrf.mxu0 }
 0x288   : > { %v3202_v42 = vadd.f32 %v3138_v8, %v3074_v58  ;;  %v2332_v16 = vadd.f32 %v2331_v62, %v2043_v63  ;;  %v2333_v54 = vpop.f32.mrf.mxu1  ;;  %v2898_v8 = vpop.permute.xlu0 %2897 }
 0x289   : > { %v2045_v31 = vpop.f32.mrf.mxu0 }
 0x28a   : > { %v3266_v9 = vmax.f32 %v3202_v42, 0.0  ;;  %v3075_v13 = vmul.f32 %v2878_v34, %v2332_v16  ;;  %v2046_v2 = vadd.f32 %v2045_v31, %v4766_v52  ;;  %v2334_v18 = vpop.f32.mrf.mxu1  ;;  %v3143_v42 = vld [vmem:[%s4877_s30 + $0x110] sm:$0xff]  ;;  %v2903_v31 = vpop.permute.xlu1 %2902 }
 0x28b   : > { %v2047_v36 = vpop.f32.mrf.mxu0 }
 0x28c   : > { %v4000_v48 = vpack.c.bf16 %v3266_v9, %v3265_v27  ;;  %v2335_v51 = vadd.f32 %v2334_v18, %v2046_v2  ;;  %v2336_v32 = vpop.f32.mrf.mxu1  ;;  %v3203_v61 = vadd.f32 %v3139_v17, %v3075_v13  ;;  %v3144_v27 = vld [vmem:[%s4877_s30 + $0x118] sm:$0xff] }
 0x28d   : > { %v2050_v35 = vpop.f32.mrf.mxu0  ;;  %v2908_v32 = vpop.permute.xlu0 %2907 }
 0x28e   : > { %4100 = vst [vmem:[%s4894_s9 + $0x70] sm:$0xff] %v4000_v48   ;;  %v3076_v22 = vmul.f32 %v2883_v23, %v2335_v51  ;;  %v2051_v10 = vadd.f32 %v2050_v35, %v4770_v7  ;;  %v2339_v28 = vpop.f32.mrf.mxu1  ;;  %v3267_v1 = vmax.f32 %v3203_v61, 0.0 }
 0x28f   : > { %v2052_v37 = vpop.f32.mrf.mxu0 }
 0x290   : > { %v3204_v4 = vadd.f32 %v3140_v57, %v3076_v22  ;;  %v2340_v52 = vadd.f32 %v2339_v28, %v2051_v10  ;;  %v2341_v30 = vpop.f32.mrf.mxu1  ;;  %v3145_v28 = vld [vmem:[%s4877_s30 + $0x120] sm:$0xff] }
 0x291   : > { %v2053_v26 = vpop.f32.mrf.mxu0  ;;  %v2913_v30 = vpop.permute.xlu1 %2912 }
 0x292   : > { %v3268_v0 = vmax.f32 %v3204_v4, 0.0  ;;  %v3077_v21 = vmul.f32 %v2888_v49, %v2340_v52  ;;  %v2054_v5 = vadd.f32 %v2053_v26, %v4776_v29  ;;  %v2342_v45 = vpop.f32.mrf.mxu1  ;;  %v3146_v49 = vld [vmem:[%s4877_s30 + $0x128] sm:$0xff] }
 0x293   : > { %v2055_v24 = vpop.f32.mrf.mxu0 }
 0x294   : > { %v4005_v53 = vpack.c.bf16 %v3268_v0, %v3267_v1  ;;  %v2343_v46 = vadd.f32 %v2342_v45, %v2054_v5  ;;  %v2344_v7 = vpop.f32.mrf.mxu1  ;;  %v3205_v47 = vadd.f32 %v3141_v41, %v3077_v21 }
 0x295   : > { %v2058_v50 = vpop.f32.mrf.mxu0 }
 0x296   : > { %4101 = vst [vmem:[%s4894_s9 + $0x78] sm:$0xff] %v4005_v53   ;;  %v3078_v40 = vmul.f32 %v2893_v3, %v2343_v46  ;;  %v2059_v59 = vadd.f32 %v2058_v50, %v4781_v43  ;;  %v2347_v15 = vpop.f32.mrf.mxu1  ;;  %v3269_v20 = vmax.f32 %v3205_v47, 0.0  ;;  %v2918_v53 = vpop.permute.xlu0 %2917 }
 0x297   : > { %v2060_v25 = vpop.f32.mrf.mxu0 }
 0x298   : > { %v3206_v60 = vadd.f32 %v3142_v44, %v3078_v40  ;;  %v2348_v29 = vadd.f32 %v2347_v15, %v2059_v59  ;;  %v2349_v11 = vpop.f32.mrf.mxu1  ;;  %v3147_v40 = vld [vmem:[%s4877_s30 + $0x130] sm:$0xff] }
 0x299   : > { %v2061_v39 = vpop.f32.mrf.mxu0 }
 0x29a   : > { %v3270_v58 = vmax.f32 %v3206_v60, 0.0  ;;  %v3079_v63 = vmul.f32 %v2898_v8, %v2348_v29  ;;  %v2062_v62 = vadd.f32 %v2061_v39, %v4784_v6  ;;  %v2350_v14 = vpop.f32.mrf.mxu1  ;;  %v2923_v60 = vpop.permute.xlu1 %2922  ;;  %v3148_v29 = vld [vmem:[%s4877_s30 + $0x138] sm:$0xff] }
 0x29b   : > { %v2063_v16 = vpop.f32.mrf.mxu0 }
 0x29c   : > { %v4010_v54 = vpack.c.bf16 %v3270_v58, %v3269_v20  ;;  %v2351_v34 = vadd.f32 %v2350_v14, %v2062_v62  ;;  %v2352_v43 = vpop.f32.mrf.mxu1  ;;  %v3207_v13 = vadd.f32 %v3143_v42, %v3079_v63  ;;  %v2928_v42 = vpop.permute.xlu0 %2927 }
 0x29d   : > { %v2066_v9 = vpop.f32.mrf.mxu0 }
 0x29e   : > { %4102 = vst [vmem:[%s4894_s9 + $0x80] sm:$0xff] %v4010_v54   ;;  %v3080_v2 = vmul.f32 %v2903_v31, %v2351_v34  ;;  %v2067_v18 = vadd.f32 %v2066_v9, %v4786_v19  ;;  %v2355_v17 = vpop.f32.mrf.mxu1  ;;  %v3271_v57 = vmax.f32 %v3207_v13, 0.0  ;;  %v3149_v9 = vld [vmem:[%s4877_s30 + $0x140] sm:$0xff] }
 0x29f   : > { %v2068_v36 = vpop.f32.mrf.mxu0 }
 0x2a0   : > { %v3208_v48 = vadd.f32 %v3144_v27, %v3080_v2  ;;  %v2356_v6 = vadd.f32 %v2355_v17, %v2067_v18  ;;  %v2357_v51 = vpop.f32.mrf.mxu1  ;;  %v2933_v17 = vpop.permute.xlu1 %2932  ;;  %v3150_v36 = vld [vmem:[%s4877_s30 + $0x148] sm:$0xff] }
 0x2a1   : > { %v2069_v23 = vpop.f32.mrf.mxu0 }
 0x2a2   : > { %v3272_v35 = vmax.f32 %v3208_v48, 0.0  ;;  %v3081_v61 = vmul.f32 %v2908_v32, %v2356_v6  ;;  %v2070_v22 = vadd.f32 %v2069_v23, %v4790_v38  ;;  %v2358_v10 = vpop.f32.mrf.mxu1  ;;  %v5115_v32 = vld [vmem:[#allocation3_spill] sm:$0xff] }
 0x2a3   : > { %v2071_v37 = vpop.f32.mrf.mxu0 }
 0x2a4   : > { %v4015_v4 = vpack.c.bf16 %v3272_v35, %v3271_v57  ;;  %v2359_v52 = vadd.f32 %v2358_v10, %v2070_v22  ;;  %v2360_v19 = vpop.f32.mrf.mxu1  ;;  %v3209_v1 = vadd.f32 %v3145_v28, %v3081_v61  ;;  %v2938_v10 = vpop.permute.xlu0 %2937 }
 0x2a5   : > { %v2074_v26 = vpop.f32.mrf.mxu0  ;;  %v5116_v19 = vld [vmem:[#allocation4_spill] sm:$0xff] }
 0x2a6   : > { %4103 = vst [vmem:[%s4894_s9 + $0x88] sm:$0xff] %v4015_v4   ;;  %v3082_v0 = vmul.f32 %v2913_v30, %v2359_v52  ;;  %v2075_v21 = vadd.f32 %v2074_v26, %v4793_v55  ;;  %v2363_v5 = vpop.f32.mrf.mxu1  ;;  %v3273_v7 = vmax.f32 %v3209_v1, 0.0  ;;  %v3151_v26 = vld [vmem:[%s4877_s30 + $0x150] sm:$0xff] }
 0x2a7   : > { %v2076_v45 = vpop.f32.mrf.mxu0 }
 0x2a8   : > { %v3210_v41 = vadd.f32 %v3146_v49, %v3082_v0  ;;  %v2364_v38 = vadd.f32 %v2363_v5, %v2075_v21  ;;  %v2365_v24 = vpop.f32.mrf.mxu1  ;;  %v2943_v45 = vpop.permute.xlu1 %2942 }
 0x2a9   : > { %v2077_v46 = vpop.f32.mrf.mxu0 }
 0x2aa   : > { %v3274_v3 = vmax.f32 %v3210_v41, 0.0  ;;  %v3083_v44 = vmul.f32 %v2918_v53, %v2364_v38  ;;  %v2078_v50 = vadd.f32 %v2077_v46, %v4796_v12  ;;  %v2366_v47 = vpop.f32.mrf.mxu1  ;;  %v3152_v41 = vld [vmem:[%s4877_s30 + $0x158] sm:$0xff]  ;;  %v5117_v46 = vld [vmem:[#allocation5_spill] sm:$0xff] }
 0x2ab   : > { %v2079_v59 = vpop.f32.mrf.mxu0 }
 0x2ac   : > { %v4020_v15 = vpack.c.bf16 %v3274_v3, %v3273_v7  ;;  %v2367_v25 = vadd.f32 %v2366_v47, %v2078_v50  ;;  %v2368_v55 = vpop.f32.mrf.mxu1  ;;  %v3211_v8 = vadd.f32 %v3147_v40, %v3083_v44  ;;  %v2948_v59 = vpop.permute.xlu0 %2947 }
 0x2ad   : > { %v2082_v11 = vpop.f32.mrf.mxu0 }
 0x2ae   : > { %4104 = vst [vmem:[%s4894_s9 + $0x90] sm:$0xff] %v4020_v15   ;;  %v3084_v39 = vmul.f32 %v2923_v60, %v2367_v25  ;;  %v2083_v20 = vadd.f32 %v2082_v11, %v4798_v33  ;;  %v2371_v58 = vpop.f32.mrf.mxu1  ;;  %v3275_v54 = vmax.f32 %v3211_v8, 0.0 }
 0x2af   : > { %v2084_v63 = vpop.f32.mrf.mxu0 }
 0x2b0   : > { %v3212_v62 = vadd.f32 %v3148_v29, %v3084_v39  ;;  %v2372_v12 = vadd.f32 %v2371_v58, %v2083_v20  ;;  %v2373_v14 = vpop.f32.mrf.mxu1  ;;  %v5118_v29 = vld [vmem:[#allocation6_spill] sm:$0xff]  ;;  %v3153_v39 = vld [vmem:[%s4877_s30 + $0x160] sm:$0xff] }
 0x2b1   : > { %v2085_v16 = vpop.f32.mrf.mxu0  ;;  %v3154_v14 = vld [vmem:[%s4877_s30 + $0x168] sm:$0xff] }
 0x2b2   : > { %v3276_v34 = vmax.f32 %v3212_v62, 0.0  ;;  %v3085_v43 = vmul.f32 %v2928_v42, %v2372_v12  ;;  %v2086_v31 = vadd.f32 %v2085_v16, %v4802_v56  ;;  %v2374_v27 = vpop.f32.mrf.mxu1  ;;  %v2953_v12 = vpop.permute.xlu1 %2952 }
 0x2b3   : > { %v2087_v13 = vpop.f32.mrf.mxu0 }
 0x2b4   : > { %v4025_v2 = vpack.c.bf16 %v3276_v34, %v3275_v54  ;;  %v2375_v18 = vadd.f32 %v2374_v27, %v2086_v31  ;;  %v2376_v33 = vpop.f32.mrf.mxu1  ;;  %v3213_v6 = vadd.f32 %v3149_v9, %v3085_v43  ;;  %v5119_v34 = vld [vmem:[#allocation7_spill] sm:$0xff] }
 0x2b5   : > { %v2090_v48 = vpop.f32.mrf.mxu0 }
 0x2b6   : > { %4105 = vst [vmem:[%s4894_s9 + $0x98] sm:$0xff] %v4025_v2   ;;  %v3086_v51 = vmul.f32 %v2933_v17, %v2375_v18  ;;  %v2091_v23 = vadd.f32 %v2090_v48, %v5115_v32  ;;  %v2379_v57 = vpop.f32.mrf.mxu1  ;;  %v3277_v37 = vmax.f32 %v3213_v6, 0.0  ;;  %v2958_v18 = vpop.permute.xlu0 %2957  ;;  %v5120_v6 = vld [vmem:[#allocation8_spill] sm:$0xff] }
 0x2b7   : > { %v2092_v35 = vpop.f32.mrf.mxu0 }
 0x2b8   : > { %v3214_v61 = vadd.f32 %v3150_v36, %v3086_v51  ;;  %v2380_v56 = vadd.f32 %v2379_v57, %v2091_v23  ;;  %v2381_v22 = vpop.f32.mrf.mxu1  ;;  %v3155_v23 = vld [vmem:[%s4877_s30 + $0x170] sm:$0xff] }
 0x2b9   : > { %v2093_v28 = vpop.f32.mrf.mxu0  ;;  %v2963_v22 = vpop.permute.xlu1 %2962 }
 0x2ba   : > { %v3278_v4 = vmax.f32 %v3214_v61, 0.0  ;;  %v3087_v52 = vmul.f32 %v2938_v10, %v2380_v56  ;;  %v2094_v30 = vadd.f32 %v2093_v28, %v5116_v19  ;;  %v2382_v49 = vpop.f32.mrf.mxu1  ;;  %v3156_v10 = vld [vmem:[%s4877_s30 + $0x178] sm:$0xff] }
 0x2bb   : > { %v2095_v1 = vpop.f32.mrf.mxu0 }
 0x2bc   : > { %v4030_v0 = vpack.c.bf16 %v3278_v4, %v3277_v37  ;;  %v2383_v21 = vadd.f32 %v2382_v49, %v2094_v30  ;;  %v2384_v5 = vpop.f32.mrf.mxu1  ;;  %v3215_v24 = vadd.f32 %v3151_v26, %v3087_v52  ;;  %v5121_v52 = vld [vmem:[#allocation9_spill] sm:$0xff] }
 0x2bd   : > { %v2098_v38 = vpop.f32.mrf.mxu0 }
 0x2be   : > { %4106 = vst [vmem:[%s4894_s9 + $0xa0] sm:$0xff] %v4030_v0   ;;  %v3088_v53 = vmul.f32 %v2943_v45, %v2383_v21  ;;  %v2099_v7 = vadd.f32 %v2098_v38, %v5117_v46  ;;  %v2387_v3 = vpop.f32.mrf.mxu1  ;;  %v3279_v25 = vmax.f32 %v3215_v24, 0.0  ;;  %v2968_v21 = vpop.permute.xlu0 %2967  ;;  %v5122_v24 = vld [vmem:[#allocation10_spill] sm:$0xff] }
 0x2bf   : > { %v2100_v44 = vpop.f32.mrf.mxu0 }
 0x2c0   : > { %v3216_v50 = vadd.f32 %v3152_v41, %v3088_v53  ;;  %v2388_v47 = vadd.f32 %v2387_v3, %v2099_v7  ;;  %v2389_v40 = vpop.f32.mrf.mxu1  ;;  %v3157_v7 = vld [vmem:[%s4877_s30 + $0x180] sm:$0xff] }
 0x2c1   : > { %v2101_v15 = vpop.f32.mrf.mxu0  ;;  %v2973_v40 = vpop.permute.xlu1 %2972 }
 0x2c2   : > { %v3280_v55 = vmax.f32 %v3216_v50, 0.0  ;;  %v3089_v60 = vmul.f32 %v2948_v59, %v2388_v47  ;;  %v2102_v11 = vadd.f32 %v2101_v15, %v5118_v29  ;;  %v2390_v8 = vpop.f32.mrf.mxu1  ;;  %v3158_v59 = vld [vmem:[%s4877_s30 + $0x188] sm:$0xff] }
 0x2c3   : > { %v2103_v20 = vpop.f32.mrf.mxu0 }
 0x2c4   : > { %v4035_v58 = vpack.c.bf16 %v3280_v55, %v3279_v25  ;;  %v2391_v63 = vadd.f32 %v2390_v8, %v2102_v11  ;;  %v2392_v62 = vpop.f32.mrf.mxu1  ;;  %v3217_v16 = vadd.f32 %v3153_v39, %v3089_v60  ;;  %v5123_v60 = vld [vmem:[#allocation11_spill] sm:$0xff] }
 0x2c5   : > { %v2106_v42 = vpop.f32.mrf.mxu0 }
 0x2c6   : > { %4107 = vst [vmem:[%s4894_s9 + $0xa8] sm:$0xff] %v4035_v58   ;;  %v3090_v54 = vmul.f32 %v2953_v12, %v2391_v63  ;;  %v2107_v43 = vadd.f32 %v2106_v42, %v5119_v34  ;;  %v2395_v31 = vpop.f32.mrf.mxu1  ;;  %v3281_v17 = vmax.f32 %v3217_v16, 0.0  ;;  %v2978_v63 = vpop.permute.xlu0 %2977  ;;  %v5124_v16 = vld [vmem:[#allocation12_spill] sm:$0xff] }
 0x2c7   : > { %v2108_v27 = vpop.f32.mrf.mxu0 }
 0x2c8   : > { %v3218_v9 = vadd.f32 %v3154_v14, %v3090_v54  ;;  %v2396_v13 = vadd.f32 %v2395_v31, %v2107_v43  ;;  %v2397_v2 = vpop.f32.mrf.mxu1  ;;  %v3159_v43 = vld [vmem:[%s4877_s30 + $0x190] sm:$0xff] }
 0x2c9   : > { %v2109_v33 = vpop.f32.mrf.mxu0  ;;  %v2983_v2 = vpop.permute.xlu1 %2982 }
 0x2ca   : > { %v3282_v36 = vmax.f32 %v3218_v9, 0.0  ;;  %v3091_v48 = vmul.f32 %v2958_v18, %v2396_v13  ;;  %v2110_v51 = vadd.f32 %v2109_v33, %v5120_v6  ;;  %v2398_v32 = vpop.f32.mrf.mxu1  ;;  %v3160_v18 = vld [vmem:[%s4877_s30 + $0x198] sm:$0xff] }
 0x2cb   : > { %v2111_v57 = vpop.f32.mrf.mxu0 }
 0x2cc   : > { %v4040_v35 = vpack.c.bf16 %v3282_v36, %v3281_v17  ;;  %v2399_v61 = vadd.f32 %v2398_v32, %v2110_v51  ;;  %v2400_v56 = vpop.f32.mrf.mxu1  ;;  %v3219_v37 = vadd.f32 %v3155_v23, %v3091_v48  ;;  %v5125_v48 = vld [vmem:[#allocation13_spill] sm:$0xff] }
 0x2cd   : > { %v2114_v28 = vpop.f32.mrf.mxu0 }
 0x2ce   : > { %4108 = vst [vmem:[%s4894_s9 + $0xb0] sm:$0xff] %v4040_v35   ;;  %v3092_v4 = vmul.f32 %v2963_v22, %v2399_v61  ;;  %v2115_v19 = vadd.f32 %v2114_v28, %v5121_v52  ;;  %v2403_v30 = vpop.f32.mrf.mxu1  ;;  %v3283_v45 = vmax.f32 %v3219_v37, 0.0  ;;  %v2988_v61 = vpop.permute.xlu0 %2987  ;;  %v5126_v37 = vld [vmem:[#allocation14_spill] sm:$0xff] }
 0x2cf   : > { %v2116_v49 = vpop.f32.mrf.mxu0 }
 0x2d0   : > { %v3220_v26 = vadd.f32 %v3156_v10, %v3092_v4  ;;  %v2404_v1 = vadd.f32 %v2403_v30, %v2115_v19  ;;  %v2405_v0 = vpop.f32.mrf.mxu1  ;;  %v3161_v19 = vld [vmem:[%s4877_s30 + $0x1a0] sm:$0xff] }
 0x2d1   : > { %v2117_v5 = vpop.f32.mrf.mxu0  ;;  %v2993_v0 = vpop.permute.xlu1 %2992 }
 0x2d2   : > { %v3284_v41 = vmax.f32 %v3220_v26, 0.0  ;;  %v3093_v38 = vmul.f32 %v2968_v21, %v2404_v1  ;;  %v2118_v53 = vadd.f32 %v2117_v5, %v5122_v24  ;;  %v2406_v46 = vpop.f32.mrf.mxu1  ;;  %v3162_v21 = vld [vmem:[%s4877_s30 + $0x1a8] sm:$0xff] }
 0x2d3   : > { %v2119_v3 = vpop.f32.mrf.mxu0 }
 0x2d4   : > { %v4045_v44 = vpack.c.bf16 %v3284_v41, %v3283_v45  ;;  %v2407_v50 = vadd.f32 %v2406_v46, %v2118_v53  ;;  %v2408_v47 = vpop.f32.mrf.mxu1  ;;  %v3221_v25 = vadd.f32 %v3157_v7, %v3093_v38  ;;  %v5127_v38 = vld [vmem:[#allocation15_spill] sm:$0xff] }
 0x2d5   : > { %v2122_v15 = vpop.f32.mrf.mxu0 }
 0x2d6   : > { %4109 = vst [vmem:[%s4894_s9 + $0xb8] sm:$0xff] %v4045_v44   ;;  %v3094_v55 = vmul.f32 %v2973_v40, %v2407_v50  ;;  %v2123_v29 = vadd.f32 %v2122_v15, %v5123_v60  ;;  %v2411_v11 = vpop.f32.mrf.mxu1  ;;  %v3285_v12 = vmax.f32 %v3221_v25, 0.0  ;;  %v2998_v50 = vpop.permute.xlu0 %2997  ;;  %v5128_v25 = vld [vmem:[#allocation16_spill] sm:$0xff] }
 0x2d7   : > { %v2124_v8 = vpop.f32.mrf.mxu0 }
 0x2d8   : > { %v3222_v39 = vadd.f32 %v3158_v59, %v3094_v55  ;;  %v2412_v20 = vadd.f32 %v2411_v11, %v2123_v29  ;;  %v2413_v58 = vpop.f32.mrf.mxu1  ;;  %v3163_v29 = vld [vmem:[%s4877_s30 + $0x1b0] sm:$0xff] }
 0x2d9   : > { %v2125_v62 = vpop.f32.mrf.mxu0  ;;  %v3003_v58 = vpop.permute.xlu1 %3002 }
 0x2da   : > { %v3286_v14 = vmax.f32 %v3222_v39, 0.0  ;;  %v3095_v42 = vmul.f32 %v2978_v63, %v2412_v20  ;;  %v2126_v54 = vadd.f32 %v2125_v62, %v5124_v16  ;;  %v2414_v34 = vpop.f32.mrf.mxu1  ;;  %v3164_v63 = vld [vmem:[%s4877_s30 + $0x1b8] sm:$0xff] }
 0x2db   : > { %v2127_v31 = vpop.f32.mrf.mxu0 }
 0x2dc   : > { %v4050_v27 = vpack.c.bf16 %v3286_v14, %v3285_v12  ;;  %v2415_v9 = vadd.f32 %v2414_v34, %v2126_v54  ;;  %v2416_v13 = vpop.f32.mrf.mxu1  ;;  %v3223_v17 = vadd.f32 %v3159_v43, %v3095_v42  ;;  %v5129_v42 = vld [vmem:[#allocation17_spill] sm:$0xff] }
 0x2dd   : > { %v2130_v33 = vpop.f32.mrf.mxu0 }
 0x2de   : > { %4110 = vst [vmem:[%s4894_s9 + $0xc0] sm:$0xff] %v4050_v27   ;;  %v3096_v36 = vmul.f32 %v2983_v2, %v2415_v9  ;;  %v2131_v6 = vadd.f32 %v2130_v33, %v5125_v48  ;;  %v2419_v51 = vpop.f32.mrf.mxu1  ;;  %v3287_v22 = vmax.f32 %v3223_v17, 0.0  ;;  %v3008_v9 = vpop.permute.xlu0 %3007  ;;  %v5130_v17 = vld [vmem:[#allocation18_spill] sm:$0xff] }
 0x2df   : > { %v2132_v32 = vpop.f32.mrf.mxu0 }
 0x2e0   : > { %v3224_v23 = vadd.f32 %v3160_v18, %v3096_v36  ;;  %v2420_v57 = vadd.f32 %v2419_v51, %v2131_v6  ;;  %v2421_v35 = vpop.f32.mrf.mxu1  ;;  %v3165_v6 = vld [vmem:[%s4877_s30 + $0x1c0] sm:$0xff] }
 0x2e1   : > { %v2133_v56 = vpop.f32.mrf.mxu0  ;;  %v3013_v35 = vpop.permute.xlu1 %3012 }
 0x2e2   : > { %v3288_v10 = vmax.f32 %v3224_v23, 0.0  ;;  %v3097_v28 = vmul.f32 %v2988_v61, %v2420_v57  ;;  %v2134_v4 = vadd.f32 %v2133_v56, %v5126_v37  ;;  %v2422_v52 = vpop.f32.mrf.mxu1  ;;  %v3166_v61 = vld [vmem:[%s4877_s30 + $0x1c8] sm:$0xff] }
 0x2e3   : > { %v2135_v30 = vpop.f32.mrf.mxu0 }
 0x2e4   : > { %v4055_v49 = vpack.c.bf16 %v3288_v10, %v3287_v22  ;;  %v2423_v26 = vadd.f32 %v2422_v52, %v2134_v4  ;;  %v2424_v1 = vpop.f32.mrf.mxu1  ;;  %v3225_v45 = vadd.f32 %v3161_v19, %v3097_v28  ;;  %v5131_v28 = vld [vmem:[#allocation19_spill] sm:$0xff] }
 0x2e5   : > { %v2138_v5 = vpop.f32.mrf.mxu0 }
 0x2e6   : > { %4111 = vst [vmem:[%s4894_s9 + $0xc8] sm:$0xff] %v4055_v49   ;;  %v3098_v41 = vmul.f32 %v2993_v0, %v2423_v26  ;;  %v2139_v24 = vadd.f32 %v2138_v5, %v5127_v38  ;;  %v2427_v53 = vpop.f32.mrf.mxu1  ;;  %v3289_v40 = vmax.f32 %v3225_v45, 0.0  ;;  %v3018_v26 = vpop.permute.xlu0 %3017  ;;  %v5132_v45 = vld [vmem:[#allocation20_spill] sm:$0xff] }
 0x2e7   : > { %v2140_v46 = vpop.f32.mrf.mxu0 }
 0x2e8   : > { %v3226_v7 = vadd.f32 %v3162_v21, %v3098_v41  ;;  %v2428_v3 = vadd.f32 %v2427_v53, %v2139_v24  ;;  %v2429_v44 = vpop.f32.mrf.mxu1  ;;  %v3167_v24 = vld [vmem:[%s4877_s30 + $0x1d0] sm:$0xff] }
 0x2e9   : > { %v2141_v47 = vpop.f32.mrf.mxu0  ;;  %v3023_v44 = vpop.permute.xlu1 %3022 }
 0x2ea   : > { %v3290_v59 = vmax.f32 %v3226_v7, 0.0  ;;  %v3099_v15 = vmul.f32 %v2998_v50, %v2428_v3  ;;  %v2142_v55 = vadd.f32 %v2141_v47, %v5128_v25  ;;  %v2430_v60 = vpop.f32.mrf.mxu1  ;;  %v3168_v50 = vld [vmem:[%s4877_s30 + $0x1d8] sm:$0xff] }
 0x2eb   : > { %v2143_v11 = vpop.f32.mrf.mxu0 }
 0x2ec   : > { %v4060_v8 = vpack.c.bf16 %v3290_v59, %v3289_v40  ;;  %v2431_v39 = vadd.f32 %v2430_v60, %v2142_v55  ;;  %v2432_v20 = vpop.f32.mrf.mxu1  ;;  %v3227_v12 = vadd.f32 %v3163_v29, %v3099_v15  ;;  %v5133_v15 = vld [vmem:[#allocation21_spill] sm:$0xff] }
 0x2ed   : > { %v2146_v62 = vpop.f32.mrf.mxu0 }
 0x2ee   : > { %4112 = vst [vmem:[%s4894_s9 + $0xd0] sm:$0xff] %v4060_v8   ;;  %v3100_v14 = vmul.f32 %v3003_v58, %v2431_v39  ;;  %v2147_v16 = vadd.f32 %v2146_v62, %v5129_v42  ;;  %v2435_v54 = vpop.f32.mrf.mxu1  ;;  %v3291_v2 = vmax.f32 %v3227_v12, 0.0  ;;  %v3028_v39 = vpop.permute.xlu0 %3027  ;;  %v5134_v12 = vld [vmem:[#allocation22_spill] sm:$0xff] }
 0x2ef   : > { %v2148_v34 = vpop.f32.mrf.mxu0 }
 0x2f0   : > { %v3228_v43 = vadd.f32 %v3164_v63, %v3100_v14  ;;  %v2436_v31 = vadd.f32 %v2435_v54, %v2147_v16  ;;  %v2437_v27 = vpop.f32.mrf.mxu1  ;;  %v3169_v16 = vld [vmem:[%s4877_s30 + $0x1e0] sm:$0xff] }
 0x2f1   : > { %v2149_v13 = vpop.f32.mrf.mxu0  ;;  %v3033_v27 = vpop.permute.xlu1 %3032 }
 0x2f2   : > { %v3292_v18 = vmax.f32 %v3228_v43, 0.0  ;;  %v3101_v33 = vmul.f32 %v3008_v9, %v2436_v31  ;;  %v2150_v36 = vadd.f32 %v2149_v13, %v5130_v17  ;;  %v2438_v48 = vpop.f32.mrf.mxu1  ;;  %v3170_v9 = vld [vmem:[%s4877_s30 + $0x1e8] sm:$0xff] }
 0x2f3   : > { %v2151_v51 = vpop.f32.mrf.mxu0 }
 0x2f4   : > { %v4065_v32 = vpack.c.bf16 %v3292_v18, %v3291_v2  ;;  %v2439_v23 = vadd.f32 %v2438_v48, %v2150_v36  ;;  %v2440_v57 = vpop.f32.mrf.mxu1  ;;  %v3229_v22 = vadd.f32 %v3165_v6, %v3101_v33  ;;  %v5135_v33 = vld [vmem:[#allocation23_spill] sm:$0xff] }
 0x2f5   : > { %v2154_v56 = vpop.f32.mrf.mxu0 }
 0x2f6   : > { %4113 = vst [vmem:[%s4894_s9 + $0xd8] sm:$0xff] %v4065_v32   ;;  %v3102_v10 = vmul.f32 %v3013_v35, %v2439_v23  ;;  %v2155_v37 = vadd.f32 %v2154_v56, %v5131_v28  ;;  %v2443_v4 = vpop.f32.mrf.mxu1  ;;  %v3293_v0 = vmax.f32 %v3229_v22, 0.0  ;;  %v3038_v23 = vpop.permute.xlu0 %3037  ;;  %v5136_v22 = vld [vmem:[#allocation24_spill] sm:$0xff] }
 0x2f7   : > { %v2156_v52 = vpop.f32.mrf.mxu0 }
 0x2f8   : > { %v3230_v19 = vadd.f32 %v3166_v61, %v3102_v10  ;;  %v2444_v30 = vadd.f32 %v2443_v4, %v2155_v37  ;;  %v2445_v49 = vpop.f32.mrf.mxu1  ;;  %v3171_v37 = vld [vmem:[%s4877_s30 + $0x1f0] sm:$0xff] }
 0x2f9   : > { %v2157_v1 = vpop.f32.mrf.mxu0  ;;  %v3043_v49 = vpop.permute.xlu1 %3042 }
 0x2fa   : > { %v3294_v21 = vmax.f32 %v3230_v19, 0.0  ;;  %v3103_v5 = vmul.f32 %v3018_v26, %v2444_v30  ;;  %v2158_v41 = vadd.f32 %v2157_v1, %v5132_v45  ;;  %v2446_v38 = vpop.f32.mrf.mxu1  ;;  %v3172_v26 = vld [vmem:[%s4877_s30 + $0x1f8] sm:$0xff] }
 0x2fb   : > { %v2159_v53 = vpop.f32.mrf.mxu0 }
 0x2fc   : > { %v4070_v46 = vpack.c.bf16 %v3294_v21, %v3293_v0  ;;  %v2447_v7 = vadd.f32 %v2446_v38, %v2158_v41  ;;  %v2448_v3 = vpop.f32.mrf.mxu1  ;;  %v3231_v40 = vadd.f32 %v3167_v24, %v3103_v5 }
 0x2fd   : > { %v2162_v47 = vpop.f32.mrf.mxu0 }
 0x2fe   : > { %4114 = vst [vmem:[%s4894_s9 + $0xe0] sm:$0xff] %v4070_v46   ;;  %v3104_v59 = vmul.f32 %v3023_v44, %v2447_v7  ;;  %v2163_v25 = vadd.f32 %v2162_v47, %v5133_v15  ;;  %v2451_v55 = vpop.f32.mrf.mxu1  ;;  %v3295_v58 = vmax.f32 %v3231_v40, 0.0 }
 0x2ff   : > { %v2164_v60 = vpop.f32.mrf.mxu0 }
 0x300   : > { %v3232_v29 = vadd.f32 %v3168_v50, %v3104_v59  ;;  %v2452_v11 = vadd.f32 %v2451_v55, %v2163_v25  ;;  %v2453_v8 = vpop.f32.mrf.mxu1 }
 0x301   : > { %v2165_v20 = vpop.f32.mrf.mxu0 }
 0x302   : > { %v3296_v63 = vmax.f32 %v3232_v29, 0.0  ;;  %v3105_v62 = vmul.f32 %v3028_v39, %v2452_v11  ;;  %v2166_v14 = vadd.f32 %v2165_v20, %v5134_v12  ;;  %v2454_v42 = vpop.f32.mrf.mxu1 }
 0x303   : > { %v2167_v54 = vpop.f32.mrf.mxu0 }
 0x304   : > { %v4075_v34 = vpack.c.bf16 %v3296_v63, %v3295_v58  ;;  %v2455_v43 = vadd.f32 %v2454_v42, %v2166_v14  ;;  %v2456_v31 = vpop.f32.mrf.mxu1  ;;  %v3233_v2 = vadd.f32 %v3169_v16, %v3105_v62 }
 0x305   : > { %v2170_v13 = vpop.f32.mrf.mxu0 }
 0x306   : > { %4115 = vst [vmem:[%s4894_s9 + $0xe8] sm:$0xff] %v4075_v34   ;;  %v3106_v18 = vmul.f32 %v3033_v27, %v2455_v43  ;;  %v2171_v17 = vadd.f32 %v2170_v13, %v5135_v33  ;;  %v2459_v36 = vpop.f32.mrf.mxu1  ;;  %v3297_v35 = vmax.f32 %v3233_v2, 0.0 }
 0x307   : > { %v2172_v48 = vpop.f32.mrf.mxu0 }
 0x308   : > { %v3234_v6 = vadd.f32 %v3170_v9, %v3106_v18  ;;  %v2460_v51 = vadd.f32 %v2459_v36, %v2171_v17  ;;  %v2461_v32 = vpop.f32.mrf.mxu1 }
 0x309   : > { %v2173_v57 = vpop.f32.mrf.mxu0 }
 0x30a   : > { %v3298_v61 = vmax.f32 %v3234_v6, 0.0  ;;  %v3107_v56 = vmul.f32 %v3038_v23, %v2460_v51  ;;  %v2174_v10 = vadd.f32 %v2173_v57, %v5136_v22  ;;  %v2462_v28 = vpop.f32.mrf.mxu1 }
 0x30b   : > { %v2175_v4 = vpop.f32.mrf.mxu0 }
 0x30c   : > { %v4080_v52 = vpack.c.bf16 %v3298_v61, %v3297_v35  ;;  %v2463_v19 = vadd.f32 %v2462_v28, %v2174_v10  ;;  %v2464_v30 = vpop.f32.mrf.mxu1  ;;  %v3235_v1 = vadd.f32 %v3171_v37, %v3107_v56 }
 0x30e   : > { %4116 = vst [vmem:[%s4894_s9 + $0xf0] sm:$0xff] %v4080_v52   ;;  %v3108_v0 = vmul.f32 %v3043_v49, %v2463_v19  ;;  %v3299_v5 = vmax.f32 %v3235_v1, 0.0 }
 0x310   : > { %v3236_v21 = vadd.f32 %v3172_v26, %v3108_v0 }
 0x312   : > { %v3300_v45 = vmax.f32 %v3236_v21, 0.0 }
 0x314   : > { %v4085_v41 = vpack.c.bf16 %v3300_v45, %v3299_v5 }
 0x316   : > { %4117 = vst [vmem:[%s4894_s9 + $0xf8] sm:$0xff] %v4085_v41  }
 0x317 PF: > { %s14_s17 = sadd.s32 1, %s4231_s17   ;;  %s5137_s15 = smov %s4227_s16 }
 0x318   : > { %p11_p6 = scmp.ge.s32.totalorder %s14_s17, 4   ;;  %s5138_s16 = smov %s5140_s18 }
 0x31a   :  { %13 = sbr.rel (!%p11_p6) target bundleno = 2 (0x2), region = 81 }

// kernel: graphsage_forward.11
= control target key start
LH: loop header
LB: loop body
LE: loop exit
PB: predicated region body
PF: predicated region fallthrough
CT: control target
= control target key end

     0   :  { %s3620_s15 = smov 0   ;;  %s3622_s16 = smov 0   ;;  %s4454_s0 = inlined_call_operand.vmem [shape: s8[1024,1024], index: 0, kind: input, shape index: {}]   ;;  %s4455_s1 = inlined_call_operand.vmem [shape: bf16[1024,128], index: 1, kind: input, shape index: {}]   ;;  %s4456_s2 = inlined_call_operand.vmem [shape: f32[1024,128], index: 2, kind: input, shape index: {}]   ;;  %s4457_s3 = inlined_call_operand.vmem [shape: f32[1024,1], index: 3, kind: input, shape index: {}]   ;;  %s4458_s4 = inlined_call_operand.vmem [shape: f32[1024,128], index: 4, kind: output, shape index: {}]  }
   0x1   :  { %s3624_s17 = smov 0  }
   0x2 LB: > { %s26_s18 = sadd.s32 1, %s3588_s16  ;;  %p3402_p0 = scmp.ge.s32.totalorder %s3592_s17, 1  ;;  %s3592_s17 = sphi %s3624_s17, %s14_s17   ;;  %s3588_s16 = sphi %s3622_s16, %s4502_s16   ;;  %s3584_s15 = sphi %s3620_s15, %s4501_s15  }
   0x3   : > { %p28_p1 = scmp.ge.s32.totalorder %s26_s18, 2  ;;  %p205_p2 = scmp.lt.s32.totalorder %s3592_s17, 3 }
   0x5   : > { %s4504_s18 = smov (%p28_p1, %s26_s18), 0  ;;  %p206_p3 = pnand %p3402_p0, %p205_p2 }
   0x7   : > { %209 = sbr.rel (%p206_p3) target bundleno = 787 (0x313), region = 36 }
   0xc   : > { %v3506_v0 = vld [vmem:[%s4455_s1 + $0x38] sm:$0xff]   ;;  %v3594_v1 = vmov 0   ;;  %v3508_v3 = vld [vmem:[%s4455_s1 + $0x30] sm:$0xff]   ;;  %v3510_v5 = vld [vmem:[%s4455_s1 + $0x28] sm:$0xff]   ;;  %s3403_s13 = sshll.u32 %s3584_s15, 4  ;;  %s3406_s24 = sshll.u32 %s3584_s15, 6 }
   0xd   : > { %1310 = vmatprep.subr.bf16.mxu0 %v3594_v1  ;;  %1599 = vmatprep.subr.bf16.mxu1 %v3594_v1  ;;  %v3507_v2 = vld [vmem:[%s4455_s1 + $0xb8] sm:$0xff]   ;;  %v3509_v4 = vld [vmem:[%s4455_s1 + $0xb0] sm:$0xff]   ;;  %v3511_v6 = vld [vmem:[%s4455_s1 + $0xa8] sm:$0xff]   ;;  %p248_p4 = scmp.lt.s32.totalorder %s3403_s13, 31  ;;  %p259_p5 = scmp.lt.s32.totalorder %s3406_s24, 127 }
   0xe   : > { %1311 = vmatpush1.bf16.msra.mxu0 %v3506_v0  ;;  %3504 = vset.pattern.permute.xlu0 %v3594_v1  ;;  %v3512_v7 = vld [vmem:[%s4455_s1 + $0x20] sm:$0xff]   ;;  %v3514_v9 = vld [vmem:[%s4455_s1 + $0x18] sm:$0xff]   ;;  %v3516_v11 = vld [vmem:[%s4455_s1 + $0x10] sm:$0xff]  }
   0xf   : > { %1600 = vmatpush1.bf16.msra.mxu1 %v3507_v2  ;;  %1312 = vmatprep.subr.bf16.mxu0 %v3594_v1  ;;  %v3513_v8 = vld [vmem:[%s4455_s1 + $0xa0] sm:$0xff]   ;;  %v3515_v10 = vld [vmem:[%s4455_s1 + $0x98] sm:$0xff]   ;;  %v3517_v12 = vld [vmem:[%s4455_s1 + $0x90] sm:$0xff]   ;;  %s4506_s13 = smov (!%p248_p4, %s3403_s13), 31  ;;  %s4508_s24 = smov (!%p259_p5, %s3406_s24), 127 }
  0x10   : > { %1601 = vmatprep.subr.bf16.mxu1 %v3594_v1  ;;  %3505 = vset.pattern.permute.xlu1 %v3594_v1  ;;  %v3518_v13 = vld [vmem:[%s4455_s1 + $0x8] sm:$0xff]   ;;  %v3520_v15 = vld [vmem:[%s4455_s1] sm:$0xff]   ;;  %s3478_s28 = sshll.u32 %s4506_s13, 6  ;;  %v3522_v17 = vld [vmem:[%s4455_s1 + $0x78] sm:$0xff]   ;;  %s3971_s25 = sshll.u32 %s4508_s24, 3 }
  0x11   : > { %v3519_v14 = vld [vmem:[%s4455_s1 + $0x88] sm:$0xff]   ;;  %v3521_v16 = vld [vmem:[%s4455_s1 + $0x80] sm:$0xff]   ;;  %s3710_s7 = scalar_lea.vmem %s4454_s0, %s3478_s28  ;;  %v3523_v18 = vld [vmem:[%s4455_s1 + $0xf8] sm:$0xff]   ;;  %s3977_s27 = scalar_lea.vmem %s4457_s3, %s3971_s25 }
  0x12   : > { %1313 = vmatpush1.bf16.msra.mxu0 %v3508_v3  ;;  %v3721_v19 = vld [vmem:[%s3710_s7 + $0x8] sm:$0xff]  ;;  %v3724_v20 = vld [vmem:[%s3710_s7 + $0x18] sm:$0xff]  ;;  %v3524_v23 = vld [vmem:[%s4455_s1 + $0x70] sm:$0xff]   ;;  %s4234_s30 = scalar_lea.vmem %s4456_s2, %s3971_s25  ;;  %s4244_s8 = scalar_lea.vmem %s4458_s4, %s3971_s25 }
  0x13   : > { %1602 = vmatpush1.bf16.msra.mxu1 %v3509_v4  ;;  %1314 = vmatprep.subr.bf16.mxu0 %v3594_v1  ;;  %v474_v21 = vunpack.c.l.s8.bf16 %v3721_v19  ;;  %v476_v22 = vunpack.c.l.s8.bf16 %v3724_v20  ;;  %v3525_v24 = vld [vmem:[%s4455_s1 + $0xf0] sm:$0xff]   ;;  %v3526_v25 = vld [vmem:[%s4455_s1 + $0x68] sm:$0xff]   ;;  %v3528_v27 = vld [vmem:[%s4455_s1 + $0x60] sm:$0xff]   ;;  %v482_v42 = vunpack.c.h.s8.bf16 %v3721_v19  ;;  %v484_v44 = vunpack.c.h.s8.bf16 %v3724_v20 }
  0x14   : > { %1603 = vmatprep.subr.bf16.mxu1 %v3594_v1  ;;  %v3527_v26 = vld [vmem:[%s4455_s1 + $0xe8] sm:$0xff]   ;;  %v3529_v28 = vld [vmem:[%s4455_s1 + $0xe0] sm:$0xff]   ;;  %v3530_v29 = vld [vmem:[%s4455_s1 + $0x58] sm:$0xff]  }
  0x15   : > { %1342 = vmatprep.mubr.bf16.mxu0 %v474_v21  ;;  %1631 = vmatprep.mubr.bf16.mxu1 %v476_v22  ;;  %v3531_v30 = vld [vmem:[%s4455_s1 + $0xd8] sm:$0xff]   ;;  %v3532_v31 = vld [vmem:[%s4455_s1 + $0x50] sm:$0xff]   ;;  %v3534_v33 = vld [vmem:[%s4455_s1 + $0x48] sm:$0xff]  }
  0x16   : > { %1315 = vmatpush1.bf16.msra.mxu0 %v3510_v5  ;;  %v3533_v32 = vld [vmem:[%s4455_s1 + $0xd0] sm:$0xff]   ;;  %v3535_v34 = vld [vmem:[%s4455_s1 + $0xc8] sm:$0xff]   ;;  %v3536_v35 = vld [vmem:[%s4455_s1 + $0x40] sm:$0xff]  }
  0x17   : > { %1604 = vmatpush1.bf16.msra.mxu1 %v3511_v6  ;;  %1316 = vmatprep.subr.bf16.mxu0 %v3594_v1  ;;  %v345_v36 = vld [vmem:[%s3710_s7] sm:$0xff]  ;;  %v347_v38 = vld [vmem:[%s3710_s7 + $0x10] sm:$0xff]  ;;  %v3538_v39 = vld [vmem:[%s4455_s1 + $0x138] sm:$0xff]  }
  0x18   : > { %1605 = vmatprep.subr.bf16.mxu1 %v3594_v1  ;;  %v3537_v37 = vld [vmem:[%s4455_s1 + $0xc0] sm:$0xff]   ;;  %v473_v40 = vunpack.c.l.s8.bf16 %v345_v36  ;;  %v475_v41 = vunpack.c.l.s8.bf16 %v347_v38  ;;  %v3539_v43 = vld [vmem:[%s4455_s1 + $0x1b8] sm:$0xff]   ;;  %v354_v45 = vld [vmem:[%s3710_s7 + $0x48] sm:$0xff]  ;;  %v481_v49 = vunpack.c.h.s8.bf16 %v345_v36  ;;  %v483_v50 = vunpack.c.h.s8.bf16 %v347_v38 }
  0x19   : > { %v356_v46 = vld [vmem:[%s3710_s7 + $0x58] sm:$0xff]  ;;  %v3540_v47 = vld [vmem:[%s4455_s1 + $0x130] sm:$0xff]   ;;  %v490_v51 = vunpack.c.l.s8.bf16 %v354_v45  ;;  %v3542_v53 = vld [vmem:[%s4455_s1 + $0x128] sm:$0xff]   ;;  %v498_v61 = vunpack.c.h.s8.bf16 %v354_v45 }
  0x1a   : > { %1317 = vmatpush1.bf16.msra.mxu0 %v3512_v7  ;;  %v3541_v48 = vld [vmem:[%s4455_s1 + $0x1b0] sm:$0xff]   ;;  %v492_v52 = vunpack.c.l.s8.bf16 %v356_v46  ;;  %v3543_v54 = vld [vmem:[%s4455_s1 + $0x1a8] sm:$0xff]   ;;  %v353_v55 = vld [vmem:[%s3710_s7 + $0x40] sm:$0xff]  ;;  %v500_v62 = vunpack.c.h.s8.bf16 %v356_v46 }
  0x1b   : > { %1606 = vmatpush1.bf16.msra.mxu1 %v3513_v8  ;;  %1318 = vmatprep.subr.bf16.mxu0 %v3594_v1  ;;  %v355_v56 = vld [vmem:[%s3710_s7 + $0x50] sm:$0xff]  ;;  %v3544_v57 = vld [vmem:[%s4455_s1 + $0x120] sm:$0xff]   ;;  %v489_v59 = vunpack.c.l.s8.bf16 %v353_v55  ;;  %v3546_v63 = vld [vmem:[%s4455_s1 + $0x118] sm:$0xff]   ;;  %v497_v6 = vunpack.c.h.s8.bf16 %v353_v55 }
  0x1c   : > { %1607 = vmatprep.subr.bf16.mxu1 %v3594_v1  ;;  %v3545_v58 = vld [vmem:[%s4455_s1 + $0x1a0] sm:$0xff]   ;;  %v491_v60 = vunpack.c.l.s8.bf16 %v355_v56  ;;  %v3547_v0 = vld [vmem:[%s4455_s1 + $0x198] sm:$0xff]   ;;  %v362_v2 = vld [vmem:[%s3710_s7 + $0x88] sm:$0xff]  ;;  %v499_v7 = vunpack.c.h.s8.bf16 %v355_v56 }
  0x1d   : > { %v3548_v3 = vld [vmem:[%s4455_s1 + $0x110] sm:$0xff]   ;;  %v364_v4 = vld [vmem:[%s3710_s7 + $0x98] sm:$0xff]  ;;  %v506_v8 = vunpack.c.l.s8.bf16 %v362_v2  ;;  %v370_v22 = vld [vmem:[%s3710_s7 + $0xc8] sm:$0xff] }
  0x1e   : > { %1319 = vmatpush1.bf16.msra.mxu0 %v3514_v9  ;;  %v3549_v5 = vld [vmem:[%s4455_s1 + $0x190] sm:$0xff]   ;;  %v508_v9 = vunpack.c.l.s8.bf16 %v364_v4  ;;  %v516_v19 = vunpack.c.h.s8.bf16 %v364_v4  ;;  %v3554_v20 = vld [vmem:[%s4455_s1 + $0x178] sm:$0xff]   ;;  %v530_v36 = vunpack.c.h.s8.bf16 %v370_v22  ;;  %v3560_v38 = vld [vmem:[%s4455_s1 + $0x160] sm:$0xff]  }
  0x1f   : > { %1608 = vmatpush1.bf16.msra.mxu1 %v3515_v10  ;;  %1320 = vmatprep.subr.bf16.mxu0 %v3594_v1  ;;  %v3550_v10 = vld [vmem:[%s4455_s1 + $0x108] sm:$0xff]   ;;  %v3555_v21 = vld [vmem:[%s4455_s1 + $0x1f8] sm:$0xff]   ;;  %v377_v46 = vld [vmem:[%s3710_s7 + $0x100] sm:$0xff] }
  0x20   : > { %1609 = vmatprep.subr.bf16.mxu1 %v3594_v1  ;;  %v3563_v55 = vld [vmem:[%s4455_s1 + $0x1d8] sm:$0xff]   ;;  %v545_v56 = vunpack.c.h.s8.bf16 %v377_v46  ;;  %v3564_v4 = vld [vmem:[%s4455_s1 + $0x150] sm:$0xff]  }
  0x22   : > { %1321 = vmatpush1.bf16.msra.mxu0 %v3516_v11  ;;  %v3551_v11 = vld [vmem:[%s4455_s1 + $0x188] sm:$0xff]  }
  0x23   : > { %1610 = vmatpush1.bf16.msra.mxu1 %v3517_v12  ;;  %1322 = vmatprep.subr.bf16.mxu0 %v3594_v1  ;;  %v361_v12 = vld [vmem:[%s3710_s7 + $0x80] sm:$0xff] }
  0x24   : > { %1611 = vmatprep.subr.bf16.mxu1 %v3594_v1 }
  0x26   : > { %1323 = vmatpush1.bf16.msra.mxu0 %v3518_v13  ;;  %v363_v13 = vld [vmem:[%s3710_s7 + $0x90] sm:$0xff] }
  0x27   : > { %1612 = vmatpush1.bf16.msra.mxu1 %v3519_v14  ;;  %1324 = vmatprep.subr.bf16.mxu0 %v3594_v1  ;;  %v3552_v14 = vld [vmem:[%s4455_s1 + $0x100] sm:$0xff]  }
  0x28   : > { %1613 = vmatprep.subr.bf16.mxu1 %v3594_v1 }
  0x2a   : > { %1325 = vmatpush1.bf16.msra.mxu0 %v3520_v15  ;;  %v3553_v15 = vld [vmem:[%s4455_s1 + $0x180] sm:$0xff]  }
  0x2b   : > { %1614 = vmatpush1.bf16.msra.mxu1 %v3521_v16  ;;  %1326 = vmatprep.subr.bf16.mxu0 %v3594_v1  ;;  %v505_v16 = vunpack.c.l.s8.bf16 %v361_v12 }
  0x2c   : > { %1615 = vmatprep.subr.bf16.mxu1 %v3594_v1 }
  0x2e   : > { %1327 = vmatpush2.bf16.msra.mxu0 %v3522_v17  ;;  %v507_v17 = vunpack.c.l.s8.bf16 %v363_v13 }
  0x2f   : > { %1616 = vmatpush2.bf16.msra.mxu1 %v3523_v18  ;;  %1328 = vmatprep.subr.bf16.mxu0 %v3594_v1  ;;  %v514_v18 = vunpack.c.h.s8.bf16 %v362_v2 }
  0x30   : > { %1617 = vmatprep.subr.bf16.mxu1 %v3594_v1 }
  0x32   : > { %1329 = vmatpush2.bf16.msra.mxu0 %v3524_v23  ;;  %v3556_v23 = vld [vmem:[%s4455_s1 + $0x170] sm:$0xff]  }
  0x33   : > { %1618 = vmatpush2.bf16.msra.mxu1 %v3525_v24  ;;  %1330 = vmatprep.subr.bf16.mxu0 %v3594_v1  ;;  %v372_v24 = vld [vmem:[%s3710_s7 + $0xd8] sm:$0xff] }
  0x34   : > { %1619 = vmatprep.subr.bf16.mxu1 %v3594_v1 }
  0x36   : > { %1331 = vmatpush2.bf16.msra.mxu0 %v3526_v25  ;;  %v3557_v25 = vld [vmem:[%s4455_s1 + $0x1f0] sm:$0xff]  }
  0x37   : > { %1620 = vmatpush2.bf16.msra.mxu1 %v3527_v26  ;;  %1332 = vmatprep.subr.bf16.mxu0 %v3594_v1  ;;  %v513_v26 = vunpack.c.h.s8.bf16 %v361_v12  ;;  %v395_v12 = vld [vmem:[%s3710_s7 + $0x190] sm:$0xff] }
  0x38   : > { %1621 = vmatprep.subr.bf16.mxu1 %v3594_v1 }
  0x3a   : > { %1333 = vmatpush2.bf16.msra.mxu0 %v3528_v27  ;;  %v515_v27 = vunpack.c.h.s8.bf16 %v363_v13 }
  0x3b   : > { %1622 = vmatpush2.bf16.msra.mxu1 %v3529_v28  ;;  %1334 = vmatprep.subr.bf16.mxu0 %v3594_v1  ;;  %v522_v28 = vunpack.c.l.s8.bf16 %v370_v22  ;;  %v579_v22 = vunpack.c.h.s8.bf16 %v395_v12 }
  0x3c   : > { %1623 = vmatprep.subr.bf16.mxu1 %v3594_v1 }
  0x3e   : > { %1335 = vmatpush2.bf16.msra.mxu0 %v3530_v29  ;;  %v524_v29 = vunpack.c.l.s8.bf16 %v372_v24 }
  0x3f   : > { %1624 = vmatpush2.bf16.msra.mxu1 %v3531_v30  ;;  %1336 = vmatprep.subr.bf16.mxu0 %v3594_v1  ;;  %v3558_v30 = vld [vmem:[%s4455_s1 + $0x168] sm:$0xff]  }
  0x40   : > { %1625 = vmatprep.subr.bf16.mxu1 %v3594_v1 }
  0x42   : > { %1337 = vmatpush2.bf16.msra.mxu0 %v3532_v31  ;;  %v3559_v31 = vld [vmem:[%s4455_s1 + $0x1e8] sm:$0xff]  }
  0x43   : > { %1626 = vmatpush2.bf16.msra.mxu1 %v3533_v32  ;;  %1338 = vmatprep.subr.bf16.mxu0 %v3594_v1  ;;  %v369_v32 = vld [vmem:[%s3710_s7 + $0xc0] sm:$0xff] }
  0x44   : > { %1627 = vmatprep.subr.bf16.mxu1 %v3594_v1 }
  0x46   : > { %1339 = vmatpush2.bf16.msra.mxu0 %v3534_v33  ;;  %v371_v33 = vld [vmem:[%s3710_s7 + $0xd0] sm:$0xff] }
  0x47   : > { %1628 = vmatpush2.bf16.msra.mxu1 %v3535_v34  ;;  %1340 = vmatprep.subr.bf16.mxu0 %v3594_v1  ;;  %v521_v34 = vunpack.c.l.s8.bf16 %v369_v32 }
  0x48   : > { %1629 = vmatprep.subr.bf16.mxu1 %v3594_v1 }
  0x4a   : > { %1341 = vmatpush2.bf16.msra.mxu0 %v3536_v35  ;;  %v523_v35 = vunpack.c.l.s8.bf16 %v371_v33 }
  0x4b   : > { %1630 = vmatpush2.bf16.msra.mxu1 %v3537_v37  ;;  %1888 = vmatprep.subr.bf16.mxu0 %v3594_v1  ;;  %v532_v37 = vunpack.c.h.s8.bf16 %v372_v24 }
  0x4c   : > { %2177 = vmatprep.subr.bf16.mxu1 %v3594_v1 }
  0x4d   : > { %1343 = vmatmul.mubr.bf16.vlgmr.msra.gmra.mxu0 %v473_v40  ;;  %v378_v40 = vld [vmem:[%s3710_s7 + $0x108] sm:$0xff] }
  0x4e   : > { %1632 = vmatmul.mubr.bf16.vlgmr.msra.gmra.mxu1 %v475_v41  ;;  %1889 = vmatpush1.bf16.msra.mxu0 %v3538_v39  ;;  %v3561_v39 = vld [vmem:[%s4455_s1 + $0x1e0] sm:$0xff]   ;;  %v380_v41 = vld [vmem:[%s3710_s7 + $0x118] sm:$0xff] }
  0x4f   : > { %2178 = vmatpush1.bf16.msra.mxu1 %v3539_v43  ;;  %1350 = vmatprep.mubr.bf16.mxu0 %v482_v42  ;;  %v529_v42 = vunpack.c.h.s8.bf16 %v369_v32  ;;  %v531_v43 = vunpack.c.h.s8.bf16 %v371_v33  ;;  %v540_v45 = vunpack.c.l.s8.bf16 %v380_v41  ;;  %v412_v32 = vld [vmem:[%s3710_s7 + $0x218] sm:$0xff]  ;;  %v3569_v33 = vld [vmem:[%s4455_s1 + $0x1c0] sm:$0xff]  }
  0x50   : > { %1639 = vmatprep.mubr.bf16.mxu1 %v484_v44  ;;  %1890 = vmatprep.subr.bf16.mxu0 %v3594_v1  ;;  %v538_v44 = vunpack.c.l.s8.bf16 %v378_v40 }
  0x51   : > { %2179 = vmatprep.subr.bf16.mxu1 %v3594_v1 }
  0x52   : > { %1891 = vmatpush1.bf16.msra.mxu0 %v3540_v47  ;;  %v379_v47 = vld [vmem:[%s3710_s7 + $0x110] sm:$0xff] }
  0x53   : > { %2180 = vmatpush1.bf16.msra.mxu1 %v3541_v48  ;;  %1892 = vmatprep.subr.bf16.mxu0 %v3594_v1  ;;  %v537_v48 = vunpack.c.l.s8.bf16 %v377_v46 }
  0x54   : > { %2181 = vmatprep.subr.bf16.mxu1 %v3594_v1 }
  0x55   : > { %1351 = vmatmul.mubr.bf16.gmra.mxu0 %v481_v49  ;;  %v539_v49 = vunpack.c.l.s8.bf16 %v379_v47 }
  0x56   : > { %1640 = vmatmul.mubr.bf16.gmra.mxu1 %v483_v50  ;;  %1358 = vmatprep.mubr.bf16.mxu0 %v490_v51  ;;  %v546_v50 = vunpack.c.h.s8.bf16 %v378_v40  ;;  %v548_v51 = vunpack.c.h.s8.bf16 %v380_v41 }
  0x57   : > { %1647 = vmatprep.mubr.bf16.mxu1 %v492_v52  ;;  %1893 = vmatpush1.bf16.msra.mxu0 %v3542_v53  ;;  %v386_v52 = vld [vmem:[%s3710_s7 + $0x148] sm:$0xff]  ;;  %v3562_v53 = vld [vmem:[%s4455_s1 + $0x158] sm:$0xff]  }
  0x58   : > { %2182 = vmatpush1.bf16.msra.mxu1 %v3543_v54  ;;  %1894 = vmatprep.subr.bf16.mxu0 %v3594_v1  ;;  %v388_v54 = vld [vmem:[%s3710_s7 + $0x158] sm:$0xff] }
  0x59   : > { %2183 = vmatprep.subr.bf16.mxu1 %v3594_v1  ;;  %v564_v2 = vunpack.c.h.s8.bf16 %v388_v54 }
  0x5b   : > { %1895 = vmatpush1.bf16.msra.mxu0 %v3544_v57  ;;  %v547_v57 = vunpack.c.h.s8.bf16 %v379_v47 }
  0x5c   : > { %2184 = vmatpush1.bf16.msra.mxu1 %v3545_v58  ;;  %1896 = vmatprep.subr.bf16.mxu0 %v3594_v1  ;;  %v554_v58 = vunpack.c.l.s8.bf16 %v386_v52 }
  0x5d   : > { %1359 = vmatmul.mubr.bf16.gmra.mxu0 %v489_v59  ;;  %2185 = vmatprep.subr.bf16.mxu1 %v3594_v1  ;;  %v556_v59 = vunpack.c.l.s8.bf16 %v388_v54 }
  0x5e   : > { %1648 = vmatmul.mubr.bf16.gmra.mxu1 %v491_v60  ;;  %1366 = vmatprep.mubr.bf16.mxu0 %v498_v61  ;;  %v385_v60 = vld [vmem:[%s3710_s7 + $0x140] sm:$0xff]  ;;  %v387_v61 = vld [vmem:[%s3710_s7 + $0x150] sm:$0xff] }
  0x5f   : > { %1655 = vmatprep.mubr.bf16.mxu1 %v500_v62  ;;  %1897 = vmatpush1.bf16.msra.mxu0 %v3546_v63  ;;  %v553_v62 = vunpack.c.l.s8.bf16 %v385_v60  ;;  %v555_v63 = vunpack.c.l.s8.bf16 %v387_v61 }
  0x60   : > { %2186 = vmatpush1.bf16.msra.mxu1 %v3547_v0  ;;  %1898 = vmatprep.subr.bf16.mxu0 %v3594_v1  ;;  %v562_v0 = vunpack.c.h.s8.bf16 %v386_v52 }
  0x61   : > { %2187 = vmatprep.subr.bf16.mxu1 %v3594_v1 }
  0x63   : > { %1899 = vmatpush1.bf16.msra.mxu0 %v3548_v3  ;;  %v394_v3 = vld [vmem:[%s3710_s7 + $0x188] sm:$0xff] }
  0x64   : > { %2188 = vmatpush1.bf16.msra.mxu1 %v3549_v5  ;;  %1900 = vmatprep.subr.bf16.mxu0 %v3594_v1  ;;  %v396_v5 = vld [vmem:[%s3710_s7 + $0x198] sm:$0xff] }
  0x65   : > { %1367 = vmatmul.mubr.bf16.gmra.mxu0 %v497_v6  ;;  %2189 = vmatprep.subr.bf16.mxu1 %v3594_v1  ;;  %v3565_v6 = vld [vmem:[%s4455_s1 + $0x1d0] sm:$0xff]  }
  0x66   : > { %1656 = vmatmul.mubr.bf16.gmra.mxu1 %v499_v7  ;;  %1374 = vmatprep.mubr.bf16.mxu0 %v506_v8  ;;  %v561_v7 = vunpack.c.h.s8.bf16 %v385_v60  ;;  %v563_v8 = vunpack.c.h.s8.bf16 %v387_v61 }
  0x67   : > { %1663 = vmatprep.mubr.bf16.mxu1 %v508_v9  ;;  %1901 = vmatpush1.bf16.msra.mxu0 %v3550_v10  ;;  %v570_v9 = vunpack.c.l.s8.bf16 %v394_v3  ;;  %v572_v10 = vunpack.c.l.s8.bf16 %v396_v5 }
  0x68   : > { %2190 = vmatpush1.bf16.msra.mxu1 %v3551_v11  ;;  %1902 = vmatprep.subr.bf16.mxu0 %v3594_v1  ;;  %v393_v11 = vld [vmem:[%s3710_s7 + $0x180] sm:$0xff] }
  0x69   : > { %2191 = vmatprep.subr.bf16.mxu1 %v3594_v1  ;;  %v569_v13 = vunpack.c.l.s8.bf16 %v393_v11 }
  0x6b   : > { %1903 = vmatpush1.bf16.msra.mxu0 %v3552_v14  ;;  %v571_v14 = vunpack.c.l.s8.bf16 %v395_v12  ;;  %v435_v12 = vld [vmem:[%s3710_s7 + $0x2d0] sm:$0xff] }
  0x6c   : > { %2192 = vmatpush1.bf16.msra.mxu1 %v3553_v15  ;;  %1904 = vmatprep.subr.bf16.mxu0 %v3594_v1  ;;  %v578_v15 = vunpack.c.h.s8.bf16 %v394_v3 }
  0x6d   : > { %1375 = vmatmul.mubr.bf16.gmra.mxu0 %v505_v16  ;;  %2193 = vmatprep.subr.bf16.mxu1 %v3594_v1  ;;  %v580_v16 = vunpack.c.h.s8.bf16 %v396_v5  ;;  %v434_v5 = vld [vmem:[%s3710_s7 + $0x2c8] sm:$0xff] }
  0x6e   : > { %1664 = vmatmul.mubr.bf16.gmra.mxu1 %v507_v17  ;;  %1382 = vmatprep.mubr.bf16.mxu0 %v514_v18  ;;  %v402_v17 = vld [vmem:[%s3710_s7 + $0x1c8] sm:$0xff] }
  0x6f   : > { %1671 = vmatprep.mubr.bf16.mxu1 %v516_v19  ;;  %1905 = vmatpush2.bf16.msra.mxu0 %v3554_v20  ;;  %v3566_v18 = vld [vmem:[%s4455_s1 + $0x148] sm:$0xff]   ;;  %v404_v19 = vld [vmem:[%s3710_s7 + $0x1d8] sm:$0xff] }
  0x70   : > { %2194 = vmatpush2.bf16.msra.mxu1 %v3555_v21  ;;  %1906 = vmatprep.subr.bf16.mxu0 %v3594_v1  ;;  %v3567_v20 = vld [vmem:[%s4455_s1 + $0x1c8] sm:$0xff]   ;;  %v577_v21 = vunpack.c.h.s8.bf16 %v393_v11  ;;  %v588_v24 = vunpack.c.l.s8.bf16 %v404_v19  ;;  %v433_v11 = vld [vmem:[%s3710_s7 + $0x2c0] sm:$0xff] }
  0x71   : > { %2195 = vmatprep.subr.bf16.mxu1 %v3594_v1 }
  0x73   : > { %1907 = vmatpush2.bf16.msra.mxu0 %v3556_v23  ;;  %v586_v23 = vunpack.c.l.s8.bf16 %v402_v17 }
  0x74   : > { %2196 = vmatpush2.bf16.msra.mxu1 %v3557_v25  ;;  %1908 = vmatprep.subr.bf16.mxu0 %v3594_v1  ;;  %v401_v25 = vld [vmem:[%s3710_s7 + $0x1c0] sm:$0xff] }
  0x75   : > { %1383 = vmatmul.mubr.bf16.gmra.mxu0 %v513_v26  ;;  %2197 = vmatprep.subr.bf16.mxu1 %v3594_v1  ;;  %v403_v26 = vld [vmem:[%s3710_s7 + $0x1d0] sm:$0xff] }
  0x76   : > { %1672 = vmatmul.mubr.bf16.gmra.mxu1 %v515_v27  ;;  %1390 = vmatprep.mubr.bf16.mxu0 %v522_v28  ;;  %v585_v27 = vunpack.c.l.s8.bf16 %v401_v25  ;;  %v587_v28 = vunpack.c.l.s8.bf16 %v403_v26 }
  0x77   : > { %1679 = vmatprep.mubr.bf16.mxu1 %v524_v29  ;;  %1909 = vmatpush2.bf16.msra.mxu0 %v3558_v30  ;;  %v594_v29 = vunpack.c.h.s8.bf16 %v402_v17  ;;  %v596_v30 = vunpack.c.h.s8.bf16 %v404_v19  ;;  %v442_v17 = vld [vmem:[%s3710_s7 + $0x308] sm:$0xff]  ;;  %v657_v19 = vunpack.c.h.s8.bf16 %v433_v11 }
  0x78   : > { %2198 = vmatpush2.bf16.msra.mxu1 %v3559_v31  ;;  %1910 = vmatprep.subr.bf16.mxu0 %v3594_v1  ;;  %v410_v31 = vld [vmem:[%s3710_s7 + $0x208] sm:$0xff] }
  0x79   : > { %2199 = vmatprep.subr.bf16.mxu1 %v3594_v1 }
  0x7b   : > { %1911 = vmatpush2.bf16.msra.mxu0 %v3560_v38  ;;  %v409_v38 = vld [vmem:[%s3710_s7 + $0x200] sm:$0xff] }
  0x7c   : > { %2200 = vmatpush2.bf16.msra.mxu1 %v3561_v39  ;;  %1912 = vmatprep.subr.bf16.mxu0 %v3594_v1  ;;  %v411_v39 = vld [vmem:[%s3710_s7 + $0x210] sm:$0xff]  ;;  %v601_v40 = vunpack.c.l.s8.bf16 %v409_v38  ;;  %v609_v46 = vunpack.c.h.s8.bf16 %v409_v38 }
  0x7d   : > { %1391 = vmatmul.mubr.bf16.gmra.mxu0 %v521_v34  ;;  %2201 = vmatprep.subr.bf16.mxu1 %v3594_v1  ;;  %v593_v34 = vunpack.c.h.s8.bf16 %v401_v25  ;;  %v603_v41 = vunpack.c.l.s8.bf16 %v411_v39  ;;  %v611_v47 = vunpack.c.h.s8.bf16 %v411_v39 }
  0x7e   : > { %1680 = vmatmul.mubr.bf16.gmra.mxu1 %v523_v35  ;;  %1398 = vmatprep.mubr.bf16.mxu0 %v530_v36  ;;  %v595_v35 = vunpack.c.h.s8.bf16 %v403_v26  ;;  %v602_v36 = vunpack.c.l.s8.bf16 %v410_v31 }
  0x7f   : > { %1687 = vmatprep.mubr.bf16.mxu1 %v532_v37  ;;  %1913 = vmatpush2.bf16.msra.mxu0 %v3562_v53  ;;  %v604_v37 = vunpack.c.l.s8.bf16 %v412_v32 }
  0x80   : > { %2202 = vmatpush2.bf16.msra.mxu1 %v3563_v55  ;;  %1914 = vmatprep.subr.bf16.mxu0 %v3594_v1 }
  0x81   : > { %2203 = vmatprep.subr.bf16.mxu1 %v3594_v1 }
  0x83   : > { %1915 = vmatpush2.bf16.msra.mxu0 %v3564_v4 }
  0x84   : > { %2204 = vmatpush2.bf16.msra.mxu1 %v3565_v6  ;;  %1916 = vmatprep.subr.bf16.mxu0 %v3594_v1  ;;  %v436_v6 = vld [vmem:[%s3710_s7 + $0x2d8] sm:$0xff] }
  0x85   : > { %1399 = vmatmul.mubr.bf16.gmra.mxu0 %v529_v42  ;;  %2205 = vmatprep.subr.bf16.mxu1 %v3594_v1  ;;  %v610_v42 = vunpack.c.h.s8.bf16 %v410_v31 }
  0x86   : > { %1688 = vmatmul.mubr.bf16.gmra.mxu1 %v531_v43  ;;  %1406 = vmatprep.mubr.bf16.mxu0 %v538_v44  ;;  %v612_v43 = vunpack.c.h.s8.bf16 %v412_v32  ;;  %v418_v44 = vld [vmem:[%s3710_s7 + $0x248] sm:$0xff] }
  0x87   : > { %1695 = vmatprep.mubr.bf16.mxu1 %v540_v45  ;;  %1917 = vmatpush2.bf16.msra.mxu0 %v3566_v18  ;;  %v420_v45 = vld [vmem:[%s3710_s7 + $0x258] sm:$0xff]  ;;  %v626_v54 = vunpack.c.h.s8.bf16 %v418_v44  ;;  %v450_v32 = vld [vmem:[%s3710_s7 + $0x348] sm:$0xff] }
  0x88   : > { %2206 = vmatpush2.bf16.msra.mxu1 %v3567_v20  ;;  %1918 = vmatprep.subr.bf16.mxu0 %v3594_v1  ;;  %v628_v55 = vunpack.c.h.s8.bf16 %v420_v45  ;;  %v444_v18 = vld [vmem:[%s3710_s7 + $0x318] sm:$0xff]  ;;  %v659_v20 = vunpack.c.h.s8.bf16 %v435_v12  ;;  %v682_v39 = vunpack.c.l.s8.bf16 %v450_v32 }
  0x89   : > { %2207 = vmatprep.subr.bf16.mxu1 %v3594_v1  ;;  %v3568_v1 = vld [vmem:[%s4455_s1 + $0x140] sm:$0xff]  }
  0x8b   : > { %1919 = vmatpush2.bf16.msra.mxu0 %v3568_v1 }
  0x8c   : > { %2208 = vmatpush2.bf16.msra.mxu1 %v3569_v33 }
  0x8d   : > { %1407 = vmatmul.mubr.bf16.gmra.mxu0 %v537_v48  ;;  %v618_v48 = vunpack.c.l.s8.bf16 %v418_v44 }
  0x8e   : > { %1696 = vmatmul.mubr.bf16.gmra.mxu1 %v539_v49  ;;  %1414 = vmatprep.mubr.bf16.mxu0 %v546_v50  ;;  %v620_v49 = vunpack.c.l.s8.bf16 %v420_v45  ;;  %v417_v50 = vld [vmem:[%s3710_s7 + $0x240] sm:$0xff] }
  0x8f   : > { %1703 = vmatprep.mubr.bf16.mxu1 %v548_v51  ;;  %v419_v51 = vld [vmem:[%s3710_s7 + $0x250] sm:$0xff]  ;;  %v617_v52 = vunpack.c.l.s8.bf16 %v417_v50 }
  0x90   : > { %v619_v53 = vunpack.c.l.s8.bf16 %v419_v51 }
  0x95   : > { %1415 = vmatmul.mubr.bf16.gmra.mxu0 %v545_v56  ;;  %v426_v56 = vld [vmem:[%s3710_s7 + $0x288] sm:$0xff] }
  0x96   : > { %1704 = vmatmul.mubr.bf16.gmra.mxu1 %v547_v57  ;;  %1422 = vmatprep.mubr.bf16.mxu0 %v554_v58  ;;  %v428_v57 = vld [vmem:[%s3710_s7 + $0x298] sm:$0xff]  ;;  %v625_v58 = vunpack.c.h.s8.bf16 %v417_v50  ;;  %v634_v60 = vunpack.c.l.s8.bf16 %v426_v56  ;;  %v642_v3 = vunpack.c.h.s8.bf16 %v426_v56  ;;  %v451_v50 = vld [vmem:[%s3710_s7 + $0x350] sm:$0xff]  ;;  %v690_v56 = vunpack.c.h.s8.bf16 %v450_v32 }
  0x97   : > { %1711 = vmatprep.mubr.bf16.mxu1 %v556_v59  ;;  %v627_v59 = vunpack.c.h.s8.bf16 %v419_v51  ;;  %v636_v61 = vunpack.c.l.s8.bf16 %v428_v57  ;;  %v644_v4 = vunpack.c.h.s8.bf16 %v428_v57  ;;  %v2662_v57 = vld [vmem:[%s3977_s27 + $0x8] sm:$0xff] }
  0x9d   : > { %1423 = vmatmul.mubr.bf16.gmra.mxu0 %v553_v62  ;;  %v425_v62 = vld [vmem:[%s3710_s7 + $0x280] sm:$0xff] }
  0x9e   : > { %1712 = vmatmul.mubr.bf16.gmra.mxu1 %v555_v63  ;;  %1430 = vmatprep.mubr.bf16.mxu0 %v562_v0  ;;  %v427_v63 = vld [vmem:[%s3710_s7 + $0x290] sm:$0xff]  ;;  %v633_v0 = vunpack.c.l.s8.bf16 %v425_v62 }
  0x9f   : > { %1719 = vmatprep.mubr.bf16.mxu1 %v564_v2  ;;  %v635_v2 = vunpack.c.l.s8.bf16 %v427_v63 }
  0xa5   : > { %1431 = vmatmul.mubr.bf16.gmra.mxu0 %v561_v7  ;;  %v641_v7 = vunpack.c.h.s8.bf16 %v425_v62 }
  0xa6   : > { %1720 = vmatmul.mubr.bf16.gmra.mxu1 %v563_v8  ;;  %1438 = vmatprep.mubr.bf16.mxu0 %v570_v9  ;;  %v643_v8 = vunpack.c.h.s8.bf16 %v427_v63  ;;  %v650_v9 = vunpack.c.l.s8.bf16 %v434_v5 }
  0xa7   : > { %1727 = vmatprep.mubr.bf16.mxu1 %v572_v10  ;;  %v652_v10 = vunpack.c.l.s8.bf16 %v436_v6 }
  0xad   : > { %1439 = vmatmul.mubr.bf16.gmra.mxu0 %v569_v13  ;;  %v649_v13 = vunpack.c.l.s8.bf16 %v433_v11  ;;  %v691_v11 = vunpack.c.h.s8.bf16 %v451_v50 }
  0xae   : > { %1728 = vmatmul.mubr.bf16.gmra.mxu1 %v571_v14  ;;  %1446 = vmatprep.mubr.bf16.mxu0 %v578_v15  ;;  %v651_v14 = vunpack.c.l.s8.bf16 %v435_v12  ;;  %v658_v15 = vunpack.c.h.s8.bf16 %v434_v5  ;;  %v458_v5 = vld [vmem:[%s3710_s7 + $0x388] sm:$0xff] }
  0xaf   : > { %1735 = vmatprep.mubr.bf16.mxu1 %v580_v16  ;;  %v660_v16 = vunpack.c.h.s8.bf16 %v436_v6  ;;  %v698_v12 = vunpack.c.l.s8.bf16 %v458_v5  ;;  %v706_v32 = vunpack.c.h.s8.bf16 %v458_v5 }
  0xb5   : > { %1447 = vmatmul.mubr.bf16.gmra.mxu0 %v577_v21  ;;  %v666_v21 = vunpack.c.l.s8.bf16 %v442_v17 }
  0xb6   : > { %1736 = vmatmul.mubr.bf16.gmra.mxu1 %v579_v22  ;;  %1454 = vmatprep.mubr.bf16.mxu0 %v586_v23  ;;  %v668_v22 = vunpack.c.l.s8.bf16 %v444_v18  ;;  %v441_v23 = vld [vmem:[%s3710_s7 + $0x300] sm:$0xff] }
  0xb7   : > { %1743 = vmatprep.mubr.bf16.mxu1 %v588_v24  ;;  %v443_v24 = vld [vmem:[%s3710_s7 + $0x310] sm:$0xff]  ;;  %v665_v25 = vunpack.c.l.s8.bf16 %v441_v23 }
  0xb8   : > { %v667_v26 = vunpack.c.l.s8.bf16 %v443_v24  ;;  %v675_v38 = vunpack.c.h.s8.bf16 %v443_v24 }
  0xbd   : > { %1455 = vmatmul.mubr.bf16.gmra.mxu0 %v585_v27  ;;  %v674_v27 = vunpack.c.h.s8.bf16 %v442_v17 }
  0xbe   : > { %1744 = vmatmul.mubr.bf16.gmra.mxu1 %v587_v28  ;;  %1462 = vmatprep.mubr.bf16.mxu0 %v594_v29  ;;  %v676_v28 = vunpack.c.h.s8.bf16 %v444_v18 }
  0xbf   : > { %1751 = vmatprep.mubr.bf16.mxu1 %v596_v30 }
  0xc5   : > { %1463 = vmatmul.mubr.bf16.gmra.mxu0 %v593_v34  ;;  %v452_v34 = vld [vmem:[%s3710_s7 + $0x358] sm:$0xff] }
  0xc6   : > { %1752 = vmatmul.mubr.bf16.gmra.mxu1 %v595_v35  ;;  %1470 = vmatprep.mubr.bf16.mxu0 %v602_v36  ;;  %v673_v36 = vunpack.c.h.s8.bf16 %v441_v23  ;;  %v2667_v23 = vld [vmem:[%s3977_s27 + $0x30] sm:$0xff] }
  0xc7   : > { %1759 = vmatprep.mubr.bf16.mxu1 %v604_v37 }
  0xcd   : > { %1471 = vmatmul.mubr.bf16.gmra.mxu0 %v601_v40 }
  0xce   : > { %1760 = vmatmul.mubr.bf16.gmra.mxu1 %v603_v41  ;;  %1478 = vmatprep.mubr.bf16.mxu0 %v610_v42  ;;  %v684_v42 = vunpack.c.l.s8.bf16 %v452_v34 }
  0xcf   : > { %1767 = vmatprep.mubr.bf16.mxu1 %v612_v43 }
  0xd5   : > { %1479 = vmatmul.mubr.bf16.gmra.mxu0 %v609_v46  ;;  %v449_v46 = vld [vmem:[%s3710_s7 + $0x340] sm:$0xff] }
  0xd6   : > { %1768 = vmatmul.mubr.bf16.gmra.mxu1 %v611_v47  ;;  %1486 = vmatprep.mubr.bf16.mxu0 %v618_v48  ;;  %v2661_v47 = vld [vmem:[%s3977_s27] sm:$0xff] }
  0xd7   : > { %1775 = vmatprep.mubr.bf16.mxu1 %v620_v49  ;;  %2727 = vperm.xlu0 %3504, %v2661_v47  }
  0xdb   : > { %2732 = vperm.xlu0 %3504, %v2662_v57  }
  0xdd   : > { %1487 = vmatmul.mubr.bf16.gmra.mxu0 %v617_v52 }
  0xde   : > { %1776 = vmatmul.mubr.bf16.gmra.mxu1 %v619_v53  ;;  %1494 = vmatprep.mubr.bf16.mxu0 %v626_v54  ;;  %v681_v53 = vunpack.c.l.s8.bf16 %v449_v46 }
  0xdf   : > { %1783 = vmatprep.mubr.bf16.mxu1 %v628_v55  ;;  %v683_v55 = vunpack.c.l.s8.bf16 %v451_v50 }
  0xe5   : > { %1495 = vmatmul.mubr.bf16.gmra.mxu0 %v625_v58  ;;  %v2663_v58 = vld [vmem:[%s3977_s27 + $0x10] sm:$0xff] }
  0xe6   : > { %1784 = vmatmul.mubr.bf16.gmra.mxu1 %v627_v59  ;;  %1502 = vmatprep.mubr.bf16.mxu0 %v634_v60 }
  0xe7   : > { %1791 = vmatprep.mubr.bf16.mxu1 %v636_v61  ;;  %v692_v61 = vunpack.c.h.s8.bf16 %v452_v34  ;;  %2737 = vperm.xlu1 %3505, %v2663_v58   ;;  %v2669_v34 = vld [vmem:[%s3977_s27 + $0x40] sm:$0xff] }
  0xed   : > { %1503 = vmatmul.mubr.bf16.gmra.mxu0 %v633_v0 }
  0xee   : > { %1792 = vmatmul.mubr.bf16.gmra.mxu1 %v635_v2  ;;  %1510 = vmatprep.mubr.bf16.mxu0 %v642_v3  ;;  %v2664_v2 = vld [vmem:[%s3977_s27 + $0x18] sm:$0xff] }
  0xef   : > { %1799 = vmatprep.mubr.bf16.mxu1 %v644_v4  ;;  %2742 = vperm.xlu1 %3505, %v2664_v2   ;;  %v2676_v2 = vld [vmem:[%s3977_s27 + $0x78] sm:$0xff] }
  0xf5   : > { %1511 = vmatmul.mubr.bf16.gmra.mxu0 %v641_v7  ;;  %v460_v7 = vld [vmem:[%s3710_s7 + $0x398] sm:$0xff] }
  0xf6   : > { %1800 = vmatmul.mubr.bf16.gmra.mxu1 %v643_v8  ;;  %1518 = vmatprep.mubr.bf16.mxu0 %v650_v9  ;;  %v689_v9 = vunpack.c.h.s8.bf16 %v449_v46  ;;  %v700_v17 = vunpack.c.l.s8.bf16 %v460_v7  ;;  %v466_v46 = vld [vmem:[%s3710_s7 + $0x3c8] sm:$0xff] }
  0xf7   : > { %1807 = vmatprep.mubr.bf16.mxu1 %v652_v10 }
  0xfd   : > { %1519 = vmatmul.mubr.bf16.gmra.mxu0 %v649_v13  ;;  %v2666_v13 = vld [vmem:[%s3977_s27 + $0x28] sm:$0xff] }
  0xfe   : > { %1808 = vmatmul.mubr.bf16.gmra.mxu1 %v651_v14  ;;  %1526 = vmatprep.mubr.bf16.mxu0 %v658_v15  ;;  %v2665_v14 = vld [vmem:[%s3977_s27 + $0x20] sm:$0xff] }
  0xff   : > { %1815 = vmatprep.mubr.bf16.mxu1 %v660_v16  ;;  %2752 = vperm.xlu1 %3505, %v2666_v13   ;;  %v722_v13 = vunpack.c.h.s8.bf16 %v466_v46 }
 0x100   : > { %2747 = vperm.xlu0 %3504, %v2665_v14   ;;  %v2678_v14 = vld [vmem:[%s3977_s27 + $0x88] sm:$0xff] }
 0x104   : > { %2757 = vperm.xlu0 %3504, %v2667_v23   ;;  %v2680_v23 = vld [vmem:[%s3977_s27 + $0x98] sm:$0xff] }
 0x105   : > { %1527 = vmatmul.mubr.bf16.gmra.mxu0 %v657_v19 }
 0x106   : > { %1816 = vmatmul.mubr.bf16.gmra.mxu1 %v659_v20  ;;  %1534 = vmatprep.mubr.bf16.mxu0 %v666_v21  ;;  %v457_v21 = vld [vmem:[%s3710_s7 + $0x380] sm:$0xff] }
 0x107   : > { %1823 = vmatprep.mubr.bf16.mxu1 %v668_v22  ;;  %v2668_v22 = vld [vmem:[%s3977_s27 + $0x38] sm:$0xff] }
 0x108   : > { %2762 = vperm.xlu1 %3505, %v2668_v22   ;;  %2767 = vperm.xlu0 %3504, %v2669_v34  }
 0x10d   : > { %v1344_v29 = vpop.f32.mrf.mxu0  ;;  %1535 = vmatmul.mubr.bf16.gmra.mxu0 %v665_v25 }
 0x10e   : > { %v1633_v30 = vpop.f32.mrf.mxu1  ;;  %1824 = vmatmul.mubr.bf16.gmra.mxu1 %v667_v26  ;;  %1542 = vmatprep.mubr.bf16.mxu0 %v674_v27  ;;  %v459_v26 = vld [vmem:[%s3710_s7 + $0x390] sm:$0xff] }
 0x10f   : > { %v3964_v31 = vadd.f32 %v1633_v30, %v1344_v29  ;;  %v1346_v1 = vpop.f32.mrf.mxu0  ;;  %1831 = vmatprep.mubr.bf16.mxu1 %v676_v28  ;;  %v697_v29 = vunpack.c.l.s8.bf16 %v457_v21 }
 0x110   : > { %v1635_v33 = vpop.f32.mrf.mxu1  ;;  %v699_v1 = vunpack.c.l.s8.bf16 %v459_v26 }
 0x111   : > { %v1347_v35 = vpop.f32.mrf.mxu0  ;;  %v2670_v33 = vld [vmem:[%s3977_s27 + $0x48] sm:$0xff] }
 0x112   : > { %v1636_v37 = vpop.f32.mrf.mxu1  ;;  %2772 = vperm.xlu1 %3505, %v2670_v33  }
 0x113   : > { %v3969_v40 = vadd.f32 %v1636_v37, %v1347_v35  ;;  %v1349_v41 = vpop.f32.mrf.mxu0  ;;  %v708_v37 = vunpack.c.h.s8.bf16 %v460_v7  ;;  %v467_v7 = vld [vmem:[%s3710_s7 + $0x3d0] sm:$0xff] }
 0x114   : > { %v1638_v43 = vpop.f32.mrf.mxu1  ;;  %v723_v34 = vunpack.c.h.s8.bf16 %v467_v7 }
 0x115   : > { %v1352_v44 = vpop.f32.mrf.mxu0  ;;  %1543 = vmatmul.mubr.bf16.gmra.mxu0 %v673_v36  ;;  %v2671_v43 = vld [vmem:[%s3977_s27 + $0x50] sm:$0xff] }
 0x116   : > { %v1641_v45 = vpop.f32.mrf.mxu1  ;;  %1832 = vmatmul.mubr.bf16.gmra.mxu1 %v675_v38  ;;  %1550 = vmatprep.mubr.bf16.mxu0 %v682_v39 }
 0x117   : > { %v3981_v48 = vadd.f32 %v1641_v45, %v1352_v44  ;;  %v1354_v49 = vpop.f32.mrf.mxu0  ;;  %1839 = vmatprep.mubr.bf16.mxu1 %v684_v42  ;;  %v2672_v42 = vld [vmem:[%s3977_s27 + $0x58] sm:$0xff]  ;;  %2777 = vperm.xlu0 %3504, %v2671_v43  }
 0x118   : > { %v1643_v51 = vpop.f32.mrf.mxu1  ;;  %2782 = vperm.xlu1 %3505, %v2672_v42   ;;  %v468_v49 = vld [vmem:[%s3710_s7 + $0x3d8] sm:$0xff] }
 0x119   : > { %v1355_v52 = vpop.f32.mrf.mxu0  ;;  %v705_v51 = vunpack.c.h.s8.bf16 %v457_v21 }
 0x11a   : > { %v1644_v54 = vpop.f32.mrf.mxu1 }
 0x11b   : > { %v3986_v59 = vadd.f32 %v1644_v54, %v1355_v52  ;;  %v1357_v60 = vpop.f32.mrf.mxu0  ;;  %v714_v54 = vunpack.c.l.s8.bf16 %v466_v46 }
 0x11c   : > { %v1646_v62 = vpop.f32.mrf.mxu1  ;;  %v716_v60 = vunpack.c.l.s8.bf16 %v468_v49 }
 0x11d   : > { %v1360_v63 = vpop.f32.mrf.mxu0  ;;  %1551 = vmatmul.mubr.bf16.gmra.mxu0 %v681_v53  ;;  %v707_v53 = vunpack.c.h.s8.bf16 %v459_v26 }
 0x11e   : > { %v1649_v0 = vpop.f32.mrf.mxu1  ;;  %1840 = vmatmul.mubr.bf16.gmra.mxu1 %v683_v55  ;;  %1558 = vmatprep.mubr.bf16.mxu0 %v690_v56  ;;  %v2674_v55 = vld [vmem:[%s3977_s27 + $0x68] sm:$0xff]  ;;  %v2673_v56 = vld [vmem:[%s3977_s27 + $0x60] sm:$0xff] }
 0x11f   : > { %v3989_v3 = vadd.f32 %v1649_v0, %v1360_v63  ;;  %v1362_v4 = vpop.f32.mrf.mxu0  ;;  %1847 = vmatprep.mubr.bf16.mxu1 %v692_v61  ;;  %2792 = vperm.xlu1 %3505, %v2674_v55   ;;  %v465_v0 = vld [vmem:[%s3710_s7 + $0x3c0] sm:$0xff] }
 0x120   : > { %v1651_v6 = vpop.f32.mrf.mxu1  ;;  %2787 = vperm.xlu0 %3504, %v2673_v56   ;;  %v2675_v4 = vld [vmem:[%s3977_s27 + $0x70] sm:$0xff] }
 0x121   : > { %v1363_v8 = vpop.f32.mrf.mxu0 }
 0x122   : > { %v1652_v10 = vpop.f32.mrf.mxu1 }
 0x123   : > { %v3995_v15 = vadd.f32 %v1652_v10, %v1363_v8  ;;  %v1365_v16 = vpop.f32.mrf.mxu0  ;;  %2802 = vperm.xlu1 %3505, %v2676_v2   ;;  %v713_v10 = vunpack.c.l.s8.bf16 %v465_v0 }
 0x124   : > { %v1654_v18 = vpop.f32.mrf.mxu1  ;;  %2797 = vperm.xlu0 %3504, %v2675_v4   ;;  %v2677_v16 = vld [vmem:[%s3977_s27 + $0x80] sm:$0xff] }
 0x125   : > { %v1368_v19 = vpop.f32.mrf.mxu0  ;;  %1559 = vmatmul.mubr.bf16.gmra.mxu0 %v689_v9 }
 0x126   : > { %v1657_v20 = vpop.f32.mrf.mxu1  ;;  %1848 = vmatmul.mubr.bf16.gmra.mxu1 %v691_v11  ;;  %1566 = vmatprep.mubr.bf16.mxu0 %v698_v12  ;;  %v715_v12 = vunpack.c.l.s8.bf16 %v467_v7 }
 0x127   : > { %v4000_v24 = vadd.f32 %v1657_v20, %v1368_v19  ;;  %v1370_v25 = vpop.f32.mrf.mxu0  ;;  %1855 = vmatprep.mubr.bf16.mxu1 %v700_v17  ;;  %v724_v19 = vunpack.c.h.s8.bf16 %v468_v49  ;;  %2812 = vperm.xlu1 %3505, %v2678_v14   ;;  %v2684_v49 = vld [vmem:[%s3977_s27 + $0xb8] sm:$0xff] }
 0x128   : > { %v1659_v27 = vpop.f32.mrf.mxu1  ;;  %2807 = vperm.xlu0 %3504, %v2677_v16   ;;  %v2679_v25 = vld [vmem:[%s3977_s27 + $0x90] sm:$0xff]  ;;  %v360_v16 = vld [vmem:[%s3710_s7 + $0x78] sm:$0xff] }
 0x129   : > { %v1371_v28 = vpop.f32.mrf.mxu0 }
 0x12a   : > { %v1660_v30 = vpop.f32.mrf.mxu1 }
 0x12b   : > { %v4005_v35 = vadd.f32 %v1660_v30, %v1371_v28  ;;  %v1373_v36 = vpop.f32.mrf.mxu0  ;;  %v350_v28 = vld [vmem:[%s3710_s7 + $0x28] sm:$0xff]  ;;  %2822 = vperm.xlu1 %3505, %v2680_v23   ;;  %v352_v30 = vld [vmem:[%s3710_s7 + $0x38] sm:$0xff] }
 0x12c   : > { %v1662_v38 = vpop.f32.mrf.mxu1  ;;  %2817 = vperm.xlu0 %3504, %v2679_v25   ;;  %v478_v36 = vunpack.c.l.s8.bf16 %v350_v28  ;;  %v480_v42 = vunpack.c.l.s8.bf16 %v352_v30  ;;  %v488_v4 = vunpack.c.h.s8.bf16 %v352_v30  ;;  %v2690_v23 = vld [vmem:[%s3977_s27 + $0xe8] sm:$0xff]  ;;  %v2689_v25 = vld [vmem:[%s3977_s27 + $0xe0] sm:$0xff] }
 0x12d   : > { %v1376_v39 = vpop.f32.mrf.mxu0  ;;  %1567 = vmatmul.mubr.bf16.gmra.mxu0 %v697_v29  ;;  %v2681_v38 = vld [vmem:[%s3977_s27 + $0xa0] sm:$0xff] }
 0x12e   : > { %v1665_v41 = vpop.f32.mrf.mxu1  ;;  %1856 = vmatmul.mubr.bf16.gmra.mxu1 %v699_v1  ;;  %1574 = vmatprep.mubr.bf16.mxu0 %v706_v32  ;;  %v721_v32 = vunpack.c.h.s8.bf16 %v465_v0 }
 0x12f   : > { %v4009_v44 = vadd.f32 %v1665_v41, %v1376_v39  ;;  %v1378_v45 = vpop.f32.mrf.mxu0  ;;  %1863 = vmatprep.mubr.bf16.mxu1 %v708_v37  ;;  %v2682_v37 = vld [vmem:[%s3977_s27 + $0xa8] sm:$0xff] }
 0x130   : > { %v1667_v47 = vpop.f32.mrf.mxu1  ;;  %2832 = vperm.xlu1 %3505, %v2682_v37   ;;  %2827 = vperm.xlu0 %3504, %v2681_v38  }
 0x131   : > { %v1379_v50 = vpop.f32.mrf.mxu0  ;;  %v349_v47 = vld [vmem:[%s3710_s7 + $0x20] sm:$0xff] }
 0x132   : > { %v1668_v52 = vpop.f32.mrf.mxu1  ;;  %v477_v56 = vunpack.c.l.s8.bf16 %v349_v47 }
 0x133   : > { %v4015_v57 = vadd.f32 %v1668_v52, %v1379_v50  ;;  %v1381_v58 = vpop.f32.mrf.mxu0  ;;  %v2683_v50 = vld [vmem:[%s3977_s27 + $0xb0] sm:$0xff] }
 0x134   : > { %v1670_v61 = vpop.f32.mrf.mxu1  ;;  %2842 = vperm.xlu1 %3505, %v2684_v49   ;;  %2837 = vperm.xlu0 %3504, %v2683_v50   ;;  %v2694_v50 = vld [vmem:[%s3977_s27 + $0x108] sm:$0xff] }
 0x135   : > { %v1384_v62 = vpop.f32.mrf.mxu0  ;;  %1575 = vmatmul.mubr.bf16.gmra.mxu0 %v705_v51  ;;  %v486_v61 = vunpack.c.h.s8.bf16 %v350_v28 }
 0x136   : > { %v1673_v63 = vpop.f32.mrf.mxu1  ;;  %1864 = vmatmul.mubr.bf16.gmra.mxu1 %v707_v53  ;;  %1582 = vmatprep.mubr.bf16.mxu0 %v714_v54  ;;  %v351_v53 = vld [vmem:[%s3710_s7 + $0x30] sm:$0xff] }
 0x137   : > { %v4020_v5 = vadd.f32 %v1673_v63, %v1384_v62  ;;  %v1386_v6 = vpop.f32.mrf.mxu0  ;;  %1871 = vmatprep.mubr.bf16.mxu1 %v716_v60  ;;  %v479_v60 = vunpack.c.l.s8.bf16 %v351_v53  ;;  %v2686_v62 = vld [vmem:[%s3977_s27 + $0xc8] sm:$0xff]  ;;  %v2685_v63 = vld [vmem:[%s3977_s27 + $0xc0] sm:$0xff] }
 0x138   : > { %v1675_v8 = vpop.f32.mrf.mxu1  ;;  %2852 = vperm.xlu1 %3505, %v2686_v62   ;;  %2847 = vperm.xlu0 %3504, %v2685_v63   ;;  %v2695_v62 = vld [vmem:[%s3977_s27 + $0x110] sm:$0xff] }
 0x139   : > { %v1387_v9 = vpop.f32.mrf.mxu0 }
 0x13a   : > { %v1676_v11 = vpop.f32.mrf.mxu1 }
 0x13b   : > { %v4025_v17 = vadd.f32 %v1676_v11, %v1387_v9  ;;  %v1389_v18 = vpop.f32.mrf.mxu0  ;;  %v2688_v9 = vld [vmem:[%s3977_s27 + $0xd8] sm:$0xff] }
 0x13c   : > { %v1678_v20 = vpop.f32.mrf.mxu1  ;;  %2862 = vperm.xlu1 %3505, %v2688_v9  }
 0x13d   : > { %v1392_v21 = vpop.f32.mrf.mxu0  ;;  %1583 = vmatmul.mubr.bf16.gmra.mxu0 %v713_v10  ;;  %v2687_v10 = vld [vmem:[%s3977_s27 + $0xd0] sm:$0xff] }
 0x13e   : > { %v1681_v22 = vpop.f32.mrf.mxu1  ;;  %1872 = vmatmul.mubr.bf16.gmra.mxu1 %v715_v12  ;;  %1590 = vmatprep.mubr.bf16.mxu0 %v722_v13  ;;  %v358_v13 = vld [vmem:[%s3710_s7 + $0x68] sm:$0xff] }
 0x13f   : > { %v4029_v26 = vadd.f32 %v1681_v22, %v1392_v21  ;;  %v1394_v27 = vpop.f32.mrf.mxu0  ;;  %1879 = vmatprep.mubr.bf16.mxu1 %v724_v19  ;;  %2857 = vperm.xlu0 %3504, %v2687_v10   ;;  %v485_v19 = vunpack.c.h.s8.bf16 %v349_v47  ;;  %v487_v21 = vunpack.c.h.s8.bf16 %v351_v53  ;;  %v494_v22 = vunpack.c.l.s8.bf16 %v358_v13 }
 0x140   : > { %v1683_v29 = vpop.f32.mrf.mxu1  ;;  %2872 = vperm.xlu1 %3505, %v2690_v23   ;;  %v502_v49 = vunpack.c.h.s8.bf16 %v358_v13 }
 0x141   : > { %v1395_v1 = vpop.f32.mrf.mxu0  ;;  %v496_v29 = vunpack.c.l.s8.bf16 %v360_v16 }
 0x142   : > { %v1684_v33 = vpop.f32.mrf.mxu1 }
 0x143   : > { %v4035_v39 = vadd.f32 %v1684_v33, %v1395_v1  ;;  %v1397_v41 = vpop.f32.mrf.mxu0  ;;  %2867 = vperm.xlu0 %3504, %v2689_v25   ;;  %v357_v33 = vld [vmem:[%s3710_s7 + $0x60] sm:$0xff] }
 0x144   : > { %v1686_v43 = vpop.f32.mrf.mxu1  ;;  %v359_v41 = vld [vmem:[%s3710_s7 + $0x70] sm:$0xff]  ;;  %v501_v9 = vunpack.c.h.s8.bf16 %v357_v33  ;;  %v365_v25 = vld [vmem:[%s3710_s7 + $0xa0] sm:$0xff] }
 0x145   : > { %v1400_v45 = vpop.f32.mrf.mxu0  ;;  %1591 = vmatmul.mubr.bf16.gmra.mxu0 %v721_v32  ;;  %v495_v47 = vunpack.c.l.s8.bf16 %v359_v41 }
 0x146   : > { %v1689_v46 = vpop.f32.mrf.mxu1  ;;  %1880 = vmatmul.mubr.bf16.gmra.mxu1 %v723_v34  ;;  %1920 = vmatprep.mubr.bf16.mxu0 %v478_v36  ;;  %v2692_v34 = vld [vmem:[%s3977_s27 + $0xf8] sm:$0xff]  ;;  %v2691_v36 = vld [vmem:[%s3977_s27 + $0xf0] sm:$0xff] }
 0x147   : > { %v4040_v51 = vadd.f32 %v1689_v46, %v1400_v45  ;;  %v1402_v52 = vpop.f32.mrf.mxu0  ;;  %2209 = vmatprep.mubr.bf16.mxu1 %v480_v42  ;;  %2882 = vperm.xlu1 %3505, %v2692_v34   ;;  %v493_v45 = vunpack.c.l.s8.bf16 %v357_v33 }
 0x148   : > { %v1691_v54 = vpop.f32.mrf.mxu1  ;;  %2877 = vperm.xlu0 %3504, %v2691_v36   ;;  %v2693_v52 = vld [vmem:[%s3977_s27 + $0x100] sm:$0xff]  ;;  %v509_v36 = vunpack.c.l.s8.bf16 %v365_v25 }
 0x149   : > { %v1403_v55 = vpop.f32.mrf.mxu0 }
 0x14a   : > { %v1692_v58 = vpop.f32.mrf.mxu1 }
 0x14b   : > { %v4045_v0 = vadd.f32 %v1692_v58, %v1403_v55  ;;  %v1405_v2 = vpop.f32.mrf.mxu0  ;;  %v504_v55 = vunpack.c.h.s8.bf16 %v360_v16  ;;  %2892 = vperm.xlu1 %3505, %v2694_v50   ;;  %v2697_v16 = vld [vmem:[%s3977_s27 + $0x120] sm:$0xff] }
 0x14c   : > { %v1694_v6 = vpop.f32.mrf.mxu1  ;;  %2887 = vperm.xlu0 %3504, %v2693_v52  }
 0x14d   : > { %v1408_v7 = vpop.f32.mrf.mxu0  ;;  %1921 = vmatmul.mubr.bf16.vlgmr.msra.gmra.mxu0 %v477_v56 }
 0x14e   : > { %v1697_v8 = vpop.f32.mrf.mxu1  ;;  %2210 = vmatmul.mubr.bf16.vlgmr.msra.gmra.mxu1 %v479_v60  ;;  %1928 = vmatprep.mubr.bf16.mxu0 %v486_v61  ;;  %v2696_v61 = vld [vmem:[%s3977_s27 + $0x118] sm:$0xff] }
 0x14f   : > { %v4049_v11 = vadd.f32 %v1697_v8, %v1408_v7  ;;  %v1410_v12 = vpop.f32.mrf.mxu0  ;;  %2217 = vmatprep.mubr.bf16.mxu1 %v488_v4  ;;  %v366_v4 = vld [vmem:[%s3710_s7 + $0xa8] sm:$0xff]  ;;  %2902 = vperm.xlu1 %3505, %v2696_v61   ;;  %v368_v7 = vld [vmem:[%s3710_s7 + $0xb8] sm:$0xff] }
 0x150   : > { %v1699_v14 = vpop.f32.mrf.mxu1  ;;  %2897 = vperm.xlu0 %3504, %v2695_v62   ;;  %v503_v12 = vunpack.c.h.s8.bf16 %v359_v41  ;;  %v510_v13 = vunpack.c.l.s8.bf16 %v366_v4  ;;  %v374_v61 = vld [vmem:[%s3710_s7 + $0xe8] sm:$0xff] }
 0x151   : > { %v1411_v18 = vpop.f32.mrf.mxu0  ;;  %v2698_v14 = vld [vmem:[%s3977_s27 + $0x128] sm:$0xff] }
 0x152   : > { %v1700_v20 = vpop.f32.mrf.mxu1 }
 0x153   : > { %v4055_v27 = vadd.f32 %v1700_v20, %v1411_v18  ;;  %v1413_v28 = vpop.f32.mrf.mxu0  ;;  %v512_v20 = vunpack.c.l.s8.bf16 %v368_v7  ;;  %2912 = vperm.xlu1 %3505, %v2698_v14  }
 0x154   : > { %v1702_v30 = vpop.f32.mrf.mxu1  ;;  %2907 = vperm.xlu0 %3504, %v2697_v16   ;;  %v2700_v28 = vld [vmem:[%s3977_s27 + $0x138] sm:$0xff] }
 0x155   : > { %v1416_v1 = vpop.f32.mrf.mxu0  ;;  %1929 = vmatmul.mubr.bf16.gmra.mxu0 %v485_v19 }
 0x156   : > { %v1705_v32 = vpop.f32.mrf.mxu1  ;;  %2218 = vmatmul.mubr.bf16.gmra.mxu1 %v487_v21  ;;  %1936 = vmatprep.mubr.bf16.mxu0 %v494_v22 }
 0x157   : > { %v4060_v37 = vadd.f32 %v1705_v32, %v1416_v1  ;;  %v1418_v38 = vpop.f32.mrf.mxu0  ;;  %2225 = vmatprep.mubr.bf16.mxu1 %v496_v29  ;;  %v2699_v29 = vld [vmem:[%s3977_s27 + $0x130] sm:$0xff]  ;;  %2922 = vperm.xlu1 %3505, %v2700_v28  }
 0x158   : > { %v1707_v42 = vpop.f32.mrf.mxu1  ;;  %v367_v32 = vld [vmem:[%s3710_s7 + $0xb0] sm:$0xff]  ;;  %2917 = vperm.xlu0 %3504, %v2699_v29  }
 0x159   : > { %v1419_v43 = vpop.f32.mrf.mxu0  ;;  %v511_v41 = vunpack.c.l.s8.bf16 %v367_v32  ;;  %v518_v42 = vunpack.c.h.s8.bf16 %v366_v4 }
 0x15a   : > { %v1708_v46 = vpop.f32.mrf.mxu1 }
 0x15b   : > { %v4065_v53 = vadd.f32 %v1708_v46, %v1419_v43  ;;  %v1421_v54 = vpop.f32.mrf.mxu0  ;;  %v2702_v43 = vld [vmem:[%s3977_s27 + $0x148] sm:$0xff] }
 0x15c   : > { %v1710_v56 = vpop.f32.mrf.mxu1  ;;  %2932 = vperm.xlu1 %3505, %v2702_v43   ;;  %v2709_v43 = vld [vmem:[%s3977_s27 + $0x180] sm:$0xff] }
 0x15d   : > { %v1424_v58 = vpop.f32.mrf.mxu0  ;;  %1937 = vmatmul.mubr.bf16.gmra.mxu0 %v493_v45  ;;  %v2701_v45 = vld [vmem:[%s3977_s27 + $0x140] sm:$0xff]  ;;  %v2703_v56 = vld [vmem:[%s3977_s27 + $0x150] sm:$0xff] }
 0x15e   : > { %v1713_v60 = vpop.f32.mrf.mxu1  ;;  %2226 = vmatmul.mubr.bf16.gmra.mxu1 %v495_v47  ;;  %1944 = vmatprep.mubr.bf16.mxu0 %v502_v49  ;;  %v520_v49 = vunpack.c.h.s8.bf16 %v368_v7 }
 0x15f   : > { %v4069_v63 = vadd.f32 %v1713_v60, %v1424_v58  ;;  %v1426_v2 = vpop.f32.mrf.mxu0  ;;  %2233 = vmatprep.mubr.bf16.mxu1 %v504_v55  ;;  %2927 = vperm.xlu0 %3504, %v2701_v45   ;;  %v2704_v55 = vld [vmem:[%s3977_s27 + $0x158] sm:$0xff] }
 0x160   : > { %v1715_v6 = vpop.f32.mrf.mxu1  ;;  %2942 = vperm.xlu1 %3505, %v2704_v55   ;;  %v376_v2 = vld [vmem:[%s3710_s7 + $0xf8] sm:$0xff] }
 0x161   : > { %v1427_v8 = vpop.f32.mrf.mxu0  ;;  %v517_v6 = vunpack.c.h.s8.bf16 %v365_v25  ;;  %v528_v16 = vunpack.c.l.s8.bf16 %v376_v2  ;;  %v2707_v25 = vld [vmem:[%s3977_s27 + $0x170] sm:$0xff]  ;;  %v2712_v55 = vld [vmem:[%s3977_s27 + $0x198] sm:$0xff] }
 0x162   : > { %v1716_v10 = vpop.f32.mrf.mxu1 }
 0x163   : > { %v4075_v18 = vadd.f32 %v1716_v10, %v1427_v8  ;;  %v1429_v19 = vpop.f32.mrf.mxu0  ;;  %2937 = vperm.xlu0 %3504, %v2703_v56   ;;  %v519_v8 = vunpack.c.h.s8.bf16 %v367_v32  ;;  %v2706_v10 = vld [vmem:[%s3977_s27 + $0x168] sm:$0xff]  ;;  %v2711_v56 = vld [vmem:[%s3977_s27 + $0x190] sm:$0xff] }
 0x164   : > { %v1718_v21 = vpop.f32.mrf.mxu1  ;;  %2952 = vperm.xlu1 %3505, %v2706_v10  }
 0x165   : > { %v1432_v22 = vpop.f32.mrf.mxu0  ;;  %1945 = vmatmul.mubr.bf16.gmra.mxu0 %v501_v9  ;;  %v526_v9 = vunpack.c.l.s8.bf16 %v374_v61 }
 0x166   : > { %v1721_v23 = vpop.f32.mrf.mxu1  ;;  %2234 = vmatmul.mubr.bf16.gmra.mxu1 %v503_v12  ;;  %1952 = vmatprep.mubr.bf16.mxu0 %v510_v13  ;;  %v2705_v12 = vld [vmem:[%s3977_s27 + $0x160] sm:$0xff] }
 0x167   : > { %v4080_v30 = vadd.f32 %v1721_v23, %v1432_v22  ;;  %v1434_v1 = vpop.f32.mrf.mxu0  ;;  %2241 = vmatprep.mubr.bf16.mxu1 %v512_v20  ;;  %2947 = vperm.xlu0 %3504, %v2705_v12   ;;  %v373_v22 = vld [vmem:[%s3710_s7 + $0xe0] sm:$0xff]  ;;  %v2708_v23 = vld [vmem:[%s3977_s27 + $0x178] sm:$0xff]  ;;  %v2714_v12 = vld [vmem:[%s3977_s27 + $0x1a8] sm:$0xff] }
 0x168   : > { %v1723_v33 = vpop.f32.mrf.mxu1  ;;  %v375_v1 = vld [vmem:[%s3710_s7 + $0xf0] sm:$0xff]  ;;  %2962 = vperm.xlu1 %3505, %v2708_v23  }
 0x169   : > { %v1435_v34 = vpop.f32.mrf.mxu0 }
 0x16a   : > { %v1724_v38 = vpop.f32.mrf.mxu1 }
 0x16b   : > { %v4085_v46 = vadd.f32 %v1724_v38, %v1435_v34  ;;  %v1437_v47 = vpop.f32.mrf.mxu0  ;;  %2957 = vperm.xlu0 %3504, %v2707_v25   ;;  %v525_v34 = vunpack.c.l.s8.bf16 %v373_v22  ;;  %v527_v38 = vunpack.c.l.s8.bf16 %v375_v1 }
 0x16c   : > { %v1726_v50 = vpop.f32.mrf.mxu1 }
 0x16d   : > { %v1440_v52 = vpop.f32.mrf.mxu0  ;;  %1953 = vmatmul.mubr.bf16.gmra.mxu0 %v509_v36 }
 0x16e   : > { %v1729_v54 = vpop.f32.mrf.mxu1  ;;  %2242 = vmatmul.mubr.bf16.gmra.mxu1 %v511_v41  ;;  %1960 = vmatprep.mubr.bf16.mxu0 %v518_v42  ;;  %v534_v41 = vunpack.c.h.s8.bf16 %v374_v61  ;;  %v2710_v42 = vld [vmem:[%s3977_s27 + $0x188] sm:$0xff] }
 0x16f   : > { %v4089_v58 = vadd.f32 %v1729_v54, %v1440_v52  ;;  %v1442_v60 = vpop.f32.mrf.mxu0  ;;  %2249 = vmatprep.mubr.bf16.mxu1 %v520_v49  ;;  %v536_v49 = vunpack.c.h.s8.bf16 %v376_v2  ;;  %2972 = vperm.xlu1 %3505, %v2710_v42  }
 0x170   : > { %v1731_v62 = vpop.f32.mrf.mxu1  ;;  %2967 = vperm.xlu0 %3504, %v2709_v43  }
 0x171   : > { %v1443_v4 = vpop.f32.mrf.mxu0  ;;  %v382_v62 = vld [vmem:[%s3710_s7 + $0x128] sm:$0xff] }
 0x172   : > { %v1732_v7 = vpop.f32.mrf.mxu1  ;;  %v542_v10 = vunpack.c.l.s8.bf16 %v382_v62 }
 0x173   : > { %v4095_v13 = vadd.f32 %v1732_v7, %v1443_v4  ;;  %v1445_v14 = vpop.f32.mrf.mxu0  ;;  %2982 = vperm.xlu1 %3505, %v2712_v55   ;;  %v384_v4 = vld [vmem:[%s3710_s7 + $0x138] sm:$0xff]  ;;  %v533_v7 = vunpack.c.h.s8.bf16 %v373_v22  ;;  %v381_v22 = vld [vmem:[%s3710_s7 + $0x120] sm:$0xff] }
 0x174   : > { %v1734_v19 = vpop.f32.mrf.mxu1  ;;  %2977 = vperm.xlu0 %3504, %v2711_v56   ;;  %v2713_v14 = vld [vmem:[%s3977_s27 + $0x1a0] sm:$0xff]  ;;  %v552_v55 = vunpack.c.h.s8.bf16 %v384_v4 }
 0x175   : > { %v1448_v20 = vpop.f32.mrf.mxu0  ;;  %1961 = vmatmul.mubr.bf16.gmra.mxu0 %v517_v6 }
 0x176   : > { %v1737_v21 = vpop.f32.mrf.mxu1  ;;  %2250 = vmatmul.mubr.bf16.gmra.mxu1 %v519_v8  ;;  %1968 = vmatprep.mubr.bf16.mxu0 %v526_v9  ;;  %v535_v9 = vunpack.c.h.s8.bf16 %v375_v1  ;;  %v2715_v1 = vld [vmem:[%s3977_s27 + $0x1b0] sm:$0xff] }
 0x177   : > { %v4100_v28 = vadd.f32 %v1737_v21, %v1448_v20  ;;  %v1450_v29 = vpop.f32.mrf.mxu0  ;;  %2257 = vmatprep.mubr.bf16.mxu1 %v528_v16  ;;  %v544_v20 = vunpack.c.l.s8.bf16 %v384_v4  ;;  %2992 = vperm.xlu1 %3505, %v2714_v12  }
 0x178   : > { %v1739_v32 = vpop.f32.mrf.mxu1  ;;  %2987 = vperm.xlu0 %3504, %v2713_v14   ;;  %v2716_v29 = vld [vmem:[%s3977_s27 + $0x1b8] sm:$0xff]  ;;  %v549_v14 = vunpack.c.h.s8.bf16 %v381_v22 }
 0x179   : > { %v1451_v33 = vpop.f32.mrf.mxu0 }
 0x17a   : > { %v1740_v36 = vpop.f32.mrf.mxu1 }
 0x17b   : > { %v4105_v45 = vadd.f32 %v1740_v36, %v1451_v33  ;;  %v1453_v47 = vpop.f32.mrf.mxu0  ;;  %3002 = vperm.xlu1 %3505, %v2716_v29  }
 0x17c   : > { %v1742_v50 = vpop.f32.mrf.mxu1  ;;  %2997 = vperm.xlu0 %3504, %v2715_v1   ;;  %v550_v47 = vunpack.c.h.s8.bf16 %v382_v62  ;;  %v2719_v62 = vld [vmem:[%s3977_s27 + $0x1d0] sm:$0xff] }
 0x17d   : > { %v1456_v52 = vpop.f32.mrf.mxu0  ;;  %1969 = vmatmul.mubr.bf16.gmra.mxu0 %v525_v34  ;;  %v383_v34 = vld [vmem:[%s3710_s7 + $0x130] sm:$0xff]  ;;  %v2717_v50 = vld [vmem:[%s3977_s27 + $0x1c0] sm:$0xff] }
 0x17e   : > { %v1745_v54 = vpop.f32.mrf.mxu1  ;;  %2258 = vmatmul.mubr.bf16.gmra.mxu1 %v527_v38  ;;  %1976 = vmatprep.mubr.bf16.mxu0 %v534_v41  ;;  %v541_v41 = vunpack.c.l.s8.bf16 %v381_v22  ;;  %v543_v43 = vunpack.c.l.s8.bf16 %v383_v34  ;;  %v389_v22 = vld [vmem:[%s3710_s7 + $0x160] sm:$0xff] }
 0x17f   : > { %v4109_v60 = vadd.f32 %v1745_v54, %v1456_v52  ;;  %v1458_v61 = vpop.f32.mrf.mxu0  ;;  %2265 = vmatprep.mubr.bf16.mxu1 %v536_v49  ;;  %v2718_v49 = vld [vmem:[%s3977_s27 + $0x1c8] sm:$0xff] }
 0x180   : > { %v1747_v2 = vpop.f32.mrf.mxu1  ;;  %3012 = vperm.xlu1 %3505, %v2718_v49   ;;  %3007 = vperm.xlu0 %3504, %v2717_v50   ;;  %v391_v49 = vld [vmem:[%s3710_s7 + $0x170] sm:$0xff] }
 0x181   : > { %v1459_v6 = vpop.f32.mrf.mxu0 }
 0x182   : > { %v1748_v8 = vpop.f32.mrf.mxu1 }
 0x183   : > { %v4115_v16 = vadd.f32 %v1748_v8, %v1459_v6  ;;  %v1461_v19 = vpop.f32.mrf.mxu0  ;;  %v2720_v6 = vld [vmem:[%s3977_s27 + $0x1d8] sm:$0xff] }
 0x184   : > { %v1750_v21 = vpop.f32.mrf.mxu1  ;;  %3022 = vperm.xlu1 %3505, %v2720_v6   ;;  %3017 = vperm.xlu0 %3504, %v2719_v62  }
 0x185   : > { %v1464_v23 = vpop.f32.mrf.mxu0  ;;  %1977 = vmatmul.mubr.bf16.gmra.mxu0 %v533_v7 }
 0x186   : > { %v1753_v25 = vpop.f32.mrf.mxu1  ;;  %2266 = vmatmul.mubr.bf16.gmra.mxu1 %v535_v9  ;;  %1984 = vmatprep.mubr.bf16.mxu0 %v542_v10  ;;  %v390_v9 = vld [vmem:[%s3710_s7 + $0x168] sm:$0xff]  ;;  %v392_v10 = vld [vmem:[%s3710_s7 + $0x178] sm:$0xff] }
 0x187   : > { %v4120_v32 = vadd.f32 %v1753_v25, %v1464_v23  ;;  %v1466_v33 = vpop.f32.mrf.mxu0  ;;  %2273 = vmatprep.mubr.bf16.mxu1 %v544_v20  ;;  %v551_v20 = vunpack.c.h.s8.bf16 %v383_v34  ;;  %v558_v21 = vunpack.c.l.s8.bf16 %v390_v9  ;;  %v2722_v23 = vld [vmem:[%s3977_s27 + $0x1e8] sm:$0xff]  ;;  %v2721_v25 = vld [vmem:[%s3977_s27 + $0x1e0] sm:$0xff]  ;;  %v2724_v34 = vld [vmem:[%s3977_s27 + $0x1f8] sm:$0xff] }
 0x188   : > { %v1755_v36 = vpop.f32.mrf.mxu1  ;;  %v560_v33 = vunpack.c.l.s8.bf16 %v392_v10  ;;  %3032 = vperm.xlu1 %3505, %v2722_v23   ;;  %3027 = vperm.xlu0 %3504, %v2721_v25   ;;  %v400_v25 = vld [vmem:[%s3710_s7 + $0x1b8] sm:$0xff] }
 0x189   : > { %v1467_v38 = vpop.f32.mrf.mxu0 }
 0x18a   : > { %v1756_v42 = vpop.f32.mrf.mxu1 }
 0x18b   : > { %v4125_v52 = vadd.f32 %v1756_v42, %v1467_v38  ;;  %v1469_v54 = vpop.f32.mrf.mxu0  ;;  %v2723_v42 = vld [vmem:[%s3977_s27 + $0x1f0] sm:$0xff] }
 0x18c   : > { %v1758_v56 = vpop.f32.mrf.mxu1  ;;  %3042 = vperm.xlu1 %3505, %v2724_v34   ;;  %3037 = vperm.xlu0 %3504, %v2723_v42   ;;  %v576_v34 = vunpack.c.l.s8.bf16 %v400_v25 }
 0x18d   : > { %v1472_v61 = vpop.f32.mrf.mxu0  ;;  %1985 = vmatmul.mubr.bf16.gmra.mxu0 %v541_v41 }
 0x18e   : > { %v1761_v2 = vpop.f32.mrf.mxu1  ;;  %2274 = vmatmul.mubr.bf16.gmra.mxu1 %v543_v43  ;;  %1992 = vmatprep.mubr.bf16.mxu0 %v550_v47 }
 0x18f   : > { %v4129_v7 = vadd.f32 %v1761_v2, %v1472_v61  ;;  %v1474_v8 = vpop.f32.mrf.mxu0  ;;  %2281 = vmatprep.mubr.bf16.mxu1 %v552_v55  ;;  %v557_v55 = vunpack.c.l.s8.bf16 %v389_v22  ;;  %v559_v61 = vunpack.c.l.s8.bf16 %v391_v49  ;;  %v566_v2 = vunpack.c.h.s8.bf16 %v390_v9 }
 0x190   : > { %v1763_v4 = vpop.f32.mrf.mxu1  ;;  %v568_v8 = vunpack.c.h.s8.bf16 %v392_v10  ;;  %v565_v9 = vunpack.c.h.s8.bf16 %v389_v22  ;;  %v399_v22 = vld [vmem:[%s3710_s7 + $0x1b0] sm:$0xff] }
 0x191   : > { %v1475_v12 = vpop.f32.mrf.mxu0 }
 0x192   : > { %v1764_v19 = vpop.f32.mrf.mxu1 }
 0x193   : > { %v4135_v29 = vadd.f32 %v1764_v19, %v1475_v12  ;;  %v1477_v1 = vpop.f32.mrf.mxu0 }
 0x194   : > { %v1766_v36 = vpop.f32.mrf.mxu1 }
 0x195   : > { %v1480_v38 = vpop.f32.mrf.mxu0  ;;  %1993 = vmatmul.mubr.bf16.gmra.mxu0 %v549_v14  ;;  %v567_v36 = vunpack.c.h.s8.bf16 %v391_v49 }
 0x196   : > { %v1769_v41 = vpop.f32.mrf.mxu1  ;;  %2282 = vmatmul.mubr.bf16.gmra.mxu1 %v551_v20  ;;  %2000 = vmatprep.mubr.bf16.mxu0 %v558_v21  ;;  %v398_v21 = vld [vmem:[%s3710_s7 + $0x1a8] sm:$0xff] }
 0x197   : > { %v4140_v43 = vadd.f32 %v1769_v41, %v1480_v38  ;;  %v1482_v47 = vpop.f32.mrf.mxu0  ;;  %2289 = vmatprep.mubr.bf16.mxu1 %v560_v33  ;;  %v574_v10 = vunpack.c.l.s8.bf16 %v398_v21 }
 0x198   : > { %v1771_v50 = vpop.f32.mrf.mxu1 }
 0x199   : > { %v1483_v54 = vpop.f32.mrf.mxu0 }
 0x19a   : > { %v1772_v56 = vpop.f32.mrf.mxu1 }
 0x19b   : > { %v4143_v6 = vadd.f32 %v1772_v56, %v1483_v54  ;;  %v1485_v62 = vpop.f32.mrf.mxu0  ;;  %v397_v54 = vld [vmem:[%s3710_s7 + $0x1a0] sm:$0xff] }
 0x19c   : > { %v1774_v4 = vpop.f32.mrf.mxu1  ;;  %v573_v49 = vunpack.c.l.s8.bf16 %v397_v54 }
 0x19d   : > { %v1488_v12 = vpop.f32.mrf.mxu0  ;;  %2001 = vmatmul.mubr.bf16.gmra.mxu0 %v557_v55  ;;  %v582_v4 = vunpack.c.h.s8.bf16 %v398_v21  ;;  %v581_v21 = vunpack.c.h.s8.bf16 %v397_v54  ;;  %v407_v54 = vld [vmem:[%s3710_s7 + $0x1f0] sm:$0xff] }
 0x19e   : > { %v1777_v14 = vpop.f32.mrf.mxu1  ;;  %2290 = vmatmul.mubr.bf16.gmra.mxu1 %v559_v61  ;;  %2008 = vmatprep.mubr.bf16.mxu0 %v566_v2 }
 0x19f   : > { %v4145_v19 = vadd.f32 %v1777_v14, %v1488_v12  ;;  %v1490_v20 = vpop.f32.mrf.mxu0  ;;  %2297 = vmatprep.mubr.bf16.mxu1 %v568_v8  ;;  %v575_v8 = vunpack.c.l.s8.bf16 %v399_v22 }
 0x1a0   : > { %v1779_v23 = vpop.f32.mrf.mxu1  ;;  %v584_v20 = vunpack.c.h.s8.bf16 %v400_v25 }
 0x1a1   : > { %v1491_v1 = vpop.f32.mrf.mxu0 }
 0x1a2   : > { %v1780_v33 = vpop.f32.mrf.mxu1 }
 0x1a3   : > { %v4149_v38 = vadd.f32 %v1780_v33, %v1491_v1  ;;  %v1493_v41 = vpop.f32.mrf.mxu0 }
 0x1a4   : > { %v1782_v42 = vpop.f32.mrf.mxu1 }
 0x1a5   : > { %v1496_v47 = vpop.f32.mrf.mxu0  ;;  %2009 = vmatmul.mubr.bf16.gmra.mxu0 %v565_v9 }
 0x1a6   : > { %v1785_v50 = vpop.f32.mrf.mxu1  ;;  %2298 = vmatmul.mubr.bf16.gmra.mxu1 %v567_v36  ;;  %2016 = vmatprep.mubr.bf16.mxu0 %v574_v10  ;;  %v406_v10 = vld [vmem:[%s3710_s7 + $0x1e8] sm:$0xff] }
 0x1a7   : > { %v4152_v55 = vadd.f32 %v1785_v50, %v1496_v47  ;;  %v1498_v56 = vpop.f32.mrf.mxu0  ;;  %2305 = vmatprep.mubr.bf16.mxu1 %v576_v34  ;;  %v408_v34 = vld [vmem:[%s3710_s7 + $0x1f8] sm:$0xff]  ;;  %v583_v50 = vunpack.c.h.s8.bf16 %v399_v22  ;;  %v590_v25 = vunpack.c.l.s8.bf16 %v406_v10 }
 0x1a8   : > { %v1787_v61 = vpop.f32.mrf.mxu1 }
 0x1a9   : > { %v1499_v2 = vpop.f32.mrf.mxu0 }
 0x1aa   : > { %v1788_v62 = vpop.f32.mrf.mxu1 }
 0x1ab   : > { %v4155_v12 = vadd.f32 %v1788_v62, %v1499_v2  ;;  %v1501_v14 = vpop.f32.mrf.mxu0  ;;  %v592_v2 = vunpack.c.l.s8.bf16 %v408_v34 }
 0x1ac   : > { %v1790_v23 = vpop.f32.mrf.mxu1 }
 0x1ad   : > { %v1504_v1 = vpop.f32.mrf.mxu0  ;;  %2017 = vmatmul.mubr.bf16.gmra.mxu0 %v573_v49 }
 0x1ae   : > { %v1793_v9 = vpop.f32.mrf.mxu1  ;;  %2306 = vmatmul.mubr.bf16.gmra.mxu1 %v575_v8  ;;  %2024 = vmatprep.mubr.bf16.mxu0 %v582_v4  ;;  %v405_v4 = vld [vmem:[%s3710_s7 + $0x1e0] sm:$0xff] }
 0x1af   : > { %v4157_v33 = vadd.f32 %v1793_v9, %v1504_v1  ;;  %v1506_v36 = vpop.f32.mrf.mxu0  ;;  %2313 = vmatprep.mubr.bf16.mxu1 %v584_v20  ;;  %v589_v22 = vunpack.c.l.s8.bf16 %v405_v4 }
 0x1b0   : > { %v1795_v41 = vpop.f32.mrf.mxu1  ;;  %v591_v36 = vunpack.c.l.s8.bf16 %v407_v54 }
 0x1b1   : > { %v1507_v42 = vpop.f32.mrf.mxu0  ;;  %v598_v41 = vunpack.c.h.s8.bf16 %v406_v10  ;;  %v597_v10 = vunpack.c.h.s8.bf16 %v405_v4  ;;  %v415_v4 = vld [vmem:[%s3710_s7 + $0x230] sm:$0xff] }
 0x1b2   : > { %v1796_v47 = vpop.f32.mrf.mxu1 }
 0x1b3   : > { %v4161_v56 = vadd.f32 %v1796_v47, %v1507_v42  ;;  %v1509_v61 = vpop.f32.mrf.mxu0  ;;  %v600_v47 = vunpack.c.h.s8.bf16 %v408_v34 }
 0x1b4   : > { %v1798_v49 = vpop.f32.mrf.mxu1 }
 0x1b5   : > { %v1512_v62 = vpop.f32.mrf.mxu0  ;;  %2025 = vmatmul.mubr.bf16.gmra.mxu0 %v581_v21 }
 0x1b6   : > { %v1801_v8 = vpop.f32.mrf.mxu1  ;;  %2314 = vmatmul.mubr.bf16.gmra.mxu1 %v583_v50  ;;  %2032 = vmatprep.mubr.bf16.mxu0 %v590_v25 }
 0x1b7   : > { %v4164_v14 = vadd.f32 %v1801_v8, %v1512_v62  ;;  %v1514_v20 = vpop.f32.mrf.mxu0  ;;  %2321 = vmatprep.mubr.bf16.mxu1 %v592_v2  ;;  %v414_v62 = vld [vmem:[%s3710_s7 + $0x228] sm:$0xff] }
 0x1b8   : > { %v1803_v23 = vpop.f32.mrf.mxu1  ;;  %v416_v20 = vld [vmem:[%s3710_s7 + $0x238] sm:$0xff]  ;;  %v606_v34 = vunpack.c.l.s8.bf16 %v414_v62 }
 0x1b9   : > { %v1515_v1 = vpop.f32.mrf.mxu0 }
 0x1ba   : > { %v1804_v9 = vpop.f32.mrf.mxu1 }
 0x1bb   : > { %v4167_v42 = vadd.f32 %v1804_v9, %v1515_v1  ;;  %v1517_v21 = vpop.f32.mrf.mxu0  ;;  %v599_v9 = vunpack.c.h.s8.bf16 %v407_v54 }
 0x1bc   : > { %v1806_v50 = vpop.f32.mrf.mxu1 }
 0x1bd   : > { %4459 = vst [vmem:[#allocation3_spill] sm:$0xff] %v4167_v42  ;;  %v1520_v25 = vpop.f32.mrf.mxu0  ;;  %2033 = vmatmul.mubr.bf16.gmra.mxu0 %v589_v22  ;;  %v608_v50 = vunpack.c.l.s8.bf16 %v416_v20 }
 0x1be   : > { %v1809_v61 = vpop.f32.mrf.mxu1  ;;  %2322 = vmatmul.mubr.bf16.gmra.mxu1 %v591_v36  ;;  %2040 = vmatprep.mubr.bf16.mxu0 %v598_v41 }
 0x1bf   : > { %v4169_v2 = vadd.f32 %v1809_v61, %v1520_v25  ;;  %v1522_v49 = vpop.f32.mrf.mxu0  ;;  %2329 = vmatprep.mubr.bf16.mxu1 %v600_v47  ;;  %v413_v47 = vld [vmem:[%s3710_s7 + $0x220] sm:$0xff] }
 0x1c0   : > { %v1811_v8 = vpop.f32.mrf.mxu1  ;;  %v605_v54 = vunpack.c.l.s8.bf16 %v413_v47 }
 0x1c1   : > { %4460 = vst [vmem:[#allocation4_spill] sm:$0xff] %v4169_v2  ;;  %v1523_v23 = vpop.f32.mrf.mxu0 }
 0x1c2   : > { %v1812_v1 = vpop.f32.mrf.mxu1 }
 0x1c3   : > { %v4173_v21 = vadd.f32 %v1812_v1, %v1523_v23  ;;  %v1525_v22 = vpop.f32.mrf.mxu0  ;;  %v607_v1 = vunpack.c.l.s8.bf16 %v415_v4 }
 0x1c4   : > { %v1814_v36 = vpop.f32.mrf.mxu1  ;;  %v614_v22 = vunpack.c.h.s8.bf16 %v414_v62  ;;  %v613_v62 = vunpack.c.h.s8.bf16 %v413_v47  ;;  %v423_v47 = vld [vmem:[%s3710_s7 + $0x270] sm:$0xff] }
 0x1c5   : > { %4461 = vst [vmem:[#allocation5_spill] sm:$0xff] %v4173_v21  ;;  %v1528_v41 = vpop.f32.mrf.mxu0  ;;  %2041 = vmatmul.mubr.bf16.gmra.mxu0 %v597_v10  ;;  %v616_v21 = vunpack.c.h.s8.bf16 %v416_v20 }
 0x1c6   : > { %v1817_v25 = vpop.f32.mrf.mxu1  ;;  %2330 = vmatmul.mubr.bf16.gmra.mxu1 %v599_v9  ;;  %2048 = vmatprep.mubr.bf16.mxu0 %v606_v34 }
 0x1c7   : > { %v4176_v61 = vadd.f32 %v1817_v25, %v1528_v41  ;;  %v1530_v49 = vpop.f32.mrf.mxu0  ;;  %2337 = vmatprep.mubr.bf16.mxu1 %v608_v50 }
 0x1c8   : > { %v1819_v8 = vpop.f32.mrf.mxu1  ;;  %v422_v49 = vld [vmem:[%s3710_s7 + $0x268] sm:$0xff] }
 0x1c9   : > { %4462 = vst [vmem:[#allocation6_spill] sm:$0xff] %v4176_v61  ;;  %v1531_v2 = vpop.f32.mrf.mxu0  ;;  %v424_v61 = vld [vmem:[%s3710_s7 + $0x278] sm:$0xff]  ;;  %v622_v20 = vunpack.c.l.s8.bf16 %v422_v49 }
 0x1ca   : > { %v1820_v23 = vpop.f32.mrf.mxu1 }
 0x1cb   : > { %v4179_v36 = vadd.f32 %v1820_v23, %v1531_v2  ;;  %v1533_v10 = vpop.f32.mrf.mxu0  ;;  %v615_v23 = vunpack.c.h.s8.bf16 %v415_v4 }
 0x1cc   : > { %v1822_v9 = vpop.f32.mrf.mxu1 }
 0x1cd   : > { %4463 = vst [vmem:[#allocation7_spill] sm:$0xff] %v4179_v36  ;;  %v1536_v34 = vpop.f32.mrf.mxu0  ;;  %2049 = vmatmul.mubr.bf16.gmra.mxu0 %v605_v54  ;;  %v624_v9 = vunpack.c.l.s8.bf16 %v424_v61 }
 0x1ce   : > { %v1825_v41 = vpop.f32.mrf.mxu1  ;;  %2338 = vmatmul.mubr.bf16.gmra.mxu1 %v607_v1  ;;  %2056 = vmatprep.mubr.bf16.mxu0 %v614_v22 }
 0x1cf   : > { %v4181_v50 = vadd.f32 %v1825_v41, %v1536_v34  ;;  %v1538_v25 = vpop.f32.mrf.mxu0  ;;  %2345 = vmatprep.mubr.bf16.mxu1 %v616_v21  ;;  %v421_v21 = vld [vmem:[%s3710_s7 + $0x260] sm:$0xff] }
 0x1d0   : > { %v1827_v8 = vpop.f32.mrf.mxu1  ;;  %v621_v4 = vunpack.c.l.s8.bf16 %v421_v21 }
 0x1d1   : > { %4464 = vst [vmem:[#allocation8_spill] sm:$0xff] %v4181_v50  ;;  %v1539_v42 = vpop.f32.mrf.mxu0 }
 0x1d2   : > { %v1828_v2 = vpop.f32.mrf.mxu1 }
 0x1d3   : > { %v4185_v10 = vadd.f32 %v1828_v2, %v1539_v42  ;;  %v1541_v54 = vpop.f32.mrf.mxu0  ;;  %v623_v2 = vunpack.c.l.s8.bf16 %v423_v47 }
 0x1d4   : > { %v1830_v1 = vpop.f32.mrf.mxu1  ;;  %v630_v54 = vunpack.c.h.s8.bf16 %v422_v49  ;;  %v629_v49 = vunpack.c.h.s8.bf16 %v421_v21  ;;  %v431_v21 = vld [vmem:[%s3710_s7 + $0x2b0] sm:$0xff] }
 0x1d5   : > { %4465 = vst [vmem:[#allocation9_spill] sm:$0xff] %v4185_v10  ;;  %v1544_v22 = vpop.f32.mrf.mxu0  ;;  %2057 = vmatmul.mubr.bf16.gmra.mxu0 %v613_v62  ;;  %v632_v10 = vunpack.c.h.s8.bf16 %v424_v61 }
 0x1d6   : > { %v1833_v34 = vpop.f32.mrf.mxu1  ;;  %2346 = vmatmul.mubr.bf16.gmra.mxu1 %v615_v23  ;;  %2064 = vmatprep.mubr.bf16.mxu0 %v622_v20 }
 0x1d7   : > { %v4188_v41 = vadd.f32 %v1833_v34, %v1544_v22  ;;  %v1546_v25 = vpop.f32.mrf.mxu0  ;;  %2353 = vmatprep.mubr.bf16.mxu1 %v624_v9 }
 0x1d8   : > { %v1835_v8 = vpop.f32.mrf.mxu1  ;;  %v430_v25 = vld [vmem:[%s3710_s7 + $0x2a8] sm:$0xff] }
 0x1d9   : > { %4466 = vst [vmem:[#allocation10_spill] sm:$0xff] %v4188_v41  ;;  %v1547_v50 = vpop.f32.mrf.mxu0  ;;  %v432_v41 = vld [vmem:[%s3710_s7 + $0x2b8] sm:$0xff]  ;;  %v638_v61 = vunpack.c.l.s8.bf16 %v430_v25 }
 0x1da   : > { %v1836_v42 = vpop.f32.mrf.mxu1 }
 0x1db   : > { %v4191_v1 = vadd.f32 %v1836_v42, %v1547_v50  ;;  %v1549_v62 = vpop.f32.mrf.mxu0  ;;  %v631_v42 = vunpack.c.h.s8.bf16 %v423_v47 }
 0x1dc   : > { %v1838_v23 = vpop.f32.mrf.mxu1 }
 0x1dd   : > { %4467 = vst [vmem:[#allocation11_spill] sm:$0xff] %v4191_v1  ;;  %v1552_v20 = vpop.f32.mrf.mxu0  ;;  %2065 = vmatmul.mubr.bf16.gmra.mxu0 %v621_v4  ;;  %v640_v23 = vunpack.c.l.s8.bf16 %v432_v41 }
 0x1de   : > { %v1841_v22 = vpop.f32.mrf.mxu1  ;;  %2354 = vmatmul.mubr.bf16.gmra.mxu1 %v623_v2  ;;  %2072 = vmatprep.mubr.bf16.mxu0 %v630_v54 }
 0x1df   : > { %v4193_v9 = vadd.f32 %v1841_v22, %v1552_v20  ;;  %v1554_v34 = vpop.f32.mrf.mxu0  ;;  %2361 = vmatprep.mubr.bf16.mxu1 %v632_v10  ;;  %v429_v10 = vld [vmem:[%s3710_s7 + $0x2a0] sm:$0xff] }
 0x1e0   : > { %v1843_v8 = vpop.f32.mrf.mxu1  ;;  %v637_v47 = vunpack.c.l.s8.bf16 %v429_v10 }
 0x1e1   : > { %4468 = vst [vmem:[#allocation12_spill] sm:$0xff] %v4193_v9  ;;  %v1555_v36 = vpop.f32.mrf.mxu0 }
 0x1e2   : > { %v1844_v50 = vpop.f32.mrf.mxu1 }
 0x1e3   : > { %v4197_v62 = vadd.f32 %v1844_v50, %v1555_v36  ;;  %v1557_v4 = vpop.f32.mrf.mxu0  ;;  %v639_v50 = vunpack.c.l.s8.bf16 %v431_v21 }
 0x1e4   : > { %v1846_v2 = vpop.f32.mrf.mxu1  ;;  %v646_v4 = vunpack.c.h.s8.bf16 %v430_v25  ;;  %v645_v25 = vunpack.c.h.s8.bf16 %v429_v10  ;;  %v439_v10 = vld [vmem:[%s3710_s7 + $0x2f0] sm:$0xff] }
 0x1e5   : > { %4469 = vst [vmem:[#allocation13_spill] sm:$0xff] %v4197_v62  ;;  %v1560_v54 = vpop.f32.mrf.mxu0  ;;  %2073 = vmatmul.mubr.bf16.gmra.mxu0 %v629_v49  ;;  %v648_v62 = vunpack.c.h.s8.bf16 %v432_v41 }
 0x1e6   : > { %v1849_v20 = vpop.f32.mrf.mxu1  ;;  %2362 = vmatmul.mubr.bf16.gmra.mxu1 %v631_v42  ;;  %2080 = vmatprep.mubr.bf16.mxu0 %v638_v61 }
 0x1e7   : > { %v4200_v22 = vadd.f32 %v1849_v20, %v1560_v54  ;;  %v1562_v34 = vpop.f32.mrf.mxu0  ;;  %2369 = vmatprep.mubr.bf16.mxu1 %v640_v23 }
 0x1e8   : > { %v1851_v8 = vpop.f32.mrf.mxu1  ;;  %v438_v34 = vld [vmem:[%s3710_s7 + $0x2e8] sm:$0xff] }
 0x1e9   : > { %4470 = vst [vmem:[#allocation14_spill] sm:$0xff] %v4200_v22  ;;  %v1563_v9 = vpop.f32.mrf.mxu0  ;;  %v440_v22 = vld [vmem:[%s3710_s7 + $0x2f8] sm:$0xff]  ;;  %v654_v41 = vunpack.c.l.s8.bf16 %v438_v34 }
 0x1ea   : > { %v1852_v36 = vpop.f32.mrf.mxu1 }
 0x1eb   : > { %v4203_v2 = vadd.f32 %v1852_v36, %v1563_v9  ;;  %v1565_v49 = vpop.f32.mrf.mxu0  ;;  %v647_v36 = vunpack.c.h.s8.bf16 %v431_v21 }
 0x1ec   : > { %v1854_v42 = vpop.f32.mrf.mxu1 }
 0x1ed   : > { %4471 = vst [vmem:[#allocation15_spill] sm:$0xff] %v4203_v2  ;;  %v1568_v61 = vpop.f32.mrf.mxu0  ;;  %2081 = vmatmul.mubr.bf16.gmra.mxu0 %v637_v47  ;;  %v656_v42 = vunpack.c.l.s8.bf16 %v440_v22 }
 0x1ee   : > { %v1857_v54 = vpop.f32.mrf.mxu1  ;;  %2370 = vmatmul.mubr.bf16.gmra.mxu1 %v639_v50  ;;  %2088 = vmatprep.mubr.bf16.mxu0 %v646_v4 }
 0x1ef   : > { %v4205_v23 = vadd.f32 %v1857_v54, %v1568_v61  ;;  %v1570_v20 = vpop.f32.mrf.mxu0  ;;  %2377 = vmatprep.mubr.bf16.mxu1 %v648_v62  ;;  %v437_v62 = vld [vmem:[%s3710_s7 + $0x2e0] sm:$0xff] }
 0x1f0   : > { %v1859_v8 = vpop.f32.mrf.mxu1  ;;  %v653_v21 = vunpack.c.l.s8.bf16 %v437_v62 }
 0x1f1   : > { %4472 = vst [vmem:[#allocation16_spill] sm:$0xff] %v4205_v23  ;;  %v1571_v1 = vpop.f32.mrf.mxu0 }
 0x1f2   : > { %v1860_v9 = vpop.f32.mrf.mxu1 }
 0x1f3   : > { %v4209_v49 = vadd.f32 %v1860_v9, %v1571_v1  ;;  %v1573_v47 = vpop.f32.mrf.mxu0  ;;  %v655_v9 = vunpack.c.l.s8.bf16 %v439_v10 }
 0x1f4   : > { %v1862_v50 = vpop.f32.mrf.mxu1  ;;  %v662_v47 = vunpack.c.h.s8.bf16 %v438_v34  ;;  %v661_v34 = vunpack.c.h.s8.bf16 %v437_v62  ;;  %v447_v62 = vld [vmem:[%s3710_s7 + $0x330] sm:$0xff] }
 0x1f5   : > { %4473 = vst [vmem:[#allocation17_spill] sm:$0xff] %v4209_v49  ;;  %v1576_v4 = vpop.f32.mrf.mxu0  ;;  %2089 = vmatmul.mubr.bf16.gmra.mxu0 %v645_v25  ;;  %v664_v49 = vunpack.c.h.s8.bf16 %v440_v22 }
 0x1f6   : > { %v1865_v61 = vpop.f32.mrf.mxu1  ;;  %2378 = vmatmul.mubr.bf16.gmra.mxu1 %v647_v36  ;;  %2096 = vmatprep.mubr.bf16.mxu0 %v654_v41 }
 0x1f7   : > { %v4212_v54 = vadd.f32 %v1865_v61, %v1576_v4  ;;  %v1578_v20 = vpop.f32.mrf.mxu0  ;;  %2385 = vmatprep.mubr.bf16.mxu1 %v656_v42 }
 0x1f8   : > { %v1867_v8 = vpop.f32.mrf.mxu1  ;;  %v446_v20 = vld [vmem:[%s3710_s7 + $0x328] sm:$0xff] }
 0x1f9   : > { %4474 = vst [vmem:[#allocation18_spill] sm:$0xff] %v4212_v54  ;;  %v1579_v23 = vpop.f32.mrf.mxu0  ;;  %v448_v54 = vld [vmem:[%s3710_s7 + $0x338] sm:$0xff]  ;;  %v670_v22 = vunpack.c.l.s8.bf16 %v446_v20 }
 0x1fa   : > { %v1868_v1 = vpop.f32.mrf.mxu1 }
 0x1fb   : > { %v4215_v50 = vadd.f32 %v1868_v1, %v1579_v23  ;;  %v1581_v25 = vpop.f32.mrf.mxu0  ;;  %v663_v1 = vunpack.c.h.s8.bf16 %v439_v10 }
 0x1fc   : > { %v1870_v36 = vpop.f32.mrf.mxu1 }
 0x1fd   : > { %4475 = vst [vmem:[#allocation19_spill] sm:$0xff] %v4215_v50  ;;  %v1584_v41 = vpop.f32.mrf.mxu0  ;;  %2097 = vmatmul.mubr.bf16.gmra.mxu0 %v653_v21  ;;  %v672_v36 = vunpack.c.l.s8.bf16 %v448_v54 }
 0x1fe   : > { %v1873_v4 = vpop.f32.mrf.mxu1  ;;  %2386 = vmatmul.mubr.bf16.gmra.mxu1 %v655_v9  ;;  %2104 = vmatprep.mubr.bf16.mxu0 %v662_v47 }
 0x1ff   : > { %v4217_v42 = vadd.f32 %v1873_v4, %v1584_v41  ;;  %v1586_v61 = vpop.f32.mrf.mxu0  ;;  %2393 = vmatprep.mubr.bf16.mxu1 %v664_v49  ;;  %v445_v49 = vld [vmem:[%s3710_s7 + $0x320] sm:$0xff] }
 0x200   : > { %v1875_v8 = vpop.f32.mrf.mxu1 }
 0x201   : > { %4476 = vst [vmem:[#allocation20_spill] sm:$0xff] %v4217_v42  ;;  %v1587_v2 = vpop.f32.mrf.mxu0  ;;  %v669_v42 = vunpack.c.l.s8.bf16 %v445_v49 }
 0x202   : > { %v1876_v23 = vpop.f32.mrf.mxu1 }
 0x203   : > { %v4221_v25 = vadd.f32 %v1876_v23, %v1587_v2  ;;  %v1589_v21 = vpop.f32.mrf.mxu0  ;;  %v671_v23 = vunpack.c.l.s8.bf16 %v447_v62 }
 0x204   : > { %v1878_v9 = vpop.f32.mrf.mxu1  ;;  %v678_v21 = vunpack.c.h.s8.bf16 %v446_v20 }
 0x205   : > { %4477 = vst [vmem:[#allocation21_spill] sm:$0xff] %v4221_v25  ;;  %v1592_v47 = vpop.f32.mrf.mxu0  ;;  %2105 = vmatmul.mubr.bf16.gmra.mxu0 %v661_v34 }
 0x206   : > { %v1881_v41 = vpop.f32.mrf.mxu1  ;;  %2394 = vmatmul.mubr.bf16.gmra.mxu1 %v663_v1  ;;  %2112 = vmatprep.mubr.bf16.mxu0 %v670_v22  ;;  %v680_v1 = vunpack.c.h.s8.bf16 %v448_v54 }
 0x207   : > { %v4224_v4 = vadd.f32 %v1881_v41, %v1592_v47  ;;  %v1594_v61 = vpop.f32.mrf.mxu0  ;;  %2401 = vmatprep.mubr.bf16.mxu1 %v672_v36  ;;  %v2728_v47 = vpop.permute.xlu0 %2727 }
 0x208   : > { %v1883_v8 = vpop.f32.mrf.mxu1  ;;  %v454_v61 = vld [vmem:[%s3710_s7 + $0x368] sm:$0xff] }
 0x209   : > { %4478 = vst [vmem:[#allocation22_spill] sm:$0xff] %v4224_v4  ;;  %v1595_v10 = vpop.f32.mrf.mxu0 }
 0x20a   : > { %v1884_v2 = vpop.f32.mrf.mxu1 }
 0x20b   : > { %v4227_v9 = vadd.f32 %v1884_v2, %v1595_v10  ;;  %v1597_v34 = vpop.f32.mrf.mxu0  ;;  %v456_v10 = vld [vmem:[%s3710_s7 + $0x378] sm:$0xff] }
 0x20c   : > { %v1886_v22 = vpop.f32.mrf.mxu1 }
 0x20d   : > { %4479 = vst [vmem:[#allocation23_spill] sm:$0xff] %v4227_v9  ;;  %v1922_v25 = vpop.f32.mrf.mxu0  ;;  %2113 = vmatmul.mubr.bf16.gmra.mxu0 %v669_v42  ;;  %v3109_v42 = vld [vmem:[%s4234_s30] sm:$0xff]  ;;  %v679_v22 = vunpack.c.h.s8.bf16 %v447_v62  ;;  %v686_v9 = vunpack.c.l.s8.bf16 %v454_v61 }
 0x20e   : > { %v1923_v36 = vadd.f32 %v1922_v25, %v3964_v31  ;;  %v2211_v41 = vpop.f32.mrf.mxu1  ;;  %2402 = vmatmul.mubr.bf16.gmra.mxu1 %v671_v23  ;;  %2120 = vmatprep.mubr.bf16.mxu0 %v678_v21  ;;  %v677_v31 = vunpack.c.h.s8.bf16 %v445_v49 }
 0x20f   : > { %v1924_v20 = vpop.f32.mrf.mxu0  ;;  %2409 = vmatprep.mubr.bf16.mxu1 %v680_v1  ;;  %v2733_v1 = vpop.permute.xlu0 %2732 }
 0x210   : > { %v2212_v54 = vadd.f32 %v2211_v41, %v1923_v36  ;;  %v2213_v8 = vpop.f32.mrf.mxu1  ;;  %v688_v36 = vunpack.c.l.s8.bf16 %v456_v10 }
 0x211   : > { %v1925_v2 = vpop.f32.mrf.mxu0 }
 0x212   : > { %v3045_v25 = vmul.f32 %v2728_v47, %v2212_v54  ;;  %v1926_v23 = vadd.f32 %v1925_v2, %v3969_v40  ;;  %v2214_v34 = vpop.f32.mrf.mxu1  ;;  %v3110_v47 = vld [vmem:[%s4234_s30 + $0x8] sm:$0xff]  ;;  %v453_v2 = vld [vmem:[%s3710_s7 + $0x360] sm:$0xff] }
 0x213   : > { %v1927_v21 = vpop.f32.mrf.mxu0 }
 0x214   : > { %v3173_v41 = vadd.f32 %v3109_v42, %v3045_v25  ;;  %v2215_v20 = vadd.f32 %v2214_v34, %v1926_v23  ;;  %v2216_v49 = vpop.f32.mrf.mxu1  ;;  %v2738_v21 = vpop.permute.xlu1 %2737  ;;  %v455_v42 = vld [vmem:[%s3710_s7 + $0x370] sm:$0xff] }
 0x215   : > { %v1930_v54 = vpop.f32.mrf.mxu0  ;;  %2121 = vmatmul.mubr.bf16.gmra.mxu0 %v677_v31  ;;  %v3111_v49 = vld [vmem:[%s4234_s30 + $0x10] sm:$0xff]  ;;  %v685_v31 = vunpack.c.l.s8.bf16 %v453_v2 }
 0x216   : > { %3237 = vst [vmem:[%s4244_s8] sm:$0xff] %v3173_v41  ;;  %v3046_v40 = vmul.f32 %v2733_v1, %v2215_v20  ;;  %v1931_v62 = vadd.f32 %v1930_v54, %v3981_v48  ;;  %v2219_v8 = vpop.f32.mrf.mxu1  ;;  %2410 = vmatmul.mubr.bf16.gmra.mxu1 %v679_v22  ;;  %2128 = vmatprep.mubr.bf16.mxu0 %v686_v9  ;;  %v687_v22 = vunpack.c.l.s8.bf16 %v455_v42  ;;  %v694_v9 = vunpack.c.h.s8.bf16 %v454_v61 }
 0x217   : > { %v1932_v4 = vpop.f32.mrf.mxu0  ;;  %2417 = vmatprep.mubr.bf16.mxu1 %v688_v36  ;;  %v696_v54 = vunpack.c.h.s8.bf16 %v456_v10  ;;  %v462_v10 = vld [vmem:[%s3710_s7 + $0x3a8] sm:$0xff] }
 0x218   : > { %v3174_v25 = vadd.f32 %v3110_v47, %v3046_v40  ;;  %v2220_v23 = vadd.f32 %v2219_v8, %v1931_v62  ;;  %v2221_v34 = vpop.f32.mrf.mxu1  ;;  %v2743_v40 = vpop.permute.xlu1 %2742  ;;  %v3112_v62 = vld [vmem:[%s4234_s30 + $0x18] sm:$0xff] }
 0x219   : > { %v1933_v50 = vpop.f32.mrf.mxu0 }
 0x21a   : > { %3238 = vst [vmem:[%s4244_s8 + $0x8] sm:$0xff] %v3174_v25  ;;  %v3047_v1 = vmul.f32 %v2738_v21, %v2220_v23  ;;  %v1934_v48 = vadd.f32 %v1933_v50, %v3986_v59  ;;  %v2222_v41 = vpop.f32.mrf.mxu1 }
 0x21b   : > { %v1935_v20 = vpop.f32.mrf.mxu0 }
 0x21c   : > { %v3175_v4 = vadd.f32 %v3111_v49, %v3047_v1  ;;  %v2223_v36 = vadd.f32 %v2222_v41, %v1934_v48  ;;  %v2224_v47 = vpop.f32.mrf.mxu1  ;;  %v464_v49 = vld [vmem:[%s3710_s7 + $0x3b8] sm:$0xff]  ;;  %v2748_v1 = vpop.permute.xlu0 %2747  ;;  %v3113_v48 = vld [vmem:[%s4234_s30 + $0x20] sm:$0xff] }
 0x21d   : > { %v1938_v8 = vpop.f32.mrf.mxu0  ;;  %2129 = vmatmul.mubr.bf16.gmra.mxu0 %v685_v31  ;;  %v693_v31 = vunpack.c.h.s8.bf16 %v453_v2 }
 0x21e   : > { %3239 = vst [vmem:[%s4244_s8 + $0x10] sm:$0xff] %v3175_v4  ;;  %v3048_v25 = vmul.f32 %v2743_v40, %v2223_v36  ;;  %v1939_v59 = vadd.f32 %v1938_v8, %v3989_v3  ;;  %v2227_v50 = vpop.f32.mrf.mxu1  ;;  %2418 = vmatmul.mubr.bf16.gmra.mxu1 %v687_v22  ;;  %2136 = vmatprep.mubr.bf16.mxu0 %v694_v9  ;;  %v695_v22 = vunpack.c.h.s8.bf16 %v455_v42  ;;  %v702_v9 = vunpack.c.l.s8.bf16 %v462_v10  ;;  %v2753_v8 = vpop.permute.xlu1 %2752  ;;  %v461_v42 = vld [vmem:[%s3710_s7 + $0x3a0] sm:$0xff] }
 0x21f   : > { %v1940_v61 = vpop.f32.mrf.mxu0  ;;  %2425 = vmatprep.mubr.bf16.mxu1 %v696_v54  ;;  %v704_v36 = vunpack.c.l.s8.bf16 %v464_v49 }
 0x220   : > { %v3176_v21 = vadd.f32 %v3112_v62, %v3048_v25  ;;  %v2228_v23 = vadd.f32 %v2227_v50, %v1939_v59  ;;  %v2229_v34 = vpop.f32.mrf.mxu1  ;;  %v3114_v25 = vld [vmem:[%s4234_s30 + $0x28] sm:$0xff] }
 0x221   : > { %v1941_v41 = vpop.f32.mrf.mxu0 }
 0x222   : > { %3240 = vst [vmem:[%s4244_s8 + $0x18] sm:$0xff] %v3176_v21  ;;  %v3049_v20 = vmul.f32 %v2748_v1, %v2228_v23  ;;  %v1942_v3 = vadd.f32 %v1941_v41, %v3995_v15  ;;  %v2230_v4 = vpop.f32.mrf.mxu1  ;;  %v463_v21 = vld [vmem:[%s3710_s7 + $0x3b0] sm:$0xff] }
 0x223   : > { %v1943_v54 = vpop.f32.mrf.mxu0  ;;  %v3115_v41 = vld [vmem:[%s4234_s30 + $0x30] sm:$0xff] }
 0x224   : > { %v3177_v47 = vadd.f32 %v3113_v48, %v3049_v20  ;;  %v2231_v40 = vadd.f32 %v2230_v4, %v1942_v3  ;;  %v2232_v62 = vpop.f32.mrf.mxu1  ;;  %v2758_v48 = vpop.permute.xlu0 %2757 }
 0x225   : > { %v1946_v59 = vpop.f32.mrf.mxu0  ;;  %2137 = vmatmul.mubr.bf16.gmra.mxu0 %v693_v31  ;;  %v701_v31 = vunpack.c.l.s8.bf16 %v461_v42 }
 0x226   : > { %3241 = vst [vmem:[%s4244_s8 + $0x20] sm:$0xff] %v3177_v47  ;;  %v3050_v2 = vmul.f32 %v2753_v8, %v2231_v40  ;;  %v1947_v15 = vadd.f32 %v1946_v59, %v4000_v24  ;;  %v2235_v50 = vpop.f32.mrf.mxu1  ;;  %2426 = vmatmul.mubr.bf16.gmra.mxu1 %v695_v22  ;;  %2144 = vmatprep.mubr.bf16.mxu0 %v702_v9  ;;  %v703_v22 = vunpack.c.l.s8.bf16 %v463_v21  ;;  %v710_v9 = vunpack.c.h.s8.bf16 %v462_v10  ;;  %v2763_v8 = vpop.permute.xlu1 %2762 }
 0x227   : > { %v1948_v61 = vpop.f32.mrf.mxu0  ;;  %2433 = vmatprep.mubr.bf16.mxu1 %v704_v36  ;;  %v712_v47 = vunpack.c.h.s8.bf16 %v464_v49  ;;  %v470_v49 = vld [vmem:[%s3710_s7 + $0x3e8] sm:$0xff] }
 0x228   : > { %v3178_v23 = vadd.f32 %v3114_v25, %v3050_v2  ;;  %v2236_v34 = vadd.f32 %v2235_v50, %v1947_v15  ;;  %v2237_v1 = vpop.f32.mrf.mxu1  ;;  %v3116_v25 = vld [vmem:[%s4234_s30 + $0x38] sm:$0xff] }
 0x229   : > { %v1949_v20 = vpop.f32.mrf.mxu0  ;;  %v2768_v1 = vpop.permute.xlu0 %2767 }
 0x22a   : > { %3242 = vst [vmem:[%s4244_s8 + $0x28] sm:$0xff] %v3178_v23  ;;  %v3051_v3 = vmul.f32 %v2758_v48, %v2236_v34  ;;  %v1950_v24 = vadd.f32 %v1949_v20, %v4005_v35  ;;  %v2238_v4 = vpop.f32.mrf.mxu1  ;;  %v472_v34 = vld [vmem:[%s3710_s7 + $0x3f8] sm:$0xff]  ;;  %v3117_v48 = vld [vmem:[%s4234_s30 + $0x40] sm:$0xff]  ;;  %v709_v20 = vunpack.c.h.s8.bf16 %v461_v42 }
 0x22b   : > { %v1951_v54 = vpop.f32.mrf.mxu0 }
 0x22c   : > { %v3179_v36 = vadd.f32 %v3115_v41, %v3051_v3  ;;  %v2239_v40 = vadd.f32 %v2238_v4, %v1950_v24  ;;  %v2240_v62 = vpop.f32.mrf.mxu1  ;;  %v711_v24 = vunpack.c.h.s8.bf16 %v463_v21  ;;  %v718_v4 = vunpack.c.l.s8.bf16 %v470_v49  ;;  %v469_v21 = vld [vmem:[%s3710_s7 + $0x3e0] sm:$0xff] }
 0x22d   : > { %v1954_v59 = vpop.f32.mrf.mxu0  ;;  %2145 = vmatmul.mubr.bf16.gmra.mxu0 %v701_v31  ;;  %v3118_v62 = vld [vmem:[%s4234_s30 + $0x48] sm:$0xff] }
 0x22e   : > { %3243 = vst [vmem:[%s4244_s8 + $0x30] sm:$0xff] %v3179_v36  ;;  %v3052_v2 = vmul.f32 %v2763_v8, %v2239_v40  ;;  %v1955_v35 = vadd.f32 %v1954_v59, %v4009_v44  ;;  %v2243_v15 = vpop.f32.mrf.mxu1  ;;  %2434 = vmatmul.mubr.bf16.gmra.mxu1 %v703_v22  ;;  %2152 = vmatprep.mubr.bf16.mxu0 %v710_v9  ;;  %v720_v9 = vunpack.c.l.s8.bf16 %v472_v34  ;;  %v2773_v40 = vpop.permute.xlu1 %2772 }
 0x22f   : > { %v1956_v10 = vpop.f32.mrf.mxu0  ;;  %2441 = vmatprep.mubr.bf16.mxu1 %v712_v47 }
 0x230   : > { %v3180_v50 = vadd.f32 %v3116_v25, %v3052_v2  ;;  %v2244_v61 = vadd.f32 %v2243_v15, %v1955_v35  ;;  %v2245_v23 = vpop.f32.mrf.mxu1  ;;  %v471_v2 = vld [vmem:[%s3710_s7 + $0x3f0] sm:$0xff] }
 0x231   : > { %v1957_v41 = vpop.f32.mrf.mxu0 }
 0x232   : > { %3244 = vst [vmem:[%s4244_s8 + $0x38] sm:$0xff] %v3180_v50  ;;  %v3053_v31 = vmul.f32 %v2768_v1, %v2244_v61  ;;  %v1958_v44 = vadd.f32 %v1957_v41, %v4015_v57  ;;  %v2246_v3 = vpop.f32.mrf.mxu1  ;;  %v2778_v50 = vpop.permute.xlu0 %2777  ;;  %v3119_v61 = vld [vmem:[%s4234_s30 + $0x50] sm:$0xff]  ;;  %v717_v1 = vunpack.c.l.s8.bf16 %v469_v21 }
 0x233   : > { %v1959_v22 = vpop.f32.mrf.mxu0 }
 0x234   : > { %v3181_v54 = vadd.f32 %v3117_v48, %v3053_v31  ;;  %v2247_v47 = vadd.f32 %v2246_v3, %v1958_v44  ;;  %v2248_v36 = vpop.f32.mrf.mxu1  ;;  %v726_v31 = vunpack.c.h.s8.bf16 %v470_v49  ;;  %v728_v3 = vunpack.c.h.s8.bf16 %v472_v34 }
 0x235   : > { %v1962_v8 = vpop.f32.mrf.mxu0  ;;  %2153 = vmatmul.mubr.bf16.gmra.mxu0 %v709_v20  ;;  %v719_v20 = vunpack.c.l.s8.bf16 %v471_v2 }
 0x236   : > { %3245 = vst [vmem:[%s4244_s8 + $0x40] sm:$0xff] %v3181_v54  ;;  %v3054_v42 = vmul.f32 %v2773_v40, %v2247_v47  ;;  %v1963_v57 = vadd.f32 %v1962_v8, %v4020_v5  ;;  %v2251_v25 = vpop.f32.mrf.mxu1  ;;  %2442 = vmatmul.mubr.bf16.gmra.mxu1 %v711_v24  ;;  %2160 = vmatprep.mubr.bf16.mxu0 %v718_v4  ;;  %v3120_v54 = vld [vmem:[%s4234_s30 + $0x58] sm:$0xff] }
 0x237   : > { %v1964_v59 = vpop.f32.mrf.mxu0  ;;  %2449 = vmatprep.mubr.bf16.mxu1 %v720_v9  ;;  %v2783_v9 = vpop.permute.xlu1 %2782 }
 0x238   : > { %v3182_v35 = vadd.f32 %v3118_v62, %v3054_v42  ;;  %v2252_v15 = vadd.f32 %v2251_v25, %v1963_v57  ;;  %v2253_v10 = vpop.f32.mrf.mxu1  ;;  %v2788_v42 = vpop.permute.xlu0 %2787  ;;  %v3121_v57 = vld [vmem:[%s4234_s30 + $0x60] sm:$0xff]  ;;  %v725_v59 = vunpack.c.h.s8.bf16 %v469_v21 }
 0x239   : > { %v1965_v23 = vpop.f32.mrf.mxu0 }
 0x23a   : > { %3246 = vst [vmem:[%s4244_s8 + $0x48] sm:$0xff] %v3182_v35  ;;  %v3055_v48 = vmul.f32 %v2778_v50, %v2252_v15  ;;  %v1966_v5 = vadd.f32 %v1965_v23, %v4025_v17  ;;  %v2254_v41 = vpop.f32.mrf.mxu1 }
 0x23b   : > { %v1967_v44 = vpop.f32.mrf.mxu0 }
 0x23c   : > { %v3183_v24 = vadd.f32 %v3119_v61, %v3055_v48  ;;  %v2255_v4 = vadd.f32 %v2254_v41, %v1966_v5  ;;  %v2256_v22 = vpop.f32.mrf.mxu1  ;;  %v2793_v48 = vpop.permute.xlu1 %2792  ;;  %v3122_v5 = vld [vmem:[%s4234_s30 + $0x68] sm:$0xff] }
 0x23d   : > { %v1970_v47 = vpop.f32.mrf.mxu0  ;;  %2161 = vmatmul.mubr.bf16.gmra.mxu0 %v717_v1 }
 0x23e   : > { %3247 = vst [vmem:[%s4244_s8 + $0x50] sm:$0xff] %v3183_v24  ;;  %v3056_v36 = vmul.f32 %v2783_v9, %v2255_v4  ;;  %v1971_v40 = vadd.f32 %v1970_v47, %v4029_v26  ;;  %v2259_v62 = vpop.f32.mrf.mxu1  ;;  %2450 = vmatmul.mubr.bf16.gmra.mxu1 %v719_v20  ;;  %2168 = vmatprep.mubr.bf16.mxu0 %v726_v31  ;;  %v727_v26 = vunpack.c.h.s8.bf16 %v471_v2  ;;  %v2798_v24 = vpop.permute.xlu0 %2797  ;;  %v3123_v4 = vld [vmem:[%s4234_s30 + $0x70] sm:$0xff] }
 0x23f   : > { %v1972_v17 = vpop.f32.mrf.mxu0  ;;  %2457 = vmatprep.mubr.bf16.mxu1 %v728_v3 }
 0x240   : > { %v3184_v49 = vadd.f32 %v3120_v54, %v3056_v36  ;;  %v2260_v34 = vadd.f32 %v2259_v62, %v1971_v40  ;;  %v2261_v8 = vpop.f32.mrf.mxu1  ;;  %v2803_v17 = vpop.permute.xlu1 %2802 }
 0x241   : > { %v1973_v25 = vpop.f32.mrf.mxu0 }
 0x242   : > { %3248 = vst [vmem:[%s4244_s8 + $0x58] sm:$0xff] %v3184_v49  ;;  %v3057_v35 = vmul.f32 %v2788_v42, %v2260_v34  ;;  %v1974_v15 = vadd.f32 %v1973_v25, %v4035_v39  ;;  %v2262_v10 = vpop.f32.mrf.mxu1  ;;  %v3124_v49 = vld [vmem:[%s4234_s30 + $0x78] sm:$0xff] }
 0x243   : > { %v1975_v50 = vpop.f32.mrf.mxu0 }
 0x244   : > { %v3185_v61 = vadd.f32 %v3121_v57, %v3057_v35  ;;  %v2263_v23 = vadd.f32 %v2262_v10, %v1974_v15  ;;  %v2264_v1 = vpop.f32.mrf.mxu1  ;;  %v2808_v15 = vpop.permute.xlu0 %2807  ;;  %v3125_v10 = vld [vmem:[%s4234_s30 + $0x80] sm:$0xff] }
 0x245   : > { %v1978_v41 = vpop.f32.mrf.mxu0  ;;  %2169 = vmatmul.mubr.bf16.gmra.mxu0 %v725_v59 }
 0x246   : > { %3249 = vst [vmem:[%s4244_s8 + $0x60] sm:$0xff] %v3185_v61  ;;  %v3058_v20 = vmul.f32 %v2793_v48, %v2263_v23  ;;  %v1979_v21 = vadd.f32 %v1978_v41, %v4040_v51  ;;  %v2267_v31 = vpop.f32.mrf.mxu1  ;;  %2458 = vmatmul.mubr.bf16.gmra.mxu1 %v727_v26  ;;  %v2813_v41 = vpop.permute.xlu1 %2812 }
 0x247   : > { %v1980_v44 = vpop.f32.mrf.mxu0 }
 0x248   : > { %v3186_v39 = vadd.f32 %v3122_v5, %v3058_v20  ;;  %v2268_v2 = vadd.f32 %v2267_v31, %v1979_v21  ;;  %v2269_v3 = vpop.f32.mrf.mxu1  ;;  %v3126_v20 = vld [vmem:[%s4234_s30 + $0x88] sm:$0xff] }
 0x249   : > { %v1981_v22 = vpop.f32.mrf.mxu0 }
 0x24a   : > { %3250 = vst [vmem:[%s4244_s8 + $0x68] sm:$0xff] %v3186_v39  ;;  %v3059_v9 = vmul.f32 %v2798_v24, %v2268_v2  ;;  %v1982_v54 = vadd.f32 %v1981_v22, %v4045_v0  ;;  %v2270_v47 = vpop.f32.mrf.mxu1  ;;  %v3127_v22 = vld [vmem:[%s4234_s30 + $0x90] sm:$0xff] }
 0x24b   : > { %v1983_v36 = vpop.f32.mrf.mxu0 }
 0x24c   : > { %v3187_v40 = vadd.f32 %v3123_v4, %v3059_v9  ;;  %v2271_v51 = vadd.f32 %v2270_v47, %v1982_v54  ;;  %v2272_v62 = vpop.f32.mrf.mxu1  ;;  %v2818_v4 = vpop.permute.xlu0 %2817 }
 0x24d   : > { %v1986_v34 = vpop.f32.mrf.mxu0 }
 0x24e   : > { %3251 = vst [vmem:[%s4244_s8 + $0x70] sm:$0xff] %v3187_v40  ;;  %v3060_v8 = vmul.f32 %v2803_v17, %v2271_v51  ;;  %v1987_v42 = vadd.f32 %v1986_v34, %v4049_v11  ;;  %v2275_v57 = vpop.f32.mrf.mxu1  ;;  %v2823_v17 = vpop.permute.xlu1 %2822 }
 0x24f   : > { %v1988_v25 = vpop.f32.mrf.mxu0 }
 0x250   : > { %v3188_v59 = vadd.f32 %v3124_v49, %v3060_v8  ;;  %v2276_v35 = vadd.f32 %v2275_v57, %v1987_v42  ;;  %v2277_v0 = vpop.f32.mrf.mxu1  ;;  %v3128_v49 = vld [vmem:[%s4234_s30 + $0x98] sm:$0xff] }
 0x251   : > { %v1989_v26 = vpop.f32.mrf.mxu0  ;;  %v2828_v0 = vpop.permute.xlu0 %2827 }
 0x252   : > { %3252 = vst [vmem:[%s4244_s8 + $0x78] sm:$0xff] %v3188_v59  ;;  %v3061_v50 = vmul.f32 %v2808_v15, %v2276_v35  ;;  %v1990_v61 = vadd.f32 %v1989_v26, %v4055_v27  ;;  %v2278_v23 = vpop.f32.mrf.mxu1  ;;  %v3129_v15 = vld [vmem:[%s4234_s30 + $0xa0] sm:$0xff] }
 0x253   : > { %v1991_v1 = vpop.f32.mrf.mxu0 }
 0x254   : > { %v3189_v48 = vadd.f32 %v3125_v10, %v3061_v50  ;;  %v2279_v5 = vadd.f32 %v2278_v23, %v1990_v61  ;;  %v2280_v11 = vpop.f32.mrf.mxu1 }
 0x255   : > { %v1994_v21 = vpop.f32.mrf.mxu0  ;;  %v3130_v11 = vld [vmem:[%s4234_s30 + $0xa8] sm:$0xff] }
 0x256   : > { %3253 = vst [vmem:[%s4244_s8 + $0x80] sm:$0xff] %v3189_v48  ;;  %v3062_v31 = vmul.f32 %v2813_v41, %v2279_v5  ;;  %v1995_v44 = vadd.f32 %v1994_v21, %v4060_v37  ;;  %v2283_v39 = vpop.f32.mrf.mxu1  ;;  %v2833_v5 = vpop.permute.xlu1 %2832 }
 0x257   : > { %v1996_v2 = vpop.f32.mrf.mxu0 }
 0x258   : > { %v3190_v3 = vadd.f32 %v3126_v20, %v3062_v31  ;;  %v2284_v24 = vadd.f32 %v2283_v39, %v1995_v44  ;;  %v2285_v27 = vpop.f32.mrf.mxu1 }
 0x259   : > { %v1997_v9 = vpop.f32.mrf.mxu0 }
 0x25a   : > { %3254 = vst [vmem:[%s4244_s8 + $0x88] sm:$0xff] %v3190_v3  ;;  %v3063_v54 = vmul.f32 %v2818_v4, %v2284_v24  ;;  %v1998_v47 = vadd.f32 %v1997_v9, %v4065_v53  ;;  %v2286_v36 = vpop.f32.mrf.mxu1  ;;  %v2838_v3 = vpop.permute.xlu0 %2837  ;;  %v3131_v24 = vld [vmem:[%s4234_s30 + $0xb0] sm:$0xff] }
 0x25b   : > { %v1999_v40 = vpop.f32.mrf.mxu0 }
 0x25c   : > { %v3191_v51 = vadd.f32 %v3127_v22, %v3063_v54  ;;  %v2287_v62 = vadd.f32 %v2286_v36, %v1998_v47  ;;  %v2288_v37 = vpop.f32.mrf.mxu1  ;;  %v2843_v40 = vpop.permute.xlu1 %2842 }
 0x25d   : > { %v2002_v34 = vpop.f32.mrf.mxu0 }
 0x25e   : > { %3255 = vst [vmem:[%s4244_s8 + $0x90] sm:$0xff] %v3191_v51  ;;  %v3064_v8 = vmul.f32 %v2823_v17, %v2287_v62  ;;  %v2003_v42 = vadd.f32 %v2002_v34, %v4069_v63  ;;  %v2291_v57 = vpop.f32.mrf.mxu1  ;;  %v3132_v51 = vld [vmem:[%s4234_s30 + $0xb8] sm:$0xff] }
 0x25f   : > { %v2004_v25 = vpop.f32.mrf.mxu0 }
 0x260   : > { %v3192_v59 = vadd.f32 %v3128_v49, %v3064_v8  ;;  %v2292_v35 = vadd.f32 %v2291_v57, %v2003_v42  ;;  %v2293_v53 = vpop.f32.mrf.mxu1  ;;  %v2848_v57 = vpop.permute.xlu0 %2847  ;;  %v3133_v25 = vld [vmem:[%s4234_s30 + $0xc0] sm:$0xff] }
 0x261   : > { %v2005_v10 = vpop.f32.mrf.mxu0 }
 0x262   : > { %3256 = vst [vmem:[%s4244_s8 + $0x98] sm:$0xff] %v3192_v59  ;;  %v3065_v26 = vmul.f32 %v2828_v0, %v2292_v35  ;;  %v2006_v50 = vadd.f32 %v2005_v10, %v4075_v18  ;;  %v2294_v61 = vpop.f32.mrf.mxu1 }
 0x263   : > { %v2007_v23 = vpop.f32.mrf.mxu0 }
 0x264   : > { %v3193_v1 = vadd.f32 %v3129_v15, %v3065_v26  ;;  %v2295_v48 = vadd.f32 %v2294_v61, %v2006_v50  ;;  %v2296_v63 = vpop.f32.mrf.mxu1  ;;  %v2853_v50 = vpop.permute.xlu1 %2852  ;;  %v3134_v61 = vld [vmem:[%s4234_s30 + $0xc8] sm:$0xff] }
 0x265   : > { %v2010_v41 = vpop.f32.mrf.mxu0 }
 0x266   : > { %3257 = vst [vmem:[%s4244_s8 + $0xa0] sm:$0xff] %v3193_v1  ;;  %v3066_v20 = vmul.f32 %v2833_v5, %v2295_v48  ;;  %v2011_v21 = vadd.f32 %v2010_v41, %v4080_v30  ;;  %v2299_v31 = vpop.f32.mrf.mxu1 }
 0x267   : > { %v2012_v44 = vpop.f32.mrf.mxu0 }
 0x268   : > { %v3194_v39 = vadd.f32 %v3130_v11, %v3066_v20  ;;  %v2300_v2 = vadd.f32 %v2299_v31, %v2011_v21  ;;  %v2301_v18 = vpop.f32.mrf.mxu1  ;;  %v2858_v20 = vpop.permute.xlu0 %2857  ;;  %v3135_v21 = vld [vmem:[%s4234_s30 + $0xd0] sm:$0xff] }
 0x269   : > { %v2013_v27 = vpop.f32.mrf.mxu0 }
 0x26a   : > { %3258 = vst [vmem:[%s4244_s8 + $0xa8] sm:$0xff] %v3194_v39  ;;  %v3067_v4 = vmul.f32 %v2838_v3, %v2300_v2  ;;  %v2014_v22 = vadd.f32 %v2013_v27, %v4085_v46  ;;  %v2302_v9 = vpop.f32.mrf.mxu1  ;;  %v2863_v27 = vpop.permute.xlu1 %2862 }
 0x26b   : > { %v2015_v54 = vpop.f32.mrf.mxu0 }
 0x26c   : > { %v3195_v47 = vadd.f32 %v3131_v24, %v3067_v4  ;;  %v2303_v36 = vadd.f32 %v2302_v9, %v2014_v22  ;;  %v2304_v30 = vpop.f32.mrf.mxu1  ;;  %v3136_v4 = vld [vmem:[%s4234_s30 + $0xd8] sm:$0xff] }
 0x26d   : > { %v2018_v62 = vpop.f32.mrf.mxu0 }
 0x26e   : > { %3259 = vst [vmem:[%s4244_s8 + $0xb0] sm:$0xff] %v3195_v47  ;;  %v3068_v37 = vmul.f32 %v2843_v40, %v2303_v36  ;;  %v2019_v17 = vadd.f32 %v2018_v62, %v4089_v58  ;;  %v2307_v49 = vpop.f32.mrf.mxu1  ;;  %v3137_v62 = vld [vmem:[%s4234_s30 + $0xe0] sm:$0xff] }
 0x26f   : > { %v2020_v34 = vpop.f32.mrf.mxu0 }
 0x270   : > { %v3196_v8 = vadd.f32 %v3132_v51, %v3068_v37  ;;  %v2308_v42 = vadd.f32 %v2307_v49, %v2019_v17  ;;  %v2309_v46 = vpop.f32.mrf.mxu1  ;;  %v2868_v51 = vpop.permute.xlu0 %2867 }
 0x271   : > { %v2021_v59 = vpop.f32.mrf.mxu0 }
 0x272   : > { %3260 = vst [vmem:[%s4244_s8 + $0xb8] sm:$0xff] %v3196_v8  ;;  %v3069_v35 = vmul.f32 %v2848_v57, %v2308_v42  ;;  %v2022_v53 = vadd.f32 %v2021_v59, %v4095_v13  ;;  %v2310_v0 = vpop.f32.mrf.mxu1  ;;  %v2873_v57 = vpop.permute.xlu1 %2872 }
 0x273   : > { %v2023_v15 = vpop.f32.mrf.mxu0 }
 0x274   : > { %v3197_v10 = vadd.f32 %v3133_v25, %v3069_v35  ;;  %v2311_v26 = vadd.f32 %v2310_v0, %v2022_v53  ;;  %v2312_v58 = vpop.f32.mrf.mxu1  ;;  %v3138_v25 = vld [vmem:[%s4234_s30 + $0xe8] sm:$0xff] }
 0x275   : > { %v2026_v23 = vpop.f32.mrf.mxu0  ;;  %v2878_v58 = vpop.permute.xlu0 %2877 }
 0x276   : > { %3261 = vst [vmem:[%s4244_s8 + $0xc0] sm:$0xff] %v3197_v10  ;;  %v3070_v1 = vmul.f32 %v2853_v50, %v2311_v26  ;;  %v2027_v48 = vadd.f32 %v2026_v23, %v4100_v28  ;;  %v2315_v63 = vpop.f32.mrf.mxu1  ;;  %v3139_v50 = vld [vmem:[%s4234_s30 + $0xf0] sm:$0xff] }
 0x277   : > { %v2028_v5 = vpop.f32.mrf.mxu0 }
 0x278   : > { %v3198_v11 = vadd.f32 %v3134_v61, %v3070_v1  ;;  %v2316_v41 = vadd.f32 %v2315_v63, %v2027_v48  ;;  %v2317_v13 = vpop.f32.mrf.mxu1 }
 0x279   : > { %v2029_v31 = vpop.f32.mrf.mxu0  ;;  %v3140_v13 = vld [vmem:[%s4234_s30 + $0xf8] sm:$0xff] }
 0x27a   : > { %3262 = vst [vmem:[%s4244_s8 + $0xc8] sm:$0xff] %v3198_v11  ;;  %v3071_v44 = vmul.f32 %v2858_v20, %v2316_v41  ;;  %v2030_v39 = vadd.f32 %v2029_v31, %v4105_v45  ;;  %v2318_v2 = vpop.f32.mrf.mxu1  ;;  %v2883_v41 = vpop.permute.xlu1 %2882 }
 0x27b   : > { %v2031_v18 = vpop.f32.mrf.mxu0 }
 0x27c   : > { %v3199_v3 = vadd.f32 %v3135_v21, %v3071_v44  ;;  %v2319_v24 = vadd.f32 %v2318_v2, %v2030_v39  ;;  %v2320_v28 = vpop.f32.mrf.mxu1 }
 0x27d   : > { %v2034_v22 = vpop.f32.mrf.mxu0 }
 0x27e   : > { %3263 = vst [vmem:[%s4244_s8 + $0xd0] sm:$0xff] %v3199_v3  ;;  %v3072_v9 = vmul.f32 %v2863_v27, %v2319_v24  ;;  %v2035_v54 = vadd.f32 %v2034_v22, %v4109_v60  ;;  %v2323_v47 = vpop.f32.mrf.mxu1  ;;  %v2888_v3 = vpop.permute.xlu0 %2887  ;;  %v3141_v24 = vld [vmem:[%s4234_s30 + $0x100] sm:$0xff] }
 0x27f   : > { %v2036_v36 = vpop.f32.mrf.mxu0 }
 0x280   : > { %v3200_v30 = vadd.f32 %v3136_v4, %v3072_v9  ;;  %v2324_v40 = vadd.f32 %v2323_v47, %v2035_v54  ;;  %v2325_v45 = vpop.f32.mrf.mxu1  ;;  %v2893_v36 = vpop.permute.xlu1 %2892 }
 0x281   : > { %v2037_v37 = vpop.f32.mrf.mxu0 }
 0x282   : > { %3264 = vst [vmem:[%s4244_s8 + $0xd8] sm:$0xff] %v3200_v30  ;;  %v3073_v17 = vmul.f32 %v2868_v51, %v2324_v40  ;;  %v2038_v49 = vadd.f32 %v2037_v37, %v4115_v16  ;;  %v2326_v34 = vpop.f32.mrf.mxu1  ;;  %v3142_v30 = vld [vmem:[%s4234_s30 + $0x108] sm:$0xff] }
 0x283   : > { %v2039_v8 = vpop.f32.mrf.mxu0 }
 0x284   : > { %v3201_v42 = vadd.f32 %v3137_v62, %v3073_v17  ;;  %v2327_v46 = vadd.f32 %v2326_v34, %v2038_v49  ;;  %v2328_v60 = vpop.f32.mrf.mxu1  ;;  %v2898_v34 = vpop.permute.xlu0 %2897  ;;  %v3143_v8 = vld [vmem:[%s4234_s30 + $0x110] sm:$0xff] }
 0x285   : > { %v2042_v59 = vpop.f32.mrf.mxu0 }
 0x286   : > { %3265 = vst [vmem:[%s4244_s8 + $0xe0] sm:$0xff] %v3201_v42  ;;  %v3074_v35 = vmul.f32 %v2873_v57, %v2327_v46  ;;  %v2043_v53 = vadd.f32 %v2042_v59, %v4120_v32  ;;  %v2331_v0 = vpop.f32.mrf.mxu1 }
 0x287   : > { %v2044_v15 = vpop.f32.mrf.mxu0 }
 0x288   : > { %v3202_v10 = vadd.f32 %v3138_v25, %v3074_v35  ;;  %v2332_v26 = vadd.f32 %v2331_v0, %v2043_v53  ;;  %v2333_v16 = vpop.f32.mrf.mxu1  ;;  %v2903_v53 = vpop.permute.xlu1 %2902  ;;  %v3144_v0 = vld [vmem:[%s4234_s30 + $0x118] sm:$0xff] }
 0x289   : > { %v2045_v61 = vpop.f32.mrf.mxu0 }
 0x28a   : > { %3266 = vst [vmem:[%s4244_s8 + $0xe8] sm:$0xff] %v3202_v10  ;;  %v3075_v23 = vmul.f32 %v2878_v58, %v2332_v26  ;;  %v2046_v1 = vadd.f32 %v2045_v61, %v4125_v52  ;;  %v2334_v48 = vpop.f32.mrf.mxu1 }
 0x28b   : > { %v2047_v63 = vpop.f32.mrf.mxu0 }
 0x28c   : > { %v3203_v5 = vadd.f32 %v3139_v50, %v3075_v23  ;;  %v2335_v11 = vadd.f32 %v2334_v48, %v2046_v1  ;;  %v2336_v32 = vpop.f32.mrf.mxu1  ;;  %v2908_v23 = vpop.permute.xlu0 %2907  ;;  %v3145_v1 = vld [vmem:[%s4234_s30 + $0x120] sm:$0xff] }
 0x28d   : > { %v2050_v20 = vpop.f32.mrf.mxu0 }
 0x28e   : > { %3267 = vst [vmem:[%s4244_s8 + $0xf0] sm:$0xff] %v3203_v5  ;;  %v3076_v21 = vmul.f32 %v2883_v41, %v2335_v11  ;;  %v2051_v31 = vadd.f32 %v2050_v20, %v4129_v7  ;;  %v2339_v44 = vpop.f32.mrf.mxu1  ;;  %v2913_v20 = vpop.permute.xlu1 %2912 }
 0x28f   : > { %v2052_v39 = vpop.f32.mrf.mxu0 }
 0x290   : > { %v3204_v2 = vadd.f32 %v3140_v13, %v3076_v21  ;;  %v2340_v18 = vadd.f32 %v2339_v44, %v2051_v31  ;;  %v2341_v52 = vpop.f32.mrf.mxu1  ;;  %v3146_v21 = vld [vmem:[%s4234_s30 + $0x128] sm:$0xff] }
 0x291   : > { %v2053_v28 = vpop.f32.mrf.mxu0 }
 0x292   : > { %3268 = vst [vmem:[%s4244_s8 + $0xf8] sm:$0xff] %v3204_v2  ;;  %v3077_v27 = vmul.f32 %v2888_v3, %v2340_v18  ;;  %v2054_v4 = vadd.f32 %v2053_v28, %v4135_v29  ;;  %v2342_v22 = vpop.f32.mrf.mxu1  ;;  %v3147_v28 = vld [vmem:[%s4234_s30 + $0x130] sm:$0xff] }
 0x293   : > { %v2055_v9 = vpop.f32.mrf.mxu0 }
 0x294   : > { %v3205_v54 = vadd.f32 %v3141_v24, %v3077_v27  ;;  %v2343_v47 = vadd.f32 %v2342_v22, %v2054_v4  ;;  %v2344_v7 = vpop.f32.mrf.mxu1  ;;  %v2918_v24 = vpop.permute.xlu0 %2917 }
 0x295   : > { %v2058_v40 = vpop.f32.mrf.mxu0 }
 0x296   : > { %3269 = vst [vmem:[%s4244_s8 + $0x100] sm:$0xff] %v3205_v54  ;;  %v3078_v45 = vmul.f32 %v2893_v36, %v2343_v47  ;;  %v2059_v51 = vadd.f32 %v2058_v40, %v4140_v43  ;;  %v2347_v62 = vpop.f32.mrf.mxu1  ;;  %v2923_v36 = vpop.permute.xlu1 %2922 }
 0x297   : > { %v2060_v37 = vpop.f32.mrf.mxu0 }
 0x298   : > { %v3206_v17 = vadd.f32 %v3142_v30, %v3078_v45  ;;  %v2348_v49 = vadd.f32 %v2347_v62, %v2059_v51  ;;  %v2349_v29 = vpop.f32.mrf.mxu1  ;;  %v3148_v30 = vld [vmem:[%s4234_s30 + $0x138] sm:$0xff] }
 0x299   : > { %v2061_v42 = vpop.f32.mrf.mxu0  ;;  %v2928_v29 = vpop.permute.xlu0 %2927 }
 0x29a   : > { %3270 = vst [vmem:[%s4244_s8 + $0x108] sm:$0xff] %v3206_v17  ;;  %v3079_v46 = vmul.f32 %v2898_v34, %v2348_v49  ;;  %v2062_v60 = vadd.f32 %v2061_v42, %v4143_v6  ;;  %v2350_v57 = vpop.f32.mrf.mxu1  ;;  %v3149_v34 = vld [vmem:[%s4234_s30 + $0x140] sm:$0xff] }
 0x29b   : > { %v2063_v25 = vpop.f32.mrf.mxu0 }
 0x29c   : > { %v3207_v59 = vadd.f32 %v3143_v8, %v3079_v46  ;;  %v2351_v35 = vadd.f32 %v2350_v57, %v2062_v60  ;;  %v2352_v43 = vpop.f32.mrf.mxu1 }
 0x29d   : > { %v2066_v15 = vpop.f32.mrf.mxu0  ;;  %v3150_v43 = vld [vmem:[%s4234_s30 + $0x148] sm:$0xff] }
 0x29e   : > { %3271 = vst [vmem:[%s4244_s8 + $0x110] sm:$0xff] %v3207_v59  ;;  %v3080_v10 = vmul.f32 %v2903_v53, %v2351_v35  ;;  %v2067_v26 = vadd.f32 %v2066_v15, %v4145_v19  ;;  %v2355_v16 = vpop.f32.mrf.mxu1  ;;  %v2933_v35 = vpop.permute.xlu1 %2932 }
 0x29f   : > { %v2068_v58 = vpop.f32.mrf.mxu0 }
 0x2a0   : > { %v3208_v50 = vadd.f32 %v3144_v0, %v3080_v10  ;;  %v2356_v61 = vadd.f32 %v2355_v16, %v2067_v26  ;;  %v2357_v6 = vpop.f32.mrf.mxu1 }
 0x2a1   : > { %v2069_v48 = vpop.f32.mrf.mxu0 }
 0x2a2   : > { %3272 = vst [vmem:[%s4244_s8 + $0x118] sm:$0xff] %v3208_v50  ;;  %v3081_v63 = vmul.f32 %v2908_v23, %v2356_v61  ;;  %v2070_v5 = vadd.f32 %v2069_v48, %v4149_v38  ;;  %v2358_v11 = vpop.f32.mrf.mxu1  ;;  %v2938_v50 = vpop.permute.xlu0 %2937  ;;  %v3151_v61 = vld [vmem:[%s4234_s30 + $0x150] sm:$0xff] }
 0x2a3   : > { %v2071_v32 = vpop.f32.mrf.mxu0 }
 0x2a4   : > { %v3209_v41 = vadd.f32 %v3145_v1, %v3081_v63  ;;  %v2359_v13 = vadd.f32 %v2358_v11, %v2070_v5  ;;  %v2360_v19 = vpop.f32.mrf.mxu1  ;;  %v4480_v1 = vld [vmem:[#allocation3_spill] sm:$0xff] }
 0x2a5   : > { %v2074_v31 = vpop.f32.mrf.mxu0 }
 0x2a6   : > { %3273 = vst [vmem:[%s4244_s8 + $0x120] sm:$0xff] %v3209_v41  ;;  %v3082_v44 = vmul.f32 %v2913_v20, %v2359_v13  ;;  %v2075_v39 = vadd.f32 %v2074_v31, %v4152_v55  ;;  %v2363_v2 = vpop.f32.mrf.mxu1  ;;  %v2943_v41 = vpop.permute.xlu1 %2942  ;;  %v3152_v13 = vld [vmem:[%s4234_s30 + $0x158] sm:$0xff] }
 0x2a7   : > { %v2076_v18 = vpop.f32.mrf.mxu0 }
 0x2a8   : > { %v3210_v52 = vadd.f32 %v3146_v21, %v3082_v44  ;;  %v2364_v3 = vadd.f32 %v2363_v2, %v2075_v39  ;;  %v2365_v38 = vpop.f32.mrf.mxu1  ;;  %v4481_v21 = vld [vmem:[#allocation4_spill] sm:$0xff] }
 0x2a9   : > { %v2077_v27 = vpop.f32.mrf.mxu0  ;;  %v3153_v38 = vld [vmem:[%s4234_s30 + $0x160] sm:$0xff] }
 0x2aa   : > { %3274 = vst [vmem:[%s4244_s8 + $0x128] sm:$0xff] %v3210_v52  ;;  %v3083_v4 = vmul.f32 %v2918_v24, %v2364_v3  ;;  %v2078_v22 = vadd.f32 %v2077_v27, %v4155_v12  ;;  %v2366_v9 = vpop.f32.mrf.mxu1  ;;  %v2948_v3 = vpop.permute.xlu0 %2947  ;;  %v4482_v27 = vld [vmem:[#allocation5_spill] sm:$0xff] }
 0x2ab   : > { %v2079_v54 = vpop.f32.mrf.mxu0 }
 0x2ac   : > { %v3211_v47 = vadd.f32 %v3147_v28, %v3083_v4  ;;  %v2367_v7 = vadd.f32 %v2366_v9, %v2078_v22  ;;  %v2368_v55 = vpop.f32.mrf.mxu1 }
 0x2ad   : > { %v2082_v40 = vpop.f32.mrf.mxu0  ;;  %v2953_v55 = vpop.permute.xlu1 %2952 }
 0x2ae   : > { %3275 = vst [vmem:[%s4244_s8 + $0x130] sm:$0xff] %v3211_v47  ;;  %v3084_v45 = vmul.f32 %v2923_v36, %v2367_v7  ;;  %v2083_v51 = vadd.f32 %v2082_v40, %v4157_v33  ;;  %v2371_v62 = vpop.f32.mrf.mxu1  ;;  %v3154_v36 = vld [vmem:[%s4234_s30 + $0x168] sm:$0xff] }
 0x2af   : > { %v2084_v37 = vpop.f32.mrf.mxu0 }
 0x2b0   : > { %v3212_v17 = vadd.f32 %v3148_v30, %v3084_v45  ;;  %v2372_v49 = vadd.f32 %v2371_v62, %v2083_v51  ;;  %v2373_v12 = vpop.f32.mrf.mxu1  ;;  %v4483_v45 = vld [vmem:[#allocation6_spill] sm:$0xff] }
 0x2b1   : > { %v2085_v8 = vpop.f32.mrf.mxu0 }
 0x2b2   : > { %3276 = vst [vmem:[%s4244_s8 + $0x138] sm:$0xff] %v3212_v17  ;;  %v3085_v42 = vmul.f32 %v2928_v29, %v2372_v49  ;;  %v2086_v46 = vadd.f32 %v2085_v8, %v4161_v56  ;;  %v2374_v60 = vpop.f32.mrf.mxu1  ;;  %v2958_v29 = vpop.permute.xlu0 %2957 }
 0x2b3   : > { %v2087_v57 = vpop.f32.mrf.mxu0 }
 0x2b4   : > { %v3213_v25 = vadd.f32 %v3149_v34, %v3085_v42  ;;  %v2375_v59 = vadd.f32 %v2374_v60, %v2086_v46  ;;  %v2376_v33 = vpop.f32.mrf.mxu1  ;;  %v3155_v34 = vld [vmem:[%s4234_s30 + $0x170] sm:$0xff]  ;;  %v4484_v46 = vld [vmem:[#allocation7_spill] sm:$0xff] }
 0x2b5   : > { %v2090_v53 = vpop.f32.mrf.mxu0 }
 0x2b6   : > { %3277 = vst [vmem:[%s4244_s8 + $0x140] sm:$0xff] %v3213_v25  ;;  %v3086_v0 = vmul.f32 %v2933_v35, %v2375_v59  ;;  %v2091_v15 = vadd.f32 %v2090_v53, %v4164_v14  ;;  %v2379_v10 = vpop.f32.mrf.mxu1  ;;  %v3156_v53 = vld [vmem:[%s4234_s30 + $0x178] sm:$0xff] }
 0x2b7   : > { %v2092_v26 = vpop.f32.mrf.mxu0 }
 0x2b8   : > { %v3214_v16 = vadd.f32 %v3150_v43, %v3086_v0  ;;  %v2380_v58 = vadd.f32 %v2379_v10, %v2091_v15  ;;  %v2381_v56 = vpop.f32.mrf.mxu1  ;;  %v2963_v43 = vpop.permute.xlu1 %2962  ;;  %v4485_v10 = vld [vmem:[#allocation8_spill] sm:$0xff] }
 0x2b9   : > { %v2093_v6 = vpop.f32.mrf.mxu0 }
 0x2ba   : > { %3278 = vst [vmem:[%s4244_s8 + $0x148] sm:$0xff] %v3214_v16  ;;  %v3087_v23 = vmul.f32 %v2938_v50, %v2380_v58  ;;  %v2094_v48 = vadd.f32 %v2093_v6, %v4480_v1  ;;  %v2382_v63 = vpop.f32.mrf.mxu1  ;;  %v2968_v6 = vpop.permute.xlu0 %2967 }
 0x2bb   : > { %v2095_v5 = vpop.f32.mrf.mxu0 }
 0x2bc   : > { %v3215_v11 = vadd.f32 %v3151_v61, %v3087_v23  ;;  %v2383_v32 = vadd.f32 %v2382_v63, %v2094_v48  ;;  %v2384_v14 = vpop.f32.mrf.mxu1  ;;  %v3157_v23 = vld [vmem:[%s4234_s30 + $0x180] sm:$0xff]  ;;  %v4486_v63 = vld [vmem:[#allocation9_spill] sm:$0xff] }
 0x2bd   : > { %v2098_v19 = vpop.f32.mrf.mxu0 }
 0x2be   : > { %3279 = vst [vmem:[%s4244_s8 + $0x150] sm:$0xff] %v3215_v11  ;;  %v3088_v20 = vmul.f32 %v2943_v41, %v2383_v32  ;;  %v2099_v31 = vadd.f32 %v2098_v19, %v4481_v21  ;;  %v2387_v44 = vpop.f32.mrf.mxu1  ;;  %v2973_v19 = vpop.permute.xlu1 %2972 }
 0x2bf   : > { %v2100_v39 = vpop.f32.mrf.mxu0 }
 0x2c0   : > { %v3216_v2 = vadd.f32 %v3152_v13, %v3088_v20  ;;  %v2388_v18 = vadd.f32 %v2387_v44, %v2099_v31  ;;  %v2389_v52 = vpop.f32.mrf.mxu1  ;;  %v3158_v20 = vld [vmem:[%s4234_s30 + $0x188] sm:$0xff]  ;;  %v4487_v44 = vld [vmem:[#allocation10_spill] sm:$0xff] }
 0x2c1   : > { %v2101_v24 = vpop.f32.mrf.mxu0 }
 0x2c2   : > { %3280 = vst [vmem:[%s4244_s8 + $0x158] sm:$0xff] %v3216_v2  ;;  %v3089_v28 = vmul.f32 %v2948_v3, %v2388_v18  ;;  %v2102_v4 = vadd.f32 %v2101_v24, %v4482_v27  ;;  %v2390_v22 = vpop.f32.mrf.mxu1  ;;  %v2978_v24 = vpop.permute.xlu0 %2977 }
 0x2c3   : > { %v2103_v9 = vpop.f32.mrf.mxu0 }
 0x2c4   : > { %v3217_v54 = vadd.f32 %v3153_v38, %v3089_v28  ;;  %v2391_v47 = vadd.f32 %v2390_v22, %v2102_v4  ;;  %v2392_v7 = vpop.f32.mrf.mxu1  ;;  %v3159_v28 = vld [vmem:[%s4234_s30 + $0x190] sm:$0xff]  ;;  %v4488_v22 = vld [vmem:[#allocation11_spill] sm:$0xff] }
 0x2c5   : > { %v2106_v30 = vpop.f32.mrf.mxu0 }
 0x2c6   : > { %3281 = vst [vmem:[%s4244_s8 + $0x160] sm:$0xff] %v3217_v54  ;;  %v3090_v40 = vmul.f32 %v2953_v55, %v2391_v47  ;;  %v2107_v51 = vadd.f32 %v2106_v30, %v4483_v45  ;;  %v2395_v62 = vpop.f32.mrf.mxu1  ;;  %v2983_v30 = vpop.permute.xlu1 %2982 }
 0x2c7   : > { %v2108_v37 = vpop.f32.mrf.mxu0 }
 0x2c8   : > { %v3218_v17 = vadd.f32 %v3154_v36, %v3090_v40  ;;  %v2396_v49 = vadd.f32 %v2395_v62, %v2107_v51  ;;  %v2397_v12 = vpop.f32.mrf.mxu1  ;;  %v3160_v40 = vld [vmem:[%s4234_s30 + $0x198] sm:$0xff]  ;;  %v4489_v62 = vld [vmem:[#allocation12_spill] sm:$0xff] }
 0x2c9   : > { %v2109_v8 = vpop.f32.mrf.mxu0 }
 0x2ca   : > { %3282 = vst [vmem:[%s4244_s8 + $0x168] sm:$0xff] %v3218_v17  ;;  %v3091_v42 = vmul.f32 %v2958_v29, %v2396_v49  ;;  %v2110_v60 = vadd.f32 %v2109_v8, %v4484_v46  ;;  %v2398_v57 = vpop.f32.mrf.mxu1  ;;  %v2988_v8 = vpop.permute.xlu0 %2987 }
 0x2cb   : > { %v2111_v25 = vpop.f32.mrf.mxu0 }
 0x2cc   : > { %v3219_v59 = vadd.f32 %v3155_v34, %v3091_v42  ;;  %v2399_v33 = vadd.f32 %v2398_v57, %v2110_v60  ;;  %v2400_v35 = vpop.f32.mrf.mxu1  ;;  %v3161_v42 = vld [vmem:[%s4234_s30 + $0x1a0] sm:$0xff]  ;;  %v4490_v57 = vld [vmem:[#allocation13_spill] sm:$0xff] }
 0x2cd   : > { %v2114_v0 = vpop.f32.mrf.mxu0 }
 0x2ce   : > { %3283 = vst [vmem:[%s4244_s8 + $0x170] sm:$0xff] %v3219_v59  ;;  %v3092_v15 = vmul.f32 %v2963_v43, %v2399_v33  ;;  %v2115_v26 = vadd.f32 %v2114_v0, %v4485_v10  ;;  %v2403_v16 = vpop.f32.mrf.mxu1  ;;  %v2993_v0 = vpop.permute.xlu1 %2992 }
 0x2cf   : > { %v2116_v58 = vpop.f32.mrf.mxu0 }
 0x2d0   : > { %v3220_v56 = vadd.f32 %v3156_v53, %v3092_v15  ;;  %v2404_v50 = vadd.f32 %v2403_v16, %v2115_v26  ;;  %v2405_v61 = vpop.f32.mrf.mxu1  ;;  %v3162_v15 = vld [vmem:[%s4234_s30 + $0x1a8] sm:$0xff]  ;;  %v4491_v16 = vld [vmem:[#allocation14_spill] sm:$0xff] }
 0x2d1   : > { %v2117_v1 = vpop.f32.mrf.mxu0 }
 0x2d2   : > { %3284 = vst [vmem:[%s4244_s8 + $0x178] sm:$0xff] %v3220_v56  ;;  %v3093_v48 = vmul.f32 %v2968_v6, %v2404_v50  ;;  %v2118_v5 = vadd.f32 %v2117_v1, %v4486_v63  ;;  %v2406_v11 = vpop.f32.mrf.mxu1  ;;  %v2998_v1 = vpop.permute.xlu0 %2997 }
 0x2d3   : > { %v2119_v32 = vpop.f32.mrf.mxu0 }
 0x2d4   : > { %v3221_v14 = vadd.f32 %v3157_v23, %v3093_v48  ;;  %v2407_v41 = vadd.f32 %v2406_v11, %v2118_v5  ;;  %v2408_v13 = vpop.f32.mrf.mxu1  ;;  %v3163_v48 = vld [vmem:[%s4234_s30 + $0x1b0] sm:$0xff]  ;;  %v4492_v11 = vld [vmem:[#allocation15_spill] sm:$0xff] }
 0x2d5   : > { %v2122_v21 = vpop.f32.mrf.mxu0 }
 0x2d6   : > { %3285 = vst [vmem:[%s4244_s8 + $0x180] sm:$0xff] %v3221_v14  ;;  %v3094_v31 = vmul.f32 %v2973_v19, %v2407_v41  ;;  %v2123_v39 = vadd.f32 %v2122_v21, %v4487_v44  ;;  %v2411_v2 = vpop.f32.mrf.mxu1  ;;  %v3003_v21 = vpop.permute.xlu1 %3002 }
 0x2d7   : > { %v2124_v18 = vpop.f32.mrf.mxu0 }
 0x2d8   : > { %v3222_v52 = vadd.f32 %v3158_v20, %v3094_v31  ;;  %v2412_v3 = vadd.f32 %v2411_v2, %v2123_v39  ;;  %v2413_v38 = vpop.f32.mrf.mxu1  ;;  %v3164_v31 = vld [vmem:[%s4234_s30 + $0x1b8] sm:$0xff]  ;;  %v4493_v2 = vld [vmem:[#allocation16_spill] sm:$0xff] }
 0x2d9   : > { %v2125_v27 = vpop.f32.mrf.mxu0 }
 0x2da   : > { %3286 = vst [vmem:[%s4244_s8 + $0x188] sm:$0xff] %v3222_v52  ;;  %v3095_v4 = vmul.f32 %v2978_v24, %v2412_v3  ;;  %v2126_v9 = vadd.f32 %v2125_v27, %v4488_v22  ;;  %v2414_v54 = vpop.f32.mrf.mxu1  ;;  %v3008_v27 = vpop.permute.xlu0 %3007 }
 0x2db   : > { %v2127_v47 = vpop.f32.mrf.mxu0 }
 0x2dc   : > { %v3223_v7 = vadd.f32 %v3159_v28, %v3095_v4  ;;  %v2415_v55 = vadd.f32 %v2414_v54, %v2126_v9  ;;  %v2416_v36 = vpop.f32.mrf.mxu1  ;;  %v3165_v4 = vld [vmem:[%s4234_s30 + $0x1c0] sm:$0xff]  ;;  %v4494_v54 = vld [vmem:[#allocation17_spill] sm:$0xff] }
 0x2dd   : > { %v2130_v45 = vpop.f32.mrf.mxu0 }
 0x2de   : > { %3287 = vst [vmem:[%s4244_s8 + $0x190] sm:$0xff] %v3223_v7  ;;  %v3096_v51 = vmul.f32 %v2983_v30, %v2415_v55  ;;  %v2131_v37 = vadd.f32 %v2130_v45, %v4489_v62  ;;  %v2419_v17 = vpop.f32.mrf.mxu1  ;;  %v3013_v45 = vpop.permute.xlu1 %3012 }
 0x2df   : > { %v2132_v49 = vpop.f32.mrf.mxu0 }
 0x2e0   : > { %v3224_v12 = vadd.f32 %v3160_v40, %v3096_v51  ;;  %v2420_v29 = vadd.f32 %v2419_v17, %v2131_v37  ;;  %v2421_v34 = vpop.f32.mrf.mxu1  ;;  %v3166_v51 = vld [vmem:[%s4234_s30 + $0x1c8] sm:$0xff]  ;;  %v4495_v17 = vld [vmem:[#allocation18_spill] sm:$0xff] }
 0x2e1   : > { %v2133_v46 = vpop.f32.mrf.mxu0 }
 0x2e2   : > { %3288 = vst [vmem:[%s4244_s8 + $0x198] sm:$0xff] %v3224_v12  ;;  %v3097_v60 = vmul.f32 %v2988_v8, %v2420_v29  ;;  %v2134_v25 = vadd.f32 %v2133_v46, %v4490_v57  ;;  %v2422_v59 = vpop.f32.mrf.mxu1  ;;  %v3018_v46 = vpop.permute.xlu0 %3017 }
 0x2e3   : > { %v2135_v33 = vpop.f32.mrf.mxu0 }
 0x2e4   : > { %v3225_v35 = vadd.f32 %v3161_v42, %v3097_v60  ;;  %v2423_v43 = vadd.f32 %v2422_v59, %v2134_v25  ;;  %v2424_v53 = vpop.f32.mrf.mxu1  ;;  %v3167_v60 = vld [vmem:[%s4234_s30 + $0x1d0] sm:$0xff]  ;;  %v4496_v59 = vld [vmem:[#allocation19_spill] sm:$0xff] }
 0x2e5   : > { %v2138_v10 = vpop.f32.mrf.mxu0 }
 0x2e6   : > { %3289 = vst [vmem:[%s4244_s8 + $0x1a0] sm:$0xff] %v3225_v35  ;;  %v3098_v26 = vmul.f32 %v2993_v0, %v2423_v43  ;;  %v2139_v58 = vadd.f32 %v2138_v10, %v4491_v16  ;;  %v2427_v56 = vpop.f32.mrf.mxu1  ;;  %v3023_v10 = vpop.permute.xlu1 %3022 }
 0x2e7   : > { %v2140_v50 = vpop.f32.mrf.mxu0 }
 0x2e8   : > { %v3226_v61 = vadd.f32 %v3162_v15, %v3098_v26  ;;  %v2428_v6 = vadd.f32 %v2427_v56, %v2139_v58  ;;  %v2429_v23 = vpop.f32.mrf.mxu1  ;;  %v3168_v26 = vld [vmem:[%s4234_s30 + $0x1d8] sm:$0xff]  ;;  %v4497_v56 = vld [vmem:[#allocation20_spill] sm:$0xff] }
 0x2e9   : > { %v2141_v63 = vpop.f32.mrf.mxu0 }
 0x2ea   : > { %3290 = vst [vmem:[%s4244_s8 + $0x1a8] sm:$0xff] %v3226_v61  ;;  %v3099_v5 = vmul.f32 %v2998_v1, %v2428_v6  ;;  %v2142_v32 = vadd.f32 %v2141_v63, %v4492_v11  ;;  %v2430_v14 = vpop.f32.mrf.mxu1  ;;  %v3028_v63 = vpop.permute.xlu0 %3027 }
 0x2eb   : > { %v2143_v41 = vpop.f32.mrf.mxu0 }
 0x2ec   : > { %v3227_v13 = vadd.f32 %v3163_v48, %v3099_v5  ;;  %v2431_v19 = vadd.f32 %v2430_v14, %v2142_v32  ;;  %v2432_v20 = vpop.f32.mrf.mxu1  ;;  %v3169_v5 = vld [vmem:[%s4234_s30 + $0x1e0] sm:$0xff]  ;;  %v4498_v14 = vld [vmem:[#allocation21_spill] sm:$0xff] }
 0x2ed   : > { %v2146_v44 = vpop.f32.mrf.mxu0 }
 0x2ee   : > { %3291 = vst [vmem:[%s4244_s8 + $0x1b0] sm:$0xff] %v3227_v13  ;;  %v3100_v39 = vmul.f32 %v3003_v21, %v2431_v19  ;;  %v2147_v18 = vadd.f32 %v2146_v44, %v4493_v2  ;;  %v2435_v52 = vpop.f32.mrf.mxu1  ;;  %v3033_v44 = vpop.permute.xlu1 %3032 }
 0x2ef   : > { %v2148_v3 = vpop.f32.mrf.mxu0 }
 0x2f0   : > { %v3228_v38 = vadd.f32 %v3164_v31, %v3100_v39  ;;  %v2436_v24 = vadd.f32 %v2435_v52, %v2147_v18  ;;  %v2437_v28 = vpop.f32.mrf.mxu1  ;;  %v3170_v39 = vld [vmem:[%s4234_s30 + $0x1e8] sm:$0xff]  ;;  %v4499_v52 = vld [vmem:[#allocation22_spill] sm:$0xff] }
 0x2f1   : > { %v2149_v22 = vpop.f32.mrf.mxu0 }
 0x2f2   : > { %3292 = vst [vmem:[%s4244_s8 + $0x1b8] sm:$0xff] %v3228_v38  ;;  %v3101_v9 = vmul.f32 %v3008_v27, %v2436_v24  ;;  %v2150_v47 = vadd.f32 %v2149_v22, %v4494_v54  ;;  %v2438_v7 = vpop.f32.mrf.mxu1  ;;  %v3038_v22 = vpop.permute.xlu0 %3037 }
 0x2f3   : > { %v2151_v55 = vpop.f32.mrf.mxu0 }
 0x2f4   : > { %v3229_v36 = vadd.f32 %v3165_v4, %v3101_v9  ;;  %v2439_v30 = vadd.f32 %v2438_v7, %v2150_v47  ;;  %v2440_v40 = vpop.f32.mrf.mxu1  ;;  %v3171_v9 = vld [vmem:[%s4234_s30 + $0x1f0] sm:$0xff]  ;;  %v4500_v7 = vld [vmem:[#allocation23_spill] sm:$0xff] }
 0x2f5   : > { %v2154_v62 = vpop.f32.mrf.mxu0 }
 0x2f6   : > { %3293 = vst [vmem:[%s4244_s8 + $0x1c0] sm:$0xff] %v3229_v36  ;;  %v3102_v37 = vmul.f32 %v3013_v45, %v2439_v30  ;;  %v2155_v49 = vadd.f32 %v2154_v62, %v4495_v17  ;;  %v2443_v12 = vpop.f32.mrf.mxu1  ;;  %v3043_v62 = vpop.permute.xlu1 %3042 }
 0x2f7   : > { %v2156_v29 = vpop.f32.mrf.mxu0 }
 0x2f8   : > { %v3230_v34 = vadd.f32 %v3166_v51, %v3102_v37  ;;  %v2444_v8 = vadd.f32 %v2443_v12, %v2155_v49  ;;  %v2445_v42 = vpop.f32.mrf.mxu1  ;;  %v3172_v37 = vld [vmem:[%s4234_s30 + $0x1f8] sm:$0xff] }
 0x2f9   : > { %v2157_v57 = vpop.f32.mrf.mxu0 }
 0x2fa   : > { %3294 = vst [vmem:[%s4244_s8 + $0x1c8] sm:$0xff] %v3230_v34  ;;  %v3103_v25 = vmul.f32 %v3018_v46, %v2444_v8  ;;  %v2158_v33 = vadd.f32 %v2157_v57, %v4496_v59  ;;  %v2446_v35 = vpop.f32.mrf.mxu1 }
 0x2fb   : > { %v2159_v43 = vpop.f32.mrf.mxu0 }
 0x2fc   : > { %v3231_v53 = vadd.f32 %v3167_v60, %v3103_v25  ;;  %v2447_v0 = vadd.f32 %v2446_v35, %v2158_v33  ;;  %v2448_v15 = vpop.f32.mrf.mxu1 }
 0x2fd   : > { %v2162_v16 = vpop.f32.mrf.mxu0 }
 0x2fe   : > { %3295 = vst [vmem:[%s4244_s8 + $0x1d0] sm:$0xff] %v3231_v53  ;;  %v3104_v58 = vmul.f32 %v3023_v10, %v2447_v0  ;;  %v2163_v50 = vadd.f32 %v2162_v16, %v4497_v56  ;;  %v2451_v61 = vpop.f32.mrf.mxu1 }
 0x2ff   : > { %v2164_v6 = vpop.f32.mrf.mxu0 }
 0x300   : > { %v3232_v23 = vadd.f32 %v3168_v26, %v3104_v58  ;;  %v2452_v1 = vadd.f32 %v2451_v61, %v2163_v50  ;;  %v2453_v48 = vpop.f32.mrf.mxu1 }
 0x301   : > { %v2165_v11 = vpop.f32.mrf.mxu0 }
 0x302   : > { %3296 = vst [vmem:[%s4244_s8 + $0x1d8] sm:$0xff] %v3232_v23  ;;  %v3105_v32 = vmul.f32 %v3028_v63, %v2452_v1  ;;  %v2166_v41 = vadd.f32 %v2165_v11, %v4498_v14  ;;  %v2454_v13 = vpop.f32.mrf.mxu1 }
 0x303   : > { %v2167_v19 = vpop.f32.mrf.mxu0 }
 0x304   : > { %v3233_v20 = vadd.f32 %v3169_v5, %v3105_v32  ;;  %v2455_v21 = vadd.f32 %v2454_v13, %v2166_v41  ;;  %v2456_v31 = vpop.f32.mrf.mxu1 }
 0x305   : > { %v2170_v2 = vpop.f32.mrf.mxu0 }
 0x306   : > { %3297 = vst [vmem:[%s4244_s8 + $0x1e0] sm:$0xff] %v3233_v20  ;;  %v3106_v18 = vmul.f32 %v3033_v44, %v2455_v21  ;;  %v2171_v3 = vadd.f32 %v2170_v2, %v4499_v52  ;;  %v2459_v38 = vpop.f32.mrf.mxu1 }
 0x307   : > { %v2172_v24 = vpop.f32.mrf.mxu0 }
 0x308   : > { %v3234_v28 = vadd.f32 %v3170_v39, %v3106_v18  ;;  %v2460_v27 = vadd.f32 %v2459_v38, %v2171_v3  ;;  %v2461_v4 = vpop.f32.mrf.mxu1 }
 0x309   : > { %v2173_v54 = vpop.f32.mrf.mxu0 }
 0x30a   : > { %3298 = vst [vmem:[%s4244_s8 + $0x1e8] sm:$0xff] %v3234_v28  ;;  %v3107_v47 = vmul.f32 %v3038_v22, %v2460_v27  ;;  %v2174_v55 = vadd.f32 %v2173_v54, %v4500_v7  ;;  %v2462_v36 = vpop.f32.mrf.mxu1 }
 0x30b   : > { %v2175_v30 = vpop.f32.mrf.mxu0 }
 0x30c   : > { %v3235_v40 = vadd.f32 %v3171_v9, %v3107_v47  ;;  %v2463_v45 = vadd.f32 %v2462_v36, %v2174_v55  ;;  %v2464_v51 = vpop.f32.mrf.mxu1 }
 0x30e   : > { %3299 = vst [vmem:[%s4244_s8 + $0x1f0] sm:$0xff] %v3235_v40  ;;  %v3108_v17 = vmul.f32 %v3043_v62, %v2463_v45 }
 0x310   : > { %v3236_v49 = vadd.f32 %v3172_v37, %v3108_v17 }
 0x312   : > { %3300 = vst [vmem:[%s4244_s8 + $0x1f8] sm:$0xff] %v3236_v49 }
 0x313 PF: > { %s14_s17 = sadd.s32 1, %s3592_s17   ;;  %s4501_s15 = smov %s3588_s16 }
 0x314   : > { %p11_p6 = scmp.ge.s32.totalorder %s14_s17, 4   ;;  %s4502_s16 = smov %s4504_s18 }
 0x316   :  { %13 = sbr.rel (!%p11_p6) target bundleno = 2 (0x2), region = 81 }

</bundles_post_ra>
